<compile_context>
chip_gen: v7x
topology: tpu7x:2x2x1
jax: 0.10.0
libtpu: 0.0.40
codegen_flags: <defaults>
</compile_context>

<pallas_src>
import math

import jax
import jax.numpy as jnp
from jax.experimental import pallas as pl
from jax.experimental.pallas import tpu as pltpu

MAX_TM = 512                       # row-tile size (biggest single bandwidth lever)
VMEM_LIMIT_BYTES = 32 * 1024 * 1024
EPS = 1e-5
# LIF: decay = sigmoid(tau=1.0); mem = decay * 0.5 * (1 - 0.5) + I_in
LIF_CONST = 0.25 / (1.0 + math.exp(-1.0))


# ----------------------------- small helpers --------------------------------

def _round_up(n, m):
    return ((n + m - 1) // m) * m


def _mm_dims(M, K, N):
    """Padded matmul dims: K/N fully resident (single block), M tiled."""
    Kp = _round_up(K, 16)          # bf16 sublane packing
    Np = _round_up(N, 128)         # lane-dense output
    if M > MAX_TM:
        Mp = _round_up(M, MAX_TM)
        tm = MAX_TM
    else:
        Mp = _round_up(M, 16)
        tm = Mp
    return Mp, Kp, Np, tm


def _pad2(x, rows, cols):
    return jnp.pad(x, ((0, rows - x.shape[0]), (0, cols - x.shape[1])))


def _compiler_params():
    return pltpu.CompilerParams(
        dimension_semantics=("parallel",),
        vmem_limit_bytes=VMEM_LIMIT_BYTES)


# ----------------------------- Pallas kernels -------------------------------

def _make_matmul_affine_kernel(spike):
    """Single-pass conv: bf16 matmul -> per-channel scale/shift -> (spike)."""
    def kernel(a_ref, b_ref, scale_ref, shift_ref, o_ref):
        y = jnp.dot(a_ref[...], b_ref[...], preferred_element_type=jnp.float32)
        y = y * scale_ref[...] + shift_ref[...]
        if spike:
            y = (y >= 0.0)
        o_ref[...] = y.astype(o_ref.dtype)
    return kernel


def _matmul_stats_kernel(a_ref, b_ref, y_ref, stats_ref):
    """bf16 matmul -> f32 y tile, plus per-channel partial sum / sum-of-squares
    (rows 0 and 1 of an (8, Np) stats block) so BN stats need no extra y pass."""
    y = jnp.dot(a_ref[...], b_ref[...], preferred_element_type=jnp.float32)
    y_ref[...] = y
    n = y.shape[1]
    s = jnp.sum(y, axis=0, keepdims=True)
    ss = jnp.sum(y * y, axis=0, keepdims=True)
    stats_ref[...] = jnp.concatenate(
        [s, ss, jnp.zeros((6, n), jnp.float32)], axis=0)


def _affine_spike_kernel(x_ref, scale_ref, shift_ref, o_ref):
    """Fused folded-BN + LIF const + Heaviside spike, lane-dense bf16 output."""
    y = x_ref[...] * scale_ref[...] + shift_ref[...]
    o_ref[...] = (y >= 0.0).astype(o_ref.dtype)


# ----------------------------- Pallas wrappers ------------------------------

def _pallas_matmul_affine(a, b, scale, shift, *, spike):
    """(M,K)@(K,N) with fused per-channel affine (+ optional spike) epilogue."""
    M, K = a.shape
    _, N = b.shape
    Mp, Kp, Np, tm = _mm_dims(M, K, N)
    a = _pad2(a.astype(jnp.bfloat16), Mp, Kp)
    b = _pad2(b.astype(jnp.bfloat16), Kp, Np)
    sc = _pad2(scale.astype(jnp.float32).reshape(1, N), 1, Np)
    sh = _pad2(shift.astype(jnp.float32).reshape(1, N), 1, Np)
    out = pl.pallas_call(
        _make_matmul_affine_kernel(spike),
        out_shape=jax.ShapeDtypeStruct((Mp, Np), jnp.bfloat16),
        grid_spec=pltpu.PrefetchScalarGridSpec(
            num_scalar_prefetch=0,
            grid=(Mp // tm,),
            in_specs=[pl.BlockSpec((tm, Kp), lambda i: (i, 0)),
                      pl.BlockSpec((Kp, Np), lambda i: (0, 0)),   # resident RHS
                      pl.BlockSpec((1, Np), lambda i: (0, 0)),
                      pl.BlockSpec((1, Np), lambda i: (0, 0))],
            out_specs=pl.BlockSpec((tm, Np), lambda i: (i, 0)),
        ),
        compiler_params=_compiler_params(),
    )(a, b, sc, sh)
    return out[:M, :N]


def _pallas_matmul_stats(a, b):
    """(M,K)@(K,N) -> padded f32 y plus per-channel sum and sum-of-squares."""
    M, K = a.shape
    _, N = b.shape
    Mp, Kp, Np, tm = _mm_dims(M, K, N)
    a = _pad2(a.astype(jnp.bfloat16), Mp, Kp)
    b = _pad2(b.astype(jnp.bfloat16), Kp, Np)
    nblk = Mp // tm
    y, stats = pl.pallas_call(
        _matmul_stats_kernel,
        out_shape=(jax.ShapeDtypeStruct((Mp, Np), jnp.float32),
                   jax.ShapeDtypeStruct((nblk * 8, Np), jnp.float32)),
        grid_spec=pltpu.PrefetchScalarGridSpec(
            num_scalar_prefetch=0,
            grid=(nblk,),
            in_specs=[pl.BlockSpec((tm, Kp), lambda i: (i, 0)),
                      pl.BlockSpec((Kp, Np), lambda i: (0, 0))],  # resident RHS
            out_specs=[pl.BlockSpec((tm, Np), lambda i: (i, 0)),
                       pl.BlockSpec((8, Np), lambda i: (i, 0))],
        ),
        compiler_params=_compiler_params(),
    )(a, b)
    st = stats.reshape(nblk, 8, Np)
    total = jnp.sum(st[:, 0, :], axis=0)      # (Np,) per-channel sum
    totalsq = jnp.sum(st[:, 1, :], axis=0)    # (Np,) per-channel sum of squares
    return y, total, totalsq                  # y stays padded (sliced after spike)


def _pallas_affine_spike(y_padded, scale, shift):
    """Folded-BN + spike over the padded y; emits bf16 {0,1} spikes."""
    Mp, Np = y_padded.shape
    N = scale.shape[0]
    tm = MAX_TM if Mp % MAX_TM == 0 else Mp
    sc = _pad2(scale.astype(jnp.float32).reshape(1, N), 1, Np)
    sh = _pad2(shift.astype(jnp.float32).reshape(1, N), 1, Np)
    out = pl.pallas_call(
        _affine_spike_kernel,
        out_shape=jax.ShapeDtypeStruct((Mp, Np), jnp.bfloat16),
        grid_spec=pltpu.PrefetchScalarGridSpec(
            num_scalar_prefetch=0,
            grid=(Mp // tm,),
            in_specs=[pl.BlockSpec((tm, Np), lambda i: (i, 0)),
                      pl.BlockSpec((1, Np), lambda i: (0, 0)),
                      pl.BlockSpec((1, Np), lambda i: (0, 0))],
            out_specs=pl.BlockSpec((tm, Np), lambda i: (i, 0)),
        ),
        compiler_params=_compiler_params(),
    )(y_padded, sc, sh)
    return out


# ----------------------------- conv plumbing (glue) --------------------------

def _im2col(x, ksize, stride, padding):
    # x: (B, H, W, C) -> (B*Ho*Wo, ksize*ksize*C); column order = (kh, kw, cin)
    # TODO(synk): the im2col patches are still materialized by XLA; an in-kernel
    # halo-row patch construction would remove this ~9x HBM amplification.
    B, H, W, C = x.shape
    Ho = (H + 2 * padding - ksize) // stride + 1
    Wo = (W + 2 * padding - ksize) // stride + 1
    xp = jnp.pad(x, ((0, 0), (padding, padding), (padding, padding), (0, 0)))
    cols = []
    for kh in range(ksize):
        for kw in range(ksize):
            cols.append(xp[:, kh:kh + stride * Ho:stride,
                           kw:kw + stride * Wo:stride, :])
    a = jnp.concatenate(cols, axis=-1)
    return a.reshape(B * Ho * Wo, ksize * ksize * C), B, Ho, Wo


def _conv_operands(x_nhwc, w_oihw, *, stride, padding):
    cout, cin, kh, kw = w_oihw.shape
    a, B, Ho, Wo = _im2col(x_nhwc, kh, stride, padding)
    wm = jnp.transpose(w_oihw, (2, 3, 1, 0)).reshape(kh * kw * cin, cout)
    return a, wm, B, Ho, Wo


def conv_bn_lif(x_nhwc, w, gamma, beta, *, stride):
    """conv (no bias) -> training-mode BatchNorm -> LIF membrane -> Heaviside."""
    cout = w.shape[0]
    a, wm, B, Ho, Wo = _conv_operands(x_nhwc, w, stride=stride, padding=1)
    M = B * Ho * Wo
    y_pad, total, totalsq = _pallas_matmul_stats(a, wm)
    mean = total[:cout] / M
    var = jnp.maximum(totalsq[:cout] / M - mean * mean, 0.0)  # biased, like torch
    scale = gamma * jax.lax.rsqrt(var + EPS)
    shift = beta - mean * scale + LIF_CONST
    spike_pad = _pallas_affine_spike(y_pad, scale, shift)     # bf16 {0,1}
    return spike_pad[:M, :cout].reshape(B, Ho, Wo, cout)


def conv_bias(x_nhwc, w, b, *, stride, padding, spike):
    """conv + bias (+ LIF const + Heaviside), fully fused in one matmul pass."""
    cout = w.shape[0]
    a, wm, B, Ho, Wo = _conv_operands(x_nhwc, w, stride=stride, padding=padding)
    scale = jnp.ones((cout,), jnp.float32)
    shift = b + (LIF_CONST if spike else 0.0)
    out = _pallas_matmul_affine(a, wm, scale, shift, spike=spike)
    return out.reshape(B, Ho, Wo, cout)


# ----------------------------- full forward ---------------------------------

def ems_yolo_forward(x_nchw, p):
    # NHWC, bf16 activations (spikes are exactly {0,1}; input cast is the bf16
    # MXU-path optimization).
    x = jnp.transpose(x_nchw, (0, 2, 3, 1)).astype(jnp.bfloat16)
    s1 = conv_bn_lif(x,  p["w1"], p["g1"], p["b1"], stride=1)   # (B, H,    W,    64)
    s2 = conv_bn_lif(s1, p["w2"], p["g2"], p["b2"], stride=2)   # (B, H/2,  W/2,  64)
    s3 = conv_bn_lif(s2, p["w3"], p["g3"], p["b3"], stride=2)   # (B, H/4,  W/4,  128)
    s4 = conv_bn_lif(s3, p["w4"], p["g4"], p["b4"], stride=2)   # (B, H/8,  W/8,  256)
    s5 = conv_bn_lif(s4, p["w5"], p["g5"], p["b5"], stride=2)   # (B, H/16, W/16, 512)
    _ = s5  # computed (as in the reference) but unusable in a consistent fusion

    # TODO(synk): the reference concatenates upsample(c3_spike) [128ch @ H/2] with
    # c5_spike [512ch @ H/16], which is shape-inconsistent and does not match
    # concat_conv's declared 384 input channels.  We implement the only consistent
    # FPN-style fusion: upsample(c4_spike) [256ch @ H/4] ++ c3_spike [128ch @ H/4].
    # TODO(synk): the nearest-neighbor upsample + concat could be folded into the
    # concat-conv's input indexing to avoid materializing the fused tensor.
    p4 = jnp.repeat(jnp.repeat(s4, 2, axis=1), 2, axis=2)       # nearest x2 (bf16)
    fused = jnp.concatenate([p4, s3], axis=-1)                  # (B, H/4, W/4, 384)
    fused = conv_bias(fused, p["wc"], p["bc"], stride=1, padding=1, spike=False)
    det = conv_bias(fused, p["wd"], p["bd"], stride=1, padding=0, spike=True)
    return jnp.transpose(det.astype(jnp.float32), (0, 3, 1, 2))  # NCHW (B,255,H/4,W/4)


# ----------------------------- parameters -----------------------------------

def init_params(key):
    ks = jax.random.split(key, 8)

    def conv_w(k, cout, cin, ksz):
        fan_in = cin * ksz * ksz
        return jax.random.normal(k, (cout, cin, ksz, ksz), jnp.float32) * (2.0 / fan_in) ** 0.5

    p = {
        "w1": conv_w(ks[0], 64, 3, 3),
        "w2": conv_w(ks[1], 64, 64, 3),
        "w3": conv_w(ks[2], 128, 64, 3),
        "w4": conv_w(ks[3], 256, 128, 3),
        "w5": conv_w(ks[4], 512, 256, 3),
        "wc": conv_w(ks[5], 256, 384, 3),
        "bc": 0.01 * jax.random.normal(ks[6], (256,), jnp.float32),
        "wd": conv_w(ks[7], 255, 256, 1),
        "bd": jnp.zeros((255,), jnp.float32),
    }
    for i, c in zip(range(1, 6), (64, 64, 128, 256, 512)):
        p[f"g{i}"] = jnp.ones((c,), jnp.float32)    # BN gamma (torch default init)
        p[f"b{i}"] = jnp.zeros((c,), jnp.float32)   # BN beta  (torch default init)
    return p


if __name__ == "__main__":
    key = jax.random.PRNGKey(0)
    pkey, xkey = jax.random.split(key)
    params = init_params(pkey)
    x = jax.random.normal(xkey, (2, 3, 32, 32), jnp.float32)  # NCHW, like PyTorch
    fwd = jax.jit(ems_yolo_forward)
    out = fwd(x, params)
    jax.block_until_ready(out)
    assert out.shape == (2, 255, 8, 8), out.shape
    print("KERNEL_OK")
</pallas_src>

<mosaic_0001>
module attributes {stable_mosaic.version = 11 : i64} {
  func.func @_matmul_stats_kernel(%arg0: i32, %arg1: memref<512x32xbf16, #tpu.memory_space<vmem>>, %arg2: memref<32x128xbf16, #tpu.memory_space<vmem>>, %arg3: memref<512x128xf32, #tpu.memory_space<vmem>>, %arg4: memref<8x128xf32, #tpu.memory_space<vmem>>) attributes {dimension_semantics = [#tpu.dimension_semantics<parallel>], iteration_bounds = array<i64: 4>, scalar_prefetch = 0 : i64, scratch_operands = 0 : i64, tpu.core_type = #tpu.core_type<tc>, window_params = [{transform_indices = @transform_0, window_bounds = array<i64: 512, 32>}, {pipeline_mode = #tpu.pipeline_mode<synchronous>, transform_indices = @transform_1, window_bounds = array<i64: 32, 128>}, {transform_indices = @transform_2, window_bounds = array<i64: 512, 128>}, {transform_indices = @transform_3, window_bounds = array<i64: 8, 128>}]} {
    %c0 = arith.constant 0 : index
    %c0_0 = arith.constant 0 : index
    %0 = vector.load %arg1[%c0, %c0_0] : memref<512x32xbf16, #tpu.memory_space<vmem>>, vector<512x32xbf16>
    %c0_1 = arith.constant 0 : index
    %c0_2 = arith.constant 0 : index
    %1 = vector.load %arg2[%c0_1, %c0_2] : memref<32x128xbf16, #tpu.memory_space<vmem>>, vector<32x128xbf16>
    %cst = arith.constant dense<0.000000e+00> : vector<512x128xf32>
    %2 = tpu.matmul %0, %1, %cst {dimension_numbers = #tpu.dot_dimension_numbers<[1], [0], [0], [1], [0, 0, 1, 1], [], []>} : vector<512x32xbf16>, vector<32x128xbf16>, vector<512x128xf32> -> vector<512x128xf32>
    %c0_3 = arith.constant 0 : index
    %c0_4 = arith.constant 0 : index
    %3 = vector.load %arg3[%c0_3, %c0_4] : memref<512x128xf32, #tpu.memory_space<vmem>>, vector<512x128xf32>
    tpu.vector_store %arg3[%c0_3, %c0_4], %2 {strides = array<i32>} : memref<512x128xf32, #tpu.memory_space<vmem>>, vector<512x128xf32>,
    %cst_5 = arith.constant dense<0.000000e+00> : vector<128xf32>
    %4 = vector.multi_reduction <add>, %2, %cst_5 [0] : vector<512x128xf32> to vector<128xf32>
    %5 = vector.shape_cast %4 : vector<128xf32> to vector<1x128xf32>
    %6 = arith.mulf %2, %2 : vector<512x128xf32>
    %cst_6 = arith.constant dense<0.000000e+00> : vector<128xf32>
    %7 = vector.multi_reduction <add>, %6, %cst_6 [0] : vector<512x128xf32> to vector<128xf32>
    %8 = vector.shape_cast %7 : vector<128xf32> to vector<1x128xf32>
    %cst_7 = arith.constant 0.000000e+00 : f32
    %9 = vector.broadcast %cst_7 : f32 to vector<6x128xf32>
    %10 = tpu.concatenate %5, %8, %9 in 0 : vector<1x128xf32>, vector<1x128xf32>, vector<6x128xf32> -> vector<8x128xf32>
    %c0_8 = arith.constant 0 : index
    %c0_9 = arith.constant 0 : index
    %11 = vector.load %arg4[%c0_8, %c0_9] : memref<8x128xf32, #tpu.memory_space<vmem>>, vector<8x128xf32>
    tpu.vector_store %arg4[%c0_8, %c0_9], %10 {strides = array<i32>} : memref<8x128xf32, #tpu.memory_space<vmem>>, vector<8x128xf32>,
    return
  }
  func.func @transform_0(%arg0: i32) -> (i32, i32) {
    %c0_i32 = arith.constant 0 : i32
    %c0_i32_0 = arith.constant 0 : i32
    return %arg0, %c0_i32 : i32, i32
  }
  func.func @transform_1(%arg0: i32) -> (i32, i32) {
    %c0_i32 = arith.constant 0 : i32
    %c0_i32_0 = arith.constant 0 : i32
    %c0_i32_1 = arith.constant 0 : i32
    return %c0_i32, %c0_i32_0 : i32, i32
  }
  func.func @transform_2(%arg0: i32) -> (i32, i32) {
    %c0_i32 = arith.constant 0 : i32
    %c0_i32_0 = arith.constant 0 : i32
    return %arg0, %c0_i32 : i32, i32
  }
  func.func @transform_3(%arg0: i32) -> (i32, i32) {
    %c0_i32 = arith.constant 0 : i32
    %c0_i32_0 = arith.constant 0 : i32
    return %arg0, %c0_i32 : i32, i32
  }
}

module attributes {stable_mosaic.version = 11 : i64} {
  func.func @_affine_spike_kernel(%arg0: i32, %arg1: memref<512x128xf32, #tpu.memory_space<vmem>>, %arg2: memref<1x128xf32, #tpu.memory_space<vmem>>, %arg3: memref<1x128xf32, #tpu.memory_space<vmem>>, %arg4: memref<512x128xbf16, #tpu.memory_space<vmem>>) attributes {dimension_semantics = [#tpu.dimension_semantics<parallel>], iteration_bounds = array<i64: 4>, scalar_prefetch = 0 : i64, scratch_operands = 0 : i64, tpu.core_type = #tpu.core_type<tc>, window_params = [{transform_indices = @transform_0, window_bounds = array<i64: 512, 128>}, {pipeline_mode = #tpu.pipeline_mode<synchronous>, transform_indices = @transform_1, window_bounds = array<i64: 1, 128>}, {pipeline_mode = #tpu.pipeline_mode<synchronous>, transform_indices = @transform_2, window_bounds = array<i64: 1, 128>}, {transform_indices = @transform_3, window_bounds = array<i64: 512, 128>}]} {
    %c0 = arith.constant 0 : index
    %c0_0 = arith.constant 0 : index
    %0 = vector.load %arg1[%c0, %c0_0] : memref<512x128xf32, #tpu.memory_space<vmem>>, vector<512x128xf32>
    %c0_1 = arith.constant 0 : index
    %c0_2 = arith.constant 0 : index
    %1 = vector.load %arg2[%c0_1, %c0_2] : memref<1x128xf32, #tpu.memory_space<vmem>>, vector<1x128xf32>
    %2 = vector.broadcast %1 : vector<1x128xf32> to vector<512x128xf32>
    %3 = arith.mulf %0, %2 : vector<512x128xf32>
    %c0_3 = arith.constant 0 : index
    %c0_4 = arith.constant 0 : index
    %4 = vector.load %arg3[%c0_3, %c0_4] : memref<1x128xf32, #tpu.memory_space<vmem>>, vector<1x128xf32>
    %5 = vector.broadcast %4 : vector<1x128xf32> to vector<512x128xf32>
    %6 = arith.addf %3, %5 : vector<512x128xf32>
    %cst = arith.constant 0.000000e+00 : f32
    %7 = vector.broadcast %cst : f32 to vector<512x128xf32>
    %8 = arith.cmpf oge, %6, %7 : vector<512x128xf32>
    %9 = arith.extui %8 : vector<512x128xi1> to vector<512x128xi32>
    %10 = arith.sitofp %9 : vector<512x128xi32> to vector<512x128xf32>
    %11 = arith.truncf %10 : vector<512x128xf32> to vector<512x128xbf16>
    %c0_5 = arith.constant 0 : index
    %c0_6 = arith.constant 0 : index
    %12 = vector.load %arg4[%c0_5, %c0_6] : memref<512x128xbf16, #tpu.memory_space<vmem>>, vector<512x128xbf16>
    tpu.vector_store %arg4[%c0_5, %c0_6], %11 {strides = array<i32>} : memref<512x128xbf16, #tpu.memory_space<vmem>>, vector<512x128xbf16>,
    return
  }
  func.func @transform_0(%arg0: i32) -> (i32, i32) {
    %c0_i32 = arith.constant 0 : i32
    %c0_i32_0 = arith.constant 0 : i32
    return %arg0, %c0_i32 : i32, i32
  }
  func.func @transform_1(%arg0: i32) -> (i32, i32) {
    %c0_i32 = arith.constant 0 : i32
    %c0_i32_0 = arith.constant 0 : i32
    %c0_i32_1 = arith.constant 0 : i32
    return %c0_i32, %c0_i32_0 : i32, i32
  }
  func.func @transform_2(%arg0: i32) -> (i32, i32) {
    %c0_i32 = arith.constant 0 : i32
    %c0_i32_0 = arith.constant 0 : i32
    %c0_i32_1 = arith.constant 0 : i32
    return %c0_i32, %c0_i32_0 : i32, i32
  }
  func.func @transform_3(%arg0: i32) -> (i32, i32) {
    %c0_i32 = arith.constant 0 : i32
    %c0_i32_0 = arith.constant 0 : i32
    return %arg0, %c0_i32 : i32, i32
  }
}

module attributes {stable_mosaic.version = 11 : i64} {
  func.func @_matmul_stats_kernel(%arg0: i32, %arg1: memref<512x576xbf16, #tpu.memory_space<vmem>>, %arg2: memref<576x128xbf16, #tpu.memory_space<vmem>>, %arg3: memref<512x128xf32, #tpu.memory_space<vmem>>, %arg4: memref<8x128xf32, #tpu.memory_space<vmem>>) attributes {dimension_semantics = [#tpu.dimension_semantics<parallel>], iteration_bounds = array<i64: 1>, scalar_prefetch = 0 : i64, scratch_operands = 0 : i64, tpu.core_type = #tpu.core_type<tc>, window_params = [{transform_indices = @transform_0, window_bounds = array<i64: 512, 576>}, {pipeline_mode = #tpu.pipeline_mode<synchronous>, transform_indices = @transform_1, window_bounds = array<i64: 576, 128>}, {transform_indices = @transform_2, window_bounds = array<i64: 512, 128>}, {transform_indices = @transform_3, window_bounds = array<i64: 8, 128>}]} {
    %c0 = arith.constant 0 : index
    %c0_0 = arith.constant 0 : index
    %0 = vector.load %arg1[%c0, %c0_0] : memref<512x576xbf16, #tpu.memory_space<vmem>>, vector<512x576xbf16>
    %c0_1 = arith.constant 0 : index
    %c0_2 = arith.constant 0 : index
    %1 = vector.load %arg2[%c0_1, %c0_2] : memref<576x128xbf16, #tpu.memory_space<vmem>>, vector<576x128xbf16>
    %cst = arith.constant dense<0.000000e+00> : vector<512x128xf32>
    %2 = tpu.matmul %0, %1, %cst {dimension_numbers = #tpu.dot_dimension_numbers<[1], [0], [0], [1], [0, 0, 1, 1], [], []>} : vector<512x576xbf16>, vector<576x128xbf16>, vector<512x128xf32> -> vector<512x128xf32>
    %c0_3 = arith.constant 0 : index
    %c0_4 = arith.constant 0 : index
    %3 = vector.load %arg3[%c0_3, %c0_4] : memref<512x128xf32, #tpu.memory_space<vmem>>, vector<512x128xf32>
    tpu.vector_store %arg3[%c0_3, %c0_4], %2 {strides = array<i32>} : memref<512x128xf32, #tpu.memory_space<vmem>>, vector<512x128xf32>,
    %cst_5 = arith.constant dense<0.000000e+00> : vector<128xf32>
    %4 = vector.multi_reduction <add>, %2, %cst_5 [0] : vector<512x128xf32> to vector<128xf32>
    %5 = vector.shape_cast %4 : vector<128xf32> to vector<1x128xf32>
    %6 = arith.mulf %2, %2 : vector<512x128xf32>
    %cst_6 = arith.constant dense<0.000000e+00> : vector<128xf32>
    %7 = vector.multi_reduction <add>, %6, %cst_6 [0] : vector<512x128xf32> to vector<128xf32>
    %8 = vector.shape_cast %7 : vector<128xf32> to vector<1x128xf32>
    %cst_7 = arith.constant 0.000000e+00 : f32
    %9 = vector.broadcast %cst_7 : f32 to vector<6x128xf32>
    %10 = tpu.concatenate %5, %8, %9 in 0 : vector<1x128xf32>, vector<1x128xf32>, vector<6x128xf32> -> vector<8x128xf32>
    %c0_8 = arith.constant 0 : index
    %c0_9 = arith.constant 0 : index
    %11 = vector.load %arg4[%c0_8, %c0_9] : memref<8x128xf32, #tpu.memory_space<vmem>>, vector<8x128xf32>
    tpu.vector_store %arg4[%c0_8, %c0_9], %10 {strides = array<i32>} : memref<8x128xf32, #tpu.memory_space<vmem>>, vector<8x128xf32>,
    return
  }
  func.func @transform_0(%arg0: i32) -> (i32, i32) {
    %c0_i32 = arith.constant 0 : i32
    %c0_i32_0 = arith.constant 0 : i32
    return %arg0, %c0_i32 : i32, i32
  }
  func.func @transform_1(%arg0: i32) -> (i32, i32) {
    %c0_i32 = arith.constant 0 : i32
    %c0_i32_0 = arith.constant 0 : i32
    %c0_i32_1 = arith.constant 0 : i32
    return %c0_i32, %c0_i32_0 : i32, i32
  }
  func.func @transform_2(%arg0: i32) -> (i32, i32) {
    %c0_i32 = arith.constant 0 : i32
    %c0_i32_0 = arith.constant 0 : i32
    return %arg0, %c0_i32 : i32, i32
  }
  func.func @transform_3(%arg0: i32) -> (i32, i32) {
    %c0_i32 = arith.constant 0 : i32
    %c0_i32_0 = arith.constant 0 : i32
    return %arg0, %c0_i32 : i32, i32
  }
}

module attributes {stable_mosaic.version = 11 : i64} {
  func.func @_affine_spike_kernel(%arg0: i32, %arg1: memref<512x128xf32, #tpu.memory_space<vmem>>, %arg2: memref<1x128xf32, #tpu.memory_space<vmem>>, %arg3: memref<1x128xf32, #tpu.memory_space<vmem>>, %arg4: memref<512x128xbf16, #tpu.memory_space<vmem>>) attributes {dimension_semantics = [#tpu.dimension_semantics<parallel>], iteration_bounds = array<i64: 1>, scalar_prefetch = 0 : i64, scratch_operands = 0 : i64, tpu.core_type = #tpu.core_type<tc>, window_params = [{transform_indices = @transform_0, window_bounds = array<i64: 512, 128>}, {pipeline_mode = #tpu.pipeline_mode<synchronous>, transform_indices = @transform_1, window_bounds = array<i64: 1, 128>}, {pipeline_mode = #tpu.pipeline_mode<synchronous>, transform_indices = @transform_2, window_bounds = array<i64: 1, 128>}, {transform_indices = @transform_3, window_bounds = array<i64: 512, 128>}]} {
    %c0 = arith.constant 0 : index
    %c0_0 = arith.constant 0 : index
    %0 = vector.load %arg1[%c0, %c0_0] : memref<512x128xf32, #tpu.memory_space<vmem>>, vector<512x128xf32>
    %c0_1 = arith.constant 0 : index
    %c0_2 = arith.constant 0 : index
    %1 = vector.load %arg2[%c0_1, %c0_2] : memref<1x128xf32, #tpu.memory_space<vmem>>, vector<1x128xf32>
    %2 = vector.broadcast %1 : vector<1x128xf32> to vector<512x128xf32>
    %3 = arith.mulf %0, %2 : vector<512x128xf32>
    %c0_3 = arith.constant 0 : index
    %c0_4 = arith.constant 0 : index
    %4 = vector.load %arg3[%c0_3, %c0_4] : memref<1x128xf32, #tpu.memory_space<vmem>>, vector<1x128xf32>
    %5 = vector.broadcast %4 : vector<1x128xf32> to vector<512x128xf32>
    %6 = arith.addf %3, %5 : vector<512x128xf32>
    %cst = arith.constant 0.000000e+00 : f32
    %7 = vector.broadcast %cst : f32 to vector<512x128xf32>
    %8 = arith.cmpf oge, %6, %7 : vector<512x128xf32>
    %9 = arith.extui %8 : vector<512x128xi1> to vector<512x128xi32>
    %10 = arith.sitofp %9 : vector<512x128xi32> to vector<512x128xf32>
    %11 = arith.truncf %10 : vector<512x128xf32> to vector<512x128xbf16>
    %c0_5 = arith.constant 0 : index
    %c0_6 = arith.constant 0 : index
    %12 = vector.load %arg4[%c0_5, %c0_6] : memref<512x128xbf16, #tpu.memory_space<vmem>>, vector<512x128xbf16>
    tpu.vector_store %arg4[%c0_5, %c0_6], %11 {strides = array<i32>} : memref<512x128xbf16, #tpu.memory_space<vmem>>, vector<512x128xbf16>,
    return
  }
  func.func @transform_0(%arg0: i32) -> (i32, i32) {
    %c0_i32 = arith.constant 0 : i32
    %c0_i32_0 = arith.constant 0 : i32
    return %arg0, %c0_i32 : i32, i32
  }
  func.func @transform_1(%arg0: i32) -> (i32, i32) {
    %c0_i32 = arith.constant 0 : i32
    %c0_i32_0 = arith.constant 0 : i32
    %c0_i32_1 = arith.constant 0 : i32
    return %c0_i32, %c0_i32_0 : i32, i32
  }
  func.func @transform_2(%arg0: i32) -> (i32, i32) {
    %c0_i32 = arith.constant 0 : i32
    %c0_i32_0 = arith.constant 0 : i32
    %c0_i32_1 = arith.constant 0 : i32
    return %c0_i32, %c0_i32_0 : i32, i32
  }
  func.func @transform_3(%arg0: i32) -> (i32, i32) {
    %c0_i32 = arith.constant 0 : i32
    %c0_i32_0 = arith.constant 0 : i32
    return %arg0, %c0_i32 : i32, i32
  }
}

module attributes {stable_mosaic.version = 11 : i64} {
  func.func @_matmul_stats_kernel(%arg0: i32, %arg1: memref<128x576xbf16, #tpu.memory_space<vmem>>, %arg2: memref<576x128xbf16, #tpu.memory_space<vmem>>, %arg3: memref<128x128xf32, #tpu.memory_space<vmem>>, %arg4: memref<8x128xf32, #tpu.memory_space<vmem>>) attributes {dimension_semantics = [#tpu.dimension_semantics<parallel>], iteration_bounds = array<i64: 1>, scalar_prefetch = 0 : i64, scratch_operands = 0 : i64, tpu.core_type = #tpu.core_type<tc>, window_params = [{transform_indices = @transform_0, window_bounds = array<i64: 128, 576>}, {pipeline_mode = #tpu.pipeline_mode<synchronous>, transform_indices = @transform_1, window_bounds = array<i64: 576, 128>}, {transform_indices = @transform_2, window_bounds = array<i64: 128, 128>}, {transform_indices = @transform_3, window_bounds = array<i64: 8, 128>}]} {
    %c0 = arith.constant 0 : index
    %c0_0 = arith.constant 0 : index
    %0 = vector.load %arg1[%c0, %c0_0] : memref<128x576xbf16, #tpu.memory_space<vmem>>, vector<128x576xbf16>
    %c0_1 = arith.constant 0 : index
    %c0_2 = arith.constant 0 : index
    %1 = vector.load %arg2[%c0_1, %c0_2] : memref<576x128xbf16, #tpu.memory_space<vmem>>, vector<576x128xbf16>
    %cst = arith.constant dense<0.000000e+00> : vector<128x128xf32>
    %2 = tpu.matmul %0, %1, %cst {dimension_numbers = #tpu.dot_dimension_numbers<[1], [0], [0], [1], [0, 0, 1, 1], [], []>} : vector<128x576xbf16>, vector<576x128xbf16>, vector<128x128xf32> -> vector<128x128xf32>
    %c0_3 = arith.constant 0 : index
    %c0_4 = arith.constant 0 : index
    %3 = vector.load %arg3[%c0_3, %c0_4] : memref<128x128xf32, #tpu.memory_space<vmem>>, vector<128x128xf32>
    tpu.vector_store %arg3[%c0_3, %c0_4], %2 {strides = array<i32>} : memref<128x128xf32, #tpu.memory_space<vmem>>, vector<128x128xf32>,
    %cst_5 = arith.constant dense<0.000000e+00> : vector<128xf32>
    %4 = vector.multi_reduction <add>, %2, %cst_5 [0] : vector<128x128xf32> to vector<128xf32>
    %5 = vector.shape_cast %4 : vector<128xf32> to vector<1x128xf32>
    %6 = arith.mulf %2, %2 : vector<128x128xf32>
    %cst_6 = arith.constant dense<0.000000e+00> : vector<128xf32>
    %7 = vector.multi_reduction <add>, %6, %cst_6 [0] : vector<128x128xf32> to vector<128xf32>
    %8 = vector.shape_cast %7 : vector<128xf32> to vector<1x128xf32>
    %cst_7 = arith.constant 0.000000e+00 : f32
    %9 = vector.broadcast %cst_7 : f32 to vector<6x128xf32>
    %10 = tpu.concatenate %5, %8, %9 in 0 : vector<1x128xf32>, vector<1x128xf32>, vector<6x128xf32> -> vector<8x128xf32>
    %c0_8 = arith.constant 0 : index
    %c0_9 = arith.constant 0 : index
    %11 = vector.load %arg4[%c0_8, %c0_9] : memref<8x128xf32, #tpu.memory_space<vmem>>, vector<8x128xf32>
    tpu.vector_store %arg4[%c0_8, %c0_9], %10 {strides = array<i32>} : memref<8x128xf32, #tpu.memory_space<vmem>>, vector<8x128xf32>,
    return
  }
  func.func @transform_0(%arg0: i32) -> (i32, i32) {
    %c0_i32 = arith.constant 0 : i32
    %c0_i32_0 = arith.constant 0 : i32
    return %arg0, %c0_i32 : i32, i32
  }
  func.func @transform_1(%arg0: i32) -> (i32, i32) {
    %c0_i32 = arith.constant 0 : i32
    %c0_i32_0 = arith.constant 0 : i32
    %c0_i32_1 = arith.constant 0 : i32
    return %c0_i32, %c0_i32_0 : i32, i32
  }
  func.func @transform_2(%arg0: i32) -> (i32, i32) {
    %c0_i32 = arith.constant 0 : i32
    %c0_i32_0 = arith.constant 0 : i32
    return %arg0, %c0_i32 : i32, i32
  }
  func.func @transform_3(%arg0: i32) -> (i32, i32) {
    %c0_i32 = arith.constant 0 : i32
    %c0_i32_0 = arith.constant 0 : i32
    return %arg0, %c0_i32 : i32, i32
  }
}

module attributes {stable_mosaic.version = 11 : i64} {
  func.func @_affine_spike_kernel(%arg0: i32, %arg1: memref<128x128xf32, #tpu.memory_space<vmem>>, %arg2: memref<1x128xf32, #tpu.memory_space<vmem>>, %arg3: memref<1x128xf32, #tpu.memory_space<vmem>>, %arg4: memref<128x128xbf16, #tpu.memory_space<vmem>>) attributes {dimension_semantics = [#tpu.dimension_semantics<parallel>], iteration_bounds = array<i64: 1>, scalar_prefetch = 0 : i64, scratch_operands = 0 : i64, tpu.core_type = #tpu.core_type<tc>, window_params = [{transform_indices = @transform_0, window_bounds = array<i64: 128, 128>}, {pipeline_mode = #tpu.pipeline_mode<synchronous>, transform_indices = @transform_1, window_bounds = array<i64: 1, 128>}, {pipeline_mode = #tpu.pipeline_mode<synchronous>, transform_indices = @transform_2, window_bounds = array<i64: 1, 128>}, {transform_indices = @transform_3, window_bounds = array<i64: 128, 128>}]} {
    %c0 = arith.constant 0 : index
    %c0_0 = arith.constant 0 : index
    %0 = vector.load %arg1[%c0, %c0_0] : memref<128x128xf32, #tpu.memory_space<vmem>>, vector<128x128xf32>
    %c0_1 = arith.constant 0 : index
    %c0_2 = arith.constant 0 : index
    %1 = vector.load %arg2[%c0_1, %c0_2] : memref<1x128xf32, #tpu.memory_space<vmem>>, vector<1x128xf32>
    %2 = vector.broadcast %1 : vector<1x128xf32> to vector<128x128xf32>
    %3 = arith.mulf %0, %2 : vector<128x128xf32>
    %c0_3 = arith.constant 0 : index
    %c0_4 = arith.constant 0 : index
    %4 = vector.load %arg3[%c0_3, %c0_4] : memref<1x128xf32, #tpu.memory_space<vmem>>, vector<1x128xf32>
    %5 = vector.broadcast %4 : vector<1x128xf32> to vector<128x128xf32>
    %6 = arith.addf %3, %5 : vector<128x128xf32>
    %cst = arith.constant 0.000000e+00 : f32
    %7 = vector.broadcast %cst : f32 to vector<128x128xf32>
    %8 = arith.cmpf oge, %6, %7 : vector<128x128xf32>
    %9 = arith.extui %8 : vector<128x128xi1> to vector<128x128xi32>
    %10 = arith.sitofp %9 : vector<128x128xi32> to vector<128x128xf32>
    %11 = arith.truncf %10 : vector<128x128xf32> to vector<128x128xbf16>
    %c0_5 = arith.constant 0 : index
    %c0_6 = arith.constant 0 : index
    %12 = vector.load %arg4[%c0_5, %c0_6] : memref<128x128xbf16, #tpu.memory_space<vmem>>, vector<128x128xbf16>
    tpu.vector_store %arg4[%c0_5, %c0_6], %11 {strides = array<i32>} : memref<128x128xbf16, #tpu.memory_space<vmem>>, vector<128x128xbf16>,
    return
  }
  func.func @transform_0(%arg0: i32) -> (i32, i32) {
    %c0_i32 = arith.constant 0 : i32
    %c0_i32_0 = arith.constant 0 : i32
    return %arg0, %c0_i32 : i32, i32
  }
  func.func @transform_1(%arg0: i32) -> (i32, i32) {
    %c0_i32 = arith.constant 0 : i32
    %c0_i32_0 = arith.constant 0 : i32
    %c0_i32_1 = arith.constant 0 : i32
    return %c0_i32, %c0_i32_0 : i32, i32
  }
  func.func @transform_2(%arg0: i32) -> (i32, i32) {
    %c0_i32 = arith.constant 0 : i32
    %c0_i32_0 = arith.constant 0 : i32
    %c0_i32_1 = arith.constant 0 : i32
    return %c0_i32, %c0_i32_0 : i32, i32
  }
  func.func @transform_3(%arg0: i32) -> (i32, i32) {
    %c0_i32 = arith.constant 0 : i32
    %c0_i32_0 = arith.constant 0 : i32
    return %arg0, %c0_i32 : i32, i32
  }
}

module attributes {stable_mosaic.version = 11 : i64} {
  func.func @_matmul_stats_kernel(%arg0: i32, %arg1: memref<32x1152xbf16, #tpu.memory_space<vmem>>, %arg2: memref<1152x256xbf16, #tpu.memory_space<vmem>>, %arg3: memref<32x256xf32, #tpu.memory_space<vmem>>, %arg4: memref<8x256xf32, #tpu.memory_space<vmem>>) attributes {dimension_semantics = [#tpu.dimension_semantics<parallel>], iteration_bounds = array<i64: 1>, scalar_prefetch = 0 : i64, scratch_operands = 0 : i64, tpu.core_type = #tpu.core_type<tc>, window_params = [{transform_indices = @transform_0, window_bounds = array<i64: 32, 1152>}, {pipeline_mode = #tpu.pipeline_mode<synchronous>, transform_indices = @transform_1, window_bounds = array<i64: 1152, 256>}, {transform_indices = @transform_2, window_bounds = array<i64: 32, 256>}, {transform_indices = @transform_3, window_bounds = array<i64: 8, 256>}]} {
    %c0 = arith.constant 0 : index
    %c0_0 = arith.constant 0 : index
    %0 = vector.load %arg1[%c0, %c0_0] : memref<32x1152xbf16, #tpu.memory_space<vmem>>, vector<32x1152xbf16>
    %c0_1 = arith.constant 0 : index
    %c0_2 = arith.constant 0 : index
    %1 = vector.load %arg2[%c0_1, %c0_2] : memref<1152x256xbf16, #tpu.memory_space<vmem>>, vector<1152x256xbf16>
    %cst = arith.constant dense<0.000000e+00> : vector<32x256xf32>
    %2 = tpu.matmul %0, %1, %cst {dimension_numbers = #tpu.dot_dimension_numbers<[1], [0], [0], [1], [0, 0, 1, 1], [], []>} : vector<32x1152xbf16>, vector<1152x256xbf16>, vector<32x256xf32> -> vector<32x256xf32>
    %c0_3 = arith.constant 0 : index
    %c0_4 = arith.constant 0 : index
    %3 = vector.load %arg3[%c0_3, %c0_4] : memref<32x256xf32, #tpu.memory_space<vmem>>, vector<32x256xf32>
    tpu.vector_store %arg3[%c0_3, %c0_4], %2 {strides = array<i32>} : memref<32x256xf32, #tpu.memory_space<vmem>>, vector<32x256xf32>,
    %cst_5 = arith.constant dense<0.000000e+00> : vector<256xf32>
    %4 = vector.multi_reduction <add>, %2, %cst_5 [0] : vector<32x256xf32> to vector<256xf32>
    %5 = vector.shape_cast %4 : vector<256xf32> to vector<1x256xf32>
    %6 = arith.mulf %2, %2 : vector<32x256xf32>
    %cst_6 = arith.constant dense<0.000000e+00> : vector<256xf32>
    %7 = vector.multi_reduction <add>, %6, %cst_6 [0] : vector<32x256xf32> to vector<256xf32>
    %8 = vector.shape_cast %7 : vector<256xf32> to vector<1x256xf32>
    %cst_7 = arith.constant 0.000000e+00 : f32
    %9 = vector.broadcast %cst_7 : f32 to vector<6x256xf32>
    %10 = tpu.concatenate %5, %8, %9 in 0 : vector<1x256xf32>, vector<1x256xf32>, vector<6x256xf32> -> vector<8x256xf32>
    %c0_8 = arith.constant 0 : index
    %c0_9 = arith.constant 0 : index
    %11 = vector.load %arg4[%c0_8, %c0_9] : memref<8x256xf32, #tpu.memory_space<vmem>>, vector<8x256xf32>
    tpu.vector_store %arg4[%c0_8, %c0_9], %10 {strides = array<i32>} : memref<8x256xf32, #tpu.memory_space<vmem>>, vector<8x256xf32>,
    return
  }
  func.func @transform_0(%arg0: i32) -> (i32, i32) {
    %c0_i32 = arith.constant 0 : i32
    %c0_i32_0 = arith.constant 0 : i32
    return %arg0, %c0_i32 : i32, i32
  }
  func.func @transform_1(%arg0: i32) -> (i32, i32) {
    %c0_i32 = arith.constant 0 : i32
    %c0_i32_0 = arith.constant 0 : i32
    %c0_i32_1 = arith.constant 0 : i32
    return %c0_i32, %c0_i32_0 : i32, i32
  }
  func.func @transform_2(%arg0: i32) -> (i32, i32) {
    %c0_i32 = arith.constant 0 : i32
    %c0_i32_0 = arith.constant 0 : i32
    return %arg0, %c0_i32 : i32, i32
  }
  func.func @transform_3(%arg0: i32) -> (i32, i32) {
    %c0_i32 = arith.constant 0 : i32
    %c0_i32_0 = arith.constant 0 : i32
    return %arg0, %c0_i32 : i32, i32
  }
}

module attributes {stable_mosaic.version = 11 : i64} {
  func.func @_affine_spike_kernel(%arg0: i32, %arg1: memref<32x256xf32, #tpu.memory_space<vmem>>, %arg2: memref<1x256xf32, #tpu.memory_space<vmem>>, %arg3: memref<1x256xf32, #tpu.memory_space<vmem>>, %arg4: memref<32x256xbf16, #tpu.memory_space<vmem>>) attributes {dimension_semantics = [#tpu.dimension_semantics<parallel>], iteration_bounds = array<i64: 1>, scalar_prefetch = 0 : i64, scratch_operands = 0 : i64, tpu.core_type = #tpu.core_type<tc>, window_params = [{transform_indices = @transform_0, window_bounds = array<i64: 32, 256>}, {pipeline_mode = #tpu.pipeline_mode<synchronous>, transform_indices = @transform_1, window_bounds = array<i64: 1, 256>}, {pipeline_mode = #tpu.pipeline_mode<synchronous>, transform_indices = @transform_2, window_bounds = array<i64: 1, 256>}, {transform_indices = @transform_3, window_bounds = array<i64: 32, 256>}]} {
    %c0 = arith.constant 0 : index
    %c0_0 = arith.constant 0 : index
    %0 = vector.load %arg1[%c0, %c0_0] : memref<32x256xf32, #tpu.memory_space<vmem>>, vector<32x256xf32>
    %c0_1 = arith.constant 0 : index
    %c0_2 = arith.constant 0 : index
    %1 = vector.load %arg2[%c0_1, %c0_2] : memref<1x256xf32, #tpu.memory_space<vmem>>, vector<1x256xf32>
    %2 = vector.broadcast %1 : vector<1x256xf32> to vector<32x256xf32>
    %3 = arith.mulf %0, %2 : vector<32x256xf32>
    %c0_3 = arith.constant 0 : index
    %c0_4 = arith.constant 0 : index
    %4 = vector.load %arg3[%c0_3, %c0_4] : memref<1x256xf32, #tpu.memory_space<vmem>>, vector<1x256xf32>
    %5 = vector.broadcast %4 : vector<1x256xf32> to vector<32x256xf32>
    %6 = arith.addf %3, %5 : vector<32x256xf32>
    %cst = arith.constant 0.000000e+00 : f32
    %7 = vector.broadcast %cst : f32 to vector<32x256xf32>
    %8 = arith.cmpf oge, %6, %7 : vector<32x256xf32>
    %9 = arith.extui %8 : vector<32x256xi1> to vector<32x256xi32>
    %10 = arith.sitofp %9 : vector<32x256xi32> to vector<32x256xf32>
    %11 = arith.truncf %10 : vector<32x256xf32> to vector<32x256xbf16>
    %c0_5 = arith.constant 0 : index
    %c0_6 = arith.constant 0 : index
    %12 = vector.load %arg4[%c0_5, %c0_6] : memref<32x256xbf16, #tpu.memory_space<vmem>>, vector<32x256xbf16>
    tpu.vector_store %arg4[%c0_5, %c0_6], %11 {strides = array<i32>} : memref<32x256xbf16, #tpu.memory_space<vmem>>, vector<32x256xbf16>,
    return
  }
  func.func @transform_0(%arg0: i32) -> (i32, i32) {
    %c0_i32 = arith.constant 0 : i32
    %c0_i32_0 = arith.constant 0 : i32
    return %arg0, %c0_i32 : i32, i32
  }
  func.func @transform_1(%arg0: i32) -> (i32, i32) {
    %c0_i32 = arith.constant 0 : i32
    %c0_i32_0 = arith.constant 0 : i32
    %c0_i32_1 = arith.constant 0 : i32
    return %c0_i32, %c0_i32_0 : i32, i32
  }
  func.func @transform_2(%arg0: i32) -> (i32, i32) {
    %c0_i32 = arith.constant 0 : i32
    %c0_i32_0 = arith.constant 0 : i32
    %c0_i32_1 = arith.constant 0 : i32
    return %c0_i32, %c0_i32_0 : i32, i32
  }
  func.func @transform_3(%arg0: i32) -> (i32, i32) {
    %c0_i32 = arith.constant 0 : i32
    %c0_i32_0 = arith.constant 0 : i32
    return %arg0, %c0_i32 : i32, i32
  }
}

module attributes {stable_mosaic.version = 11 : i64} {
  func.func @kernel(%arg0: i32, %arg1: memref<128x3456xbf16, #tpu.memory_space<vmem>>, %arg2: memref<3456x256xbf16, #tpu.memory_space<vmem>>, %arg3: memref<1x256xf32, #tpu.memory_space<vmem>>, %arg4: memref<1x256xf32, #tpu.memory_space<vmem>>, %arg5: memref<128x256xbf16, #tpu.memory_space<vmem>>) attributes {dimension_semantics = [#tpu.dimension_semantics<parallel>], iteration_bounds = array<i64: 1>, scalar_prefetch = 0 : i64, scratch_operands = 0 : i64, tpu.core_type = #tpu.core_type<tc>, window_params = [{transform_indices = @transform_0, window_bounds = array<i64: 128, 3456>}, {pipeline_mode = #tpu.pipeline_mode<synchronous>, transform_indices = @transform_1, window_bounds = array<i64: 3456, 256>}, {pipeline_mode = #tpu.pipeline_mode<synchronous>, transform_indices = @transform_2, window_bounds = array<i64: 1, 256>}, {pipeline_mode = #tpu.pipeline_mode<synchronous>, transform_indices = @transform_3, window_bounds = array<i64: 1, 256>}, {transform_indices = @transform_4, window_bounds = array<i64: 128, 256>}]} {
    %c0 = arith.constant 0 : index
    %c0_0 = arith.constant 0 : index
    %0 = vector.load %arg1[%c0, %c0_0] : memref<128x3456xbf16, #tpu.memory_space<vmem>>, vector<128x3456xbf16>
    %c0_1 = arith.constant 0 : index
    %c0_2 = arith.constant 0 : index
    %1 = vector.load %arg2[%c0_1, %c0_2] : memref<3456x256xbf16, #tpu.memory_space<vmem>>, vector<3456x256xbf16>
    %cst = arith.constant dense<0.000000e+00> : vector<128x256xf32>
    %2 = tpu.matmul %0, %1, %cst {dimension_numbers = #tpu.dot_dimension_numbers<[1], [0], [0], [1], [0, 0, 1, 1], [], []>} : vector<128x3456xbf16>, vector<3456x256xbf16>, vector<128x256xf32> -> vector<128x256xf32>
    %c0_3 = arith.constant 0 : index
    %c0_4 = arith.constant 0 : index
    %3 = vector.load %arg3[%c0_3, %c0_4] : memref<1x256xf32, #tpu.memory_space<vmem>>, vector<1x256xf32>
    %4 = vector.broadcast %3 : vector<1x256xf32> to vector<128x256xf32>
    %5 = arith.mulf %2, %4 : vector<128x256xf32>
    %c0_5 = arith.constant 0 : index
    %c0_6 = arith.constant 0 : index
    %6 = vector.load %arg4[%c0_5, %c0_6] : memref<1x256xf32, #tpu.memory_space<vmem>>, vector<1x256xf32>
    %7 = vector.broadcast %6 : vector<1x256xf32> to vector<128x256xf32>
    %8 = arith.addf %5, %7 : vector<128x256xf32>
    %9 = arith.truncf %8 : vector<128x256xf32> to vector<128x256xbf16>
    %c0_7 = arith.constant 0 : index
    %c0_8 = arith.constant 0 : index
    %10 = vector.load %arg5[%c0_7, %c0_8] : memref<128x256xbf16, #tpu.memory_space<vmem>>, vector<128x256xbf16>
    tpu.vector_store %arg5[%c0_7, %c0_8], %9 {strides = array<i32>} : memref<128x256xbf16, #tpu.memory_space<vmem>>, vector<128x256xbf16>,
    return
  }
  func.func @transform_0(%arg0: i32) -> (i32, i32) {
    %c0_i32 = arith.constant 0 : i32
    %c0_i32_0 = arith.constant 0 : i32
    return %arg0, %c0_i32 : i32, i32
  }
  func.func @transform_1(%arg0: i32) -> (i32, i32) {
    %c0_i32 = arith.constant 0 : i32
    %c0_i32_0 = arith.constant 0 : i32
    %c0_i32_1 = arith.constant 0 : i32
    return %c0_i32, %c0_i32_0 : i32, i32
  }
  func.func @transform_2(%arg0: i32) -> (i32, i32) {
    %c0_i32 = arith.constant 0 : i32
    %c0_i32_0 = arith.constant 0 : i32
    %c0_i32_1 = arith.constant 0 : i32
    return %c0_i32, %c0_i32_0 : i32, i32
  }
  func.func @transform_3(%arg0: i32) -> (i32, i32) {
    %c0_i32 = arith.constant 0 : i32
    %c0_i32_0 = arith.constant 0 : i32
    %c0_i32_1 = arith.constant 0 : i32
    return %c0_i32, %c0_i32_0 : i32, i32
  }
  func.func @transform_4(%arg0: i32) -> (i32, i32) {
    %c0_i32 = arith.constant 0 : i32
    %c0_i32_0 = arith.constant 0 : i32
    return %arg0, %c0_i32 : i32, i32
  }
}

module attributes {stable_mosaic.version = 11 : i64} {
  func.func @kernel(%arg0: i32, %arg1: memref<128x256xbf16, #tpu.memory_space<vmem>>, %arg2: memref<256x256xbf16, #tpu.memory_space<vmem>>, %arg3: memref<1x256xf32, #tpu.memory_space<vmem>>, %arg4: memref<1x256xf32, #tpu.memory_space<vmem>>, %arg5: memref<128x256xbf16, #tpu.memory_space<vmem>>) attributes {dimension_semantics = [#tpu.dimension_semantics<parallel>], iteration_bounds = array<i64: 1>, scalar_prefetch = 0 : i64, scratch_operands = 0 : i64, tpu.core_type = #tpu.core_type<tc>, window_params = [{transform_indices = @transform_0, window_bounds = array<i64: 128, 256>}, {pipeline_mode = #tpu.pipeline_mode<synchronous>, transform_indices = @transform_1, window_bounds = array<i64: 256, 256>}, {pipeline_mode = #tpu.pipeline_mode<synchronous>, transform_indices = @transform_2, window_bounds = array<i64: 1, 256>}, {pipeline_mode = #tpu.pipeline_mode<synchronous>, transform_indices = @transform_3, window_bounds = array<i64: 1, 256>}, {transform_indices = @transform_4, window_bounds = array<i64: 128, 256>}]} {
    %c0 = arith.constant 0 : index
    %c0_0 = arith.constant 0 : index
    %0 = vector.load %arg1[%c0, %c0_0] : memref<128x256xbf16, #tpu.memory_space<vmem>>, vector<128x256xbf16>
    %c0_1 = arith.constant 0 : index
    %c0_2 = arith.constant 0 : index
    %1 = vector.load %arg2[%c0_1, %c0_2] : memref<256x256xbf16, #tpu.memory_space<vmem>>, vector<256x256xbf16>
    %cst = arith.constant dense<0.000000e+00> : vector<128x256xf32>
    %2 = tpu.matmul %0, %1, %cst {dimension_numbers = #tpu.dot_dimension_numbers<[1], [0], [0], [1], [0, 0, 1, 1], [], []>} : vector<128x256xbf16>, vector<256x256xbf16>, vector<128x256xf32> -> vector<128x256xf32>
    %c0_3 = arith.constant 0 : index
    %c0_4 = arith.constant 0 : index
    %3 = vector.load %arg3[%c0_3, %c0_4] : memref<1x256xf32, #tpu.memory_space<vmem>>, vector<1x256xf32>
    %4 = vector.broadcast %3 : vector<1x256xf32> to vector<128x256xf32>
    %5 = arith.mulf %2, %4 : vector<128x256xf32>
    %c0_5 = arith.constant 0 : index
    %c0_6 = arith.constant 0 : index
    %6 = vector.load %arg4[%c0_5, %c0_6] : memref<1x256xf32, #tpu.memory_space<vmem>>, vector<1x256xf32>
    %7 = vector.broadcast %6 : vector<1x256xf32> to vector<128x256xf32>
    %8 = arith.addf %5, %7 : vector<128x256xf32>
    %cst_7 = arith.constant 0.000000e+00 : f32
    %9 = vector.broadcast %cst_7 : f32 to vector<128x256xf32>
    %10 = arith.cmpf oge, %8, %9 : vector<128x256xf32>
    %11 = arith.extui %10 : vector<128x256xi1> to vector<128x256xi32>
    %12 = arith.sitofp %11 : vector<128x256xi32> to vector<128x256xf32>
    %13 = arith.truncf %12 : vector<128x256xf32> to vector<128x256xbf16>
    %c0_8 = arith.constant 0 : index
    %c0_9 = arith.constant 0 : index
    %14 = vector.load %arg5[%c0_8, %c0_9] : memref<128x256xbf16, #tpu.memory_space<vmem>>, vector<128x256xbf16>
    tpu.vector_store %arg5[%c0_8, %c0_9], %13 {strides = array<i32>} : memref<128x256xbf16, #tpu.memory_space<vmem>>, vector<128x256xbf16>,
    return
  }
  func.func @transform_0(%arg0: i32) -> (i32, i32) {
    %c0_i32 = arith.constant 0 : i32
    %c0_i32_0 = arith.constant 0 : i32
    return %arg0, %c0_i32 : i32, i32
  }
  func.func @transform_1(%arg0: i32) -> (i32, i32) {
    %c0_i32 = arith.constant 0 : i32
    %c0_i32_0 = arith.constant 0 : i32
    %c0_i32_1 = arith.constant 0 : i32
    return %c0_i32, %c0_i32_0 : i32, i32
  }
  func.func @transform_2(%arg0: i32) -> (i32, i32) {
    %c0_i32 = arith.constant 0 : i32
    %c0_i32_0 = arith.constant 0 : i32
    %c0_i32_1 = arith.constant 0 : i32
    return %c0_i32, %c0_i32_0 : i32, i32
  }
  func.func @transform_3(%arg0: i32) -> (i32, i32) {
    %c0_i32 = arith.constant 0 : i32
    %c0_i32_0 = arith.constant 0 : i32
    %c0_i32_1 = arith.constant 0 : i32
    return %c0_i32, %c0_i32_0 : i32, i32
  }
  func.func @transform_4(%arg0: i32) -> (i32, i32) {
    %c0_i32 = arith.constant 0 : i32
    %c0_i32_0 = arith.constant 0 : i32
    return %arg0, %c0_i32 : i32, i32
  }
}

</mosaic_0001>

<bundles_post_ra>
// kernel: ems_yolo_forward.11
= control target key start
LH: loop header
LB: loop body
LE: loop exit
PB: predicated region body
PF: predicated region fallthrough
CT: control target
= control target key end

     0   :  { %s1318_s12 = smov 0   ;;  %s1641_s0 = inlined_call_operand.vmem [shape: f32[2048,128], index: 0, kind: input, shape index: {}]   ;;  %s1642_s1 = inlined_call_operand.vmem [shape: f32[1,128], index: 1, kind: input, shape index: {}]   ;;  %s1643_s2 = inlined_call_operand.vmem [shape: f32[1,128], index: 2, kind: input, shape index: {}]   ;;  %s1644_s3 = inlined_call_operand.vmem [shape: bf16[2048,128], index: 3, kind: output, shape index: {}]  }
   0x1 LB: > { %s948_s13 = sadd.s32 4294967295, %s1295_s12   ;;  %p952_p0 = scmp.ge.s32.totalorder %s1295_s12, 1  ;;  %s1295_s12 = sphi %s1318_s12, %s13_s12  }
   0x2   : > { %p138_p1 = scmp.lt.s32.totalorder %s1295_s12, 5 }
   0x4   : > { %p139_p2 = pnand %p952_p0, %p138_p1 }
   0x5   : > { %s953_s14 = sshll.u32 (!%p139_p2), %s948_s13, 6  ;;  %v1332_v0 = vld [vmem:[%s1642_s1] ss:$0 sm:$0xff] (!%p139_p2)  ;;  %v1297_v25 = vmov (!%p139_p2), 0.0  }
   0x6   : > { %142 = sbr.rel (%p139_p2) target bundleno = 95 (0x5f), region = 32  ;;  %p163_p3 = scmp.lt.s32.totalorder (!%p139_p2), %s953_s14, 255  ;;  %v1342_v1 = vld [vmem:[%s1643_s2] ss:$0 sm:$0xff] (!%p139_p2) }
   0xd   : > { %s1646_s14 = smov (!%p163_p3, %s953_s14), 255 }
   0xe   : > { %s954_s15 = sshll.u32 %s1646_s14, 3  ;;  %s956_s23 = sshll.u32 %s1646_s14, 2 }
   0xf   : > { %s1337_s20 = scalar_lea.vmem %s1641_s0, %s954_s15  ;;  %s1371_s26 = scalar_lea.vmem %s1644_s3, %s956_s23 }
  0x10   : > { %v174_v2 = vld [vmem:[%s1337_s20] sm:$0xff]  ;;  %v175_v3 = vld [vmem:[%s1337_s20 + $0x8] sm:$0xff]  ;;  %v176_v4 = vld [vmem:[%s1337_s20 + $0x10] sm:$0xff] }
  0x11   : > { %v245_v5 = vmul.f32 %v1332_v0, %v174_v2  ;;  %v246_v6 = vmul.f32 %v1332_v0, %v175_v3  ;;  %v177_v7 = vld [vmem:[%s1337_s20 + $0x18] sm:$0xff]  ;;  %v247_v8 = vmul.f32 %v1332_v0, %v176_v4  ;;  %v178_v9 = vld [vmem:[%s1337_s20 + $0x20] sm:$0xff]  ;;  %v179_v10 = vld [vmem:[%s1337_s20 + $0x28] sm:$0xff] }
  0x12   : > { %v248_v11 = vmul.f32 %v1332_v0, %v177_v7  ;;  %v249_v12 = vmul.f32 %v1332_v0, %v178_v9  ;;  %v250_v13 = vmul.f32 %v1332_v0, %v179_v10  ;;  %v180_v14 = vld [vmem:[%s1337_s20 + $0x30] sm:$0xff]  ;;  %v181_v15 = vld [vmem:[%s1337_s20 + $0x38] sm:$0xff]  ;;  %v182_v29 = vld [vmem:[%s1337_s20 + $0x40] sm:$0xff] }
  0x13   : > { %v316_v16 = vadd.f32 %v1342_v1, %v245_v5  ;;  %v317_v17 = vadd.f32 %v1342_v1, %v246_v6  ;;  %v318_v18 = vadd.f32 %v1342_v1, %v247_v8  ;;  %v251_v19 = vmul.f32 %v1332_v0, %v180_v14  ;;  %v183_v30 = vld [vmem:[%s1337_s20 + $0x48] sm:$0xff]  ;;  %v184_v33 = vld [vmem:[%s1337_s20 + $0x50] sm:$0xff]  ;;  %v185_v34 = vld [vmem:[%s1337_s20 + $0x58] sm:$0xff] }
  0x14   : > { %v319_v20 = vadd.f32 %v1342_v1, %v248_v11  ;;  %v320_v21 = vadd.f32 %v1342_v1, %v249_v12  ;;  %v321_v22 = vadd.f32 %v1342_v1, %v250_v13  ;;  %v252_v23 = vmul.f32 %v1332_v0, %v181_v15  ;;  %v186_v39 = vld [vmem:[%s1337_s20 + $0x60] sm:$0xff]  ;;  %v187_v43 = vld [vmem:[%s1337_s20 + $0x68] sm:$0xff]  ;;  %v188_v47 = vld [vmem:[%s1337_s20 + $0x70] sm:$0xff] }
  0x15   : > { %vm380_vm0 = vcmp.ge.f32.partialorder %v316_v16, 0.0  ;;  %vm381_vm1 = vcmp.ge.f32.partialorder %v317_v17, 0.0  ;;  %vm382_vm2 = vcmp.ge.f32.partialorder %v318_v18, 0.0  ;;  %v322_v24 = vadd.f32 %v1342_v1, %v251_v19  ;;  %v189_v57 = vld [vmem:[%s1337_s20 + $0x78] sm:$0xff]  ;;  %v190_v61 = vld [vmem:[%s1337_s20 + $0x80] sm:$0xff]  ;;  %v191_v62 = vld [vmem:[%s1337_s20 + $0x88] sm:$0xff] }
  0x16   : > { %v959_v26 = vsel %vm380_vm0, 1.0, %v1297_v25  ;;  %v960_v27 = vsel %vm381_vm1, 1.0, %v1297_v25  ;;  %vm383_vm3 = vcmp.ge.f32.partialorder %v319_v20, 0.0  ;;  %v961_v28 = vsel %vm382_vm2, 1.0, %v1297_v25  ;;  %v192_v5 = vld [vmem:[%s1337_s20 + $0x90] sm:$0xff]  ;;  %v193_v12 = vld [vmem:[%s1337_s20 + $0x98] sm:$0xff] }
  0x17   : > { %v1154_v31 = vpack.c.bf16 %v960_v27, %v959_v26  ;;  %v962_v32 = vsel %vm383_vm3, 1.0, %v1297_v25  ;;  %vm384_vm4 = vcmp.ge.f32.partialorder %v320_v21, 0.0  ;;  %vm385_vm5 = vcmp.ge.f32.partialorder %v321_v22, 0.0  ;;  %v194_v13 = vld [vmem:[%s1337_s20 + $0xa0] sm:$0xff]  ;;  %v195_v17 = vld [vmem:[%s1337_s20 + $0xa8] sm:$0xff] }
  0x18   : > { %v1157_v35 = vpack.c.bf16 %v962_v32, %v961_v28  ;;  %v963_v36 = vsel %vm384_vm4, 1.0, %v1297_v25  ;;  %v964_v37 = vsel %vm385_vm5, 1.0, %v1297_v25  ;;  %v323_v38 = vadd.f32 %v1342_v1, %v252_v23  ;;  %v196_v28 = vld [vmem:[%s1337_s20 + $0xb0] sm:$0xff] }
  0x19   : > { %1155 = vst [vmem:[%s1371_s26] sm:$0xff] %v1154_v31   ;;  %v1160_v40 = vpack.c.bf16 %v964_v37, %v963_v36  ;;  %vm386_vm6 = vcmp.ge.f32.partialorder %v322_v24, 0.0  ;;  %v253_v41 = vmul.f32 %v1332_v0, %v182_v29  ;;  %v254_v42 = vmul.f32 %v1332_v0, %v183_v30  ;;  %v197_v29 = vld [vmem:[%s1337_s20 + $0xb8] sm:$0xff] }
  0x1a   : > { %1249 = vst [vmem:[%s1371_s26 + $0x8] sm:$0xff] %v1157_v35   ;;  %vm387_vm7 = vcmp.ge.f32.partialorder %v323_v38, 0.0  ;;  %v965_v44 = vsel %vm386_vm6, 1.0, %v1297_v25  ;;  %v255_v45 = vmul.f32 %v1332_v0, %v184_v33  ;;  %v256_v46 = vmul.f32 %v1332_v0, %v185_v34  ;;  %v198_v34 = vld [vmem:[%s1337_s20 + $0xc0] sm:$0xff] }
  0x1b   : > { %1250 = vst [vmem:[%s1371_s26 + $0x10] sm:$0xff] %v1160_v40   ;;  %v966_v48 = vsel %vm387_vm7, 1.0, %v1297_v25  ;;  %v324_v49 = vadd.f32 %v1342_v1, %v253_v41  ;;  %v325_v50 = vadd.f32 %v1342_v1, %v254_v42  ;;  %v257_v51 = vmul.f32 %v1332_v0, %v186_v39  ;;  %v199_v41 = vld [vmem:[%s1337_s20 + $0xc8] sm:$0xff] }
  0x1c   : > { %v1163_v52 = vpack.c.bf16 %v966_v48, %v965_v44  ;;  %v326_v53 = vadd.f32 %v1342_v1, %v255_v45  ;;  %v327_v54 = vadd.f32 %v1342_v1, %v256_v46  ;;  %v258_v55 = vmul.f32 %v1332_v0, %v187_v43  ;;  %v200_v44 = vld [vmem:[%s1337_s20 + $0xd0] sm:$0xff]  ;;  %v201_v45 = vld [vmem:[%s1337_s20 + $0xd8] sm:$0xff]  ;;  %v202_v46 = vld [vmem:[%s1337_s20 + $0xe0] sm:$0xff] }
  0x1d   : > { %vm388_vm8 = vcmp.ge.f32.partialorder %v324_v49, 0.0  ;;  %vm389_vm9 = vcmp.ge.f32.partialorder %v325_v50, 0.0  ;;  %v328_v56 = vadd.f32 %v1342_v1, %v257_v51  ;;  %v259_v58 = vmul.f32 %v1332_v0, %v188_v47 }
  0x1e   : > { %1251 = vst [vmem:[%s1371_s26 + $0x18] sm:$0xff] %v1163_v52   ;;  %v967_v59 = vsel %vm388_vm8, 1.0, %v1297_v25  ;;  %v968_v60 = vsel %vm389_vm9, 1.0, %v1297_v25  ;;  %vm390_vm10 = vcmp.ge.f32.partialorder %v326_v53, 0.0  ;;  %vm391_vm11 = vcmp.ge.f32.partialorder %v327_v54, 0.0 }
  0x1f   : > { %v1166_v63 = vpack.c.bf16 %v968_v60, %v967_v59  ;;  %v969_v2 = vsel %vm390_vm10, 1.0, %v1297_v25  ;;  %v970_v3 = vsel %vm391_vm11, 1.0, %v1297_v25  ;;  %v329_v4 = vadd.f32 %v1342_v1, %v258_v55 }
  0x20   : > { %v1169_v6 = vpack.c.bf16 %v970_v3, %v969_v2  ;;  %vm392_vm12 = vcmp.ge.f32.partialorder %v328_v56, 0.0  ;;  %v260_v7 = vmul.f32 %v1332_v0, %v189_v57  ;;  %v330_v8 = vadd.f32 %v1342_v1, %v259_v58  ;;  %v203_v57 = vld [vmem:[%s1337_s20 + $0xe8] sm:$0xff] }
  0x21   : > { %1252 = vst [vmem:[%s1371_s26 + $0x20] sm:$0xff] %v1166_v63   ;;  %vm393_vm13 = vcmp.ge.f32.partialorder %v329_v4, 0.0  ;;  %v971_v9 = vsel %vm392_vm12, 1.0, %v1297_v25  ;;  %v261_v10 = vmul.f32 %v1332_v0, %v190_v61  ;;  %v262_v11 = vmul.f32 %v1332_v0, %v191_v62  ;;  %v204_v61 = vld [vmem:[%s1337_s20 + $0xf0] sm:$0xff] }
  0x22   : > { %1253 = vst [vmem:[%s1371_s26 + $0x28] sm:$0xff] %v1169_v6   ;;  %v972_v14 = vsel %vm393_vm13, 1.0, %v1297_v25  ;;  %v331_v15 = vadd.f32 %v1342_v1, %v260_v7  ;;  %vm394_vm14 = vcmp.ge.f32.partialorder %v330_v8, 0.0  ;;  %v263_v16 = vmul.f32 %v1332_v0, %v192_v5  ;;  %v205_v7 = vld [vmem:[%s1337_s20 + $0xf8] sm:$0xff] }
  0x23   : > { %v1172_v18 = vpack.c.bf16 %v972_v14, %v971_v9  ;;  %v973_v19 = vsel %vm394_vm14, 1.0, %v1297_v25  ;;  %v332_v20 = vadd.f32 %v1342_v1, %v261_v10  ;;  %v333_v21 = vadd.f32 %v1342_v1, %v262_v11  ;;  %v206_v10 = vld [vmem:[%s1337_s20 + $0x100] sm:$0xff]  ;;  %v207_v11 = vld [vmem:[%s1337_s20 + $0x108] sm:$0xff] }
  0x24   : > { %vm395_vm15 = vcmp.ge.f32.partialorder %v331_v15, 0.0  ;;  %v264_v22 = vmul.f32 %v1332_v0, %v193_v12  ;;  %v334_v23 = vadd.f32 %v1342_v1, %v263_v16  ;;  %v265_v24 = vmul.f32 %v1332_v0, %v194_v13  ;;  %v208_v16 = vld [vmem:[%s1337_s20 + $0x110] sm:$0xff] }
  0x25   : > { %1254 = vst [vmem:[%s1371_s26 + $0x30] sm:$0xff] %v1172_v18   ;;  %v974_v26 = vsel %vm395_vm15, 1.0, %v1297_v25  ;;  %vm396_vm0 = vcmp.ge.f32.partialorder %v332_v20, 0.0  ;;  %vm397_vm1 = vcmp.ge.f32.partialorder %v333_v21, 0.0  ;;  %v266_v27 = vmul.f32 %v1332_v0, %v195_v17 }
  0x26   : > { %v1175_v30 = vpack.c.bf16 %v974_v26, %v973_v19  ;;  %v975_v31 = vsel %vm396_vm0, 1.0, %v1297_v25  ;;  %v976_v32 = vsel %vm397_vm1, 1.0, %v1297_v25  ;;  %v335_v33 = vadd.f32 %v1342_v1, %v264_v22 }
  0x27   : > { %v1178_v35 = vpack.c.bf16 %v976_v32, %v975_v31  ;;  %vm398_vm2 = vcmp.ge.f32.partialorder %v334_v23, 0.0  ;;  %v336_v36 = vadd.f32 %v1342_v1, %v265_v24  ;;  %v337_v37 = vadd.f32 %v1342_v1, %v266_v27  ;;  %v209_v23 = vld [vmem:[%s1337_s20 + $0x118] sm:$0xff]  ;;  %v210_v24 = vld [vmem:[%s1337_s20 + $0x120] sm:$0xff] }
  0x28   : > { %1255 = vst [vmem:[%s1371_s26 + $0x38] sm:$0xff] %v1175_v30   ;;  %vm399_vm3 = vcmp.ge.f32.partialorder %v335_v33, 0.0  ;;  %v977_v38 = vsel %vm398_vm2, 1.0, %v1297_v25  ;;  %v267_v39 = vmul.f32 %v1332_v0, %v196_v28  ;;  %v268_v40 = vmul.f32 %v1332_v0, %v197_v29  ;;  %v211_v29 = vld [vmem:[%s1337_s20 + $0x128] sm:$0xff] }
  0x29   : > { %1256 = vst [vmem:[%s1371_s26 + $0x40] sm:$0xff] %v1178_v35   ;;  %v978_v42 = vsel %vm399_vm3, 1.0, %v1297_v25  ;;  %vm400_vm4 = vcmp.ge.f32.partialorder %v336_v36, 0.0  ;;  %vm401_vm5 = vcmp.ge.f32.partialorder %v337_v37, 0.0  ;;  %v269_v43 = vmul.f32 %v1332_v0, %v198_v34 }
  0x2a   : > { %v1181_v47 = vpack.c.bf16 %v978_v42, %v977_v38  ;;  %v979_v48 = vsel %vm400_vm4, 1.0, %v1297_v25  ;;  %v980_v49 = vsel %vm401_vm5, 1.0, %v1297_v25  ;;  %v338_v50 = vadd.f32 %v1342_v1, %v267_v39  ;;  %v212_v39 = vld [vmem:[%s1337_s20 + $0x130] sm:$0xff] }
  0x2b   : > { %v1184_v51 = vpack.c.bf16 %v980_v49, %v979_v48  ;;  %v339_v52 = vadd.f32 %v1342_v1, %v268_v40  ;;  %v270_v53 = vmul.f32 %v1332_v0, %v199_v41  ;;  %v340_v54 = vadd.f32 %v1342_v1, %v269_v43  ;;  %v213_v40 = vld [vmem:[%s1337_s20 + $0x138] sm:$0xff] }
  0x2c   : > { %1257 = vst [vmem:[%s1371_s26 + $0x48] sm:$0xff] %v1181_v47   ;;  %vm402_vm6 = vcmp.ge.f32.partialorder %v338_v50, 0.0  ;;  %v271_v55 = vmul.f32 %v1332_v0, %v200_v44  ;;  %v272_v56 = vmul.f32 %v1332_v0, %v201_v45  ;;  %v273_v58 = vmul.f32 %v1332_v0, %v202_v46  ;;  %v214_v45 = vld [vmem:[%s1337_s20 + $0x140] sm:$0xff] }
  0x2d   : > { %1258 = vst [vmem:[%s1371_s26 + $0x50] sm:$0xff] %v1184_v51   ;;  %vm403_vm7 = vcmp.ge.f32.partialorder %v339_v52, 0.0  ;;  %v981_v59 = vsel %vm402_vm6, 1.0, %v1297_v25  ;;  %v341_v60 = vadd.f32 %v1342_v1, %v270_v53  ;;  %vm404_vm8 = vcmp.ge.f32.partialorder %v340_v54, 0.0  ;;  %v215_v52 = vld [vmem:[%s1337_s20 + $0x148] sm:$0xff] }
  0x2e   : > { %v982_v62 = vsel %vm403_vm7, 1.0, %v1297_v25  ;;  %v983_v63 = vsel %vm404_vm8, 1.0, %v1297_v25  ;;  %v342_v2 = vadd.f32 %v1342_v1, %v271_v55  ;;  %v343_v3 = vadd.f32 %v1342_v1, %v272_v56  ;;  %v216_v55 = vld [vmem:[%s1337_s20 + $0x150] sm:$0xff]  ;;  %v217_v56 = vld [vmem:[%s1337_s20 + $0x158] sm:$0xff] }
  0x2f   : > { %v1187_v4 = vpack.c.bf16 %v982_v62, %v981_v59  ;;  %vm405_vm9 = vcmp.ge.f32.partialorder %v341_v60, 0.0  ;;  %v274_v5 = vmul.f32 %v1332_v0, %v203_v57  ;;  %v344_v6 = vadd.f32 %v1342_v1, %v273_v58  ;;  %v218_v57 = vld [vmem:[%s1337_s20 + $0x160] sm:$0xff] }
  0x30   : > { %v984_v8 = vsel %vm405_vm9, 1.0, %v1297_v25  ;;  %vm406_vm10 = vcmp.ge.f32.partialorder %v342_v2, 0.0  ;;  %vm407_vm11 = vcmp.ge.f32.partialorder %v343_v3, 0.0  ;;  %v275_v9 = vmul.f32 %v1332_v0, %v204_v61 }
  0x31   : > { %1259 = vst [vmem:[%s1371_s26 + $0x58] sm:$0xff] %v1187_v4   ;;  %v1190_v12 = vpack.c.bf16 %v984_v8, %v983_v63  ;;  %v985_v13 = vsel %vm406_vm10, 1.0, %v1297_v25  ;;  %v986_v14 = vsel %vm407_vm11, 1.0, %v1297_v25  ;;  %v345_v15 = vadd.f32 %v1342_v1, %v274_v5 }
  0x32   : > { %v1193_v17 = vpack.c.bf16 %v986_v14, %v985_v13  ;;  %vm408_vm12 = vcmp.ge.f32.partialorder %v344_v6, 0.0  ;;  %v276_v18 = vmul.f32 %v1332_v0, %v205_v7  ;;  %v346_v19 = vadd.f32 %v1342_v1, %v275_v9  ;;  %v219_v6 = vld [vmem:[%s1337_s20 + $0x168] sm:$0xff] }
  0x33   : > { %1260 = vst [vmem:[%s1371_s26 + $0x60] sm:$0xff] %v1190_v12   ;;  %vm409_vm13 = vcmp.ge.f32.partialorder %v345_v15, 0.0  ;;  %v987_v20 = vsel %vm408_vm12, 1.0, %v1297_v25  ;;  %v277_v21 = vmul.f32 %v1332_v0, %v206_v10  ;;  %v278_v22 = vmul.f32 %v1332_v0, %v207_v11  ;;  %v220_v10 = vld [vmem:[%s1337_s20 + $0x170] sm:$0xff] }
  0x34   : > { %1261 = vst [vmem:[%s1371_s26 + $0x68] sm:$0xff] %v1193_v17   ;;  %v988_v26 = vsel %vm409_vm13, 1.0, %v1297_v25  ;;  %v347_v27 = vadd.f32 %v1342_v1, %v276_v18  ;;  %vm410_vm14 = vcmp.ge.f32.partialorder %v346_v19, 0.0  ;;  %v279_v28 = vmul.f32 %v1332_v0, %v208_v16  ;;  %v221_v18 = vld [vmem:[%s1337_s20 + $0x178] sm:$0xff] }
  0x35   : > { %v1196_v30 = vpack.c.bf16 %v988_v26, %v987_v20  ;;  %v989_v31 = vsel %vm410_vm14, 1.0, %v1297_v25  ;;  %v348_v32 = vadd.f32 %v1342_v1, %v277_v21  ;;  %v349_v33 = vadd.f32 %v1342_v1, %v278_v22  ;;  %v222_v21 = vld [vmem:[%s1337_s20 + $0x180] sm:$0xff]  ;;  %v223_v22 = vld [vmem:[%s1337_s20 + $0x188] sm:$0xff] }
  0x36   : > { %vm411_vm15 = vcmp.ge.f32.partialorder %v347_v27, 0.0  ;;  %v280_v34 = vmul.f32 %v1332_v0, %v209_v23  ;;  %v350_v35 = vadd.f32 %v1342_v1, %v279_v28  ;;  %v281_v36 = vmul.f32 %v1332_v0, %v210_v24  ;;  %v224_v28 = vld [vmem:[%s1337_s20 + $0x190] sm:$0xff] }
  0x37   : > { %1262 = vst [vmem:[%s1371_s26 + $0x70] sm:$0xff] %v1196_v30   ;;  %v990_v37 = vsel %vm411_vm15, 1.0, %v1297_v25  ;;  %vm412_vm0 = vcmp.ge.f32.partialorder %v348_v32, 0.0  ;;  %vm413_vm1 = vcmp.ge.f32.partialorder %v349_v33, 0.0  ;;  %v282_v38 = vmul.f32 %v1332_v0, %v211_v29 }
  0x38   : > { %v1199_v41 = vpack.c.bf16 %v990_v37, %v989_v31  ;;  %v991_v42 = vsel %vm412_vm0, 1.0, %v1297_v25  ;;  %v992_v43 = vsel %vm413_vm1, 1.0, %v1297_v25  ;;  %v351_v44 = vadd.f32 %v1342_v1, %v280_v34 }
  0x39   : > { %v1202_v46 = vpack.c.bf16 %v992_v43, %v991_v42  ;;  %vm414_vm2 = vcmp.ge.f32.partialorder %v350_v35, 0.0  ;;  %v352_v47 = vadd.f32 %v1342_v1, %v281_v36  ;;  %v353_v48 = vadd.f32 %v1342_v1, %v282_v38  ;;  %v225_v35 = vld [vmem:[%s1337_s20 + $0x198] sm:$0xff]  ;;  %v226_v36 = vld [vmem:[%s1337_s20 + $0x1a0] sm:$0xff] }
  0x3a   : > { %1263 = vst [vmem:[%s1371_s26 + $0x78] sm:$0xff] %v1199_v41   ;;  %vm415_vm3 = vcmp.ge.f32.partialorder %v351_v44, 0.0  ;;  %v993_v49 = vsel %vm414_vm2, 1.0, %v1297_v25  ;;  %v283_v50 = vmul.f32 %v1332_v0, %v212_v39  ;;  %v284_v51 = vmul.f32 %v1332_v0, %v213_v40  ;;  %v227_v40 = vld [vmem:[%s1337_s20 + $0x1a8] sm:$0xff] }
  0x3b   : > { %1264 = vst [vmem:[%s1371_s26 + $0x80] sm:$0xff] %v1202_v46   ;;  %v994_v53 = vsel %vm415_vm3, 1.0, %v1297_v25  ;;  %vm416_vm4 = vcmp.ge.f32.partialorder %v352_v47, 0.0  ;;  %vm417_vm5 = vcmp.ge.f32.partialorder %v353_v48, 0.0  ;;  %v285_v54 = vmul.f32 %v1332_v0, %v214_v45 }
  0x3c   : > { %v1205_v58 = vpack.c.bf16 %v994_v53, %v993_v49  ;;  %v995_v59 = vsel %vm416_vm4, 1.0, %v1297_v25  ;;  %v996_v60 = vsel %vm417_vm5, 1.0, %v1297_v25  ;;  %v354_v61 = vadd.f32 %v1342_v1, %v283_v50  ;;  %v228_v50 = vld [vmem:[%s1337_s20 + $0x1b0] sm:$0xff] }
  0x3d   : > { %v1208_v62 = vpack.c.bf16 %v996_v60, %v995_v59  ;;  %v355_v63 = vadd.f32 %v1342_v1, %v284_v51  ;;  %v286_v2 = vmul.f32 %v1332_v0, %v215_v52  ;;  %v356_v3 = vadd.f32 %v1342_v1, %v285_v54  ;;  %v229_v51 = vld [vmem:[%s1337_s20 + $0x1b8] sm:$0xff] }
  0x3e   : > { %1265 = vst [vmem:[%s1371_s26 + $0x88] sm:$0xff] %v1205_v58   ;;  %vm418_vm6 = vcmp.ge.f32.partialorder %v354_v61, 0.0  ;;  %v287_v4 = vmul.f32 %v1332_v0, %v216_v55  ;;  %v288_v5 = vmul.f32 %v1332_v0, %v217_v56  ;;  %v289_v7 = vmul.f32 %v1332_v0, %v218_v57  ;;  %v230_v56 = vld [vmem:[%s1337_s20 + $0x1c0] sm:$0xff] }
  0x3f   : > { %1266 = vst [vmem:[%s1371_s26 + $0x90] sm:$0xff] %v1208_v62   ;;  %vm419_vm7 = vcmp.ge.f32.partialorder %v355_v63, 0.0  ;;  %v997_v8 = vsel %vm418_vm6, 1.0, %v1297_v25  ;;  %v357_v9 = vadd.f32 %v1342_v1, %v286_v2  ;;  %vm420_vm8 = vcmp.ge.f32.partialorder %v356_v3, 0.0  ;;  %v231_v63 = vld [vmem:[%s1337_s20 + $0x1c8] sm:$0xff] }
  0x40   : > { %v998_v11 = vsel %vm419_vm7, 1.0, %v1297_v25  ;;  %v999_v12 = vsel %vm420_vm8, 1.0, %v1297_v25  ;;  %v358_v13 = vadd.f32 %v1342_v1, %v287_v4  ;;  %v359_v14 = vadd.f32 %v1342_v1, %v288_v5  ;;  %v232_v4 = vld [vmem:[%s1337_s20 + $0x1d0] sm:$0xff]  ;;  %v233_v5 = vld [vmem:[%s1337_s20 + $0x1d8] sm:$0xff] }
  0x41   : > { %v1211_v15 = vpack.c.bf16 %v998_v11, %v997_v8  ;;  %vm421_vm9 = vcmp.ge.f32.partialorder %v357_v9, 0.0  ;;  %v290_v16 = vmul.f32 %v1332_v0, %v219_v6  ;;  %v360_v17 = vadd.f32 %v1342_v1, %v289_v7  ;;  %v234_v6 = vld [vmem:[%s1337_s20 + $0x1e0] sm:$0xff] }
  0x42   : > { %v1000_v19 = vsel %vm421_vm9, 1.0, %v1297_v25  ;;  %vm422_vm10 = vcmp.ge.f32.partialorder %v358_v13, 0.0  ;;  %vm423_vm11 = vcmp.ge.f32.partialorder %v359_v14, 0.0  ;;  %v291_v20 = vmul.f32 %v1332_v0, %v220_v10 }
  0x43   : > { %1267 = vst [vmem:[%s1371_s26 + $0x98] sm:$0xff] %v1211_v15   ;;  %v1214_v23 = vpack.c.bf16 %v1000_v19, %v999_v12  ;;  %v1001_v24 = vsel %vm422_vm10, 1.0, %v1297_v25  ;;  %v1002_v26 = vsel %vm423_vm11, 1.0, %v1297_v25  ;;  %v361_v27 = vadd.f32 %v1342_v1, %v290_v16 }
  0x44   : > { %v1217_v29 = vpack.c.bf16 %v1002_v26, %v1001_v24  ;;  %vm424_vm12 = vcmp.ge.f32.partialorder %v360_v17, 0.0  ;;  %v292_v30 = vmul.f32 %v1332_v0, %v221_v18  ;;  %v362_v31 = vadd.f32 %v1342_v1, %v291_v20  ;;  %v235_v17 = vld [vmem:[%s1337_s20 + $0x1e8] sm:$0xff] }
  0x45   : > { %1268 = vst [vmem:[%s1371_s26 + $0xa0] sm:$0xff] %v1214_v23   ;;  %vm425_vm13 = vcmp.ge.f32.partialorder %v361_v27, 0.0  ;;  %v1003_v32 = vsel %vm424_vm12, 1.0, %v1297_v25  ;;  %v293_v33 = vmul.f32 %v1332_v0, %v222_v21  ;;  %v294_v34 = vmul.f32 %v1332_v0, %v223_v22  ;;  %v236_v21 = vld [vmem:[%s1337_s20 + $0x1f0] sm:$0xff] }
  0x46   : > { %1269 = vst [vmem:[%s1371_s26 + $0xa8] sm:$0xff] %v1217_v29   ;;  %v1004_v37 = vsel %vm425_vm13, 1.0, %v1297_v25  ;;  %v363_v38 = vadd.f32 %v1342_v1, %v292_v30  ;;  %vm426_vm14 = vcmp.ge.f32.partialorder %v362_v31, 0.0  ;;  %v295_v39 = vmul.f32 %v1332_v0, %v224_v28  ;;  %v237_v30 = vld [vmem:[%s1337_s20 + $0x1f8] sm:$0xff] }
  0x47   : > { %v1220_v41 = vpack.c.bf16 %v1004_v37, %v1003_v32  ;;  %v1005_v42 = vsel %vm426_vm14, 1.0, %v1297_v25  ;;  %v364_v43 = vadd.f32 %v1342_v1, %v293_v33  ;;  %v365_v44 = vadd.f32 %v1342_v1, %v294_v34 }
  0x48   : > { %vm427_vm15 = vcmp.ge.f32.partialorder %v363_v38, 0.0  ;;  %v296_v45 = vmul.f32 %v1332_v0, %v225_v35  ;;  %v366_v46 = vadd.f32 %v1342_v1, %v295_v39  ;;  %v297_v47 = vmul.f32 %v1332_v0, %v226_v36 }
  0x49   : > { %1270 = vst [vmem:[%s1371_s26 + $0xb0] sm:$0xff] %v1220_v41   ;;  %v1006_v48 = vsel %vm427_vm15, 1.0, %v1297_v25  ;;  %vm428_vm0 = vcmp.ge.f32.partialorder %v364_v43, 0.0  ;;  %vm429_vm1 = vcmp.ge.f32.partialorder %v365_v44, 0.0  ;;  %v298_v49 = vmul.f32 %v1332_v0, %v227_v40 }
  0x4a   : > { %v1223_v52 = vpack.c.bf16 %v1006_v48, %v1005_v42  ;;  %v1007_v53 = vsel %vm428_vm0, 1.0, %v1297_v25  ;;  %v1008_v54 = vsel %vm429_vm1, 1.0, %v1297_v25  ;;  %v367_v55 = vadd.f32 %v1342_v1, %v296_v45 }
  0x4b   : > { %v1226_v57 = vpack.c.bf16 %v1008_v54, %v1007_v53  ;;  %vm430_vm2 = vcmp.ge.f32.partialorder %v366_v46, 0.0  ;;  %v368_v58 = vadd.f32 %v1342_v1, %v297_v47  ;;  %v369_v59 = vadd.f32 %v1342_v1, %v298_v49 }
  0x4c   : > { %1271 = vst [vmem:[%s1371_s26 + $0xb8] sm:$0xff] %v1223_v52   ;;  %vm431_vm3 = vcmp.ge.f32.partialorder %v367_v55, 0.0  ;;  %v1009_v60 = vsel %vm430_vm2, 1.0, %v1297_v25  ;;  %v299_v61 = vmul.f32 %v1332_v0, %v228_v50  ;;  %v300_v62 = vmul.f32 %v1332_v0, %v229_v51 }
  0x4d   : > { %1272 = vst [vmem:[%s1371_s26 + $0xc0] sm:$0xff] %v1226_v57   ;;  %v1010_v2 = vsel %vm431_vm3, 1.0, %v1297_v25  ;;  %vm432_vm4 = vcmp.ge.f32.partialorder %v368_v58, 0.0  ;;  %vm433_vm5 = vcmp.ge.f32.partialorder %v369_v59, 0.0  ;;  %v301_v3 = vmul.f32 %v1332_v0, %v230_v56 }
  0x4e   : > { %v1229_v7 = vpack.c.bf16 %v1010_v2, %v1009_v60  ;;  %v1011_v8 = vsel %vm432_vm4, 1.0, %v1297_v25  ;;  %v1012_v9 = vsel %vm433_vm5, 1.0, %v1297_v25  ;;  %v370_v10 = vadd.f32 %v1342_v1, %v299_v61 }
  0x4f   : > { %v1232_v11 = vpack.c.bf16 %v1012_v9, %v1011_v8  ;;  %v371_v12 = vadd.f32 %v1342_v1, %v300_v62  ;;  %v302_v13 = vmul.f32 %v1332_v0, %v231_v63  ;;  %v372_v14 = vadd.f32 %v1342_v1, %v301_v3 }
  0x50   : > { %1273 = vst [vmem:[%s1371_s26 + $0xc8] sm:$0xff] %v1229_v7   ;;  %vm434_vm6 = vcmp.ge.f32.partialorder %v370_v10, 0.0  ;;  %v303_v15 = vmul.f32 %v1332_v0, %v232_v4  ;;  %v304_v16 = vmul.f32 %v1332_v0, %v233_v5  ;;  %v305_v18 = vmul.f32 %v1332_v0, %v234_v6 }
  0x51   : > { %1274 = vst [vmem:[%s1371_s26 + $0xd0] sm:$0xff] %v1232_v11   ;;  %vm435_vm7 = vcmp.ge.f32.partialorder %v371_v12, 0.0  ;;  %v1013_v19 = vsel %vm434_vm6, 1.0, %v1297_v25  ;;  %v373_v20 = vadd.f32 %v1342_v1, %v302_v13  ;;  %vm436_vm8 = vcmp.ge.f32.partialorder %v372_v14, 0.0 }
  0x52   : > { %v1014_v22 = vsel %vm435_vm7, 1.0, %v1297_v25  ;;  %v1015_v23 = vsel %vm436_vm8, 1.0, %v1297_v25  ;;  %v374_v24 = vadd.f32 %v1342_v1, %v303_v15  ;;  %v375_v26 = vadd.f32 %v1342_v1, %v304_v16 }
  0x53   : > { %v1235_v27 = vpack.c.bf16 %v1014_v22, %v1013_v19  ;;  %vm437_vm9 = vcmp.ge.f32.partialorder %v373_v20, 0.0  ;;  %v306_v28 = vmul.f32 %v1332_v0, %v235_v17  ;;  %v376_v29 = vadd.f32 %v1342_v1, %v305_v18 }
  0x54   : > { %v1016_v31 = vsel %vm437_vm9, 1.0, %v1297_v25  ;;  %vm438_vm10 = vcmp.ge.f32.partialorder %v374_v24, 0.0  ;;  %vm439_vm11 = vcmp.ge.f32.partialorder %v375_v26, 0.0  ;;  %v307_v32 = vmul.f32 %v1332_v0, %v236_v21 }
  0x55   : > { %1275 = vst [vmem:[%s1371_s26 + $0xd8] sm:$0xff] %v1235_v27   ;;  %v1238_v33 = vpack.c.bf16 %v1016_v31, %v1015_v23  ;;  %v1017_v34 = vsel %vm438_vm10, 1.0, %v1297_v25  ;;  %v1018_v35 = vsel %vm439_vm11, 1.0, %v1297_v25  ;;  %v377_v36 = vadd.f32 %v1342_v1, %v306_v28 }
  0x56   : > { %v1241_v37 = vpack.c.bf16 %v1018_v35, %v1017_v34  ;;  %vm440_vm12 = vcmp.ge.f32.partialorder %v376_v29, 0.0  ;;  %v308_v38 = vmul.f32 %v1332_v0, %v237_v30  ;;  %v378_v39 = vadd.f32 %v1342_v1, %v307_v32 }
  0x57   : > { %1276 = vst [vmem:[%s1371_s26 + $0xe0] sm:$0xff] %v1238_v33   ;;  %vm441_vm13 = vcmp.ge.f32.partialorder %v377_v36, 0.0  ;;  %v1019_v40 = vsel %vm440_vm12, 1.0, %v1297_v25 }
  0x58   : > { %1277 = vst [vmem:[%s1371_s26 + $0xe8] sm:$0xff] %v1241_v37   ;;  %v1020_v41 = vsel %vm441_vm13, 1.0, %v1297_v25  ;;  %v379_v42 = vadd.f32 %v1342_v1, %v308_v38  ;;  %vm442_vm14 = vcmp.ge.f32.partialorder %v378_v39, 0.0 }
  0x59   : > { %v1244_v43 = vpack.c.bf16 %v1020_v41, %v1019_v40  ;;  %v1021_v44 = vsel %vm442_vm14, 1.0, %v1297_v25 }
  0x5a   : > { %vm443_vm15 = vcmp.ge.f32.partialorder %v379_v42, 0.0 }
  0x5b   : > { %1278 = vst [vmem:[%s1371_s26 + $0xf0] sm:$0xff] %v1244_v43   ;;  %v1022_v45 = vsel %vm443_vm15, 1.0, %v1297_v25 }
  0x5c   : > { %v1247_v0 = vpack.c.bf16 %v1022_v45, %v1021_v44 }
  0x5e   : > { %1279 = vst [vmem:[%s1371_s26 + $0xf8] sm:$0xff] %v1247_v0  }
  0x5f PF: > { %s13_s12 = sadd.s32 1, %s1295_s12  }
  0x60   : > { %p10_p4 = scmp.ge.s32.totalorder %s13_s12, 6  }
  0x62   :  { %12 = sbr.rel (!%p10_p4) target bundleno = 1 (0x1), region = 62 }

// kernel: ems_yolo_forward.10
= control target key start
LH: loop header
LB: loop body
LE: loop exit
PB: predicated region body
PF: predicated region fallthrough
CT: control target
= control target key end

     0   :  { %s1424_s12 = smov 0   ;;  %s1783_s0 = inlined_call_operand.vmem [shape: bf16[2048,32], index: 0, kind: input, shape index: {}]   ;;  %s1784_s1 = inlined_call_operand.vmem [shape: bf16[32,128], index: 1, kind: input, shape index: {}]   ;;  %s1785_s2 = inlined_call_operand.vmem [shape: f32[2048,128], index: 2, kind: output, shape index: {0}]   ;;  %s1786_s3 = inlined_call_operand.vmem [shape: f32[32,128], index: 3, kind: output, shape index: {1}]  }
   0x1 LB: > { %s1430_s13 = sadd.s32 4294967295, %s1402_s12   ;;  %p1174_p0 = scmp.ge.s32.totalorder %s1402_s12, 1  ;;  %s1402_s12 = sphi %s1424_s12, %s14_s12  }
   0x2   : > { %p141_p1 = scmp.lt.s32.totalorder %s1402_s12, 5 }
   0x4   : > { %p142_p2 = pnand %p1174_p0, %p141_p1 }
   0x5   : > { %v1362_v0 = vld [vmem:[%s1784_s1] sm:$0xff] (!%p142_p2)   ;;  %s1175_s16 = sshll.u32 (!%p142_p2), %s1430_s13, 6  ;;  %v1363_v1 = vld [vmem:[%s1784_s1 + $0x8] sm:$0xff] (!%p142_p2)   ;;  %vm426_vm0 = vcmask (!%p142_p2), 261120   ;;  %p181_p4 = scmp.lt.s32.totalorder (!%p142_p2), %s1430_s13, 3  ;;  %vm1078_vm1 = vcmask (!%p142_p2), 1040384  }
   0x6   : > { %145 = sbr.rel (%p142_p2) target bundleno = 376 (0x178), region = 28  ;;  %p170_p3 = scmp.lt.s32.totalorder (!%p142_p2), %s1175_s16, 255  ;;  %1282 = vmatprep.subr.bf16.mxu0 (!%p142_p2), %v1362_v0  ;;  %1350 = vmatprep.subr.bf16.mxu1 (!%p142_p2), %v1362_v0  ;;  %vm1080_vm2 = vcmask (!%p142_p2), 1041408  }
   0x7   : > { %1283 = vmatpush3.bf16.msra.mxu0 (!%p142_p2), %v1362_v0  ;;  %1352 = vmatpush3.bf16.msra.mxu1 (!%p142_p2), %v1362_v0 }
   0x8   : > { %1284 = vmatprep.subr.bf16.mxu0 (!%p142_p2), %v1363_v1  ;;  %1351 = vmatprep.subr.bf16.mxu1 (!%p142_p2), %v1363_v1 }
   0xb   : > { %1285 = vmatpush3.bf16.msra.mxu0 (!%p142_p2), %v1363_v1  ;;  %1353 = vmatpush3.bf16.msra.mxu1 (!%p142_p2), %v1363_v1 }
   0xd   : > { %s1788_s16 = smov (!%p170_p3, %s1175_s16), 255  ;;  %s1790_s13 = smov (!%p181_p4, %s1430_s13), 3 }
   0xe   : > { %s1176_s19 = sshll.u32 %s1788_s16, 2  ;;  %s1178_s23 = sshll.u32 %s1788_s16, 3 }
   0xf   : > { %s1447_s22 = scalar_lea.vmem %s1783_s0, %s1176_s19  ;;  %s1517_s26 = scalar_lea.vmem %s1785_s2, %s1178_s23 }
  0x10   : > { %v1364_v2 = vld [vmem:[%s1447_s22] sm:$0xff]   ;;  %v1365_v3 = vld [vmem:[%s1447_s22 + $0x8] sm:$0xff]   ;;  %v1366_v4 = vld [vmem:[%s1447_s22 + $0x10] sm:$0xff]   ;;  %s1179_s27 = sshll.u32 %s1790_s13, 3 }
  0x11   : > { %1286 = vmatprep.mubr.msk.bf16.mxu0 %vm426_vm0, %v1364_v2  ;;  %v1367_v5 = vld [vmem:[%s1447_s22 + $0x18] sm:$0xff]   ;;  %v1368_v6 = vld [vmem:[%s1447_s22 + $0x20] sm:$0xff]   ;;  %v1369_v7 = vld [vmem:[%s1447_s22 + $0x28] sm:$0xff]   ;;  %s184_s30 = scalar_lea.vmem %s1786_s3, %s1179_s27 }
  0x12   : > { %1287 = vmatmul.mubr.msk.bf16.vlgmr.msra.gmra.mrb[0].mxu0 %vm426_vm0, %v1365_v3  ;;  %v1370_v8 = vld [vmem:[%s1447_s22 + $0x30] sm:$0xff]   ;;  %v1380_v9 = vld [vmem:[%s1447_s22 + $0x80] sm:$0xff]   ;;  %v1381_v10 = vld [vmem:[%s1447_s22 + $0x88] sm:$0xff]  }
  0x13   : > { %1290 = vmatprep.mubr.msk.bf16.mxu0 %vm426_vm0, %v1366_v4  ;;  %1318 = vmatprep.mubr.msk.bf16.mxu1 %vm426_vm0, %v1380_v9  ;;  %v1382_v11 = vld [vmem:[%s1447_s22 + $0x90] sm:$0xff]   ;;  %v1371_v12 = vld [vmem:[%s1447_s22 + $0x38] sm:$0xff]   ;;  %v1372_v13 = vld [vmem:[%s1447_s22 + $0x40] sm:$0xff]  }
  0x14   : > { %1319 = vmatmul.mubr.msk.bf16.vlgmr.msra.gmra.mrb[0].mxu1 %vm426_vm0, %v1381_v10  ;;  %v1383_v14 = vld [vmem:[%s1447_s22 + $0x98] sm:$0xff]   ;;  %v1384_v15 = vld [vmem:[%s1447_s22 + $0xa0] sm:$0xff]   ;;  %v1373_v16 = vld [vmem:[%s1447_s22 + $0x48] sm:$0xff]  }
  0x15   : > { %1322 = vmatprep.mubr.msk.bf16.mxu1 %vm426_vm0, %v1382_v11  ;;  %v1385_v17 = vld [vmem:[%s1447_s22 + $0xa8] sm:$0xff]   ;;  %v1374_v18 = vld [vmem:[%s1447_s22 + $0x50] sm:$0xff]   ;;  %v1375_v20 = vld [vmem:[%s1447_s22 + $0x58] sm:$0xff]  }
  0x16   : > { %v1386_v19 = vld [vmem:[%s1447_s22 + $0xb0] sm:$0xff]   ;;  %v1387_v21 = vld [vmem:[%s1447_s22 + $0xb8] sm:$0xff]   ;;  %v1376_v22 = vld [vmem:[%s1447_s22 + $0x60] sm:$0xff]  }
  0x17   : > { %v1388_v23 = vld [vmem:[%s1447_s22 + $0xc0] sm:$0xff]   ;;  %v1377_v24 = vld [vmem:[%s1447_s22 + $0x68] sm:$0xff]   ;;  %v1378_v26 = vld [vmem:[%s1447_s22 + $0x70] sm:$0xff]  }
  0x18   : > { %v1389_v25 = vld [vmem:[%s1447_s22 + $0xc8] sm:$0xff]   ;;  %v1390_v27 = vld [vmem:[%s1447_s22 + $0xd0] sm:$0xff]   ;;  %v1379_v28 = vld [vmem:[%s1447_s22 + $0x78] sm:$0xff]  }
  0x19   : > { %v1391_v29 = vld [vmem:[%s1447_s22 + $0xd8] sm:$0xff]   ;;  %v1392_v30 = vld [vmem:[%s1447_s22 + $0xe0] sm:$0xff]   ;;  %v1393_v31 = vld [vmem:[%s1447_s22 + $0xe8] sm:$0xff]  }
  0x1a   : > { %1291 = vmatmul.mubr.msk.bf16.gmra.mrb[4].mxu0 %vm426_vm0, %v1367_v5  ;;  %v1394_v32 = vld [vmem:[%s1447_s22 + $0xf0] sm:$0xff]   ;;  %v1395_v33 = vld [vmem:[%s1447_s22 + $0xf8] sm:$0xff]  }
  0x1b   : > { %1294 = vmatprep.mubr.msk.bf16.mxu0 %vm426_vm0, %v1368_v6 }
  0x1c   : > { %1323 = vmatmul.mubr.msk.bf16.gmra.mrb[4].mxu1 %vm426_vm0, %v1383_v14 }
  0x1d   : > { %1326 = vmatprep.mubr.msk.bf16.mxu1 %vm426_vm0, %v1384_v15 }
  0x22   : > { %1295 = vmatmul.mubr.msk.bf16.gmra.mrb[8].mxu0 %vm426_vm0, %v1369_v7 }
  0x23   : > { %1298 = vmatprep.mubr.msk.bf16.mxu0 %vm426_vm0, %v1370_v8 }
  0x24   : > { %1327 = vmatmul.mubr.msk.bf16.gmra.mrb[8].mxu1 %vm426_vm0, %v1385_v17 }
  0x25   : > { %1330 = vmatprep.mubr.msk.bf16.mxu1 %vm426_vm0, %v1386_v19 }
  0x2a   : > { %1299 = vmatmul.mubr.msk.bf16.gmra.mrb[12].mxu0 %vm426_vm0, %v1371_v12 }
  0x2b   : > { %1302 = vmatprep.mubr.msk.bf16.mxu0 %vm426_vm0, %v1372_v13 }
  0x2c   : > { %1331 = vmatmul.mubr.msk.bf16.gmra.mrb[12].mxu1 %vm426_vm0, %v1387_v21 }
  0x2d   : > { %1334 = vmatprep.mubr.msk.bf16.mxu1 %vm426_vm0, %v1388_v23 }
  0x32   : > { %1303 = vmatmul.mubr.msk.bf16.gmra.mrb[16].mxu0 %vm426_vm0, %v1373_v16 }
  0x33   : > { %1306 = vmatprep.mubr.msk.bf16.mxu0 %vm426_vm0, %v1374_v18 }
  0x34   : > { %1335 = vmatmul.mubr.msk.bf16.gmra.mrb[16].mxu1 %vm426_vm0, %v1389_v25 }
  0x35   : > { %1338 = vmatprep.mubr.msk.bf16.mxu1 %vm426_vm0, %v1390_v27 }
  0x3a   : > { %1307 = vmatmul.mubr.msk.bf16.gmra.mrb[20].mxu0 %vm426_vm0, %v1375_v20 }
  0x3b   : > { %1310 = vmatprep.mubr.msk.bf16.mxu0 %vm426_vm0, %v1376_v22 }
  0x3c   : > { %1339 = vmatmul.mubr.msk.bf16.gmra.mrb[20].mxu1 %vm426_vm0, %v1391_v29 }
  0x3d   : > { %1342 = vmatprep.mubr.msk.bf16.mxu1 %vm426_vm0, %v1392_v30 }
  0x42   : > { %1311 = vmatmul.mubr.msk.bf16.gmra.mrb[24].mxu0 %vm426_vm0, %v1377_v24 }
  0x43   : > { %1314 = vmatprep.mubr.msk.bf16.mxu0 %vm426_vm0, %v1378_v26 }
  0x44   : > { %1343 = vmatmul.mubr.msk.bf16.gmra.mrb[24].mxu1 %vm426_vm0, %v1393_v31 }
  0x45   : > { %1346 = vmatprep.mubr.msk.bf16.mxu1 %vm426_vm0, %v1394_v32 }
  0x4a   : > { %1315 = vmatmul.mubr.msk.bf16.gmra.mrb[28].mxu0 %vm426_vm0, %v1379_v28 }
  0x4c   : > { %1347 = vmatmul.mubr.msk.bf16.gmra.mrb[28].mxu1 %vm426_vm0, %v1395_v33 }
  0xe5   : > { %v1288_v34 = vpop.f32.mrb[0].mxu0 }
  0xe6   : > { %814 = vst [vmem:[%s1517_s26 + $0x10] sm:$0xff] %v1288_v34  ;;  %v557_v35 = vpop.f32.mrb[1].mxu0  ;;  %v947_v41 = vmul.f32 %v1288_v34, %v1288_v34 }
  0xe7   : > { %812 = vst [vmem:[%s1517_s26] sm:$0xff] %v557_v35  ;;  %v1289_v36 = vpop.f32.mrb[2].mxu0  ;;  %v945_v38 = vmul.f32 %v557_v35, %v557_v35  ;;  %v1527_v0 = vpop.f32.mrb[0].mxu1 }
  0xe8   : > { %815 = vst [vmem:[%s1517_s26 + $0x18] sm:$0xff] %v1289_v36  ;;  %v560_v37 = vpop.f32.mrb[3].mxu0  ;;  %v948_v44 = vmul.f32 %v1289_v36, %v1289_v36  ;;  %846 = vst [vmem:[%s1517_s26 + $0x110] sm:$0xff] %v1527_v0  ;;  %v1532_v2 = vpop.f32.mrb[1].mxu1 }
  0xe9   : > { %813 = vst [vmem:[%s1517_s26 + $0x8] sm:$0xff] %v560_v37  ;;  %v876_v39 = vadd.f32 %v560_v37, %v557_v35  ;;  %v946_v40 = vmul.f32 %v560_v37, %v560_v37  ;;  %844 = vst [vmem:[%s1517_s26 + $0x100] sm:$0xff] %v1532_v2  ;;  %v1537_v7 = vpop.f32.mrb[2].mxu1 }
  0xea   : > { %847 = vst [vmem:[%s1517_s26 + $0x118] sm:$0xff] %v1537_v7  ;;  %v1542_v9 = vpop.f32.mrb[3].mxu1 }
  0xeb   : > { %v877_v42 = vadd.f32 %v1288_v34, %v876_v39  ;;  %v1009_v43 = vadd.f32 %v946_v40, %v945_v38  ;;  %845 = vst [vmem:[%s1517_s26 + $0x108] sm:$0xff] %v1542_v9 }
  0xed   : > { %v1010_v45 = vadd.f32 %v1009_v43, %v947_v41  ;;  %v1292_v46 = vpop.f32.mrb[4].mxu0  ;;  %v878_v47 = vadd.f32 %v1289_v36, %v877_v42 }
  0xee   : > { %818 = vst [vmem:[%s1517_s26 + $0x30] sm:$0xff] %v1292_v46  ;;  %v573_v48 = vpop.f32.mrb[5].mxu0  ;;  %v951_v57 = vmul.f32 %v1292_v46, %v1292_v46 }
  0xef   : > { %816 = vst [vmem:[%s1517_s26 + $0x20] sm:$0xff] %v573_v48  ;;  %v879_v49 = vadd.f32 %v878_v47, %v573_v48  ;;  %v949_v50 = vmul.f32 %v573_v48, %v573_v48  ;;  %v1011_v51 = vadd.f32 %v1010_v45, %v948_v44  ;;  %v1293_v52 = vpop.f32.mrb[6].mxu0  ;;  %v1547_v20 = vpop.f32.mrb[4].mxu1 }
  0xf0   : > { %819 = vst [vmem:[%s1517_s26 + $0x38] sm:$0xff] %v1293_v52  ;;  %v576_v53 = vpop.f32.mrb[7].mxu0  ;;  %v952_v60 = vmul.f32 %v1293_v52, %v1293_v52  ;;  %850 = vst [vmem:[%s1517_s26 + $0x130] sm:$0xff] %v1547_v20  ;;  %v1552_v22 = vpop.f32.mrb[5].mxu1 }
  0xf1   : > { %v1012_v54 = vadd.f32 %v1011_v51, %v949_v50  ;;  %817 = vst [vmem:[%s1517_s26 + $0x28] sm:$0xff] %v576_v53  ;;  %v880_v55 = vadd.f32 %v879_v49, %v576_v53  ;;  %v950_v56 = vmul.f32 %v576_v53, %v576_v53  ;;  %848 = vst [vmem:[%s1517_s26 + $0x120] sm:$0xff] %v1552_v22  ;;  %v1557_v27 = vpop.f32.mrb[6].mxu1 }
  0xf2   : > { %851 = vst [vmem:[%s1517_s26 + $0x138] sm:$0xff] %v1557_v27  ;;  %v1562_v29 = vpop.f32.mrb[7].mxu1 }
  0xf3   : > { %v881_v58 = vadd.f32 %v1292_v46, %v880_v55  ;;  %v1013_v59 = vadd.f32 %v1012_v54, %v950_v56  ;;  %849 = vst [vmem:[%s1517_s26 + $0x128] sm:$0xff] %v1562_v29 }
  0xf5   : > { %v1014_v61 = vadd.f32 %v1013_v59, %v951_v57  ;;  %v1296_v62 = vpop.f32.mrb[8].mxu0  ;;  %v882_v63 = vadd.f32 %v1293_v52, %v881_v58 }
  0xf6   : > { %822 = vst [vmem:[%s1517_s26 + $0x50] sm:$0xff] %v1296_v62  ;;  %v589_v1 = vpop.f32.mrb[9].mxu0  ;;  %v955_v13 = vmul.f32 %v1296_v62, %v1296_v62 }
  0xf7   : > { %820 = vst [vmem:[%s1517_s26 + $0x40] sm:$0xff] %v589_v1  ;;  %v883_v3 = vadd.f32 %v882_v63, %v589_v1  ;;  %v953_v4 = vmul.f32 %v589_v1, %v589_v1  ;;  %v1015_v5 = vadd.f32 %v1014_v61, %v952_v60  ;;  %v1297_v6 = vpop.f32.mrb[10].mxu0  ;;  %v1567_v40 = vpop.f32.mrb[8].mxu1 }
  0xf8   : > { %823 = vst [vmem:[%s1517_s26 + $0x58] sm:$0xff] %v1297_v6  ;;  %v592_v8 = vpop.f32.mrb[11].mxu0  ;;  %v956_v16 = vmul.f32 %v1297_v6, %v1297_v6  ;;  %854 = vst [vmem:[%s1517_s26 + $0x150] sm:$0xff] %v1567_v40  ;;  %v1572_v42 = vpop.f32.mrb[9].mxu1 }
  0xf9   : > { %v1016_v10 = vadd.f32 %v1015_v5, %v953_v4  ;;  %821 = vst [vmem:[%s1517_s26 + $0x48] sm:$0xff] %v592_v8  ;;  %v884_v11 = vadd.f32 %v883_v3, %v592_v8  ;;  %v954_v12 = vmul.f32 %v592_v8, %v592_v8  ;;  %852 = vst [vmem:[%s1517_s26 + $0x140] sm:$0xff] %v1572_v42  ;;  %v1577_v47 = vpop.f32.mrb[10].mxu1 }
  0xfa   : > { %855 = vst [vmem:[%s1517_s26 + $0x158] sm:$0xff] %v1577_v47  ;;  %v1582_v49 = vpop.f32.mrb[11].mxu1 }
  0xfb   : > { %v885_v14 = vadd.f32 %v1296_v62, %v884_v11  ;;  %v1017_v15 = vadd.f32 %v1016_v10, %v954_v12  ;;  %853 = vst [vmem:[%s1517_s26 + $0x148] sm:$0xff] %v1582_v49 }
  0xfd   : > { %v1018_v17 = vadd.f32 %v1017_v15, %v955_v13  ;;  %v1300_v18 = vpop.f32.mrb[12].mxu0  ;;  %v886_v19 = vadd.f32 %v1297_v6, %v885_v14 }
  0xfe   : > { %826 = vst [vmem:[%s1517_s26 + $0x70] sm:$0xff] %v1300_v18  ;;  %v605_v21 = vpop.f32.mrb[13].mxu0  ;;  %v959_v33 = vmul.f32 %v1300_v18, %v1300_v18 }
  0xff   : > { %824 = vst [vmem:[%s1517_s26 + $0x60] sm:$0xff] %v605_v21  ;;  %v887_v23 = vadd.f32 %v886_v19, %v605_v21  ;;  %v957_v24 = vmul.f32 %v605_v21, %v605_v21  ;;  %v1019_v25 = vadd.f32 %v1018_v17, %v956_v16  ;;  %v1301_v26 = vpop.f32.mrb[14].mxu0  ;;  %v1587_v60 = vpop.f32.mrb[12].mxu1 }
 0x100   : > { %827 = vst [vmem:[%s1517_s26 + $0x78] sm:$0xff] %v1301_v26  ;;  %v608_v28 = vpop.f32.mrb[15].mxu0  ;;  %v960_v36 = vmul.f32 %v1301_v26, %v1301_v26  ;;  %858 = vst [vmem:[%s1517_s26 + $0x170] sm:$0xff] %v1587_v60  ;;  %v1592_v62 = vpop.f32.mrb[13].mxu1 }
 0x101   : > { %v1020_v30 = vadd.f32 %v1019_v25, %v957_v24  ;;  %825 = vst [vmem:[%s1517_s26 + $0x68] sm:$0xff] %v608_v28  ;;  %v888_v31 = vadd.f32 %v887_v23, %v608_v28  ;;  %v958_v32 = vmul.f32 %v608_v28, %v608_v28  ;;  %856 = vst [vmem:[%s1517_s26 + $0x160] sm:$0xff] %v1592_v62  ;;  %v1597_v5 = vpop.f32.mrb[14].mxu1 }
 0x102   : > { %859 = vst [vmem:[%s1517_s26 + $0x178] sm:$0xff] %v1597_v5  ;;  %v1602_v8 = vpop.f32.mrb[15].mxu1 }
 0x103   : > { %v889_v34 = vadd.f32 %v1300_v18, %v888_v31  ;;  %v1021_v35 = vadd.f32 %v1020_v30, %v958_v32  ;;  %857 = vst [vmem:[%s1517_s26 + $0x168] sm:$0xff] %v1602_v8 }
 0x105   : > { %v1022_v37 = vadd.f32 %v1021_v35, %v959_v33  ;;  %v1304_v38 = vpop.f32.mrb[16].mxu0  ;;  %v890_v39 = vadd.f32 %v1301_v26, %v889_v34 }
 0x106   : > { %830 = vst [vmem:[%s1517_s26 + $0x90] sm:$0xff] %v1304_v38  ;;  %v621_v41 = vpop.f32.mrb[17].mxu0  ;;  %v963_v53 = vmul.f32 %v1304_v38, %v1304_v38 }
 0x107   : > { %828 = vst [vmem:[%s1517_s26 + $0x80] sm:$0xff] %v621_v41  ;;  %v891_v43 = vadd.f32 %v890_v39, %v621_v41  ;;  %v961_v44 = vmul.f32 %v621_v41, %v621_v41  ;;  %v1023_v45 = vadd.f32 %v1022_v37, %v960_v36  ;;  %v1305_v46 = vpop.f32.mrb[18].mxu0  ;;  %v1607_v21 = vpop.f32.mrb[16].mxu1 }
 0x108   : > { %831 = vst [vmem:[%s1517_s26 + $0x98] sm:$0xff] %v1305_v46  ;;  %v624_v48 = vpop.f32.mrb[19].mxu0  ;;  %v964_v56 = vmul.f32 %v1305_v46, %v1305_v46  ;;  %862 = vst [vmem:[%s1517_s26 + $0x190] sm:$0xff] %v1607_v21  ;;  %v1612_v24 = vpop.f32.mrb[17].mxu1 }
 0x109   : > { %v1024_v50 = vadd.f32 %v1023_v45, %v961_v44  ;;  %829 = vst [vmem:[%s1517_s26 + $0x88] sm:$0xff] %v624_v48  ;;  %v892_v51 = vadd.f32 %v891_v43, %v624_v48  ;;  %v962_v52 = vmul.f32 %v624_v48, %v624_v48  ;;  %860 = vst [vmem:[%s1517_s26 + $0x180] sm:$0xff] %v1612_v24  ;;  %v1617_v31 = vpop.f32.mrb[18].mxu1 }
 0x10a   : > { %863 = vst [vmem:[%s1517_s26 + $0x198] sm:$0xff] %v1617_v31  ;;  %v1622_v33 = vpop.f32.mrb[19].mxu1 }
 0x10b   : > { %v893_v54 = vadd.f32 %v1304_v38, %v892_v51  ;;  %v1025_v55 = vadd.f32 %v1024_v50, %v962_v52  ;;  %861 = vst [vmem:[%s1517_s26 + $0x188] sm:$0xff] %v1622_v33 }
 0x10d   : > { %v1026_v57 = vadd.f32 %v1025_v55, %v963_v53  ;;  %v1308_v58 = vpop.f32.mrb[20].mxu0  ;;  %v894_v59 = vadd.f32 %v1305_v46, %v893_v54 }
 0x10e   : > { %834 = vst [vmem:[%s1517_s26 + $0xb0] sm:$0xff] %v1308_v58  ;;  %v637_v61 = vpop.f32.mrb[21].mxu0  ;;  %v967_v13 = vmul.f32 %v1308_v58, %v1308_v58 }
 0x10f   : > { %832 = vst [vmem:[%s1517_s26 + $0xa0] sm:$0xff] %v637_v61  ;;  %v895_v63 = vadd.f32 %v894_v59, %v637_v61  ;;  %v965_v1 = vmul.f32 %v637_v61, %v637_v61  ;;  %v1027_v3 = vadd.f32 %v1026_v57, %v964_v56  ;;  %v1309_v4 = vpop.f32.mrb[22].mxu0  ;;  %v1627_v46 = vpop.f32.mrb[20].mxu1 }
 0x110   : > { %835 = vst [vmem:[%s1517_s26 + $0xb8] sm:$0xff] %v1309_v4  ;;  %v640_v6 = vpop.f32.mrb[23].mxu0  ;;  %v968_v16 = vmul.f32 %v1309_v4, %v1309_v4  ;;  %866 = vst [vmem:[%s1517_s26 + $0x1b0] sm:$0xff] %v1627_v46  ;;  %v1632_v50 = vpop.f32.mrb[21].mxu1 }
 0x111   : > { %v1028_v10 = vadd.f32 %v1027_v3, %v965_v1  ;;  %833 = vst [vmem:[%s1517_s26 + $0xa8] sm:$0xff] %v640_v6  ;;  %v896_v11 = vadd.f32 %v895_v63, %v640_v6  ;;  %v966_v12 = vmul.f32 %v640_v6, %v640_v6  ;;  %864 = vst [vmem:[%s1517_s26 + $0x1a0] sm:$0xff] %v1632_v50  ;;  %v1637_v55 = vpop.f32.mrb[22].mxu1 }
 0x112   : > { %867 = vst [vmem:[%s1517_s26 + $0x1b8] sm:$0xff] %v1637_v55  ;;  %v1642_v57 = vpop.f32.mrb[23].mxu1 }
 0x113   : > { %v897_v14 = vadd.f32 %v1308_v58, %v896_v11  ;;  %v1029_v15 = vadd.f32 %v1028_v10, %v966_v12  ;;  %865 = vst [vmem:[%s1517_s26 + $0x1a8] sm:$0xff] %v1642_v57  ;;  %v977_v11 = vmul.f32 %v1532_v2, %v1532_v2 }
 0x115   : > { %v1030_v17 = vadd.f32 %v1029_v15, %v967_v13  ;;  %v1312_v18 = vpop.f32.mrb[24].mxu0  ;;  %v898_v19 = vadd.f32 %v1309_v4, %v897_v14 }
 0x116   : > { %838 = vst [vmem:[%s1517_s26 + $0xd0] sm:$0xff] %v1312_v18  ;;  %v653_v23 = vpop.f32.mrb[25].mxu0  ;;  %v971_v37 = vmul.f32 %v1312_v18, %v1312_v18 }
 0x117   : > { %836 = vst [vmem:[%s1517_s26 + $0xc0] sm:$0xff] %v653_v23  ;;  %v899_v25 = vadd.f32 %v898_v19, %v653_v23  ;;  %v969_v26 = vmul.f32 %v653_v23, %v653_v23  ;;  %v1031_v28 = vadd.f32 %v1030_v17, %v968_v16  ;;  %v1313_v30 = vpop.f32.mrb[26].mxu0  ;;  %v1649_v12 = vpop.f32.mrb[24].mxu1  ;;  %v978_v23 = vmul.f32 %v1542_v9, %v1542_v9 }
 0x118   : > { %839 = vst [vmem:[%s1517_s26 + $0xd8] sm:$0xff] %v1313_v30  ;;  %v656_v32 = vpop.f32.mrb[27].mxu0  ;;  %v972_v41 = vmul.f32 %v1313_v30, %v1313_v30  ;;  %870 = vst [vmem:[%s1517_s26 + $0x1d0] sm:$0xff] %v1649_v12  ;;  %v1653_v13 = vpop.f32.mrb[25].mxu1 }
 0x119   : > { %v1032_v34 = vadd.f32 %v1031_v28, %v969_v26  ;;  %837 = vst [vmem:[%s1517_s26 + $0xc8] sm:$0xff] %v656_v32  ;;  %v900_v35 = vadd.f32 %v899_v25, %v656_v32  ;;  %v970_v36 = vmul.f32 %v656_v32, %v656_v32  ;;  %868 = vst [vmem:[%s1517_s26 + $0x1c0] sm:$0xff] %v1653_v13  ;;  %v1658_v16 = vpop.f32.mrb[26].mxu1 }
 0x11a   : > { %871 = vst [vmem:[%s1517_s26 + $0x1d8] sm:$0xff] %v1658_v16  ;;  %v1662_v17 = vpop.f32.mrb[27].mxu1  ;;  %v980_v28 = vmul.f32 %v1537_v7, %v1537_v7 }
 0x11b   : > { %v901_v38 = vadd.f32 %v1312_v18, %v900_v35  ;;  %v1033_v39 = vadd.f32 %v1032_v34, %v970_v36  ;;  %869 = vst [vmem:[%s1517_s26 + $0x1c8] sm:$0xff] %v1662_v17  ;;  %v981_v34 = vmul.f32 %v1552_v22, %v1552_v22 }
 0x11d   : > { %v1034_v43 = vadd.f32 %v1033_v39, %v971_v37  ;;  %v1316_v44 = vpop.f32.mrb[28].mxu0  ;;  %v902_v45 = vadd.f32 %v1313_v30, %v901_v38 }
 0x11e   : > { %842 = vst [vmem:[%s1517_s26 + $0xf0] sm:$0xff] %v1316_v44  ;;  %v669_v48 = vpop.f32.mrb[29].mxu0  ;;  %v975_v63 = vmul.f32 %v1316_v44, %v1316_v44 }
 0x11f   : > { %840 = vst [vmem:[%s1517_s26 + $0xe0] sm:$0xff] %v669_v48  ;;  %v903_v51 = vadd.f32 %v902_v45, %v669_v48  ;;  %v973_v52 = vmul.f32 %v669_v48, %v669_v48  ;;  %v1035_v53 = vadd.f32 %v1034_v43, %v972_v41  ;;  %v1317_v54 = vpop.f32.mrb[30].mxu0  ;;  %v982_v41 = vmul.f32 %v1562_v29, %v1562_v29 }
 0x120   : > { %843 = vst [vmem:[%s1517_s26 + $0xf8] sm:$0xff] %v1317_v54  ;;  %v672_v56 = vpop.f32.mrb[31].mxu0  ;;  %v976_v4 = vmul.f32 %v1317_v54, %v1317_v54  ;;  %v984_v45 = vmul.f32 %v1557_v27, %v1557_v27 }
 0x121   : > { %v1036_v58 = vadd.f32 %v1035_v53, %v973_v52  ;;  %841 = vst [vmem:[%s1517_s26 + $0xe8] sm:$0xff] %v672_v56  ;;  %v904_v59 = vadd.f32 %v903_v51, %v672_v56  ;;  %v974_v61 = vmul.f32 %v672_v56, %v672_v56  ;;  %v985_v52 = vmul.f32 %v1572_v42, %v1572_v42 }
 0x123   : > { %v905_v1 = vadd.f32 %v1316_v44, %v904_v59  ;;  %v1037_v3 = vadd.f32 %v1036_v58, %v974_v61  ;;  %v986_v58 = vmul.f32 %v1582_v49, %v1582_v49 }
 0x125   : > { %v1038_v6 = vadd.f32 %v1037_v3, %v975_v63  ;;  %v906_v10 = vadd.f32 %v1317_v54, %v905_v1 }
 0x127   : > { %v907_v14 = vadd.f32 %v906_v10, %v1532_v2  ;;  %v1039_v15 = vadd.f32 %v1038_v6, %v976_v4  ;;  %v979_v2 = vmul.f32 %v1527_v0, %v1527_v0  ;;  %v990_v10 = vmul.f32 %v1602_v8, %v1602_v8 }
 0x129   : > { %v1040_v18 = vadd.f32 %v1039_v15, %v977_v11  ;;  %v908_v19 = vadd.f32 %v907_v14, %v1542_v9  ;;  %v1677_v9 = vpop.f32.mrb[28].mxu1 }
 0x12a   : > { %874 = vst [vmem:[%s1517_s26 + $0x1f0] sm:$0xff] %v1677_v9  ;;  %v1681_v35 = vpop.f32.mrb[29].mxu1 }
 0x12b   : > { %v909_v25 = vadd.f32 %v1527_v0, %v908_v19  ;;  %v1041_v26 = vadd.f32 %v1040_v18, %v978_v23  ;;  %872 = vst [vmem:[%s1517_s26 + $0x1e0] sm:$0xff] %v1681_v35  ;;  %v1686_v37 = vpop.f32.mrb[30].mxu1 }
 0x12c   : > { %875 = vst [vmem:[%s1517_s26 + $0x1f8] sm:$0xff] %v1686_v37  ;;  %v1690_v38 = vpop.f32.mrb[31].mxu1 }
 0x12d   : > { %v1042_v30 = vadd.f32 %v1041_v26, %v979_v2  ;;  %v910_v32 = vadd.f32 %v1537_v7, %v909_v25  ;;  %873 = vst [vmem:[%s1517_s26 + $0x1e8] sm:$0xff] %v1690_v38  ;;  %v994_v25 = vmul.f32 %v1622_v33, %v1622_v33 }
 0x12f   : > { %v911_v36 = vadd.f32 %v910_v32, %v1552_v22  ;;  %v1043_v0 = vadd.f32 %v1042_v30, %v980_v28  ;;  %v983_v22 = vmul.f32 %v1547_v20, %v1547_v20 }
 0x131   : > { %v1044_v7 = vadd.f32 %v1043_v0, %v981_v34  ;;  %v912_v39 = vadd.f32 %v911_v36, %v1562_v29 }
 0x133   : > { %v913_v43 = vadd.f32 %v1547_v20, %v912_v39  ;;  %v1045_v44 = vadd.f32 %v1044_v7, %v982_v41  ;;  %v987_v20 = vmul.f32 %v1567_v40, %v1567_v40  ;;  %v998_v7 = vmul.f32 %v1642_v57, %v1642_v57 }
 0x135   : > { %v1046_v48 = vadd.f32 %v1045_v44, %v983_v22  ;;  %v914_v51 = vadd.f32 %v1557_v27, %v913_v43  ;;  %v988_v27 = vmul.f32 %v1577_v47, %v1577_v47 }
 0x137   : > { %v915_v53 = vadd.f32 %v914_v51, %v1572_v42  ;;  %v1047_v29 = vadd.f32 %v1046_v48, %v984_v45  ;;  %v989_v42 = vmul.f32 %v1592_v62, %v1592_v62  ;;  %v1002_v51 = vmul.f32 %v1662_v17, %v1662_v17 }
 0x139   : > { %v1048_v54 = vadd.f32 %v1047_v29, %v985_v52  ;;  %v916_v56 = vadd.f32 %v915_v53, %v1582_v49 }
 0x13b   : > { %v917_v59 = vadd.f32 %v1567_v40, %v916_v56  ;;  %v1049_v61 = vadd.f32 %v1048_v54, %v986_v58  ;;  %v991_v40 = vmul.f32 %v1587_v60, %v1587_v60  ;;  %v1005_v54 = vmul.f32 %v1681_v35, %v1681_v35 }
 0x13d   : > { %v1050_v63 = vadd.f32 %v1049_v61, %v987_v20  ;;  %v918_v1 = vadd.f32 %v1577_v47, %v917_v59  ;;  %v992_v47 = vmul.f32 %v1597_v5, %v1597_v5  ;;  %v1007_v59 = vmul.f32 %v1677_v9, %v1677_v9 }
 0x13f   : > { %v919_v3 = vadd.f32 %v918_v1, %v1592_v62  ;;  %v1051_v4 = vadd.f32 %v1050_v63, %v988_v27  ;;  %v993_v62 = vmul.f32 %v1612_v24, %v1612_v24 }
 0x141   : > { %v1052_v6 = vadd.f32 %v1051_v4, %v989_v42  ;;  %v920_v49 = vadd.f32 %v919_v3, %v1602_v8 }
 0x143   : > { %v921_v11 = vadd.f32 %v1587_v60, %v920_v49  ;;  %v1053_v14 = vadd.f32 %v1052_v6, %v990_v10  ;;  %v995_v60 = vmul.f32 %v1607_v21, %v1607_v21 }
 0x145   : > { %v1054_v15 = vadd.f32 %v1053_v14, %v991_v40  ;;  %v922_v18 = vadd.f32 %v1597_v5, %v921_v11  ;;  %v996_v5 = vmul.f32 %v1617_v31, %v1617_v31 }
 0x147   : > { %v923_v19 = vadd.f32 %v922_v18, %v1612_v24  ;;  %v1055_v23 = vadd.f32 %v1054_v15, %v992_v47  ;;  %v997_v24 = vmul.f32 %v1632_v50, %v1632_v50 }
 0x149   : > { %v1056_v2 = vadd.f32 %v1055_v23, %v993_v62  ;;  %v924_v8 = vadd.f32 %v923_v19, %v1622_v33 }
 0x14b   : > { %v925_v26 = vadd.f32 %v1607_v21, %v924_v8  ;;  %v1057_v28 = vadd.f32 %v1056_v2, %v994_v25  ;;  %v999_v21 = vmul.f32 %v1627_v46, %v1627_v46 }
 0x14d   : > { %v1058_v30 = vadd.f32 %v1057_v28, %v995_v60  ;;  %v926_v32 = vadd.f32 %v1617_v31, %v925_v26  ;;  %v1000_v31 = vmul.f32 %v1637_v55, %v1637_v55 }
 0x14f   : > { %v927_v34 = vadd.f32 %v926_v32, %v1632_v50  ;;  %v1059_v36 = vadd.f32 %v1058_v30, %v996_v5  ;;  %v1001_v50 = vmul.f32 %v1653_v13, %v1653_v13 }
 0x151   : > { %v1060_v0 = vadd.f32 %v1059_v36, %v997_v24  ;;  %v928_v33 = vadd.f32 %v927_v34, %v1642_v57 }
 0x153   : > { %v929_v39 = vadd.f32 %v1627_v46, %v928_v33  ;;  %v1061_v41 = vadd.f32 %v1060_v0, %v998_v7  ;;  %v1003_v46 = vmul.f32 %v1649_v12, %v1649_v12 }
 0x155   : > { %v1062_v22 = vadd.f32 %v1061_v41, %v999_v21  ;;  %v930_v43 = vadd.f32 %v1637_v55, %v929_v39  ;;  %v1004_v55 = vmul.f32 %v1658_v16, %v1658_v16 }
 0x157   : > { %v931_v44 = vadd.f32 %v930_v43, %v1653_v13  ;;  %v1063_v45 = vadd.f32 %v1062_v22, %v1000_v31 }
 0x159   : > { %v1064_v48 = vadd.f32 %v1063_v45, %v1001_v50  ;;  %v932_v57 = vadd.f32 %v931_v44, %v1662_v17 }
 0x15b   : > { %v933_v52 = vadd.f32 %v1649_v12, %v932_v57  ;;  %v1065_v53 = vadd.f32 %v1064_v48, %v1002_v51  ;;  %v1006_v12 = vmul.f32 %v1690_v38, %v1690_v38 }
 0x15d   : > { %v1066_v29 = vadd.f32 %v1065_v53, %v1003_v46  ;;  %v934_v13 = vadd.f32 %v1658_v16, %v933_v52  ;;  %v1008_v16 = vmul.f32 %v1686_v37, %v1686_v37 }
 0x15f   : > { %v935_v56 = vadd.f32 %v934_v13, %v1681_v35  ;;  %v1067_v58 = vadd.f32 %v1066_v29, %v1004_v55 }
 0x161   : > { %v1068_v17 = vadd.f32 %v1067_v58, %v1005_v54  ;;  %v936_v20 = vadd.f32 %v935_v56, %v1690_v38 }
 0x163   : > { %v937_v61 = vadd.f32 %v1677_v9, %v936_v20  ;;  %v1069_v27 = vadd.f32 %v1068_v17, %v1006_v12 }
 0x165   : > { %v938_v63 = vadd.f32 %v1686_v37, %v937_v61  ;;  %v1070_v35 = vadd.f32 %v1069_v27, %v1007_v59 }
 0x167   : > { %v939_v1 = vrot.slane %v938_v63, 4  ;;  %v1071_v42 = vadd.f32 %v1070_v35, %v1008_v16 }
 0x169   : > { %v940_v3 = vadd.f32 %v939_v1, %v938_v63  ;;  %v1072_v4 = vrot.slane %v1071_v42, 4 }
 0x16b   : > { %v941_v6 = vrot.slane %v940_v3, 2  ;;  %v1073_v49 = vadd.f32 %v1072_v4, %v1071_v42 }
 0x16d   : > { %v942_v38 = vadd.f32 %v941_v6, %v940_v3  ;;  %v1074_v10 = vrot.slane %v1073_v49, 2 }
 0x16f   : > { %v943_v40 = vrot.slane %v942_v38, 1  ;;  %v1075_v11 = vadd.f32 %v1074_v10, %v1073_v49 }
 0x171   : > { %v1076_v9 = vrot.slane %v1075_v11, 1  ;;  %v944_v14 = vadd.f32 %v943_v40, %v942_v38 }
 0x173   : > { %v1077_v47 = vadd.f32 %v1076_v9, %v1075_v11 }
 0x175   : > { %v1079_v37 = vsel %vm1078_vm1, %v944_v14, %v1077_v47 }
 0x176   : > { %v1081_v15 = vsel %vm1080_vm2, %v1079_v37, 0.0 }
 0x177   : > { %1082 = vst [vmem:[%s184_s30] sm:$0xff] %v1081_v15 }
 0x178 PF: > { %s14_s12 = sadd.s32 1, %s1402_s12  }
 0x179   : > { %p11_p5 = scmp.ge.s32.totalorder %s14_s12, 6  }
 0x17b   :  { %13 = sbr.rel (!%p11_p5) target bundleno = 1 (0x1), region = 70 }

// kernel: ems_yolo_forward.13
= control target key start
LH: loop header
LB: loop body
LE: loop exit
PB: predicated region body
PF: predicated region fallthrough
CT: control target
= control target key end

     0   :  { %v1058_v24 = vmov 0.0   ;;  %s1569_s0 = inlined_call_operand.vmem [shape: f32[512,128], index: 0, kind: input, shape index: {}]   ;;  %s1570_s1 = inlined_call_operand.vmem [shape: f32[1,128], index: 1, kind: input, shape index: {}]   ;;  %s1571_s2 = inlined_call_operand.vmem [shape: f32[1,128], index: 2, kind: input, shape index: {}]   ;;  %s1572_s3 = inlined_call_operand.vmem [shape: bf16[512,128], index: 3, kind: output, shape index: {}]  }
   0x1   :  { %v14_v0 = vld [vmem:[%s1569_s0] sm:$0xff]  ;;  %v15_v1 = vld [vmem:[%s1569_s0 + $0x8] sm:$0xff]  ;;  %v16_v6 = vld [vmem:[%s1569_s0 + $0x10] sm:$0xff] }
   0x2   :  { %v1088_v2 = vld [vmem:[%s1570_s1] ss:$0 sm:$0xff]  ;;  %v17_v7 = vld [vmem:[%s1569_s0 + $0x18] sm:$0xff]  ;;  %v19_v11 = vld [vmem:[%s1569_s0 + $0x28] sm:$0xff] }
   0x3   :  { %v85_v3 = vmul.f32 %v1088_v2, %v14_v0  ;;  %v86_v4 = vmul.f32 %v1088_v2, %v15_v1  ;;  %v1095_v5 = vld [vmem:[%s1571_s2] ss:$0 sm:$0xff]  ;;  %v87_v8 = vmul.f32 %v1088_v2, %v16_v6  ;;  %v88_v9 = vmul.f32 %v1088_v2, %v17_v7  ;;  %v20_v12 = vld [vmem:[%s1569_s0 + $0x30] sm:$0xff]  ;;  %v21_v17 = vld [vmem:[%s1569_s0 + $0x38] sm:$0xff] }
   0x4   :  { %v18_v10 = vld [vmem:[%s1569_s0 + $0x20] sm:$0xff]  ;;  %v90_v16 = vmul.f32 %v1088_v2, %v19_v11  ;;  %v91_v20 = vmul.f32 %v1088_v2, %v20_v12  ;;  %v92_v21 = vmul.f32 %v1088_v2, %v21_v17  ;;  %v23_v28 = vld [vmem:[%s1569_s0 + $0x48] sm:$0xff]  ;;  %v24_v32 = vld [vmem:[%s1569_s0 + $0x50] sm:$0xff] }
   0x5   :  { %v156_v13 = vadd.f32 %v1095_v5, %v85_v3  ;;  %v157_v14 = vadd.f32 %v1095_v5, %v86_v4  ;;  %v89_v15 = vmul.f32 %v1088_v2, %v18_v10  ;;  %v158_v18 = vadd.f32 %v1095_v5, %v87_v8  ;;  %v22_v27 = vld [vmem:[%s1569_s0 + $0x40] sm:$0xff]  ;;  %v25_v33 = vld [vmem:[%s1569_s0 + $0x58] sm:$0xff]  ;;  %v27_v45 = vld [vmem:[%s1569_s0 + $0x68] sm:$0xff] }
   0x6   :  { %v159_v19 = vadd.f32 %v1095_v5, %v88_v9  ;;  %v161_v23 = vadd.f32 %v1095_v5, %v90_v16  ;;  %v162_v36 = vadd.f32 %v1095_v5, %v91_v20  ;;  %v163_v38 = vadd.f32 %v1095_v5, %v92_v21  ;;  %v26_v41 = vld [vmem:[%s1569_s0 + $0x60] sm:$0xff]  ;;  %v28_v55 = vld [vmem:[%s1569_s0 + $0x70] sm:$0xff]  ;;  %v29_v56 = vld [vmem:[%s1569_s0 + $0x78] sm:$0xff] }
   0x7   :  { %vm220_vm0 = vcmp.ge.f32.partialorder %v156_v13, 0.0  ;;  %vm221_vm1 = vcmp.ge.f32.partialorder %v157_v14, 0.0  ;;  %v160_v22 = vadd.f32 %v1095_v5, %v89_v15  ;;  %vm222_vm2 = vcmp.ge.f32.partialorder %v158_v18, 0.0  ;;  %v30_v57 = vld [vmem:[%s1569_s0 + $0x80] sm:$0xff]  ;;  %v31_v60 = vld [vmem:[%s1569_s0 + $0x88] sm:$0xff]  ;;  %v32_v61 = vld [vmem:[%s1569_s0 + $0x90] sm:$0xff] }
   0x8   :  { %v738_v25 = vsel %vm220_vm0, 1.0, %v1058_v24  ;;  %v739_v26 = vsel %vm221_vm1, 1.0, %v1058_v24  ;;  %vm223_vm3 = vcmp.ge.f32.partialorder %v159_v19, 0.0  ;;  %v740_v30 = vsel %vm222_vm2, 1.0, %v1058_v24  ;;  %v33_v8 = vld [vmem:[%s1569_s0 + $0x98] sm:$0xff]  ;;  %v34_v21 = vld [vmem:[%s1569_s0 + $0xa0] sm:$0xff] }
   0x9   :  { %v931_v29 = vpack.c.bf16 %v739_v26, %v738_v25  ;;  %v741_v31 = vsel %vm223_vm3, 1.0, %v1058_v24  ;;  %vm224_vm4 = vcmp.ge.f32.partialorder %v160_v22, 0.0  ;;  %vm225_vm5 = vcmp.ge.f32.partialorder %v161_v23, 0.0  ;;  %v35_v22 = vld [vmem:[%s1569_s0 + $0xa8] sm:$0xff]  ;;  %v36_v26 = vld [vmem:[%s1569_s0 + $0xb0] sm:$0xff] }
   0xa   :  { %v934_v34 = vpack.c.bf16 %v741_v31, %v740_v30  ;;  %v742_v35 = vsel %vm224_vm4, 1.0, %v1058_v24  ;;  %v743_v37 = vsel %vm225_vm5, 1.0, %v1058_v24  ;;  %v93_v39 = vmul.f32 %v1088_v2, %v22_v27  ;;  %v37_v27 = vld [vmem:[%s1569_s0 + $0xb8] sm:$0xff] }
   0xb   :  { %932 = vst [vmem:[%s1572_s3] sm:$0xff] %v931_v29   ;;  %v94_v40 = vmul.f32 %v1088_v2, %v23_v28  ;;  %v937_v42 = vpack.c.bf16 %v743_v37, %v742_v35  ;;  %vm226_vm6 = vcmp.ge.f32.partialorder %v162_v36, 0.0  ;;  %v95_v43 = vmul.f32 %v1088_v2, %v24_v32  ;;  %v38_v32 = vld [vmem:[%s1569_s0 + $0xc0] sm:$0xff]  ;;  %v39_v36 = vld [vmem:[%s1569_s0 + $0xc8] sm:$0xff] }
   0xc   :  { %1026 = vst [vmem:[%s1572_s3 + $0x8] sm:$0xff] %v934_v34   ;;  %v96_v44 = vmul.f32 %v1088_v2, %v25_v33  ;;  %vm227_vm7 = vcmp.ge.f32.partialorder %v163_v38, 0.0  ;;  %v744_v46 = vsel %vm226_vm6, 1.0, %v1058_v24  ;;  %v164_v47 = vadd.f32 %v1095_v5, %v93_v39 }
   0xd   :  { %v165_v48 = vadd.f32 %v1095_v5, %v94_v40  ;;  %1027 = vst [vmem:[%s1572_s3 + $0x10] sm:$0xff] %v937_v42   ;;  %v745_v49 = vsel %vm227_vm7, 1.0, %v1058_v24  ;;  %v166_v50 = vadd.f32 %v1095_v5, %v95_v43  ;;  %v97_v52 = vmul.f32 %v1088_v2, %v26_v41  ;;  %v40_v40 = vld [vmem:[%s1569_s0 + $0xd0] sm:$0xff] }
   0xe   :  { %v167_v51 = vadd.f32 %v1095_v5, %v96_v44  ;;  %v940_v53 = vpack.c.bf16 %v745_v49, %v744_v46  ;;  %vm228_vm8 = vcmp.ge.f32.partialorder %v164_v47, 0.0  ;;  %v98_v54 = vmul.f32 %v1088_v2, %v27_v45 }
   0xf   :  { %vm229_vm9 = vcmp.ge.f32.partialorder %v165_v48, 0.0  ;;  %v746_v58 = vsel %vm228_vm8, 1.0, %v1058_v24  ;;  %vm230_vm10 = vcmp.ge.f32.partialorder %v166_v50, 0.0  ;;  %v168_v1 = vadd.f32 %v1095_v5, %v97_v52  ;;  %v41_v50 = vld [vmem:[%s1569_s0 + $0xd8] sm:$0xff] }
  0x10   :  { %v747_v59 = vsel %vm229_vm9, 1.0, %v1058_v24  ;;  %vm231_vm11 = vcmp.ge.f32.partialorder %v167_v51, 0.0  ;;  %1028 = vst [vmem:[%s1572_s3 + $0x18] sm:$0xff] %v940_v53   ;;  %v748_v63 = vsel %vm230_vm10, 1.0, %v1058_v24  ;;  %v169_v4 = vadd.f32 %v1095_v5, %v98_v54  ;;  %v42_v54 = vld [vmem:[%s1569_s0 + $0xe0] sm:$0xff] }
  0x11   :  { %v943_v62 = vpack.c.bf16 %v747_v59, %v746_v58  ;;  %v749_v0 = vsel %vm231_vm11, 1.0, %v1058_v24  ;;  %v99_v6 = vmul.f32 %v1088_v2, %v28_v55  ;;  %v100_v7 = vmul.f32 %v1088_v2, %v29_v56  ;;  %v43_v55 = vld [vmem:[%s1569_s0 + $0xe8] sm:$0xff] }
  0x12   :  { %v946_v3 = vpack.c.bf16 %v749_v0, %v748_v63  ;;  %vm232_vm12 = vcmp.ge.f32.partialorder %v168_v1, 0.0  ;;  %v101_v9 = vmul.f32 %v1088_v2, %v30_v57  ;;  %v102_v10 = vmul.f32 %v1088_v2, %v31_v60  ;;  %v44_v60 = vld [vmem:[%s1569_s0 + $0xf0] sm:$0xff] }
  0x13   :  { %1029 = vst [vmem:[%s1572_s3 + $0x20] sm:$0xff] %v943_v62   ;;  %v103_v11 = vmul.f32 %v1088_v2, %v32_v61  ;;  %vm233_vm13 = vcmp.ge.f32.partialorder %v169_v4, 0.0  ;;  %v750_v12 = vsel %vm232_vm12, 1.0, %v1058_v24  ;;  %v170_v13 = vadd.f32 %v1095_v5, %v99_v6  ;;  %v45_v4 = vld [vmem:[%s1569_s0 + $0xf8] sm:$0xff]  ;;  %v46_v6 = vld [vmem:[%s1569_s0 + $0x100] sm:$0xff] }
  0x14   :  { %1030 = vst [vmem:[%s1572_s3 + $0x28] sm:$0xff] %v946_v3   ;;  %v171_v14 = vadd.f32 %v1095_v5, %v100_v7  ;;  %v751_v15 = vsel %vm233_vm13, 1.0, %v1058_v24  ;;  %v172_v16 = vadd.f32 %v1095_v5, %v101_v9  ;;  %v173_v17 = vadd.f32 %v1095_v5, %v102_v10  ;;  %v47_v10 = vld [vmem:[%s1569_s0 + $0x108] sm:$0xff] }
  0x15   :  { %v104_v18 = vmul.f32 %v1088_v2, %v33_v8  ;;  %v949_v19 = vpack.c.bf16 %v751_v15, %v750_v12  ;;  %vm234_vm14 = vcmp.ge.f32.partialorder %v170_v13, 0.0  ;;  %v174_v20 = vadd.f32 %v1095_v5, %v103_v11 }
  0x16   :  { %vm235_vm15 = vcmp.ge.f32.partialorder %v171_v14, 0.0  ;;  %v752_v23 = vsel %vm234_vm14, 1.0, %v1058_v24  ;;  %vm236_vm0 = vcmp.ge.f32.partialorder %v172_v16, 0.0  ;;  %vm237_vm1 = vcmp.ge.f32.partialorder %v173_v17, 0.0 }
  0x17   :  { %v753_v25 = vsel %vm235_vm15, 1.0, %v1058_v24  ;;  %1031 = vst [vmem:[%s1572_s3 + $0x30] sm:$0xff] %v949_v19   ;;  %v754_v29 = vsel %vm236_vm0, 1.0, %v1058_v24  ;;  %v755_v30 = vsel %vm237_vm1, 1.0, %v1058_v24  ;;  %v175_v31 = vadd.f32 %v1095_v5, %v104_v18 }
  0x18   :  { %v952_v28 = vpack.c.bf16 %v753_v25, %v752_v23  ;;  %v955_v33 = vpack.c.bf16 %v755_v30, %v754_v29  ;;  %vm238_vm2 = vcmp.ge.f32.partialorder %v174_v20, 0.0  ;;  %v105_v34 = vmul.f32 %v1088_v2, %v34_v21  ;;  %v48_v20 = vld [vmem:[%s1569_s0 + $0x110] sm:$0xff]  ;;  %v49_v21 = vld [vmem:[%s1569_s0 + $0x118] sm:$0xff] }
  0x19   :  { %v106_v35 = vmul.f32 %v1088_v2, %v35_v22  ;;  %vm239_vm3 = vcmp.ge.f32.partialorder %v175_v31, 0.0  ;;  %v756_v37 = vsel %vm238_vm2, 1.0, %v1058_v24  ;;  %v107_v38 = vmul.f32 %v1088_v2, %v36_v26 }
  0x1a   :  { %1032 = vst [vmem:[%s1572_s3 + $0x38] sm:$0xff] %v952_v28   ;;  %v108_v39 = vmul.f32 %v1088_v2, %v37_v27  ;;  %1033 = vst [vmem:[%s1572_s3 + $0x40] sm:$0xff] %v955_v33   ;;  %v757_v41 = vsel %vm239_vm3, 1.0, %v1058_v24  ;;  %v176_v42 = vadd.f32 %v1095_v5, %v105_v34  ;;  %v109_v44 = vmul.f32 %v1088_v2, %v38_v32  ;;  %v50_v27 = vld [vmem:[%s1569_s0 + $0x120] sm:$0xff]  ;;  %v51_v34 = vld [vmem:[%s1569_s0 + $0x128] sm:$0xff] }
  0x1b   :  { %v177_v43 = vadd.f32 %v1095_v5, %v106_v35  ;;  %v958_v45 = vpack.c.bf16 %v757_v41, %v756_v37  ;;  %v178_v46 = vadd.f32 %v1095_v5, %v107_v38  ;;  %v110_v48 = vmul.f32 %v1088_v2, %v39_v36  ;;  %v52_v37 = vld [vmem:[%s1569_s0 + $0x130] sm:$0xff]  ;;  %v53_v38 = vld [vmem:[%s1569_s0 + $0x138] sm:$0xff] }
  0x1c   :  { %v179_v47 = vadd.f32 %v1095_v5, %v108_v39  ;;  %vm240_vm4 = vcmp.ge.f32.partialorder %v176_v42, 0.0  ;;  %v180_v49 = vadd.f32 %v1095_v5, %v109_v44  ;;  %v111_v51 = vmul.f32 %v1088_v2, %v40_v40  ;;  %v54_v39 = vld [vmem:[%s1569_s0 + $0x140] sm:$0xff] }
  0x1d   :  { %vm241_vm5 = vcmp.ge.f32.partialorder %v177_v43, 0.0  ;;  %1034 = vst [vmem:[%s1572_s3 + $0x48] sm:$0xff] %v958_v45   ;;  %v758_v52 = vsel %vm240_vm4, 1.0, %v1058_v24  ;;  %vm242_vm6 = vcmp.ge.f32.partialorder %v178_v46, 0.0  ;;  %v181_v59 = vadd.f32 %v1095_v5, %v110_v48 }
  0x1e   :  { %v759_v53 = vsel %vm241_vm5, 1.0, %v1058_v24  ;;  %vm243_vm7 = vcmp.ge.f32.partialorder %v179_v47, 0.0  ;;  %v760_v57 = vsel %vm242_vm6, 1.0, %v1058_v24  ;;  %vm244_vm8 = vcmp.ge.f32.partialorder %v180_v49, 0.0 }
  0x1f   :  { %v961_v56 = vpack.c.bf16 %v759_v53, %v758_v52  ;;  %v761_v58 = vsel %vm243_vm7, 1.0, %v1058_v24  ;;  %v112_v62 = vmul.f32 %v1088_v2, %v41_v50  ;;  %v182_v63 = vadd.f32 %v1095_v5, %v111_v51  ;;  %v55_v50 = vld [vmem:[%s1569_s0 + $0x148] sm:$0xff] }
  0x20   :  { %v964_v61 = vpack.c.bf16 %v761_v58, %v760_v57  ;;  %vm245_vm9 = vcmp.ge.f32.partialorder %v181_v59, 0.0  ;;  %v762_v0 = vsel %vm244_vm8, 1.0, %v1058_v24  ;;  %v113_v1 = vmul.f32 %v1088_v2, %v42_v54  ;;  %v56_v54 = vld [vmem:[%s1569_s0 + $0x150] sm:$0xff] }
  0x21   :  { %1035 = vst [vmem:[%s1572_s3 + $0x50] sm:$0xff] %v961_v56   ;;  %v114_v3 = vmul.f32 %v1088_v2, %v43_v55  ;;  %v763_v7 = vsel %vm245_vm9, 1.0, %v1058_v24  ;;  %v183_v8 = vadd.f32 %v1095_v5, %v112_v62  ;;  %vm246_vm10 = vcmp.ge.f32.partialorder %v182_v63, 0.0  ;;  %v57_v62 = vld [vmem:[%s1569_s0 + $0x158] sm:$0xff] }
  0x22   :  { %1036 = vst [vmem:[%s1572_s3 + $0x58] sm:$0xff] %v964_v61   ;;  %v115_v9 = vmul.f32 %v1088_v2, %v44_v60  ;;  %v967_v11 = vpack.c.bf16 %v763_v7, %v762_v0  ;;  %v764_v12 = vsel %vm246_vm10, 1.0, %v1058_v24  ;;  %v184_v13 = vadd.f32 %v1095_v5, %v113_v1  ;;  %v58_v1 = vld [vmem:[%s1569_s0 + $0x160] sm:$0xff] }
  0x23   :  { %v185_v14 = vadd.f32 %v1095_v5, %v114_v3  ;;  %vm247_vm11 = vcmp.ge.f32.partialorder %v183_v8, 0.0  ;;  %v116_v15 = vmul.f32 %v1088_v2, %v45_v4  ;;  %v117_v17 = vmul.f32 %v1088_v2, %v46_v6  ;;  %v59_v3 = vld [vmem:[%s1569_s0 + $0x168] sm:$0xff] }
  0x24   :  { %v186_v16 = vadd.f32 %v1095_v5, %v115_v9  ;;  %1037 = vst [vmem:[%s1572_s3 + $0x60] sm:$0xff] %v967_v11   ;;  %v765_v18 = vsel %vm247_vm11, 1.0, %v1058_v24  ;;  %vm248_vm12 = vcmp.ge.f32.partialorder %v184_v13, 0.0  ;;  %v118_v19 = vmul.f32 %v1088_v2, %v47_v10  ;;  %v60_v9 = vld [vmem:[%s1569_s0 + $0x170] sm:$0xff] }
  0x25   :  { %vm249_vm13 = vcmp.ge.f32.partialorder %v185_v14, 0.0  ;;  %v970_v22 = vpack.c.bf16 %v765_v18, %v764_v12  ;;  %v766_v23 = vsel %vm248_vm12, 1.0, %v1058_v24  ;;  %v187_v26 = vadd.f32 %v1095_v5, %v116_v15 }
  0x26   :  { %v767_v25 = vsel %vm249_vm13, 1.0, %v1058_v24  ;;  %vm250_vm14 = vcmp.ge.f32.partialorder %v186_v16, 0.0  ;;  %v188_v29 = vadd.f32 %v1095_v5, %v117_v17  ;;  %v189_v30 = vadd.f32 %v1095_v5, %v118_v19  ;;  %v61_v16 = vld [vmem:[%s1569_s0 + $0x178] sm:$0xff]  ;;  %v62_v17 = vld [vmem:[%s1569_s0 + $0x180] sm:$0xff] }
  0x27   :  { %v973_v28 = vpack.c.bf16 %v767_v25, %v766_v23  ;;  %1038 = vst [vmem:[%s1572_s3 + $0x68] sm:$0xff] %v970_v22   ;;  %vm251_vm15 = vcmp.ge.f32.partialorder %v187_v26, 0.0  ;;  %v768_v31 = vsel %vm250_vm14, 1.0, %v1058_v24  ;;  %v119_v32 = vmul.f32 %v1088_v2, %v48_v20 }
  0x28   :  { %v120_v33 = vmul.f32 %v1088_v2, %v49_v21  ;;  %v769_v35 = vsel %vm251_vm15, 1.0, %v1058_v24  ;;  %vm252_vm0 = vcmp.ge.f32.partialorder %v188_v29, 0.0  ;;  %vm253_vm1 = vcmp.ge.f32.partialorder %v189_v30, 0.0  ;;  %v63_v21 = vld [vmem:[%s1569_s0 + $0x188] sm:$0xff] }
  0x29   :  { %1039 = vst [vmem:[%s1572_s3 + $0x70] sm:$0xff] %v973_v28   ;;  %v121_v36 = vmul.f32 %v1088_v2, %v50_v27  ;;  %v976_v40 = vpack.c.bf16 %v769_v35, %v768_v31  ;;  %v770_v41 = vsel %vm252_vm0, 1.0, %v1058_v24  ;;  %v771_v42 = vsel %vm253_vm1, 1.0, %v1058_v24 }
  0x2a   :  { %v190_v43 = vadd.f32 %v1095_v5, %v119_v32  ;;  %v979_v44 = vpack.c.bf16 %v771_v42, %v770_v41  ;;  %v191_v45 = vadd.f32 %v1095_v5, %v120_v33  ;;  %v122_v46 = vmul.f32 %v1088_v2, %v51_v34  ;;  %v64_v32 = vld [vmem:[%s1569_s0 + $0x190] sm:$0xff]  ;;  %v65_v33 = vld [vmem:[%s1569_s0 + $0x198] sm:$0xff] }
  0x2b   :  { %v192_v47 = vadd.f32 %v1095_v5, %v121_v36  ;;  %1040 = vst [vmem:[%s1572_s3 + $0x78] sm:$0xff] %v976_v40   ;;  %v123_v48 = vmul.f32 %v1088_v2, %v52_v37  ;;  %v124_v49 = vmul.f32 %v1088_v2, %v53_v38  ;;  %v125_v51 = vmul.f32 %v1088_v2, %v54_v39  ;;  %v66_v38 = vld [vmem:[%s1569_s0 + $0x1a0] sm:$0xff] }
  0x2c   :  { %vm254_vm2 = vcmp.ge.f32.partialorder %v190_v43, 0.0  ;;  %1041 = vst [vmem:[%s1572_s3 + $0x80] sm:$0xff] %v979_v44   ;;  %vm255_vm3 = vcmp.ge.f32.partialorder %v191_v45, 0.0  ;;  %v193_v53 = vadd.f32 %v1095_v5, %v122_v46  ;;  %v126_v60 = vmul.f32 %v1088_v2, %v55_v50  ;;  %v67_v45 = vld [vmem:[%s1569_s0 + $0x1a8] sm:$0xff]  ;;  %v70_v50 = vld [vmem:[%s1569_s0 + $0x1c0] sm:$0xff] }
  0x2d   :  { %v772_v52 = vsel %vm254_vm2, 1.0, %v1058_v24  ;;  %vm256_vm4 = vcmp.ge.f32.partialorder %v192_v47, 0.0  ;;  %v773_v55 = vsel %vm255_vm3, 1.0, %v1058_v24  ;;  %v194_v57 = vadd.f32 %v1095_v5, %v123_v48  ;;  %v68_v48 = vld [vmem:[%s1569_s0 + $0x1b0] sm:$0xff] }
  0x2e   :  { %v774_v56 = vsel %vm256_vm4, 1.0, %v1058_v24  ;;  %v195_v58 = vadd.f32 %v1095_v5, %v124_v49  ;;  %v982_v59 = vpack.c.bf16 %v773_v55, %v772_v52  ;;  %vm257_vm5 = vcmp.ge.f32.partialorder %v193_v53, 0.0  ;;  %v69_v49 = vld [vmem:[%s1569_s0 + $0x1b8] sm:$0xff] }
  0x2f   :  { %v196_v61 = vadd.f32 %v1095_v5, %v125_v51  ;;  %v775_v63 = vsel %vm257_vm5, 1.0, %v1058_v24  ;;  %vm258_vm6 = vcmp.ge.f32.partialorder %v194_v57, 0.0  ;;  %v127_v0 = vmul.f32 %v1088_v2, %v56_v54 }
  0x30   :  { %vm259_vm7 = vcmp.ge.f32.partialorder %v195_v58, 0.0  ;;  %1042 = vst [vmem:[%s1572_s3 + $0x88] sm:$0xff] %v982_v59   ;;  %v985_v4 = vpack.c.bf16 %v775_v63, %v774_v56  ;;  %v776_v6 = vsel %vm258_vm6, 1.0, %v1058_v24  ;;  %v197_v8 = vadd.f32 %v1095_v5, %v126_v60 }
  0x31   :  { %v777_v7 = vsel %vm259_vm7, 1.0, %v1058_v24  ;;  %vm260_vm8 = vcmp.ge.f32.partialorder %v196_v61, 0.0  ;;  %v128_v11 = vmul.f32 %v1088_v2, %v57_v62  ;;  %v198_v12 = vadd.f32 %v1095_v5, %v127_v0  ;;  %v71_v61 = vld [vmem:[%s1569_s0 + $0x1c8] sm:$0xff] }
  0x32   :  { %v988_v10 = vpack.c.bf16 %v777_v7, %v776_v6  ;;  %1043 = vst [vmem:[%s1572_s3 + $0x90] sm:$0xff] %v985_v4   ;;  %vm261_vm9 = vcmp.ge.f32.partialorder %v197_v8, 0.0  ;;  %v778_v13 = vsel %vm260_vm8, 1.0, %v1058_v24  ;;  %v129_v14 = vmul.f32 %v1088_v2, %v58_v1  ;;  %v72_v1 = vld [vmem:[%s1569_s0 + $0x1d0] sm:$0xff] }
  0x33   :  { %v130_v15 = vmul.f32 %v1088_v2, %v59_v3  ;;  %v779_v18 = vsel %vm261_vm9, 1.0, %v1058_v24  ;;  %v199_v19 = vadd.f32 %v1095_v5, %v128_v11  ;;  %vm262_vm10 = vcmp.ge.f32.partialorder %v198_v12, 0.0  ;;  %v73_v11 = vld [vmem:[%s1569_s0 + $0x1d8] sm:$0xff] }
  0x34   :  { %1044 = vst [vmem:[%s1572_s3 + $0x98] sm:$0xff] %v988_v10   ;;  %v131_v20 = vmul.f32 %v1088_v2, %v60_v9  ;;  %v991_v22 = vpack.c.bf16 %v779_v18, %v778_v13  ;;  %v780_v23 = vsel %vm262_vm10, 1.0, %v1058_v24  ;;  %v200_v25 = vadd.f32 %v1095_v5, %v129_v14  ;;  %v74_v14 = vld [vmem:[%s1569_s0 + $0x1e0] sm:$0xff] }
  0x35   :  { %v201_v26 = vadd.f32 %v1095_v5, %v130_v15  ;;  %vm263_vm11 = vcmp.ge.f32.partialorder %v199_v19, 0.0  ;;  %v132_v27 = vmul.f32 %v1088_v2, %v61_v16  ;;  %v133_v29 = vmul.f32 %v1088_v2, %v62_v17  ;;  %v75_v15 = vld [vmem:[%s1569_s0 + $0x1e8] sm:$0xff] }
  0x36   :  { %v202_v28 = vadd.f32 %v1095_v5, %v131_v20  ;;  %1045 = vst [vmem:[%s1572_s3 + $0xa0] sm:$0xff] %v991_v22   ;;  %v781_v30 = vsel %vm263_vm11, 1.0, %v1058_v24  ;;  %vm264_vm12 = vcmp.ge.f32.partialorder %v200_v25, 0.0  ;;  %v134_v31 = vmul.f32 %v1088_v2, %v63_v21  ;;  %v76_v20 = vld [vmem:[%s1569_s0 + $0x1f0] sm:$0xff] }
  0x37   :  { %vm265_vm13 = vcmp.ge.f32.partialorder %v201_v26, 0.0  ;;  %v994_v34 = vpack.c.bf16 %v781_v30, %v780_v23  ;;  %v782_v35 = vsel %vm264_vm12, 1.0, %v1058_v24  ;;  %v203_v37 = vadd.f32 %v1095_v5, %v132_v27 }
  0x38   :  { %v783_v36 = vsel %vm265_vm13, 1.0, %v1058_v24  ;;  %vm266_vm14 = vcmp.ge.f32.partialorder %v202_v28, 0.0  ;;  %v204_v40 = vadd.f32 %v1095_v5, %v133_v29  ;;  %v205_v41 = vadd.f32 %v1095_v5, %v134_v31  ;;  %v77_v28 = vld [vmem:[%s1569_s0 + $0x1f8] sm:$0xff] }
  0x39   :  { %v997_v39 = vpack.c.bf16 %v783_v36, %v782_v35  ;;  %1046 = vst [vmem:[%s1572_s3 + $0xa8] sm:$0xff] %v994_v34   ;;  %vm267_vm15 = vcmp.ge.f32.partialorder %v203_v37, 0.0  ;;  %v784_v42 = vsel %vm266_vm14, 1.0, %v1058_v24  ;;  %v135_v43 = vmul.f32 %v1088_v2, %v64_v32 }
  0x3a   :  { %v136_v44 = vmul.f32 %v1088_v2, %v65_v33  ;;  %v785_v46 = vsel %vm267_vm15, 1.0, %v1058_v24  ;;  %vm268_vm0 = vcmp.ge.f32.partialorder %v204_v40, 0.0  ;;  %vm269_vm1 = vcmp.ge.f32.partialorder %v205_v41, 0.0 }
  0x3b   :  { %1047 = vst [vmem:[%s1572_s3 + $0xb0] sm:$0xff] %v997_v39   ;;  %v137_v47 = vmul.f32 %v1088_v2, %v66_v38  ;;  %v1000_v51 = vpack.c.bf16 %v785_v46, %v784_v42  ;;  %v786_v52 = vsel %vm268_vm0, 1.0, %v1058_v24  ;;  %v787_v53 = vsel %vm269_vm1, 1.0, %v1058_v24 }
  0x3c   :  { %v206_v54 = vadd.f32 %v1095_v5, %v135_v43  ;;  %v1003_v55 = vpack.c.bf16 %v787_v53, %v786_v52  ;;  %v207_v56 = vadd.f32 %v1095_v5, %v136_v44  ;;  %v138_v57 = vmul.f32 %v1088_v2, %v67_v45 }
  0x3d   :  { %v208_v58 = vadd.f32 %v1095_v5, %v137_v47  ;;  %1048 = vst [vmem:[%s1572_s3 + $0xb8] sm:$0xff] %v1000_v51   ;;  %v139_v59 = vmul.f32 %v1088_v2, %v68_v48  ;;  %v140_v60 = vmul.f32 %v1088_v2, %v69_v49  ;;  %v141_v62 = vmul.f32 %v1088_v2, %v70_v50 }
  0x3e   :  { %vm270_vm2 = vcmp.ge.f32.partialorder %v206_v54, 0.0  ;;  %1049 = vst [vmem:[%s1572_s3 + $0xc0] sm:$0xff] %v1003_v55   ;;  %vm271_vm3 = vcmp.ge.f32.partialorder %v207_v56, 0.0  ;;  %v209_v0 = vadd.f32 %v1095_v5, %v138_v57  ;;  %v142_v9 = vmul.f32 %v1088_v2, %v71_v61 }
  0x3f   :  { %v788_v63 = vsel %vm270_vm2, 1.0, %v1058_v24  ;;  %vm272_vm4 = vcmp.ge.f32.partialorder %v208_v58, 0.0  ;;  %v789_v3 = vsel %vm271_vm3, 1.0, %v1058_v24  ;;  %v210_v6 = vadd.f32 %v1095_v5, %v139_v59 }
  0x40   :  { %v790_v4 = vsel %vm272_vm4, 1.0, %v1058_v24  ;;  %v211_v7 = vadd.f32 %v1095_v5, %v140_v60  ;;  %v1006_v8 = vpack.c.bf16 %v789_v3, %v788_v63  ;;  %vm273_vm5 = vcmp.ge.f32.partialorder %v209_v0, 0.0 }
  0x41   :  { %v212_v10 = vadd.f32 %v1095_v5, %v141_v62  ;;  %v791_v12 = vsel %vm273_vm5, 1.0, %v1058_v24  ;;  %vm274_vm6 = vcmp.ge.f32.partialorder %v210_v6, 0.0  ;;  %v143_v13 = vmul.f32 %v1088_v2, %v72_v1 }
  0x42   :  { %vm275_vm7 = vcmp.ge.f32.partialorder %v211_v7, 0.0  ;;  %1050 = vst [vmem:[%s1572_s3 + $0xc8] sm:$0xff] %v1006_v8   ;;  %v1009_v16 = vpack.c.bf16 %v791_v12, %v790_v4  ;;  %v792_v17 = vsel %vm274_vm6, 1.0, %v1058_v24  ;;  %v213_v19 = vadd.f32 %v1095_v5, %v142_v9 }
  0x43   :  { %v793_v18 = vsel %vm275_vm7, 1.0, %v1058_v24  ;;  %vm276_vm8 = vcmp.ge.f32.partialorder %v212_v10, 0.0  ;;  %v144_v22 = vmul.f32 %v1088_v2, %v73_v11  ;;  %v214_v23 = vadd.f32 %v1095_v5, %v143_v13 }
  0x44   :  { %v1012_v21 = vpack.c.bf16 %v793_v18, %v792_v17  ;;  %1051 = vst [vmem:[%s1572_s3 + $0xd0] sm:$0xff] %v1009_v16   ;;  %vm277_vm9 = vcmp.ge.f32.partialorder %v213_v19, 0.0  ;;  %v794_v25 = vsel %vm276_vm8, 1.0, %v1058_v24  ;;  %v145_v26 = vmul.f32 %v1088_v2, %v74_v14 }
  0x45   :  { %v146_v27 = vmul.f32 %v1088_v2, %v75_v15  ;;  %v795_v29 = vsel %vm277_vm9, 1.0, %v1058_v24  ;;  %v215_v30 = vadd.f32 %v1095_v5, %v144_v22  ;;  %vm278_vm10 = vcmp.ge.f32.partialorder %v214_v23, 0.0 }
  0x46   :  { %1052 = vst [vmem:[%s1572_s3 + $0xd8] sm:$0xff] %v1012_v21   ;;  %v147_v31 = vmul.f32 %v1088_v2, %v76_v20  ;;  %v1015_v32 = vpack.c.bf16 %v795_v29, %v794_v25  ;;  %v796_v33 = vsel %vm278_vm10, 1.0, %v1058_v24  ;;  %v216_v34 = vadd.f32 %v1095_v5, %v145_v26 }
  0x47   :  { %v217_v35 = vadd.f32 %v1095_v5, %v146_v27  ;;  %vm279_vm11 = vcmp.ge.f32.partialorder %v215_v30, 0.0  ;;  %v148_v36 = vmul.f32 %v1088_v2, %v77_v28 }
  0x48   :  { %v218_v37 = vadd.f32 %v1095_v5, %v147_v31  ;;  %1053 = vst [vmem:[%s1572_s3 + $0xe0] sm:$0xff] %v1015_v32   ;;  %v797_v38 = vsel %vm279_vm11, 1.0, %v1058_v24  ;;  %vm280_vm12 = vcmp.ge.f32.partialorder %v216_v34, 0.0 }
  0x49   :  { %vm281_vm13 = vcmp.ge.f32.partialorder %v217_v35, 0.0  ;;  %v1018_v39 = vpack.c.bf16 %v797_v38, %v796_v33  ;;  %v798_v40 = vsel %vm280_vm12, 1.0, %v1058_v24  ;;  %v219_v42 = vadd.f32 %v1095_v5, %v148_v36 }
  0x4a   :  { %v799_v41 = vsel %vm281_vm13, 1.0, %v1058_v24  ;;  %vm282_vm14 = vcmp.ge.f32.partialorder %v218_v37, 0.0 }
  0x4b   :  { %v1021_v43 = vpack.c.bf16 %v799_v41, %v798_v40  ;;  %1054 = vst [vmem:[%s1572_s3 + $0xe8] sm:$0xff] %v1018_v39   ;;  %vm283_vm15 = vcmp.ge.f32.partialorder %v219_v42, 0.0  ;;  %v800_v2 = vsel %vm282_vm14, 1.0, %v1058_v24 }
  0x4c   :  { %v801_v44 = vsel %vm283_vm15, 1.0, %v1058_v24 }
  0x4d   :  { %1055 = vst [vmem:[%s1572_s3 + $0xf0] sm:$0xff] %v1021_v43   ;;  %v1024_v45 = vpack.c.bf16 %v801_v44, %v800_v2 }
  0x4f   :  { %1056 = vst [vmem:[%s1572_s3 + $0xf8] sm:$0xff] %v1024_v45  }

// kernel: ems_yolo_forward.12
= control target key start
LH: loop header
LB: loop body
LE: loop exit
PB: predicated region body
PF: predicated region fallthrough
CT: control target
= control target key end

     0   :  { %v3246_v0 = vmov 0   ;;  %vm1294_vm0 = vcmask 523264   ;;  %vm2524_vm1 = vcmask 1040384   ;;  %vm2526_vm2 = vcmask 1041408   ;;  %s4442_s1 = inlined_call_operand.vmem [shape: bf16[576,128], index: 1, kind: input, shape index: {}]   ;;  %s4443_s0 = inlined_call_operand.vmem [shape: bf16[512,576], index: 0, kind: input, shape index: {}]   ;;  %s4444_s2 = inlined_call_operand.vmem [shape: f32[512,128], index: 2, kind: output, shape index: {0}]   ;;  %s4445_s3 = inlined_call_operand.vmem [shape: f32[8,128], index: 3, kind: output, shape index: {1}]  }
   0x1   :  { %1391 = vmatprep.subr.bf16.mxu0 %v3246_v0  ;;  %2873 = vmatprep.subr.bf16.mxu1 %v3246_v0  ;;  %v2986_v1 = vld [vmem:[%s4442_s1] sm:$0xff]   ;;  %v2987_v2 = vld [vmem:[%s4442_s1 + $0x8] sm:$0xff]   ;;  %v2988_v3 = vld [vmem:[%s4442_s1 + $0x10] sm:$0xff]  }
   0x2   :  { %1392 = vmatpush1.bf16.msra.mxu0 %v2986_v1  ;;  %2889 = vmatpush1.bf16.msra.mxu1 %v2986_v1  ;;  %v2989_v4 = vld [vmem:[%s4442_s1 + $0x18] sm:$0xff]   ;;  %v2990_v5 = vld [vmem:[%s4442_s1 + $0x20] sm:$0xff]   ;;  %v2991_v7 = vld [vmem:[%s4442_s1 + $0x28] sm:$0xff]  }
   0x3   :  { %1393 = vmatprep.subr.bf16.mxu0 %v3246_v0  ;;  %2874 = vmatprep.subr.bf16.mxu1 %v3246_v0  ;;  %v3004_v6 = vld [vmem:[%s4443_s0 + $0x4] ss:$20 sps:$4 sm:$0xff]   ;;  %v2992_v9 = vld [vmem:[%s4442_s1 + $0x30] sm:$0xff]   ;;  %v2995_v12 = vld [vmem:[%s4442_s1 + $0x48] sm:$0xff]  }
   0x4   :  { %v3007_v8 = vld [vmem:[%s4443_s0 + $0x144] ss:$20 sps:$4 sm:$0xff]   ;;  %1423 = vmatprep.mubr.bf16.mxu0 %v3004_v6  ;;  %v2996_v13 = vld [vmem:[%s4442_s1 + $0x50] sm:$0xff]   ;;  %v2999_v16 = vld [vmem:[%s4442_s1 + $0x68] sm:$0xff]  }
   0x5   :  { %1487 = vmatprep.mubr.bf16.mxu1 %v3007_v8  ;;  %v2993_v10 = vld [vmem:[%s4442_s1 + $0x38] sm:$0xff]   ;;  %v2994_v11 = vld [vmem:[%s4442_s1 + $0x40] sm:$0xff]   ;;  %v3000_v17 = vld [vmem:[%s4442_s1 + $0x70] sm:$0xff]  }
   0x6   :  { %1394 = vmatpush1.bf16.msra.mxu0 %v2987_v2  ;;  %2890 = vmatpush1.bf16.msra.mxu1 %v2987_v2  ;;  %v2997_v14 = vld [vmem:[%s4442_s1 + $0x58] sm:$0xff]   ;;  %v2998_v15 = vld [vmem:[%s4442_s1 + $0x60] sm:$0xff]   ;;  %v3057_v25 = vld [vmem:[%s4442_s1 + $0x108] sm:$0xff]  }
   0x7   :  { %1395 = vmatprep.subr.bf16.mxu0 %v3246_v0  ;;  %2875 = vmatprep.subr.bf16.mxu1 %v3246_v0  ;;  %v3001_v18 = vld [vmem:[%s4442_s1 + $0x78] sm:$0xff]   ;;  %v3008_v19 = vld [vmem:[%s4442_s1 + $0x100] sm:$0xff]   ;;  %v3010_v26 = vld [vmem:[%s4442_s1 + $0x88] sm:$0xff]  }
   0x8   :  { %v3002_v20 = vld [vmem:[%s4443_s0] ss:$20 sps:$4 sm:$0xff]   ;;  %v3015_v27 = vld [vmem:[%s4443_s0 + $0x28] ss:$20 sps:$4 sm:$0xff]   ;;  %v3023_v34 = vld [vmem:[%s4443_s0 + $0x50] ss:$20 sps:$4 sm:$0xff]  }
   0x9   :  { %v3005_v21 = vld [vmem:[%s4443_s0 + $0x140] ss:$20 sps:$4 sm:$0xff]   ;;  %v3016_v28 = vld [vmem:[%s4443_s0 + $0x168] ss:$20 sps:$4 sm:$0xff]   ;;  %v3024_v35 = vld [vmem:[%s4443_s0 + $0x190] ss:$20 sps:$4 sm:$0xff]  }
   0xa   :  { %1396 = vmatpush1.bf16.msra.mxu0 %v2988_v3  ;;  %2891 = vmatpush1.bf16.msra.mxu1 %v2988_v3  ;;  %v3009_v22 = vld [vmem:[%s4442_s1 + $0x80] sm:$0xff]   ;;  %v3017_v29 = vld [vmem:[%s4442_s1 + $0x90] sm:$0xff]   ;;  %v3018_v33 = vld [vmem:[%s4442_s1 + $0x98] sm:$0xff]  }
   0xb   :  { %1397 = vmatprep.subr.bf16.mxu0 %v3246_v0  ;;  %2876 = vmatprep.subr.bf16.mxu1 %v3246_v0  ;;  %v3011_v23 = vld [vmem:[%s4443_s0 + $0x2c] ss:$20 sps:$4 sm:$0xff]   ;;  %v3098_v30 = vld [vmem:[%s4442_s1 + $0x110] sm:$0xff]   ;;  %v3035_v43 = vld [vmem:[%s4443_s0 + $0xa4] ss:$20 sps:$4 sm:$0xff]  }
   0xc   :  { %v3013_v24 = vld [vmem:[%s4443_s0 + $0x16c] ss:$20 sps:$4 sm:$0xff]   ;;  %v3019_v31 = vld [vmem:[%s4443_s0 + $0x54] ss:$20 sps:$4 sm:$0xff]   ;;  %v3027_v37 = vld [vmem:[%s4443_s0 + $0x7c] ss:$20 sps:$4 sm:$0xff]  }
   0xd   :  { %v3021_v32 = vld [vmem:[%s4443_s0 + $0x194] ss:$20 sps:$4 sm:$0xff]   ;;  %v3025_v36 = vld [vmem:[%s4442_s1 + $0xa0] sm:$0xff]   ;;  %v3029_v38 = vld [vmem:[%s4443_s0 + $0x1bc] ss:$20 sps:$4 sm:$0xff]  }
   0xe   :  { %1398 = vmatpush1.bf16.msra.mxu0 %v2989_v4  ;;  %2892 = vmatpush1.bf16.msra.mxu1 %v2989_v4  ;;  %v3026_v39 = vld [vmem:[%s4442_s1 + $0xa8] sm:$0xff]   ;;  %v3033_v42 = vld [vmem:[%s4442_s1 + $0xb0] sm:$0xff]   ;;  %v3135_v44 = vld [vmem:[%s4442_s1 + $0x118] sm:$0xff]  }
   0xf   :  { %1399 = vmatprep.subr.bf16.mxu0 %v3246_v0  ;;  %2877 = vmatprep.subr.bf16.mxu1 %v3246_v0  ;;  %v3031_v40 = vld [vmem:[%s4443_s0 + $0x78] ss:$20 sps:$4 sm:$0xff]   ;;  %v3039_v47 = vld [vmem:[%s4443_s0 + $0xa0] ss:$20 sps:$4 sm:$0xff]   ;;  %v3047_v53 = vld [vmem:[%s4443_s0 + $0xc8] ss:$20 sps:$4 sm:$0xff]  }
  0x10   :  { %v3032_v41 = vld [vmem:[%s4443_s0 + $0x1b8] ss:$20 sps:$4 sm:$0xff]   ;;  %v3040_v48 = vld [vmem:[%s4443_s0 + $0x1e0] ss:$20 sps:$4 sm:$0xff]   ;;  %v3048_v54 = vld [vmem:[%s4443_s0 + $0x208] ss:$20 sps:$4 sm:$0xff]  }
  0x11   :  { %v3037_v45 = vld [vmem:[%s4443_s0 + $0x1e4] ss:$20 sps:$4 sm:$0xff]   ;;  %v3043_v50 = vld [vmem:[%s4443_s0 + $0xcc] ss:$20 sps:$4 sm:$0xff]   ;;  %v3049_v55 = vld [vmem:[%s4442_s1 + $0xd0] sm:$0xff]  }
  0x12   :  { %1400 = vmatpush1.bf16.msra.mxu0 %v2990_v5  ;;  %2893 = vmatpush1.bf16.msra.mxu1 %v2990_v5  ;;  %v3034_v46 = vld [vmem:[%s4442_s1 + $0xb8] sm:$0xff]   ;;  %v3041_v49 = vld [vmem:[%s4442_s1 + $0xc0] sm:$0xff]   ;;  %v3042_v52 = vld [vmem:[%s4442_s1 + $0xc8] sm:$0xff]  }
  0x13   :  { %1401 = vmatprep.subr.bf16.mxu0 %v3246_v0  ;;  %2878 = vmatprep.subr.bf16.mxu1 %v3246_v0  ;;  %v3045_v51 = vld [vmem:[%s4443_s0 + $0x20c] ss:$20 sps:$4 sm:$0xff]   ;;  %v3051_v56 = vld [vmem:[%s4443_s0 + $0xf4] ss:$20 sps:$4 sm:$0xff]   ;;  %v3050_v58 = vld [vmem:[%s4442_s1 + $0xd8] sm:$0xff]  }
  0x14   :  { %v3053_v57 = vld [vmem:[%s4443_s0 + $0x234] ss:$20 sps:$4 sm:$0xff]   ;;  %v3055_v59 = vld [vmem:[%s4443_s0 + $0xf0] ss:$20 sps:$4 sm:$0xff]   ;;  %v3064_v2 = vld [vmem:[%s4443_s0 + $0x118] ss:$20 sps:$4 sm:$0xff]  }
  0x15   :  { %v3056_v60 = vld [vmem:[%s4443_s0 + $0x230] ss:$20 sps:$4 sm:$0xff]   ;;  %v3059_v1 = vld [vmem:[%s4442_s1 + $0xe8] sm:$0xff]  }
  0x16   :  { %1402 = vmatpush1.bf16.msra.mxu0 %v2991_v7  ;;  %2894 = vmatpush1.bf16.msra.mxu1 %v2991_v7  ;;  %v3058_v61 = vld [vmem:[%s4442_s1 + $0xe0] sm:$0xff]   ;;  %v3060_v62 = vld [vmem:[%s4443_s0 + $0x11c] ss:$20 sps:$4 sm:$0xff]   ;;  %v3065_v3 = vld [vmem:[%s4443_s0 + $0x258] ss:$20 sps:$4 sm:$0xff]  }
  0x17   :  { %1403 = vmatprep.subr.bf16.mxu0 %v3246_v0  ;;  %2879 = vmatprep.subr.bf16.mxu1 %v3246_v0  ;;  %v3062_v63 = vld [vmem:[%s4443_s0 + $0x25c] ss:$20 sps:$4 sm:$0xff]   ;;  %v3068_v5 = vld [vmem:[%s4443_s0 + $0x284] ss:$20 sps:$4 sm:$0xff]   ;;  %v3072_v6 = vld [vmem:[%s4443_s0 + $0xc] ss:$20 sps:$4 sm:$0xff]  }
  0x18   :  { %v3066_v4 = vld [vmem:[%s4442_s1 + $0xf0] sm:$0xff]   ;;  %v3067_v7 = vld [vmem:[%s4442_s1 + $0xf8] sm:$0xff]  }
  0x19   :  { %v3070_v8 = vld [vmem:[%s4443_s0 + $0x8] ss:$20 sps:$4 sm:$0xff]  }
  0x1a   :  { %1404 = vmatpush1.bf16.msra.mxu0 %v2992_v9  ;;  %2895 = vmatpush1.bf16.msra.mxu1 %v2992_v9  ;;  %v3073_v9 = vld [vmem:[%s4443_s0 + $0x280] ss:$20 sps:$4 sm:$0xff]  }
  0x1b   :  { %1405 = vmatprep.subr.bf16.mxu0 %v3246_v0  ;;  %2880 = vmatprep.subr.bf16.mxu1 %v3246_v0 }
  0x1e   :  { %1406 = vmatpush1.bf16.msra.mxu0 %v2993_v10  ;;  %2896 = vmatpush1.bf16.msra.mxu1 %v2993_v10  ;;  %v3074_v10 = vld [vmem:[%s4443_s0 + $0x2ac] ss:$20 sps:$4 sm:$0xff]  }
  0x1f   :  { %1407 = vmatprep.subr.bf16.mxu0 %v3246_v0  ;;  %2881 = vmatprep.subr.bf16.mxu1 %v3246_v0 }
  0x22   :  { %1408 = vmatpush1.bf16.msra.mxu0 %v2994_v11  ;;  %2897 = vmatpush1.bf16.msra.mxu1 %v2994_v11  ;;  %v3076_v11 = vld [vmem:[%s4443_s0 + $0x34] ss:$20 sps:$4 sm:$0xff]  }
  0x23   :  { %1409 = vmatprep.subr.bf16.mxu0 %v3246_v0  ;;  %2882 = vmatprep.subr.bf16.mxu1 %v3246_v0 }
  0x26   :  { %1410 = vmatpush1.bf16.msra.mxu0 %v2995_v12  ;;  %2898 = vmatpush1.bf16.msra.mxu1 %v2995_v12  ;;  %v3079_v12 = vld [vmem:[%s4443_s0 + $0x30] ss:$20 sps:$4 sm:$0xff]  }
  0x27   :  { %1411 = vmatprep.subr.bf16.mxu0 %v3246_v0  ;;  %2883 = vmatprep.subr.bf16.mxu1 %v3246_v0 }
  0x2a   :  { %1412 = vmatpush1.bf16.msra.mxu0 %v2996_v13  ;;  %2899 = vmatpush1.bf16.msra.mxu1 %v2996_v13  ;;  %v3080_v13 = vld [vmem:[%s4443_s0 + $0x2d4] ss:$20 sps:$4 sm:$0xff]  }
  0x2b   :  { %1413 = vmatprep.subr.bf16.mxu0 %v3246_v0  ;;  %2884 = vmatprep.subr.bf16.mxu1 %v3246_v0 }
  0x2e   :  { %1414 = vmatpush1.bf16.msra.mxu0 %v2997_v14  ;;  %2900 = vmatpush1.bf16.msra.mxu1 %v2997_v14  ;;  %v3082_v14 = vld [vmem:[%s4443_s0 + $0x5c] ss:$20 sps:$4 sm:$0xff]  }
  0x2f   :  { %1415 = vmatprep.subr.bf16.mxu0 %v3246_v0  ;;  %2885 = vmatprep.subr.bf16.mxu1 %v3246_v0 }
  0x32   :  { %1416 = vmatpush1.bf16.msra.mxu0 %v2998_v15  ;;  %2901 = vmatpush1.bf16.msra.mxu1 %v2998_v15  ;;  %v3084_v15 = vld [vmem:[%s4443_s0 + $0x2d0] ss:$20 sps:$4 sm:$0xff]  }
  0x33   :  { %1417 = vmatprep.subr.bf16.mxu0 %v3246_v0  ;;  %2886 = vmatprep.subr.bf16.mxu1 %v3246_v0 }
  0x36   :  { %1418 = vmatpush1.bf16.msra.mxu0 %v2999_v16  ;;  %2902 = vmatpush1.bf16.msra.mxu1 %v2999_v16  ;;  %v3085_v16 = vld [vmem:[%s4443_s0 + $0x58] ss:$20 sps:$4 sm:$0xff]  }
  0x37   :  { %1419 = vmatprep.subr.bf16.mxu0 %v3246_v0  ;;  %2887 = vmatprep.subr.bf16.mxu1 %v3246_v0 }
  0x3a   :  { %1420 = vmatpush1.bf16.msra.mxu0 %v3000_v17  ;;  %2903 = vmatpush1.bf16.msra.mxu1 %v3000_v17  ;;  %v3086_v17 = vld [vmem:[%s4443_s0 + $0x2fc] ss:$20 sps:$4 sm:$0xff]  }
  0x3b   :  { %1421 = vmatprep.subr.bf16.mxu0 %v3246_v0  ;;  %2888 = vmatprep.subr.bf16.mxu1 %v3246_v0 }
  0x3e   :  { %1422 = vmatpush1.bf16.msra.mxu0 %v3001_v18  ;;  %2904 = vmatpush1.bf16.msra.mxu1 %v3001_v18  ;;  %v3088_v18 = vld [vmem:[%s4443_s0 + $0x84] ss:$20 sps:$4 sm:$0xff]  }
  0x3f   :  { %1680 = vmatprep.subr.bf16.mxu0 %v3246_v0  ;;  %2801 = vmatprep.subr.bf16.mxu1 %v3008_v19 }
  0x41   :  { %1424 = vmatmul.mubr.bf16.vlgmr.msra.gmra.mrb[0].mxu0 %v3002_v20  ;;  %1488 = vmatmul.mubr.bf16.vlgmr.msra.gmra.mrb[0].mxu1 %v3005_v21  ;;  %v3091_v20 = vld [vmem:[%s4443_s0 + $0x80] ss:$20 sps:$4 sm:$0xff]   ;;  %v3092_v21 = vld [vmem:[%s4443_s0 + $0x324] ss:$20 sps:$4 sm:$0xff]  }
  0x42   :  { %1681 = vmatpush1.bf16.msra.mxu0 %v3009_v22  ;;  %2802 = vmatpush3.bf16.msra.mxu1 %v3008_v19  ;;  %v3090_v19 = vld [vmem:[%s4443_s0 + $0x2f8] ss:$20 sps:$4 sm:$0xff]  }
  0x43   :  { %1682 = vmatprep.subr.bf16.mxu0 %v3246_v0  ;;  %1431 = vmatprep.mubr.bf16.mxu0 %v3011_v23  ;;  %v3094_v22 = vld [vmem:[%s4443_s0 + $0xac] ss:$20 sps:$4 sm:$0xff]  }
  0x44   :  { %1495 = vmatprep.mubr.bf16.mxu1 %v3013_v24  ;;  %2803 = vmatprep.subr.bf16.mxu1 %v3057_v25  ;;  %v3096_v23 = vld [vmem:[%s4443_s0 + $0x320] ss:$20 sps:$4 sm:$0xff]   ;;  %v3097_v24 = vld [vmem:[%s4443_s0 + $0xa8] ss:$20 sps:$4 sm:$0xff]  }
  0x46   :  { %1683 = vmatpush1.bf16.msra.mxu0 %v3010_v26  ;;  %2804 = vmatpush3.bf16.msra.mxu1 %v3057_v25  ;;  %v3099_v25 = vld [vmem:[%s4443_s0 + $0x34c] ss:$20 sps:$4 sm:$0xff]   ;;  %v3101_v26 = vld [vmem:[%s4443_s0 + $0xd4] ss:$20 sps:$4 sm:$0xff]  }
  0x47   :  { %1684 = vmatprep.subr.bf16.mxu0 %v3246_v0  ;;  %2805 = vmatprep.subr.bf16.mxu1 %v3098_v30 }
  0x49   :  { %1432 = vmatmul.mubr.bf16.gmra.mrb[4].mxu0 %v3015_v27  ;;  %1496 = vmatmul.mubr.bf16.gmra.mrb[4].mxu1 %v3016_v28  ;;  %v3103_v27 = vld [vmem:[%s4443_s0 + $0x348] ss:$20 sps:$4 sm:$0xff]   ;;  %v3104_v28 = vld [vmem:[%s4443_s0 + $0xd0] ss:$20 sps:$4 sm:$0xff]  }
  0x4a   :  { %1685 = vmatpush1.bf16.msra.mxu0 %v3017_v29  ;;  %1439 = vmatprep.mubr.bf16.mxu0 %v3019_v31  ;;  %v3105_v29 = vld [vmem:[%s4443_s0 + $0x374] ss:$20 sps:$4 sm:$0xff]   ;;  %v3109_v31 = vld [vmem:[%s4443_s0 + $0x370] ss:$20 sps:$4 sm:$0xff]  }
  0x4b   :  { %1686 = vmatprep.subr.bf16.mxu0 %v3246_v0  ;;  %1503 = vmatprep.mubr.bf16.mxu1 %v3021_v32  ;;  %v3110_v32 = vld [vmem:[%s4443_s0 + $0xf8] ss:$20 sps:$4 sm:$0xff]  }
  0x4c   :  { %2806 = vmatpush3.bf16.msra.mxu1 %v3098_v30  ;;  %v3107_v30 = vld [vmem:[%s4443_s0 + $0xfc] ss:$20 sps:$4 sm:$0xff]  }
  0x4d   :  { %2807 = vmatprep.subr.bf16.mxu1 %v3135_v44 }
  0x4e   :  { %1687 = vmatpush1.bf16.msra.mxu0 %v3018_v33  ;;  %v3111_v33 = vld [vmem:[%s4443_s0 + $0x39c] ss:$20 sps:$4 sm:$0xff]  }
  0x4f   :  { %1688 = vmatprep.subr.bf16.mxu0 %v3246_v0 }
  0x50   :  { %2808 = vmatpush3.bf16.msra.mxu1 %v3135_v44  ;;  %v3128_v44 = vld [vmem:[%s4443_s0 + $0x170] ss:$20 sps:$4 sm:$0xff]  }
  0x51   :  { %1440 = vmatmul.mubr.bf16.gmra.mrb[8].mxu0 %v3023_v34  ;;  %1504 = vmatmul.mubr.bf16.gmra.mrb[8].mxu1 %v3024_v35  ;;  %v3113_v34 = vld [vmem:[%s4443_s0 + $0x124] ss:$20 sps:$4 sm:$0xff]  }
  0x52   :  { %1689 = vmatpush1.bf16.msra.mxu0 %v3025_v36  ;;  %1447 = vmatprep.mubr.bf16.mxu0 %v3027_v37  ;;  %v3115_v35 = vld [vmem:[%s4443_s0 + $0x398] ss:$20 sps:$4 sm:$0xff]   ;;  %v3116_v36 = vld [vmem:[%s4443_s0 + $0x120] ss:$20 sps:$4 sm:$0xff]  }
  0x53   :  { %1690 = vmatprep.subr.bf16.mxu0 %v3246_v0  ;;  %1511 = vmatprep.mubr.bf16.mxu1 %v3029_v38  ;;  %v3117_v37 = vld [vmem:[%s4443_s0 + $0x3c4] ss:$20 sps:$4 sm:$0xff]   ;;  %v3119_v38 = vld [vmem:[%s4443_s0 + $0x14c] ss:$20 sps:$4 sm:$0xff]  }
  0x56   :  { %1691 = vmatpush1.bf16.msra.mxu0 %v3026_v39  ;;  %v3121_v39 = vld [vmem:[%s4443_s0 + $0x3c0] ss:$20 sps:$4 sm:$0xff]  }
  0x57   :  { %1692 = vmatprep.subr.bf16.mxu0 %v3246_v0 }
  0x59   :  { %1448 = vmatmul.mubr.bf16.gmra.mrb[12].mxu0 %v3031_v40  ;;  %1512 = vmatmul.mubr.bf16.gmra.mrb[12].mxu1 %v3032_v41  ;;  %v3122_v40 = vld [vmem:[%s4443_s0 + $0x148] ss:$20 sps:$4 sm:$0xff]   ;;  %v3123_v41 = vld [vmem:[%s4443_s0 + $0x3ec] ss:$20 sps:$4 sm:$0xff]  }
  0x5a   :  { %1693 = vmatpush1.bf16.msra.mxu0 %v3033_v42  ;;  %1455 = vmatprep.mubr.bf16.mxu0 %v3035_v43  ;;  %v3125_v42 = vld [vmem:[%s4443_s0 + $0x174] ss:$20 sps:$4 sm:$0xff]  }
  0x5b   :  { %1694 = vmatprep.subr.bf16.mxu0 %v3246_v0  ;;  %1519 = vmatprep.mubr.bf16.mxu1 %v3037_v45  ;;  %v3127_v43 = vld [vmem:[%s4443_s0 + $0x3e8] ss:$20 sps:$4 sm:$0xff]  }
  0x5c   :  { %v3129_v45 = vld [vmem:[%s4443_s0 + $0x414] ss:$20 sps:$4 sm:$0xff]  }
  0x5e   :  { %1695 = vmatpush1.bf16.msra.mxu0 %v3034_v46  ;;  %v3131_v46 = vld [vmem:[%s4443_s0 + $0x19c] ss:$20 sps:$4 sm:$0xff]  }
  0x5f   :  { %1696 = vmatprep.subr.bf16.mxu0 %v3246_v0 }
  0x61   :  { %1456 = vmatmul.mubr.bf16.gmra.mrb[16].mxu0 %v3039_v47  ;;  %1520 = vmatmul.mubr.bf16.gmra.mrb[16].mxu1 %v3040_v48  ;;  %v3133_v47 = vld [vmem:[%s4443_s0 + $0x410] ss:$20 sps:$4 sm:$0xff]   ;;  %v3134_v48 = vld [vmem:[%s4443_s0 + $0x198] ss:$20 sps:$4 sm:$0xff]  }
  0x62   :  { %1697 = vmatpush1.bf16.msra.mxu0 %v3041_v49  ;;  %1463 = vmatprep.mubr.bf16.mxu0 %v3043_v50  ;;  %v3136_v49 = vld [vmem:[%s4443_s0 + $0x43c] ss:$20 sps:$4 sm:$0xff]   ;;  %v3138_v50 = vld [vmem:[%s4443_s0 + $0x1c4] ss:$20 sps:$4 sm:$0xff]  }
  0x63   :  { %1698 = vmatprep.subr.bf16.mxu0 %v3246_v0  ;;  %1527 = vmatprep.mubr.bf16.mxu1 %v3045_v51  ;;  %v3140_v51 = vld [vmem:[%s4443_s0 + $0x438] ss:$20 sps:$4 sm:$0xff]  }
  0x66   :  { %1699 = vmatpush1.bf16.msra.mxu0 %v3042_v52  ;;  %v3141_v52 = vld [vmem:[%s4443_s0 + $0x1c0] ss:$20 sps:$4 sm:$0xff]  }
  0x67   :  { %1700 = vmatprep.subr.bf16.mxu0 %v3246_v0 }
  0x69   :  { %1464 = vmatmul.mubr.bf16.gmra.mrb[20].mxu0 %v3047_v53  ;;  %1528 = vmatmul.mubr.bf16.gmra.mrb[20].mxu1 %v3048_v54  ;;  %v3142_v53 = vld [vmem:[%s4443_s0 + $0x464] ss:$20 sps:$4 sm:$0xff]   ;;  %v3144_v54 = vld [vmem:[%s4443_s0 + $0x1ec] ss:$20 sps:$4 sm:$0xff]  }
  0x6a   :  { %1701 = vmatpush1.bf16.msra.mxu0 %v3049_v55  ;;  %1471 = vmatprep.mubr.bf16.mxu0 %v3051_v56  ;;  %v3146_v55 = vld [vmem:[%s4443_s0 + $0x460] ss:$20 sps:$4 sm:$0xff]   ;;  %v3147_v56 = vld [vmem:[%s4443_s0 + $0x1e8] ss:$20 sps:$4 sm:$0xff]  }
  0x6b   :  { %1702 = vmatprep.subr.bf16.mxu0 %v3246_v0  ;;  %1535 = vmatprep.mubr.bf16.mxu1 %v3053_v57  ;;  %v3148_v57 = vld [vmem:[%s4443_s0 + $0x48c] ss:$20 sps:$4 sm:$0xff]  }
  0x6e   :  { %1703 = vmatpush1.bf16.msra.mxu0 %v3050_v58  ;;  %v3150_v58 = vld [vmem:[%s4443_s0 + $0x214] ss:$20 sps:$4 sm:$0xff]  }
  0x6f   :  { %1704 = vmatprep.subr.bf16.mxu0 %v3246_v0 }
  0x71   :  { %1472 = vmatmul.mubr.bf16.gmra.mrb[24].mxu0 %v3055_v59  ;;  %1536 = vmatmul.mubr.bf16.gmra.mrb[24].mxu1 %v3056_v60  ;;  %v3152_v59 = vld [vmem:[%s4443_s0 + $0x488] ss:$20 sps:$4 sm:$0xff]   ;;  %v3153_v60 = vld [vmem:[%s4443_s0 + $0x210] ss:$20 sps:$4 sm:$0xff]  }
  0x72   :  { %1705 = vmatpush1.bf16.msra.mxu0 %v3058_v61  ;;  %1479 = vmatprep.mubr.bf16.mxu0 %v3060_v62  ;;  %v3154_v61 = vld [vmem:[%s4443_s0 + $0x4b4] ss:$20 sps:$4 sm:$0xff]   ;;  %v3156_v62 = vld [vmem:[%s4443_s0 + $0x23c] ss:$20 sps:$4 sm:$0xff]  }
  0x73   :  { %1706 = vmatprep.subr.bf16.mxu0 %v3246_v0  ;;  %1543 = vmatprep.mubr.bf16.mxu1 %v3062_v63  ;;  %v3158_v63 = vld [vmem:[%s4443_s0 + $0x4b0] ss:$20 sps:$4 sm:$0xff]  }
  0x76   :  { %1707 = vmatpush1.bf16.msra.mxu0 %v3059_v1  ;;  %v3159_v1 = vld [vmem:[%s4443_s0 + $0x238] ss:$20 sps:$4 sm:$0xff]  }
  0x77   :  { %1708 = vmatprep.subr.bf16.mxu0 %v3246_v0 }
  0x79   :  { %1480 = vmatmul.mubr.bf16.gmra.mrb[28].mxu0 %v3064_v2  ;;  %1544 = vmatmul.mubr.bf16.gmra.mrb[28].mxu1 %v3065_v3  ;;  %v3160_v2 = vld [vmem:[%s4443_s0 + $0x4dc] ss:$20 sps:$4 sm:$0xff]   ;;  %v3162_v3 = vld [vmem:[%s4443_s0 + $0x264] ss:$20 sps:$4 sm:$0xff]  }
  0x7a   :  { %1709 = vmatpush1.bf16.msra.mxu0 %v3066_v4  ;;  %1551 = vmatprep.mubr.bf16.mxu1 %v3068_v5  ;;  %v3164_v4 = vld [vmem:[%s4443_s0 + $0x4d8] ss:$20 sps:$4 sm:$0xff]   ;;  %v3165_v5 = vld [vmem:[%s4443_s0 + $0x260] ss:$20 sps:$4 sm:$0xff]  }
  0x7b   :  { %1710 = vmatprep.subr.bf16.mxu0 %v3246_v0  ;;  %1712 = vmatprep.mubr.bf16.mxu0 %v3072_v6  ;;  %v3078_v0 = vld [vmem:[%s4443_s0 + $0x2a8] ss:$20 sps:$4 sm:$0xff]   ;;  %v3166_v6 = vld [vmem:[%s4443_s0 + $0x28c] ss:$20 sps:$4 sm:$0xff]  }
  0x7e   :  { %1711 = vmatpush1.bf16.msra.mxu0 %v3067_v7  ;;  %v3168_v7 = vld [vmem:[%s4443_s0 + $0x10] ss:$20 sps:$4 sm:$0xff]  }
  0x81   :  { %1552 = vmatmul.mubr.bf16.gmra.mrb[32].mxu1 %v3073_v9  ;;  %1713 = vmatmul.mubr.bf16.vlgmr.msra.gmra.mrb[0].mxu0 %v3070_v8  ;;  %v3169_v8 = vld [vmem:[%s4443_s0 + $0x288] ss:$20 sps:$4 sm:$0xff]   ;;  %v3170_v9 = vld [vmem:[%s4443_s0 + $0x38] ss:$20 sps:$4 sm:$0xff]  }
  0x82   :  { %1559 = vmatprep.mubr.bf16.mxu1 %v3074_v10  ;;  %1720 = vmatprep.mubr.bf16.mxu0 %v3076_v11  ;;  %v3171_v10 = vld [vmem:[%s4443_s0 + $0x2b4] ss:$20 sps:$4 sm:$0xff]  }
  0x83   :  { %v3173_v11 = vld [vmem:[%s4443_s0 + $0x60] ss:$20 sps:$4 sm:$0xff]  }
  0x89   :  { %1560 = vmatmul.mubr.bf16.gmra.mrb[36].mxu1 %v3078_v0  ;;  %1721 = vmatmul.mubr.bf16.gmra.mrb[4].mxu0 %v3079_v12  ;;  %v3174_v0 = vld [vmem:[%s4443_s0 + $0x2b0] ss:$20 sps:$4 sm:$0xff]   ;;  %v3175_v12 = vld [vmem:[%s4443_s0 + $0x88] ss:$20 sps:$4 sm:$0xff]  }
  0x8a   :  { %1567 = vmatprep.mubr.bf16.mxu1 %v3080_v13  ;;  %1728 = vmatprep.mubr.bf16.mxu0 %v3082_v14  ;;  %v3176_v13 = vld [vmem:[%s4443_s0 + $0x2dc] ss:$20 sps:$4 sm:$0xff]  }
  0x8b   :  { %v3178_v14 = vld [vmem:[%s4443_s0 + $0xb0] ss:$20 sps:$4 sm:$0xff]  }
  0x91   :  { %1568 = vmatmul.mubr.bf16.gmra.mrb[40].mxu1 %v3084_v15  ;;  %1729 = vmatmul.mubr.bf16.gmra.mrb[8].mxu0 %v3085_v16  ;;  %v3179_v15 = vld [vmem:[%s4443_s0 + $0x2d8] ss:$20 sps:$4 sm:$0xff]  }
  0x92   :  { %1575 = vmatprep.mubr.bf16.mxu1 %v3086_v17  ;;  %1736 = vmatprep.mubr.bf16.mxu0 %v3088_v18  ;;  %v3180_v16 = vld [vmem:[%s4443_s0 + $0xd8] ss:$20 sps:$4 sm:$0xff]   ;;  %v3183_v18 = vld [vmem:[%s4443_s0 + $0x100] ss:$20 sps:$4 sm:$0xff]  }
  0x93   :  { %v3181_v17 = vld [vmem:[%s4443_s0 + $0x304] ss:$20 sps:$4 sm:$0xff]  }
  0x99   :  { %1576 = vmatmul.mubr.bf16.gmra.mrb[44].mxu1 %v3090_v19  ;;  %1737 = vmatmul.mubr.bf16.gmra.mrb[12].mxu0 %v3091_v20 }
  0x9a   :  { %1583 = vmatprep.mubr.bf16.mxu1 %v3092_v21  ;;  %1744 = vmatprep.mubr.bf16.mxu0 %v3094_v22  ;;  %v3184_v21 = vld [vmem:[%s4443_s0 + $0x300] ss:$20 sps:$4 sm:$0xff]   ;;  %v3185_v22 = vld [vmem:[%s4443_s0 + $0x128] ss:$20 sps:$4 sm:$0xff]  }
  0xa1   :  { %1584 = vmatmul.mubr.bf16.gmra.mrb[48].mxu1 %v3096_v23  ;;  %1745 = vmatmul.mubr.bf16.gmra.mrb[16].mxu0 %v3097_v24  ;;  %v3186_v24 = vld [vmem:[%s4443_s0 + $0x32c] ss:$20 sps:$4 sm:$0xff]  }
  0xa2   :  { %1591 = vmatprep.mubr.bf16.mxu1 %v3099_v25  ;;  %1752 = vmatprep.mubr.bf16.mxu0 %v3101_v26  ;;  %v3188_v25 = vld [vmem:[%s4443_s0 + $0x150] ss:$20 sps:$4 sm:$0xff]  }
  0xa9   :  { %1592 = vmatmul.mubr.bf16.gmra.mrb[52].mxu1 %v3103_v27  ;;  %1753 = vmatmul.mubr.bf16.gmra.mrb[20].mxu0 %v3104_v28 }
  0xaa   :  { %1599 = vmatprep.mubr.bf16.mxu1 %v3105_v29  ;;  %1760 = vmatprep.mubr.bf16.mxu0 %v3107_v30  ;;  %v3189_v29 = vld [vmem:[%s4443_s0 + $0x328] ss:$20 sps:$4 sm:$0xff]   ;;  %v3190_v30 = vld [vmem:[%s4443_s0 + $0x178] ss:$20 sps:$4 sm:$0xff]  }
  0xb1   :  { %1600 = vmatmul.mubr.bf16.gmra.mrb[56].mxu1 %v3109_v31  ;;  %1761 = vmatmul.mubr.bf16.gmra.mrb[24].mxu0 %v3110_v32  ;;  %v3191_v32 = vld [vmem:[%s4443_s0 + $0x354] ss:$20 sps:$4 sm:$0xff]  }
  0xb2   :  { %1607 = vmatprep.mubr.bf16.mxu1 %v3111_v33  ;;  %1768 = vmatprep.mubr.bf16.mxu0 %v3113_v34  ;;  %v3193_v33 = vld [vmem:[%s4443_s0 + $0x1a0] ss:$20 sps:$4 sm:$0xff]  }
  0xb9   :  { %1608 = vmatmul.mubr.bf16.gmra.mrb[60].mxu1 %v3115_v35  ;;  %1769 = vmatmul.mubr.bf16.gmra.mrb[28].mxu0 %v3116_v36 }
  0xba   :  { %1615 = vmatprep.mubr.bf16.mxu1 %v3117_v37  ;;  %1776 = vmatprep.mubr.bf16.mxu0 %v3119_v38  ;;  %v3194_v37 = vld [vmem:[%s4443_s0 + $0x350] ss:$20 sps:$4 sm:$0xff]   ;;  %v3195_v38 = vld [vmem:[%s4443_s0 + $0x1c8] ss:$20 sps:$4 sm:$0xff]  }
  0xc1   :  { %1616 = vmatmul.mubr.bf16.gmra.mrb[64].mxu1 %v3121_v39  ;;  %1777 = vmatmul.mubr.bf16.gmra.mrb[32].mxu0 %v3122_v40  ;;  %v3196_v40 = vld [vmem:[%s4443_s0 + $0x37c] ss:$20 sps:$4 sm:$0xff]  }
  0xc2   :  { %1623 = vmatprep.mubr.bf16.mxu1 %v3123_v41  ;;  %1784 = vmatprep.mubr.bf16.mxu0 %v3125_v42  ;;  %v3198_v41 = vld [vmem:[%s4443_s0 + $0x1f0] ss:$20 sps:$4 sm:$0xff]  }
  0xc9   :  { %1624 = vmatmul.mubr.bf16.gmra.mrb[68].mxu1 %v3127_v43  ;;  %1785 = vmatmul.mubr.bf16.gmra.mrb[36].mxu0 %v3128_v44 }
  0xca   :  { %1631 = vmatprep.mubr.bf16.mxu1 %v3129_v45  ;;  %1792 = vmatprep.mubr.bf16.mxu0 %v3131_v46  ;;  %v3199_v45 = vld [vmem:[%s4443_s0 + $0x378] ss:$20 sps:$4 sm:$0xff]  }
  0xcb   :  { %v3200_v46 = vld [vmem:[%s4443_s0 + $0x218] ss:$20 sps:$4 sm:$0xff]  }
  0xd1   :  { %1632 = vmatmul.mubr.bf16.gmra.mrb[72].mxu1 %v3133_v47  ;;  %1793 = vmatmul.mubr.bf16.gmra.mrb[40].mxu0 %v3134_v48  ;;  %v3201_v48 = vld [vmem:[%s4443_s0 + $0x3a4] ss:$20 sps:$4 sm:$0xff]  }
  0xd2   :  { %1639 = vmatprep.mubr.bf16.mxu1 %v3136_v49  ;;  %1800 = vmatprep.mubr.bf16.mxu0 %v3138_v50  ;;  %v3203_v49 = vld [vmem:[%s4443_s0 + $0x240] ss:$20 sps:$4 sm:$0xff]  }
  0xd9   :  { %1640 = vmatmul.mubr.bf16.gmra.mrb[76].mxu1 %v3140_v51  ;;  %1801 = vmatmul.mubr.bf16.gmra.mrb[44].mxu0 %v3141_v52 }
  0xda   :  { %1647 = vmatprep.mubr.bf16.mxu1 %v3142_v53  ;;  %1808 = vmatprep.mubr.bf16.mxu0 %v3144_v54  ;;  %v3204_v53 = vld [vmem:[%s4443_s0 + $0x3a0] ss:$20 sps:$4 sm:$0xff]   ;;  %v3205_v54 = vld [vmem:[%s4443_s0 + $0x268] ss:$20 sps:$4 sm:$0xff]  }
  0xe1   :  { %1648 = vmatmul.mubr.bf16.gmra.mrb[80].mxu1 %v3146_v55  ;;  %1809 = vmatmul.mubr.bf16.gmra.mrb[48].mxu0 %v3147_v56  ;;  %v3206_v56 = vld [vmem:[%s4443_s0 + $0x3cc] ss:$20 sps:$4 sm:$0xff]  }
  0xe2   :  { %1655 = vmatprep.mubr.bf16.mxu1 %v3148_v57  ;;  %1816 = vmatprep.mubr.bf16.mxu0 %v3150_v58  ;;  %v3208_v57 = vld [vmem:[%s4443_s0 + $0x290] ss:$20 sps:$4 sm:$0xff]  }
  0xe9   :  { %1656 = vmatmul.mubr.bf16.gmra.mrb[84].mxu1 %v3152_v59  ;;  %1817 = vmatmul.mubr.bf16.gmra.mrb[52].mxu0 %v3153_v60 }
  0xea   :  { %1663 = vmatprep.mubr.bf16.mxu1 %v3154_v61  ;;  %1824 = vmatprep.mubr.bf16.mxu0 %v3156_v62  ;;  %v3209_v61 = vld [vmem:[%s4443_s0 + $0x3c8] ss:$20 sps:$4 sm:$0xff]   ;;  %v3210_v62 = vld [vmem:[%s4443_s0 + $0x2b8] ss:$20 sps:$4 sm:$0xff]  }
  0xf1   :  { %1664 = vmatmul.mubr.bf16.gmra.mrb[88].mxu1 %v3158_v63  ;;  %1825 = vmatmul.mubr.bf16.gmra.mrb[56].mxu0 %v3159_v1  ;;  %v3211_v1 = vld [vmem:[%s4443_s0 + $0x3f4] ss:$20 sps:$4 sm:$0xff]  }
  0xf2   :  { %1671 = vmatprep.mubr.bf16.mxu1 %v3160_v2  ;;  %1832 = vmatprep.mubr.bf16.mxu0 %v3162_v3  ;;  %v3213_v2 = vld [vmem:[%s4443_s0 + $0x2e0] ss:$20 sps:$4 sm:$0xff]  }
  0xf9   :  { %1672 = vmatmul.mubr.bf16.gmra.mrb[92].mxu1 %v3164_v4  ;;  %1833 = vmatmul.mubr.bf16.gmra.mrb[60].mxu0 %v3165_v5 }
  0xfa   :  { %1840 = vmatprep.mubr.bf16.mxu0 %v3166_v6  ;;  %2809 = vmatprep.mubr.msk.bf16.mxu1 %vm1294_vm0, %v3168_v7  ;;  %v3214_v6 = vld [vmem:[%s4443_s0 + $0x3f0] ss:$20 sps:$4 sm:$0xff]   ;;  %v3215_v7 = vld [vmem:[%s4443_s0 + $0x308] ss:$20 sps:$4 sm:$0xff]  }
 0x101   :  { %1841 = vmatmul.mubr.bf16.gmra.mrb[64].mxu0 %v3169_v8  ;;  %2810 = vmatmul.mubr.msk.bf16.vlgmr.msra.gmra.mrb[96].mxu1 %vm1294_vm0, %v3170_v9  ;;  %v3216_v9 = vld [vmem:[%s4443_s0 + $0x41c] ss:$20 sps:$4 sm:$0xff]  }
 0x102   :  { %1848 = vmatprep.mubr.bf16.mxu0 %v3171_v10  ;;  %2813 = vmatprep.mubr.msk.bf16.mxu1 %vm1294_vm0, %v3173_v11  ;;  %v3218_v10 = vld [vmem:[%s4443_s0 + $0x330] ss:$20 sps:$4 sm:$0xff]  }
 0x109   :  { %1849 = vmatmul.mubr.bf16.gmra.mrb[68].mxu0 %v3174_v0  ;;  %2814 = vmatmul.mubr.msk.bf16.gmra.mrb[100].mxu1 %vm1294_vm0, %v3175_v12 }
 0x10a   :  { %1856 = vmatprep.mubr.bf16.mxu0 %v3176_v13  ;;  %2817 = vmatprep.mubr.msk.bf16.mxu1 %vm1294_vm0, %v3178_v14  ;;  %v3219_v13 = vld [vmem:[%s4443_s0 + $0x418] ss:$20 sps:$4 sm:$0xff]  }
 0x10b   :  { %v3220_v14 = vld [vmem:[%s4443_s0 + $0x358] ss:$20 sps:$4 sm:$0xff]  }
 0x111   :  { %1857 = vmatmul.mubr.bf16.gmra.mrb[72].mxu0 %v3179_v15  ;;  %2818 = vmatmul.mubr.msk.bf16.gmra.mrb[104].mxu1 %vm1294_vm0, %v3180_v16  ;;  %v3221_v16 = vld [vmem:[%s4443_s0 + $0x444] ss:$20 sps:$4 sm:$0xff]  }
 0x112   :  { %1864 = vmatprep.mubr.bf16.mxu0 %v3181_v17  ;;  %2821 = vmatprep.mubr.msk.bf16.mxu1 %vm1294_vm0, %v3183_v18  ;;  %v3223_v17 = vld [vmem:[%s4443_s0 + $0x380] ss:$20 sps:$4 sm:$0xff]  }
 0x114   :  { %v3760_v19 = vpop.f32.mrb[0].mxu1 }
 0x115   :  { %v1491_v20 = vpop.f32.mrb[1].mxu1 }
 0x116   :  { %v3768_v23 = vpop.f32.mrb[2].mxu1 }
 0x117   :  { %v1494_v26 = vpop.f32.mrb[3].mxu1 }
 0x118   :  { %v3225_v26 = vld [vmem:[%s4443_s0 + $0x3a8] ss:$20 sps:$4 sm:$0xff]  }
 0x119   :  { %1865 = vmatmul.mubr.bf16.gmra.mrb[76].mxu0 %v3184_v21  ;;  %2822 = vmatmul.mubr.msk.bf16.gmra.mrb[108].mxu1 %vm1294_vm0, %v3185_v22 }
 0x11a   :  { %1872 = vmatprep.mubr.bf16.mxu0 %v3186_v24  ;;  %2825 = vmatprep.mubr.msk.bf16.mxu1 %vm1294_vm0, %v3188_v25  ;;  %v3224_v25 = vld [vmem:[%s4443_s0 + $0x440] ss:$20 sps:$4 sm:$0xff]  }
 0x11c   :  { %v3778_v27 = vpop.f32.mrb[4].mxu1 }
 0x11d   :  { %v1499_v28 = vpop.f32.mrb[5].mxu1 }
 0x11e   :  { %v3786_v31 = vpop.f32.mrb[6].mxu1 }
 0x11f   :  { %v1502_v34 = vpop.f32.mrb[7].mxu1 }
 0x121   :  { %1873 = vmatmul.mubr.bf16.gmra.mrb[80].mxu0 %v3189_v29  ;;  %2826 = vmatmul.mubr.msk.bf16.gmra.mrb[112].mxu1 %vm1294_vm0, %v3190_v30  ;;  %v3226_v30 = vld [vmem:[%s4443_s0 + $0x46c] ss:$20 sps:$4 sm:$0xff]  }
 0x122   :  { %1880 = vmatprep.mubr.bf16.mxu0 %v3191_v32  ;;  %2829 = vmatprep.mubr.msk.bf16.mxu1 %vm1294_vm0, %v3193_v33  ;;  %v3228_v32 = vld [vmem:[%s4443_s0 + $0x3d0] ss:$20 sps:$4 sm:$0xff]  }
 0x124   :  { %v3796_v35 = vpop.f32.mrb[8].mxu1 }
 0x125   :  { %v1507_v36 = vpop.f32.mrb[9].mxu1 }
 0x126   :  { %v3804_v39 = vpop.f32.mrb[10].mxu1 }
 0x127   :  { %v1510_v42 = vpop.f32.mrb[11].mxu1 }
 0x128   :  { %v3230_v42 = vld [vmem:[%s4443_s0 + $0x3f8] ss:$20 sps:$4 sm:$0xff]  }
 0x129   :  { %1881 = vmatmul.mubr.bf16.gmra.mrb[84].mxu0 %v3194_v37  ;;  %2830 = vmatmul.mubr.msk.bf16.gmra.mrb[116].mxu1 %vm1294_vm0, %v3195_v38 }
 0x12a   :  { %1888 = vmatprep.mubr.bf16.mxu0 %v3196_v40  ;;  %2833 = vmatprep.mubr.msk.bf16.mxu1 %vm1294_vm0, %v3198_v41  ;;  %v3229_v41 = vld [vmem:[%s4443_s0 + $0x468] ss:$20 sps:$4 sm:$0xff]  }
 0x12c   :  { %v3814_v43 = vpop.f32.mrb[12].mxu1 }
 0x12d   :  { %v1515_v44 = vpop.f32.mrb[13].mxu1 }
 0x12e   :  { %v3822_v47 = vpop.f32.mrb[14].mxu1 }
 0x12f   :  { %v1518_v50 = vpop.f32.mrb[15].mxu1 }
 0x131   :  { %1889 = vmatmul.mubr.bf16.gmra.mrb[88].mxu0 %v3199_v45  ;;  %2834 = vmatmul.mubr.msk.bf16.gmra.mrb[120].mxu1 %vm1294_vm0, %v3200_v46  ;;  %v3231_v46 = vld [vmem:[%s4443_s0 + $0x494] ss:$20 sps:$4 sm:$0xff]  }
 0x132   :  { %1896 = vmatprep.mubr.bf16.mxu0 %v3201_v48  ;;  %2837 = vmatprep.mubr.msk.bf16.mxu1 %vm1294_vm0, %v3203_v49  ;;  %v3233_v48 = vld [vmem:[%s4443_s0 + $0x420] ss:$20 sps:$4 sm:$0xff]  }
 0x134   :  { %v3832_v51 = vpop.f32.mrb[16].mxu1 }
 0x135   :  { %v1523_v52 = vpop.f32.mrb[17].mxu1 }
 0x136   :  { %v3840_v55 = vpop.f32.mrb[18].mxu1 }
 0x137   :  { %v1526_v58 = vpop.f32.mrb[19].mxu1 }
 0x138   :  { %v3235_v58 = vld [vmem:[%s4443_s0 + $0x448] ss:$20 sps:$4 sm:$0xff]  }
 0x139   :  { %1897 = vmatmul.mubr.bf16.gmra.mrb[92].mxu0 %v3204_v53  ;;  %2838 = vmatmul.mubr.msk.bf16.gmra.mrb[124].mxu1 %vm1294_vm0, %v3205_v54 }
 0x13a   :  { %1904 = vmatprep.mubr.bf16.mxu0 %v3206_v56  ;;  %2841 = vmatprep.mubr.msk.bf16.mxu1 %vm1294_vm0, %v3208_v57  ;;  %v3234_v57 = vld [vmem:[%s4443_s0 + $0x490] ss:$20 sps:$4 sm:$0xff]  }
 0x13c   :  { %v3850_v59 = vpop.f32.mrb[20].mxu1 }
 0x13d   :  { %v1531_v60 = vpop.f32.mrb[21].mxu1 }
 0x13e   :  { %v3858_v63 = vpop.f32.mrb[22].mxu1 }
 0x13f   :  { %v1534_v3 = vpop.f32.mrb[23].mxu1 }
 0x141   :  { %1905 = vmatmul.mubr.bf16.gmra.mrb[96].mxu0 %v3209_v61  ;;  %2842 = vmatmul.mubr.msk.bf16.gmra.mrb[128].mxu1 %vm1294_vm0, %v3210_v62  ;;  %v3236_v62 = vld [vmem:[%s4443_s0 + $0x4bc] ss:$20 sps:$4 sm:$0xff]  }
 0x142   :  { %1912 = vmatprep.mubr.bf16.mxu0 %v3211_v1  ;;  %2845 = vmatprep.mubr.msk.bf16.mxu1 %vm1294_vm0, %v3213_v2  ;;  %v3238_v1 = vld [vmem:[%s4443_s0 + $0x470] ss:$20 sps:$4 sm:$0xff]  }
 0x144   :  { %v3868_v4 = vpop.f32.mrb[24].mxu1 }
 0x145   :  { %v1539_v5 = vpop.f32.mrb[25].mxu1 }
 0x146   :  { %v3876_v8 = vpop.f32.mrb[26].mxu1 }
 0x147   :  { %v1542_v11 = vpop.f32.mrb[27].mxu1 }
 0x148   :  { %v3240_v11 = vld [vmem:[%s4443_s0 + $0x498] ss:$20 sps:$4 sm:$0xff]  }
 0x149   :  { %1913 = vmatmul.mubr.bf16.gmra.mrb[100].mxu0 %v3214_v6  ;;  %2846 = vmatmul.mubr.msk.bf16.gmra.mrb[132].mxu1 %vm1294_vm0, %v3215_v7 }
 0x14a   :  { %1920 = vmatprep.mubr.bf16.mxu0 %v3216_v9  ;;  %2849 = vmatprep.mubr.msk.bf16.mxu1 %vm1294_vm0, %v3218_v10  ;;  %v3239_v10 = vld [vmem:[%s4443_s0 + $0x4b8] ss:$20 sps:$4 sm:$0xff]  }
 0x14c   :  { %v3886_v0 = vpop.f32.mrb[28].mxu1 }
 0x14d   :  { %v1547_v12 = vpop.f32.mrb[29].mxu1 }
 0x14e   :  { %v3894_v15 = vpop.f32.mrb[30].mxu1 }
 0x14f   :  { %v1550_v18 = vpop.f32.mrb[31].mxu1 }
 0x151   :  { %1921 = vmatmul.mubr.bf16.gmra.mrb[104].mxu0 %v3219_v13  ;;  %2850 = vmatmul.mubr.msk.bf16.gmra.mrb[136].mxu1 %vm1294_vm0, %v3220_v14  ;;  %v3241_v14 = vld [vmem:[%s4443_s0 + $0x4e4] ss:$20 sps:$4 sm:$0xff]  }
 0x152   :  { %1928 = vmatprep.mubr.bf16.mxu0 %v3221_v16  ;;  %2853 = vmatprep.mubr.msk.bf16.mxu1 %vm1294_vm0, %v3223_v17  ;;  %v3243_v16 = vld [vmem:[%s4443_s0 + $0x4c0] ss:$20 sps:$4 sm:$0xff]  }
 0x154   :  { %v3904_v20 = vpop.f32.mrb[32].mxu1  ;;  %v3906_v21 = vpop.f32.mrb[0].mxu0 }
 0x155   :  { %v1555_v22 = vpop.f32.mrb[33].mxu1  ;;  %v1716_v24 = vpop.f32.mrb[1].mxu0 }
 0x156   :  { %v3914_v28 = vpop.f32.mrb[34].mxu1  ;;  %v3916_v29 = vpop.f32.mrb[2].mxu0 }
 0x157   :  { %v1558_v33 = vpop.f32.mrb[35].mxu1  ;;  %v1719_v34 = vpop.f32.mrb[3].mxu0 }
 0x159   :  { %1929 = vmatmul.mubr.bf16.gmra.mrb[108].mxu0 %v3224_v25  ;;  %2854 = vmatmul.mubr.msk.bf16.gmra.mrb[140].mxu1 %vm1294_vm0, %v3225_v26 }
 0x15a   :  { %1936 = vmatprep.mubr.bf16.mxu0 %v3226_v30  ;;  %2857 = vmatprep.mubr.msk.bf16.mxu1 %vm1294_vm0, %v3228_v32  ;;  %v3244_v30 = vld [vmem:[%s4443_s0 + $0x4e0] ss:$20 sps:$4 sm:$0xff]   ;;  %v3245_v32 = vld [vmem:[%s4443_s0 + $0x4e8] ss:$20 sps:$4 sm:$0xff]  }
 0x15c   :  { %v3926_v36 = vpop.f32.mrb[36].mxu1  ;;  %v3928_v37 = vpop.f32.mrb[4].mxu0 }
 0x15d   :  { %v1563_v38 = vpop.f32.mrb[37].mxu1  ;;  %v1724_v40 = vpop.f32.mrb[5].mxu0 }
 0x15e   :  { %v3936_v44 = vpop.f32.mrb[38].mxu1  ;;  %v3938_v45 = vpop.f32.mrb[6].mxu0 }
 0x15f   :  { %v1566_v49 = vpop.f32.mrb[39].mxu1  ;;  %v1727_v50 = vpop.f32.mrb[7].mxu0 }
 0x161   :  { %1937 = vmatmul.mubr.bf16.gmra.mrb[112].mxu0 %v3229_v41  ;;  %2858 = vmatmul.mubr.msk.bf16.gmra.mrb[144].mxu1 %vm1294_vm0, %v3230_v42 }
 0x162   :  { %1944 = vmatprep.mubr.bf16.mxu0 %v3231_v46  ;;  %2861 = vmatprep.mubr.msk.bf16.mxu1 %vm1294_vm0, %v3233_v48 }
 0x164   :  { %v3948_v52 = vpop.f32.mrb[40].mxu1  ;;  %v3950_v53 = vpop.f32.mrb[8].mxu0 }
 0x165   :  { %v1571_v54 = vpop.f32.mrb[41].mxu1  ;;  %v1732_v56 = vpop.f32.mrb[9].mxu0 }
 0x166   :  { %v3958_v60 = vpop.f32.mrb[42].mxu1  ;;  %v3960_v61 = vpop.f32.mrb[10].mxu0 }
 0x167   :  { %v1574_v2 = vpop.f32.mrb[43].mxu1  ;;  %v1735_v3 = vpop.f32.mrb[11].mxu0 }
 0x169   :  { %1945 = vmatmul.mubr.bf16.gmra.mrb[116].mxu0 %v3234_v57  ;;  %2862 = vmatmul.mubr.msk.bf16.gmra.mrb[148].mxu1 %vm1294_vm0, %v3235_v58 }
 0x16a   :  { %1952 = vmatprep.mubr.bf16.mxu0 %v3236_v62  ;;  %2865 = vmatprep.mubr.msk.bf16.mxu1 %vm1294_vm0, %v3238_v1 }
 0x16c   :  { %v3970_v5 = vpop.f32.mrb[44].mxu1  ;;  %v3972_v6 = vpop.f32.mrb[12].mxu0 }
 0x16d   :  { %v1579_v7 = vpop.f32.mrb[45].mxu1  ;;  %v1740_v9 = vpop.f32.mrb[13].mxu0 }
 0x16e   :  { %v3980_v12 = vpop.f32.mrb[46].mxu1  ;;  %v3982_v13 = vpop.f32.mrb[14].mxu0 }
 0x16f   :  { %v1582_v17 = vpop.f32.mrb[47].mxu1  ;;  %v1743_v18 = vpop.f32.mrb[15].mxu0 }
 0x171   :  { %1953 = vmatmul.mubr.bf16.gmra.mrb[120].mxu0 %v3239_v10  ;;  %2866 = vmatmul.mubr.msk.bf16.gmra.mrb[152].mxu1 %vm1294_vm0, %v3240_v11 }
 0x172   :  { %1960 = vmatprep.mubr.bf16.mxu0 %v3241_v14  ;;  %2869 = vmatprep.mubr.msk.bf16.mxu1 %vm1294_vm0, %v3243_v16 }
 0x174   :  { %v3992_v22 = vpop.f32.mrb[48].mxu1  ;;  %v3994_v24 = vpop.f32.mrb[16].mxu0 }
 0x175   :  { %v1587_v25 = vpop.f32.mrb[49].mxu1  ;;  %v1748_v26 = vpop.f32.mrb[17].mxu0 }
 0x176   :  { %v4002_v33 = vpop.f32.mrb[50].mxu1  ;;  %v4004_v34 = vpop.f32.mrb[18].mxu0 }
 0x177   :  { %v1590_v38 = vpop.f32.mrb[51].mxu1  ;;  %v1751_v40 = vpop.f32.mrb[19].mxu0 }
 0x179   :  { %1961 = vmatmul.mubr.bf16.gmra.mrb[124].mxu0 %v3244_v30  ;;  %2870 = vmatmul.mubr.msk.bf16.gmra.mrb[156].mxu1 %vm1294_vm0, %v3245_v32 }
 0x17c   :  { %v4007_v41 = vpop.f32.mrb[52].mxu1  ;;  %v4009_v42 = vpop.f32.mrb[20].mxu0 }
 0x17d   :  { %v1595_v46 = vpop.f32.mrb[53].mxu1  ;;  %v1756_v48 = vpop.f32.mrb[21].mxu0 }
 0x17e   :  { %v4011_v49 = vpop.f32.mrb[54].mxu1  ;;  %v4013_v50 = vpop.f32.mrb[22].mxu0 }
 0x17f   :  { %v1598_v54 = vpop.f32.mrb[55].mxu1  ;;  %v1759_v56 = vpop.f32.mrb[23].mxu0 }
 0x184   :  { %v4015_v57 = vpop.f32.mrb[56].mxu1  ;;  %v4017_v58 = vpop.f32.mrb[24].mxu0 }
 0x185   :  { %v1603_v62 = vpop.f32.mrb[57].mxu1  ;;  %v1764_v1 = vpop.f32.mrb[25].mxu0 }
 0x186   :  { %v4019_v2 = vpop.f32.mrb[58].mxu1  ;;  %v4021_v3 = vpop.f32.mrb[26].mxu0 }
 0x187   :  { %v1606_v7 = vpop.f32.mrb[59].mxu1  ;;  %v1767_v9 = vpop.f32.mrb[27].mxu0 }
 0x18c   :  { %v4023_v10 = vpop.f32.mrb[60].mxu1  ;;  %v4025_v11 = vpop.f32.mrb[28].mxu0 }
 0x18d   :  { %v1611_v14 = vpop.f32.mrb[61].mxu1  ;;  %v1772_v16 = vpop.f32.mrb[29].mxu0 }
 0x18e   :  { %v4027_v17 = vpop.f32.mrb[62].mxu1  ;;  %v4029_v18 = vpop.f32.mrb[30].mxu0 }
 0x18f   :  { %v1614_v25 = vpop.f32.mrb[63].mxu1  ;;  %v1775_v26 = vpop.f32.mrb[31].mxu0 }
 0x194   :  { %v4031_v30 = vpop.f32.mrb[64].mxu1  ;;  %v1778_v32 = vpop.f32.mrb[32].mxu0 }
 0x195   :  { %v4034_v38 = vadd.f32 %v1778_v32, %v3760_v19  ;;  %v1619_v40 = vpop.f32.mrb[65].mxu1  ;;  %v1780_v46 = vpop.f32.mrb[33].mxu0 }
 0x196   :  { %v4036_v48 = vpop.f32.mrb[66].mxu1  ;;  %v1781_v54 = vpop.f32.mrb[34].mxu0 }
 0x197   :  { %4446 = vst [vmem:[#allocation2_spill] sm:$0xff] %v4036_v48  ;;  %v4039_v56 = vadd.f32 %v1781_v54, %v3768_v23  ;;  %v1622_v62 = vpop.f32.mrb[67].mxu1  ;;  %v1783_v1 = vpop.f32.mrb[35].mxu0 }
 0x19c   :  { %v4041_v7 = vpop.f32.mrb[68].mxu1  ;;  %v1786_v9 = vpop.f32.mrb[36].mxu0 }
 0x19d   :  { %4447 = vst [vmem:[#allocation3_spill] sm:$0xff] %v4041_v7  ;;  %v4044_v14 = vadd.f32 %v1786_v9, %v3778_v27  ;;  %v1627_v16 = vpop.f32.mrb[69].mxu1  ;;  %v1788_v25 = vpop.f32.mrb[37].mxu0 }
 0x19e   :  { %v4046_v19 = vpop.f32.mrb[70].mxu1  ;;  %v1789_v26 = vpop.f32.mrb[38].mxu0 }
 0x19f   :  { %4448 = vst [vmem:[#allocation4_spill] sm:$0xff] %v4046_v19  ;;  %v4049_v32 = vadd.f32 %v1789_v26, %v3786_v31  ;;  %v1630_v40 = vpop.f32.mrb[71].mxu1  ;;  %v1791_v46 = vpop.f32.mrb[39].mxu0 }
 0x1a4   :  { %v4051_v23 = vpop.f32.mrb[72].mxu1  ;;  %v1794_v54 = vpop.f32.mrb[40].mxu0 }
 0x1a5   :  { %4449 = vst [vmem:[#allocation5_spill] sm:$0xff] %v4051_v23  ;;  %v4054_v62 = vadd.f32 %v1794_v54, %v3796_v35  ;;  %v1635_v1 = vpop.f32.mrb[73].mxu1  ;;  %v1796_v7 = vpop.f32.mrb[41].mxu0 }
 0x1a6   :  { %v4056_v27 = vpop.f32.mrb[74].mxu1  ;;  %v1797_v9 = vpop.f32.mrb[42].mxu0 }
 0x1a7   :  { %4450 = vst [vmem:[#allocation6_spill] sm:$0xff] %v4056_v27  ;;  %v4059_v16 = vadd.f32 %v1797_v9, %v3804_v39  ;;  %v1638_v25 = vpop.f32.mrb[75].mxu1  ;;  %v1799_v19 = vpop.f32.mrb[43].mxu0 }
 0x1ac   :  { %v4061_v31 = vpop.f32.mrb[76].mxu1  ;;  %v1802_v26 = vpop.f32.mrb[44].mxu0 }
 0x1ad   :  { %4451 = vst [vmem:[#allocation7_spill] sm:$0xff] %v4061_v31  ;;  %v4064_v40 = vadd.f32 %v1802_v26, %v3814_v43  ;;  %v1643_v46 = vpop.f32.mrb[77].mxu1  ;;  %v1804_v23 = vpop.f32.mrb[45].mxu0 }
 0x1ae   :  { %v4066_v35 = vpop.f32.mrb[78].mxu1  ;;  %v1805_v54 = vpop.f32.mrb[46].mxu0 }
 0x1af   :  { %4452 = vst [vmem:[#allocation8_spill] sm:$0xff] %v4066_v35  ;;  %v4069_v7 = vadd.f32 %v1805_v54, %v3822_v47  ;;  %v1646_v1 = vpop.f32.mrb[79].mxu1  ;;  %v1807_v27 = vpop.f32.mrb[47].mxu0 }
 0x1b4   :  { %v4071_v39 = vpop.f32.mrb[80].mxu1  ;;  %v1810_v9 = vpop.f32.mrb[48].mxu0 }
 0x1b5   :  { %4453 = vst [vmem:[#allocation9_spill] sm:$0xff] %v4071_v39  ;;  %v4074_v19 = vadd.f32 %v1810_v9, %v3832_v51  ;;  %v1651_v25 = vpop.f32.mrb[81].mxu1  ;;  %v1812_v31 = vpop.f32.mrb[49].mxu0 }
 0x1b6   :  { %v4076_v43 = vpop.f32.mrb[82].mxu1  ;;  %v1813_v26 = vpop.f32.mrb[50].mxu0 }
 0x1b7   :  { %4454 = vst [vmem:[#allocation10_spill] sm:$0xff] %v4076_v43  ;;  %v4079_v23 = vadd.f32 %v1813_v26, %v3840_v55  ;;  %v1654_v46 = vpop.f32.mrb[83].mxu1  ;;  %v1815_v35 = vpop.f32.mrb[51].mxu0 }
 0x1bc   :  { %v4081_v47 = vpop.f32.mrb[84].mxu1  ;;  %v1818_v54 = vpop.f32.mrb[52].mxu0 }
 0x1bd   :  { %4455 = vst [vmem:[#allocation11_spill] sm:$0xff] %v4081_v47  ;;  %v4084_v27 = vadd.f32 %v1818_v54, %v3850_v59  ;;  %v1659_v1 = vpop.f32.mrb[85].mxu1  ;;  %v1820_v39 = vpop.f32.mrb[53].mxu0 }
 0x1be   :  { %v4086_v51 = vpop.f32.mrb[86].mxu1  ;;  %v1821_v9 = vpop.f32.mrb[54].mxu0 }
 0x1bf   :  { %4456 = vst [vmem:[#allocation12_spill] sm:$0xff] %v4086_v51  ;;  %v4089_v31 = vadd.f32 %v1821_v9, %v3858_v63  ;;  %v1662_v25 = vpop.f32.mrb[87].mxu1  ;;  %v1823_v43 = vpop.f32.mrb[55].mxu0 }
 0x1c4   :  { %v4091_v55 = vpop.f32.mrb[88].mxu1  ;;  %v1826_v26 = vpop.f32.mrb[56].mxu0 }
 0x1c5   :  { %4457 = vst [vmem:[#allocation13_spill] sm:$0xff] %v4091_v55  ;;  %v4094_v35 = vadd.f32 %v1826_v26, %v3868_v4  ;;  %v1667_v46 = vpop.f32.mrb[89].mxu1  ;;  %v1828_v47 = vpop.f32.mrb[57].mxu0 }
 0x1c6   :  { %v4096_v59 = vpop.f32.mrb[90].mxu1  ;;  %v1829_v54 = vpop.f32.mrb[58].mxu0 }
 0x1c7   :  { %4458 = vst [vmem:[#allocation14_spill] sm:$0xff] %v4096_v59  ;;  %v4099_v39 = vadd.f32 %v1829_v54, %v3876_v8  ;;  %v1670_v1 = vpop.f32.mrb[91].mxu1  ;;  %v1831_v51 = vpop.f32.mrb[59].mxu0 }
 0x1cc   :  { %v4101_v63 = vpop.f32.mrb[92].mxu1  ;;  %v1834_v9 = vpop.f32.mrb[60].mxu0 }
 0x1cd   :  { %4459 = vst [vmem:[#allocation15_spill] sm:$0xff] %v4101_v63  ;;  %v4104_v43 = vadd.f32 %v1834_v9, %v3886_v0  ;;  %v1675_v25 = vpop.f32.mrb[93].mxu1  ;;  %v1836_v55 = vpop.f32.mrb[61].mxu0 }
 0x1ce   :  { %v4106_v4 = vpop.f32.mrb[94].mxu1  ;;  %v1837_v26 = vpop.f32.mrb[62].mxu0 }
 0x1cf   :  { %4460 = vst [vmem:[#allocation16_spill] sm:$0xff] %v4106_v4  ;;  %v4109_v47 = vadd.f32 %v1837_v26, %v3894_v15  ;;  %v1678_v46 = vpop.f32.mrb[95].mxu1  ;;  %v1839_v59 = vpop.f32.mrb[63].mxu0 }
 0x1d4   :  { %v1842_v8 = vpop.f32.mrb[64].mxu0  ;;  %v2811_v54 = vpop.f32.mrb[96].mxu1 }
 0x1d5   :  { %v4112_v51 = vadd.f32 %v1842_v8, %v3904_v20  ;;  %v2012_v1 = vadd.f32 %v2811_v54, %v3928_v37  ;;  %v1844_v63 = vpop.f32.mrb[65].mxu0  ;;  %v2003_v0 = vpop.f32.mrb[97].mxu1 }
 0x1d6   :  { %v2004_v9 = vadd.f32 %v2003_v0, %v3906_v21  ;;  %v1845_v55 = vpop.f32.mrb[66].mxu0  ;;  %v2812_v25 = vpop.f32.mrb[98].mxu1 }
 0x1d7   :  { %4461 = vst [vmem:[#allocation17_spill] sm:$0xff] %v4112_v51  ;;  %2260 = vst [vmem:[%s4444_s2 + $0x10] sm:$0xff] %v2012_v1  ;;  %v4120_v15 = vadd.f32 %v1845_v55, %v3914_v28  ;;  %v2015_v59 = vadd.f32 %v2812_v25, %v3938_v45  ;;  %v2006_v26 = vpop.f32.mrb[99].mxu1  ;;  %v1847_v20 = vpop.f32.mrb[67].mxu0  ;;  %v2393_v45 = vmul.f32 %v2012_v1, %v2012_v1 }
 0x1d8   :  { %2258 = vst [vmem:[%s4444_s2] sm:$0xff] %v2004_v9  ;;  %v2007_v37 = vadd.f32 %v2006_v26, %v3916_v29  ;;  %v2391_v21 = vmul.f32 %v2004_v9, %v2004_v9 }
 0x1d9   :  { %4462 = vst [vmem:[#allocation18_spill] sm:$0xff] %v4120_v15  ;;  %2261 = vst [vmem:[%s4444_s2 + $0x18] sm:$0xff] %v2015_v59  ;;  %v2394_v20 = vmul.f32 %v2015_v59, %v2015_v59 }
 0x1da   :  { %2259 = vst [vmem:[%s4444_s2 + $0x8] sm:$0xff] %v2007_v37  ;;  %v2322_v28 = vadd.f32 %v2007_v37, %v2004_v9  ;;  %v2392_v63 = vmul.f32 %v2007_v37, %v2007_v37 }
 0x1dc   :  { %v2323_v46 = vadd.f32 %v2322_v28, %v2012_v1  ;;  %v2455_v8 = vadd.f32 %v2392_v63, %v2391_v21  ;;  %v1850_v54 = vpop.f32.mrb[68].mxu0  ;;  %v2815_v0 = vpop.f32.mrb[100].mxu1 }
 0x1dd   :  { %v4134_v55 = vadd.f32 %v1850_v54, %v3926_v36  ;;  %v2028_v29 = vadd.f32 %v2815_v0, %v3972_v6  ;;  %v1852_v25 = vpop.f32.mrb[69].mxu0  ;;  %v2019_v26 = vpop.f32.mrb[101].mxu1 }
 0x1de   :  { %v2456_v4 = vadd.f32 %v2455_v8, %v2393_v45  ;;  %v2020_v15 = vadd.f32 %v2019_v26, %v3950_v53  ;;  %v2324_v48 = vadd.f32 %v2323_v46, %v2015_v59  ;;  %v1853_v51 = vpop.f32.mrb[70].mxu0  ;;  %v2816_v9 = vpop.f32.mrb[102].mxu1 }
 0x1df   :  { %2264 = vst [vmem:[%s4444_s2 + $0x30] sm:$0xff] %v2028_v29  ;;  %v4142_v1 = vadd.f32 %v1853_v51, %v3936_v44  ;;  %v2031_v36 = vadd.f32 %v2816_v9, %v3982_v13  ;;  %v2022_v37 = vpop.f32.mrb[103].mxu1  ;;  %v1855_v6 = vpop.f32.mrb[71].mxu0  ;;  %v2397_v51 = vmul.f32 %v2028_v29, %v2028_v29 }
 0x1e0   :  { %2262 = vst [vmem:[%s4444_s2 + $0x20] sm:$0xff] %v2020_v15  ;;  %v2325_v21 = vadd.f32 %v2324_v48, %v2020_v15  ;;  %v2395_v53 = vmul.f32 %v2020_v15, %v2020_v15  ;;  %v2457_v59 = vadd.f32 %v2456_v4, %v2394_v20  ;;  %v2023_v28 = vadd.f32 %v2022_v37, %v3960_v61 }
 0x1e1   :  { %2265 = vst [vmem:[%s4444_s2 + $0x38] sm:$0xff] %v2031_v36  ;;  %v2398_v0 = vmul.f32 %v2031_v36, %v2031_v36 }
 0x1e2   :  { %v2458_v63 = vadd.f32 %v2457_v59, %v2395_v53  ;;  %2263 = vst [vmem:[%s4444_s2 + $0x28] sm:$0xff] %v2023_v28  ;;  %v2326_v44 = vadd.f32 %v2325_v21, %v2023_v28  ;;  %v2396_v13 = vmul.f32 %v2023_v28, %v2023_v28 }
 0x1e4   :  { %v2327_v45 = vadd.f32 %v2326_v44, %v2028_v29  ;;  %v2459_v46 = vadd.f32 %v2458_v63, %v2396_v13  ;;  %v1858_v8 = vpop.f32.mrb[72].mxu0  ;;  %v2819_v48 = vpop.f32.mrb[104].mxu1 }
 0x1e5   :  { %v4156_v4 = vadd.f32 %v1858_v8, %v3948_v52  ;;  %v2044_v61 = vadd.f32 %v2819_v48, %v4009_v42  ;;  %v1860_v15 = vpop.f32.mrb[73].mxu0  ;;  %v2035_v54 = vpop.f32.mrb[105].mxu1 }
 0x1e6   :  { %v2460_v25 = vadd.f32 %v2459_v46, %v2397_v51  ;;  %v2036_v26 = vadd.f32 %v2035_v54, %v3994_v24  ;;  %v2328_v20 = vadd.f32 %v2327_v45, %v2031_v36  ;;  %v1861_v9 = vpop.f32.mrb[74].mxu0  ;;  %v2820_v37 = vpop.f32.mrb[106].mxu1 }
 0x1e7   :  { %2268 = vst [vmem:[%s4444_s2 + $0x50] sm:$0xff] %v2044_v61  ;;  %v4164_v29 = vadd.f32 %v1861_v9, %v3958_v60  ;;  %v2047_v52 = vadd.f32 %v2820_v37, %v4013_v50  ;;  %v2038_v6 = vpop.f32.mrb[107].mxu1  ;;  %v1863_v42 = vpop.f32.mrb[75].mxu0  ;;  %v2401_v28 = vmul.f32 %v2044_v61, %v2044_v61 }
 0x1e8   :  { %2266 = vst [vmem:[%s4444_s2 + $0x40] sm:$0xff] %v2036_v26  ;;  %v2329_v21 = vadd.f32 %v2328_v20, %v2036_v26  ;;  %v2399_v24 = vmul.f32 %v2036_v26, %v2036_v26  ;;  %v2461_v36 = vadd.f32 %v2460_v25, %v2398_v0  ;;  %v2039_v53 = vadd.f32 %v2038_v6, %v4004_v34 }
 0x1e9   :  { %2269 = vst [vmem:[%s4444_s2 + $0x58] sm:$0xff] %v2047_v52  ;;  %v2402_v48 = vmul.f32 %v2047_v52, %v2047_v52 }
 0x1ea   :  { %v2462_v59 = vadd.f32 %v2461_v36, %v2399_v24  ;;  %2267 = vst [vmem:[%s4444_s2 + $0x48] sm:$0xff] %v2039_v53  ;;  %v2330_v60 = vadd.f32 %v2329_v21, %v2039_v53  ;;  %v2400_v50 = vmul.f32 %v2039_v53, %v2039_v53 }
 0x1ec   :  { %v2331_v63 = vadd.f32 %v2330_v60, %v2044_v61  ;;  %v2463_v44 = vadd.f32 %v2462_v59, %v2400_v50  ;;  %v1866_v13 = vpop.f32.mrb[76].mxu0  ;;  %v2823_v51 = vpop.f32.mrb[108].mxu1 }
 0x1ed   :  { %v4178_v45 = vadd.f32 %v1866_v13, %v3970_v5  ;;  %v2060_v34 = vadd.f32 %v2823_v51, %v4025_v11  ;;  %v1868_v46 = vpop.f32.mrb[77].mxu0  ;;  %v2051_v8 = vpop.f32.mrb[109].mxu1 }
 0x1ee   :  { %v2464_v15 = vadd.f32 %v2463_v44, %v2401_v28  ;;  %v2052_v54 = vadd.f32 %v2051_v8, %v4017_v58  ;;  %v2332_v0 = vadd.f32 %v2331_v63, %v2047_v52  ;;  %v1869_v25 = vpop.f32.mrb[78].mxu0  ;;  %v2824_v26 = vpop.f32.mrb[110].mxu1 }
 0x1ef   :  { %2272 = vst [vmem:[%s4444_s2 + $0x70] sm:$0xff] %v2060_v34  ;;  %v4186_v61 = vadd.f32 %v1869_v25, %v3980_v12  ;;  %v2063_v5 = vadd.f32 %v2824_v26, %v4029_v18  ;;  %v2054_v20 = vpop.f32.mrb[111].mxu1  ;;  %v1871_v11 = vpop.f32.mrb[79].mxu0  ;;  %v2405_v42 = vmul.f32 %v2060_v34, %v2060_v34 }
 0x1f0   :  { %2270 = vst [vmem:[%s4444_s2 + $0x60] sm:$0xff] %v2052_v54  ;;  %v2333_v9 = vadd.f32 %v2332_v0, %v2052_v54  ;;  %v2403_v58 = vmul.f32 %v2052_v54, %v2052_v54  ;;  %v2465_v37 = vadd.f32 %v2464_v15, %v2402_v48  ;;  %v2055_v52 = vadd.f32 %v2054_v20, %v4021_v3 }
 0x1f1   :  { %2273 = vst [vmem:[%s4444_s2 + $0x78] sm:$0xff] %v2063_v5  ;;  %v2406_v28 = vmul.f32 %v2063_v5, %v2063_v5 }
 0x1f2   :  { %v2466_v6 = vadd.f32 %v2465_v37, %v2403_v58  ;;  %2271 = vst [vmem:[%s4444_s2 + $0x68] sm:$0xff] %v2055_v52  ;;  %v2334_v12 = vadd.f32 %v2333_v9, %v2055_v52  ;;  %v2404_v18 = vmul.f32 %v2055_v52, %v2055_v52 }
 0x1f4   :  { %v2335_v21 = vadd.f32 %v2334_v12, %v2060_v34  ;;  %v2467_v24 = vadd.f32 %v2466_v6, %v2404_v18  ;;  %v1874_v36 = vpop.f32.mrb[80].mxu0  ;;  %v2827_v53 = vpop.f32.mrb[112].mxu1 }
 0x1f5   :  { %v4200_v59 = vadd.f32 %v1874_v36, %v3992_v22  ;;  %v2076_v3 = vadd.f32 %v2827_v53, %v4044_v14  ;;  %v1876_v60 = vpop.f32.mrb[81].mxu0  ;;  %v2067_v50 = vpop.f32.mrb[113].mxu1 }
 0x1f6   :  { %v2468_v63 = vadd.f32 %v2467_v24, %v2405_v42  ;;  %v2068_v44 = vadd.f32 %v2067_v50, %v4034_v38  ;;  %v2336_v13 = vadd.f32 %v2335_v21, %v2063_v5  ;;  %v1877_v51 = vpop.f32.mrb[82].mxu0  ;;  %v2828_v46 = vpop.f32.mrb[114].mxu1 }
 0x1f7   :  { %2276 = vst [vmem:[%s4444_s2 + $0x90] sm:$0xff] %v2076_v3  ;;  %v4208_v34 = vadd.f32 %v1877_v51, %v4002_v33  ;;  %v2079_v22 = vadd.f32 %v2828_v46, %v4049_v32  ;;  %v2070_v8 = vpop.f32.mrb[115].mxu1  ;;  %v1879_v14 = vpop.f32.mrb[83].mxu0  ;;  %v2409_v25 = vmul.f32 %v2076_v3, %v2076_v3 }
 0x1f8   :  { %2274 = vst [vmem:[%s4444_s2 + $0x80] sm:$0xff] %v2068_v44  ;;  %v2337_v48 = vadd.f32 %v2336_v13, %v2068_v44  ;;  %v2407_v38 = vmul.f32 %v2068_v44, %v2068_v44  ;;  %v2469_v15 = vadd.f32 %v2468_v63, %v2406_v28  ;;  %v2071_v54 = vadd.f32 %v2070_v8, %v4039_v56 }
 0x1f9   :  { %2277 = vst [vmem:[%s4444_s2 + $0x98] sm:$0xff] %v2079_v22  ;;  %v2410_v52 = vmul.f32 %v2079_v22, %v2079_v22 }
 0x1fa   :  { %v2470_v0 = vadd.f32 %v2469_v15, %v2407_v38  ;;  %2275 = vst [vmem:[%s4444_s2 + $0x88] sm:$0xff] %v2071_v54  ;;  %v2338_v33 = vadd.f32 %v2337_v48, %v2071_v54  ;;  %v2408_v32 = vmul.f32 %v2071_v54, %v2071_v54 }
 0x1fc   :  { %v2339_v26 = vadd.f32 %v2338_v33, %v2076_v3  ;;  %v2471_v5 = vadd.f32 %v2470_v0, %v2408_v32  ;;  %v1882_v20 = vpop.f32.mrb[84].mxu0  ;;  %v2831_v11 = vpop.f32.mrb[116].mxu1 }
 0x1fd   :  { %v4222_v9 = vadd.f32 %v1882_v20, %v4007_v41  ;;  %v2092_v56 = vadd.f32 %v2831_v11, %v4064_v40  ;;  %v1884_v58 = vpop.f32.mrb[85].mxu0  ;;  %v2083_v37 = vpop.f32.mrb[117].mxu1 }
 0x1fe   :  { %v2472_v6 = vadd.f32 %v2471_v5, %v2409_v25  ;;  %v2084_v12 = vadd.f32 %v2083_v37, %v4054_v62  ;;  %v2340_v18 = vadd.f32 %v2339_v26, %v2079_v22  ;;  %v1885_v42 = vpop.f32.mrb[86].mxu0  ;;  %v2832_v21 = vpop.f32.mrb[118].mxu1 }
 0x1ff   :  { %2280 = vst [vmem:[%s4444_s2 + $0xb0] sm:$0xff] %v2092_v56  ;;  %v4230_v24 = vadd.f32 %v1885_v42, %v4011_v49  ;;  %v2095_v41 = vadd.f32 %v2832_v21, %v4069_v7  ;;  %v2086_v36 = vpop.f32.mrb[119].mxu1  ;;  %v1887_v40 = vpop.f32.mrb[87].mxu0  ;;  %v2413_v28 = vmul.f32 %v2092_v56, %v2092_v56 }
 0x200   :  { %2278 = vst [vmem:[%s4444_s2 + $0xa0] sm:$0xff] %v2084_v12  ;;  %v2341_v53 = vadd.f32 %v2340_v18, %v2084_v12  ;;  %v2411_v62 = vmul.f32 %v2084_v12, %v2084_v12  ;;  %v2473_v3 = vadd.f32 %v2472_v6, %v2410_v52  ;;  %v2087_v60 = vadd.f32 %v2086_v36, %v4059_v16 }
 0x201   :  { %2281 = vst [vmem:[%s4444_s2 + $0xb8] sm:$0xff] %v2095_v41  ;;  %v2414_v14 = vmul.f32 %v2095_v41, %v2095_v41 }
 0x202   :  { %v2474_v50 = vadd.f32 %v2473_v3, %v2411_v62  ;;  %2279 = vst [vmem:[%s4444_s2 + $0xa8] sm:$0xff] %v2087_v60  ;;  %v2342_v49 = vadd.f32 %v2341_v53, %v2087_v60  ;;  %v2412_v7 = vmul.f32 %v2087_v60, %v2087_v60 }
 0x204   :  { %v2343_v63 = vadd.f32 %v2342_v49, %v2092_v56  ;;  %v2475_v44 = vadd.f32 %v2474_v50, %v2412_v7  ;;  %v1890_v13 = vpop.f32.mrb[88].mxu0  ;;  %v2835_v51 = vpop.f32.mrb[120].mxu1 }
 0x205   :  { %v4244_v46 = vadd.f32 %v1890_v13, %v4015_v57  ;;  %v2108_v16 = vadd.f32 %v2835_v51, %v4084_v27  ;;  %v1892_v22 = vpop.f32.mrb[89].mxu0  ;;  %v2099_v8 = vpop.f32.mrb[121].mxu1 }
 0x206   :  { %v2476_v48 = vadd.f32 %v2475_v44, %v2413_v28  ;;  %v2100_v38 = vadd.f32 %v2099_v8, %v4074_v19  ;;  %v2344_v15 = vadd.f32 %v2343_v63, %v2095_v41  ;;  %v1893_v54 = vpop.f32.mrb[90].mxu0  ;;  %v2836_v0 = vpop.f32.mrb[122].mxu1 }
 0x207   :  { %2284 = vst [vmem:[%s4444_s2 + $0xd0] sm:$0xff] %v2108_v16  ;;  %v4252_v33 = vadd.f32 %v1893_v54, %v4019_v2  ;;  %v2111_v57 = vadd.f32 %v2836_v0, %v4089_v31  ;;  %v2102_v32 = vpop.f32.mrb[123].mxu1  ;;  %v1895_v27 = vpop.f32.mrb[91].mxu0  ;;  %v2417_v11 = vmul.f32 %v2108_v16, %v2108_v16 }
 0x208   :  { %2282 = vst [vmem:[%s4444_s2 + $0xc0] sm:$0xff] %v2100_v38  ;;  %v2345_v25 = vadd.f32 %v2344_v15, %v2100_v38  ;;  %v2415_v19 = vmul.f32 %v2100_v38, %v2100_v38  ;;  %v2477_v26 = vadd.f32 %v2476_v48, %v2414_v14  ;;  %v2103_v5 = vadd.f32 %v2102_v32, %v4079_v23  ;;  %v4463_v38 = vld [vmem:[#allocation17_spill] sm:$0xff]  ;;  %v4464_v32 = vld [vmem:[#allocation2_spill] sm:$0xff] }
 0x209   :  { %2285 = vst [vmem:[%s4444_s2 + $0xd8] sm:$0xff] %v2111_v57  ;;  %v2418_v42 = vmul.f32 %v2111_v57, %v2111_v57 }
 0x20a   :  { %v2478_v20 = vadd.f32 %v2477_v26, %v2415_v19  ;;  %2283 = vst [vmem:[%s4444_s2 + $0xc8] sm:$0xff] %v2103_v5  ;;  %v2346_v2 = vadd.f32 %v2345_v25, %v2103_v5  ;;  %v2416_v31 = vmul.f32 %v2103_v5, %v2103_v5 }
 0x20c   :  { %v2347_v56 = vadd.f32 %v2346_v2, %v2108_v16  ;;  %v2479_v58 = vadd.f32 %v2478_v20, %v2416_v31  ;;  %v1898_v37 = vpop.f32.mrb[92].mxu0  ;;  %v2839_v52 = vpop.f32.mrb[124].mxu1  ;;  %v4465_v20 = vld [vmem:[#allocation18_spill] sm:$0xff] }
 0x20d   :  { %v4266_v6 = vadd.f32 %v1898_v37, %v4023_v10  ;;  %v2124_v23 = vadd.f32 %v2839_v52, %v4104_v43  ;;  %v1900_v12 = vpop.f32.mrb[93].mxu0  ;;  %v2115_v18 = vpop.f32.mrb[125].mxu1 }
 0x20e   :  { %v2480_v21 = vadd.f32 %v2479_v58, %v2417_v11  ;;  %v2116_v41 = vadd.f32 %v2115_v18, %v4094_v35  ;;  %v2348_v36 = vadd.f32 %v2347_v56, %v2111_v57  ;;  %v1901_v40 = vpop.f32.mrb[94].mxu0  ;;  %v2840_v53 = vpop.f32.mrb[126].mxu1  ;;  %v4466_v12 = vld [vmem:[#allocation3_spill] sm:$0xff] }
 0x20f   :  { %2288 = vst [vmem:[%s4444_s2 + $0xf0] sm:$0xff] %v2124_v23  ;;  %v4274_v62 = vadd.f32 %v1901_v40, %v4027_v17  ;;  %v2127_v10 = vadd.f32 %v2840_v53, %v4109_v47  ;;  %v2118_v3 = vpop.f32.mrb[127].mxu1  ;;  %v1903_v43 = vpop.f32.mrb[95].mxu0  ;;  %v2421_v28 = vmul.f32 %v2124_v23, %v2124_v23 }
 0x210   :  { %2286 = vst [vmem:[%s4444_s2 + $0xe0] sm:$0xff] %v2116_v41  ;;  %v2349_v60 = vadd.f32 %v2348_v36, %v2116_v41  ;;  %v2419_v35 = vmul.f32 %v2116_v41, %v2116_v41  ;;  %v2481_v50 = vadd.f32 %v2480_v21, %v2418_v42  ;;  %v2119_v49 = vadd.f32 %v2118_v3, %v4099_v39 }
 0x211   :  { %2289 = vst [vmem:[%s4444_s2 + $0xf8] sm:$0xff] %v2127_v10  ;;  %v2422_v14 = vmul.f32 %v2127_v10, %v2127_v10 }
 0x212   :  { %v2482_v7 = vadd.f32 %v2481_v50, %v2419_v35  ;;  %2287 = vst [vmem:[%s4444_s2 + $0xe8] sm:$0xff] %v2119_v49  ;;  %v2350_v17 = vadd.f32 %v2349_v60, %v2119_v49  ;;  %v2420_v47 = vmul.f32 %v2119_v49, %v2119_v49  ;;  %v4467_v60 = vld [vmem:[#allocation4_spill] sm:$0xff] }
 0x214   :  { %v2351_v63 = vadd.f32 %v2350_v17, %v2124_v23  ;;  %v2483_v44 = vadd.f32 %v2482_v7, %v2420_v47  ;;  %v1906_v13 = vpop.f32.mrb[96].mxu0  ;;  %v2843_v51 = vpop.f32.mrb[128].mxu1 }
 0x215   :  { %v4288_v16 = vadd.f32 %v1906_v13, %v4031_v30  ;;  %v2140_v39 = vadd.f32 %v2843_v51, %v4134_v55  ;;  %v1908_v22 = vpop.f32.mrb[97].mxu0  ;;  %v2131_v8 = vpop.f32.mrb[129].mxu1 }
 0x216   :  { %v2484_v48 = vadd.f32 %v2483_v44, %v2421_v28  ;;  %v2132_v15 = vadd.f32 %v2131_v8, %v4463_v38  ;;  %v2352_v54 = vadd.f32 %v2351_v63, %v2127_v10  ;;  %v1909_v0 = vpop.f32.mrb[98].mxu0  ;;  %v2844_v57 = vpop.f32.mrb[130].mxu1  ;;  %v4468_v8 = vld [vmem:[#allocation5_spill] sm:$0xff] }
 0x217   :  { %2292 = vst [vmem:[%s4444_s2 + $0x110] sm:$0xff] %v2140_v39  ;;  %v4296_v27 = vadd.f32 %v1909_v0, %v4464_v32  ;;  %v2143_v30 = vadd.f32 %v2844_v57, %v4142_v1  ;;  %v2134_v25 = vpop.f32.mrb[131].mxu1  ;;  %v1911_v55 = vpop.f32.mrb[99].mxu0  ;;  %v2425_v56 = vmul.f32 %v2140_v39, %v2140_v39 }
 0x218   :  { %2290 = vst [vmem:[%s4444_s2 + $0x100] sm:$0xff] %v2132_v15  ;;  %v2353_v19 = vadd.f32 %v2352_v54, %v2132_v15  ;;  %v2423_v26 = vmul.f32 %v2132_v15, %v2132_v15  ;;  %v2485_v5 = vadd.f32 %v2484_v48, %v2422_v14  ;;  %v2135_v2 = vadd.f32 %v2134_v25, %v4465_v20  ;;  %v4469_v25 = vld [vmem:[#allocation6_spill] sm:$0xff] }
 0x219   :  { %2293 = vst [vmem:[%s4444_s2 + $0x118] sm:$0xff] %v2143_v30  ;;  %v2426_v36 = vmul.f32 %v2143_v30, %v2143_v30 }
 0x21a   :  { %v2486_v31 = vadd.f32 %v2485_v5, %v2423_v26  ;;  %2291 = vst [vmem:[%s4444_s2 + $0x108] sm:$0xff] %v2135_v2  ;;  %v2354_v1 = vadd.f32 %v2353_v19, %v2135_v2  ;;  %v2424_v11 = vmul.f32 %v2135_v2, %v2135_v2 }
 0x21c   :  { %v2355_v58 = vadd.f32 %v2354_v1, %v2140_v39  ;;  %v2487_v37 = vadd.f32 %v2486_v31, %v2424_v11  ;;  %v1914_v52 = vpop.f32.mrb[100].mxu0  ;;  %v2847_v23 = vpop.f32.mrb[132].mxu1 }
 0x21d   :  { %v4310_v18 = vadd.f32 %v1914_v52, %v4466_v12  ;;  %v2156_v42 = vadd.f32 %v2847_v23, %v4178_v45  ;;  %v1916_v21 = vpop.f32.mrb[101].mxu0  ;;  %v2147_v41 = vpop.f32.mrb[133].mxu1  ;;  %v4470_v23 = vld [vmem:[#allocation7_spill] sm:$0xff] }
 0x21e   :  { %v2488_v40 = vadd.f32 %v2487_v37, %v2425_v56  ;;  %v2148_v53 = vadd.f32 %v2147_v41, %v4156_v4  ;;  %v2356_v10 = vadd.f32 %v2355_v58, %v2143_v30  ;;  %v1917_v3 = vpop.f32.mrb[102].mxu0  ;;  %v2848_v43 = vpop.f32.mrb[134].mxu1 }
 0x21f   :  { %2296 = vst [vmem:[%s4444_s2 + $0x130] sm:$0xff] %v2156_v42  ;;  %v4318_v35 = vadd.f32 %v1917_v3, %v4467_v60  ;;  %v2159_v50 = vadd.f32 %v2848_v43, %v4186_v61  ;;  %v2150_v49 = vpop.f32.mrb[135].mxu1  ;;  %v1919_v45 = vpop.f32.mrb[103].mxu0  ;;  %v2429_v44 = vmul.f32 %v2156_v42, %v2156_v42  ;;  %v4471_v43 = vld [vmem:[#allocation8_spill] sm:$0xff] }
 0x220   :  { %2294 = vst [vmem:[%s4444_s2 + $0x120] sm:$0xff] %v2148_v53  ;;  %v2357_v7 = vadd.f32 %v2356_v10, %v2148_v53  ;;  %v2427_v4 = vmul.f32 %v2148_v53, %v2148_v53  ;;  %v2489_v17 = vadd.f32 %v2488_v40, %v2426_v36  ;;  %v2151_v47 = vadd.f32 %v2150_v49, %v4164_v29 }
 0x221   :  { %2297 = vst [vmem:[%s4444_s2 + $0x138] sm:$0xff] %v2159_v50  ;;  %v2430_v15 = vmul.f32 %v2159_v50, %v2159_v50 }
 0x222   :  { %v2490_v28 = vadd.f32 %v2489_v17, %v2427_v4  ;;  %2295 = vst [vmem:[%s4444_s2 + $0x128] sm:$0xff] %v2151_v47  ;;  %v2358_v61 = vadd.f32 %v2357_v7, %v2151_v47  ;;  %v2428_v63 = vmul.f32 %v2151_v47, %v2151_v47 }
 0x224   :  { %v2359_v13 = vadd.f32 %v2358_v61, %v2156_v42  ;;  %v2491_v51 = vadd.f32 %v2490_v28, %v2428_v63  ;;  %v1922_v39 = vpop.f32.mrb[104].mxu0  ;;  %v2851_v22 = vpop.f32.mrb[136].mxu1 }
 0x225   :  { %v4332_v14 = vadd.f32 %v1922_v39, %v4468_v8  ;;  %v2172_v29 = vadd.f32 %v2851_v22, %v4222_v9  ;;  %v1924_v48 = vpop.f32.mrb[105].mxu0  ;;  %v2163_v38 = vpop.f32.mrb[137].mxu1 }
 0x226   :  { %v2492_v54 = vadd.f32 %v2491_v51, %v2429_v44  ;;  %v2164_v0 = vadd.f32 %v2163_v38, %v4200_v59  ;;  %v2360_v57 = vadd.f32 %v2359_v13, %v2159_v50  ;;  %v1925_v32 = vpop.f32.mrb[106].mxu0  ;;  %v2852_v30 = vpop.f32.mrb[138].mxu1  ;;  %v4472_v51 = vld [vmem:[#allocation9_spill] sm:$0xff] }
 0x227   :  { %2300 = vst [vmem:[%s4444_s2 + $0x150] sm:$0xff] %v2172_v29  ;;  %v4340_v55 = vadd.f32 %v1925_v32, %v4469_v25  ;;  %v2175_v19 = vadd.f32 %v2852_v30, %v4230_v24  ;;  %v2166_v26 = vpop.f32.mrb[139].mxu1  ;;  %v1927_v9 = vpop.f32.mrb[107].mxu0  ;;  %v2433_v11 = vmul.f32 %v2172_v29, %v2172_v29 }
 0x228   :  { %2298 = vst [vmem:[%s4444_s2 + $0x140] sm:$0xff] %v2164_v0  ;;  %v2361_v5 = vadd.f32 %v2360_v57, %v2164_v0  ;;  %v2431_v59 = vmul.f32 %v2164_v0, %v2164_v0  ;;  %v2493_v20 = vadd.f32 %v2492_v54, %v2430_v15  ;;  %v2167_v2 = vadd.f32 %v2166_v26, %v4208_v34  ;;  %v4473_v57 = vld [vmem:[#allocation10_spill] sm:$0xff] }
 0x229   :  { %2301 = vst [vmem:[%s4444_s2 + $0x158] sm:$0xff] %v2175_v19  ;;  %v2434_v41 = vmul.f32 %v2175_v19, %v2175_v19 }
 0x22a   :  { %v2494_v31 = vadd.f32 %v2493_v20, %v2431_v59  ;;  %2299 = vst [vmem:[%s4444_s2 + $0x148] sm:$0xff] %v2167_v2  ;;  %v2362_v24 = vadd.f32 %v2361_v5, %v2167_v2  ;;  %v2432_v1 = vmul.f32 %v2167_v2, %v2167_v2 }
 0x22c   :  { %v2363_v56 = vadd.f32 %v2362_v24, %v2172_v29  ;;  %v2495_v58 = vadd.f32 %v2494_v31, %v2432_v1  ;;  %v1930_v37 = vpop.f32.mrb[108].mxu0  ;;  %v2855_v52 = vpop.f32.mrb[140].mxu1 }
 0x22d   :  { %v1931_v12 = vadd.f32 %v1930_v37, %v4470_v23  ;;  %v2188_v34 = vadd.f32 %v2855_v52, %v4266_v6  ;;  %v1932_v42 = vpop.f32.mrb[109].mxu0  ;;  %v2179_v21 = vpop.f32.mrb[141].mxu1 }
 0x22e   :  { %v2496_v36 = vadd.f32 %v2495_v58, %v2433_v11  ;;  %v2180_v40 = vadd.f32 %v2179_v21, %v4244_v46  ;;  %v2364_v53 = vadd.f32 %v2363_v56, %v2175_v19  ;;  %v1933_v10 = vpop.f32.mrb[110].mxu0  ;;  %v2856_v3 = vpop.f32.mrb[142].mxu1  ;;  %v4474_v11 = vld [vmem:[#allocation11_spill] sm:$0xff] }
 0x22f   :  { %2304 = vst [vmem:[%s4444_s2 + $0x170] sm:$0xff] %v2188_v34  ;;  %v1934_v60 = vadd.f32 %v1933_v10, %v4471_v43  ;;  %v2191_v50 = vadd.f32 %v2856_v3, %v4274_v62  ;;  %v2182_v49 = vpop.f32.mrb[143].mxu1  ;;  %v1935_v45 = vpop.f32.mrb[111].mxu0  ;;  %v2437_v28 = vmul.f32 %v2188_v34, %v2188_v34 }
 0x230   :  { %2302 = vst [vmem:[%s4444_s2 + $0x160] sm:$0xff] %v2180_v40  ;;  %v2365_v6 = vadd.f32 %v2364_v53, %v2180_v40  ;;  %v2435_v7 = vmul.f32 %v2180_v40, %v2180_v40  ;;  %v2497_v46 = vadd.f32 %v2496_v36, %v2434_v41  ;;  %v2183_v4 = vadd.f32 %v2182_v49, %v4252_v33  ;;  %v4475_v36 = vld [vmem:[#allocation12_spill] sm:$0xff] }
 0x231   :  { %2305 = vst [vmem:[%s4444_s2 + $0x178] sm:$0xff] %v2191_v50  ;;  %v2438_v29 = vmul.f32 %v2191_v50, %v2191_v50 }
 0x232   :  { %v2498_v17 = vadd.f32 %v2497_v46, %v2435_v7  ;;  %2303 = vst [vmem:[%s4444_s2 + $0x168] sm:$0xff] %v2183_v4  ;;  %v2366_v62 = vadd.f32 %v2365_v6, %v2183_v4  ;;  %v2436_v47 = vmul.f32 %v2183_v4, %v2183_v4 }
 0x234   :  { %v2367_v61 = vadd.f32 %v2366_v62, %v2188_v34  ;;  %v2499_v63 = vadd.f32 %v2498_v17, %v2436_v47  ;;  %v1938_v44 = vpop.f32.mrb[112].mxu0  ;;  %v2859_v13 = vpop.f32.mrb[144].mxu1  ;;  %v4476_v62 = vld [vmem:[#allocation13_spill] sm:$0xff] }
 0x235   :  { %v4372_v39 = vadd.f32 %v1938_v44, %v4472_v51  ;;  %v2204_v33 = vadd.f32 %v2859_v13, %v4310_v18  ;;  %v1940_v22 = vpop.f32.mrb[113].mxu0  ;;  %v2195_v8 = vpop.f32.mrb[145].mxu1 }
 0x236   :  { %v2500_v48 = vadd.f32 %v2499_v63, %v2437_v28  ;;  %v2196_v38 = vadd.f32 %v2195_v8, %v4288_v16  ;;  %v2368_v15 = vadd.f32 %v2367_v61, %v2191_v50  ;;  %v1941_v54 = vpop.f32.mrb[114].mxu0  ;;  %v2860_v0 = vpop.f32.mrb[146].mxu1  ;;  %v4477_v8 = vld [vmem:[#allocation14_spill] sm:$0xff] }
 0x237   :  { %2308 = vst [vmem:[%s4444_s2 + $0x190] sm:$0xff] %v2204_v33  ;;  %v4380_v32 = vadd.f32 %v1941_v54, %v4473_v57  ;;  %v2207_v30 = vadd.f32 %v2860_v0, %v4318_v35  ;;  %v2198_v25 = vpop.f32.mrb[147].mxu1  ;;  %v1943_v18 = vpop.f32.mrb[115].mxu0  ;;  %v2441_v20 = vmul.f32 %v2204_v33, %v2204_v33 }
 0x238   :  { %2306 = vst [vmem:[%s4444_s2 + $0x180] sm:$0xff] %v2196_v38  ;;  %v2369_v19 = vadd.f32 %v2368_v15, %v2196_v38  ;;  %v2439_v16 = vmul.f32 %v2196_v38, %v2196_v38  ;;  %v2501_v26 = vadd.f32 %v2500_v48, %v2438_v29  ;;  %v2199_v9 = vadd.f32 %v2198_v25, %v4296_v27 }
 0x239   :  { %2309 = vst [vmem:[%s4444_s2 + $0x198] sm:$0xff] %v2207_v30  ;;  %v2442_v52 = vmul.f32 %v2207_v30, %v2207_v30 }
 0x23a   :  { %v2502_v5 = vadd.f32 %v2501_v26, %v2439_v16  ;;  %2307 = vst [vmem:[%s4444_s2 + $0x188] sm:$0xff] %v2199_v9  ;;  %v2370_v35 = vadd.f32 %v2369_v19, %v2199_v9  ;;  %v2440_v59 = vmul.f32 %v2199_v9, %v2199_v9 }
 0x23c   :  { %v2371_v2 = vadd.f32 %v2370_v35, %v2204_v33  ;;  %v2503_v31 = vadd.f32 %v2502_v5, %v2440_v59  ;;  %v1946_v24 = vpop.f32.mrb[116].mxu0  ;;  %v2863_v1 = vpop.f32.mrb[148].mxu1  ;;  %v4478_v35 = vld [vmem:[#allocation15_spill] sm:$0xff] }
 0x23d   :  { %v1947_v56 = vadd.f32 %v1946_v24, %v4474_v11  ;;  %v2220_v58 = vadd.f32 %v2863_v1, %v1931_v12  ;;  %v1948_v27 = vpop.f32.mrb[117].mxu0  ;;  %v2211_v37 = vpop.f32.mrb[149].mxu1 }
 0x23e   :  { %v2504_v23 = vadd.f32 %v2503_v31, %v2441_v20  ;;  %v2212_v34 = vadd.f32 %v2211_v37, %v4332_v14  ;;  %v2372_v42 = vadd.f32 %v2371_v2, %v2207_v30  ;;  %v1949_v21 = vpop.f32.mrb[118].mxu0  ;;  %v2864_v41 = vpop.f32.mrb[150].mxu1  ;;  %v4479_v27 = vld [vmem:[#allocation16_spill] sm:$0xff] }
 0x23f   :  { %2312 = vst [vmem:[%s4444_s2 + $0x1b0] sm:$0xff] %v2220_v58  ;;  %v1950_v40 = vadd.f32 %v1949_v21, %v4475_v36  ;;  %v2223_v53 = vadd.f32 %v2864_v41, %v1934_v60  ;;  %v2214_v10 = vpop.f32.mrb[151].mxu1  ;;  %v1951_v3 = vpop.f32.mrb[119].mxu0  ;;  %v2445_v6 = vmul.f32 %v2220_v58, %v2220_v58 }
 0x240   :  { %2310 = vst [vmem:[%s4444_s2 + $0x1a0] sm:$0xff] %v2212_v34  ;;  %v2373_v12 = vadd.f32 %v2372_v42, %v2212_v34  ;;  %v2443_v43 = vmul.f32 %v2212_v34, %v2212_v34  ;;  %v2505_v50 = vadd.f32 %v2504_v23, %v2442_v52  ;;  %v2215_v14 = vadd.f32 %v2214_v10, %v4340_v55 }
 0x241   :  { %2313 = vst [vmem:[%s4444_s2 + $0x1b8] sm:$0xff] %v2223_v53  ;;  %v2446_v63 = vmul.f32 %v2223_v53, %v2223_v53 }
 0x242   :  { %v2506_v49 = vadd.f32 %v2505_v50, %v2443_v43  ;;  %2311 = vst [vmem:[%s4444_s2 + $0x1a8] sm:$0xff] %v2215_v14  ;;  %v2374_v60 = vadd.f32 %v2373_v12, %v2215_v14  ;;  %v2444_v45 = vmul.f32 %v2215_v14, %v2215_v14 }
 0x244   :  { %v2375_v7 = vadd.f32 %v2374_v60, %v2220_v58  ;;  %v2507_v46 = vadd.f32 %v2506_v49, %v2444_v45  ;;  %v1954_v4 = vpop.f32.mrb[120].mxu0  ;;  %v2867_v17 = vpop.f32.mrb[152].mxu1 }
 0x245   :  { %v1955_v47 = vadd.f32 %v1954_v4, %v4476_v62  ;;  %v2236_v28 = vadd.f32 %v2867_v17, %v1947_v56  ;;  %v1956_v55 = vpop.f32.mrb[121].mxu0  ;;  %v2227_v61 = vpop.f32.mrb[153].mxu1 }
 0x246   :  { %v2508_v44 = vadd.f32 %v2507_v46, %v2445_v6  ;;  %v2228_v13 = vadd.f32 %v2227_v61, %v4372_v39  ;;  %v2376_v51 = vadd.f32 %v2375_v7, %v2223_v53  ;;  %v1957_v33 = vpop.f32.mrb[122].mxu0  ;;  %v2868_v22 = vpop.f32.mrb[154].mxu1 }
 0x247   :  { %2316 = vst [vmem:[%s4444_s2 + $0x1d0] sm:$0xff] %v2236_v28  ;;  %v1958_v29 = vadd.f32 %v1957_v33, %v4477_v8  ;;  %v2239_v48 = vadd.f32 %v2868_v22, %v1950_v40  ;;  %v2230_v38 = vpop.f32.mrb[155].mxu1  ;;  %v1959_v15 = vpop.f32.mrb[123].mxu0  ;;  %v2449_v19 = vmul.f32 %v2236_v28, %v2236_v28 }
 0x248   :  { %2314 = vst [vmem:[%s4444_s2 + $0x1c0] sm:$0xff] %v2228_v13  ;;  %v2377_v54 = vadd.f32 %v2376_v51, %v2228_v13  ;;  %v2447_v0 = vmul.f32 %v2228_v13, %v2228_v13  ;;  %v2509_v57 = vadd.f32 %v2508_v44, %v2446_v63  ;;  %v2231_v39 = vadd.f32 %v2230_v38, %v4380_v32 }
 0x249   :  { %2317 = vst [vmem:[%s4444_s2 + $0x1d8] sm:$0xff] %v2239_v48  ;;  %v2450_v2 = vmul.f32 %v2239_v48, %v2239_v48 }
 0x24a   :  { %v2510_v30 = vadd.f32 %v2509_v57, %v2447_v0  ;;  %2315 = vst [vmem:[%s4444_s2 + $0x1c8] sm:$0xff] %v2231_v39  ;;  %v2378_v25 = vadd.f32 %v2377_v54, %v2231_v39  ;;  %v2448_v18 = vmul.f32 %v2231_v39, %v2231_v39 }
 0x24c   :  { %v2379_v16 = vadd.f32 %v2378_v25, %v2236_v28  ;;  %v2511_v26 = vadd.f32 %v2510_v30, %v2448_v18  ;;  %v1962_v9 = vpop.f32.mrb[124].mxu0  ;;  %v2871_v5 = vpop.f32.mrb[156].mxu1 }
 0x24d   :  { %v1963_v59 = vadd.f32 %v1962_v9, %v4478_v35  ;;  %v1964_v20 = vpop.f32.mrb[125].mxu0  ;;  %v2243_v32 = vpop.f32.mrb[157].mxu1 }
 0x24e   :  { %v2512_v31 = vadd.f32 %v2511_v26, %v2449_v19  ;;  %v2244_v24 = vadd.f32 %v2243_v32, %v1955_v47  ;;  %v2380_v1 = vadd.f32 %v2379_v16, %v2239_v48  ;;  %v1965_v11 = vpop.f32.mrb[126].mxu0  ;;  %v2872_v56 = vpop.f32.mrb[158].mxu1 }
 0x24f   :  { %v2252_v58 = vadd.f32 %v2871_v5, %v1963_v59  ;;  %v1966_v37 = vadd.f32 %v1965_v11, %v4479_v27  ;;  %v2246_v52 = vpop.f32.mrb[159].mxu1  ;;  %v1967_v23 = vpop.f32.mrb[127].mxu0 }
 0x250   :  { %2318 = vst [vmem:[%s4444_s2 + $0x1e0] sm:$0xff] %v2244_v24  ;;  %v2381_v34 = vadd.f32 %v2380_v1, %v2244_v24  ;;  %v2451_v42 = vmul.f32 %v2244_v24, %v2244_v24  ;;  %v2513_v21 = vadd.f32 %v2512_v31, %v2450_v2  ;;  %v2247_v41 = vadd.f32 %v2246_v52, %v1958_v29 }
 0x251   :  { %2320 = vst [vmem:[%s4444_s2 + $0x1f0] sm:$0xff] %v2252_v58  ;;  %v2255_v36 = vadd.f32 %v2872_v56, %v1966_v37  ;;  %v2453_v3 = vmul.f32 %v2252_v58, %v2252_v58 }
 0x252   :  { %v2514_v40 = vadd.f32 %v2513_v21, %v2451_v42  ;;  %2319 = vst [vmem:[%s4444_s2 + $0x1e8] sm:$0xff] %v2247_v41  ;;  %v2382_v53 = vadd.f32 %v2381_v34, %v2247_v41  ;;  %v2452_v10 = vmul.f32 %v2247_v41, %v2247_v41 }
 0x253   :  { %2321 = vst [vmem:[%s4444_s2 + $0x1f8] sm:$0xff] %v2255_v36  ;;  %v2454_v50 = vmul.f32 %v2255_v36, %v2255_v36 }
 0x254   :  { %v2383_v12 = vadd.f32 %v2382_v53, %v2252_v58  ;;  %v2515_v43 = vadd.f32 %v2514_v40, %v2452_v10 }
 0x256   :  { %v2384_v14 = vadd.f32 %v2383_v12, %v2255_v36  ;;  %v2516_v49 = vadd.f32 %v2515_v43, %v2453_v3 }
 0x258   :  { %v2385_v60 = vrot.slane %v2384_v14, 4  ;;  %v2517_v45 = vadd.f32 %v2516_v49, %v2454_v50 }
 0x25a   :  { %v2386_v6 = vadd.f32 %v2385_v60, %v2384_v14  ;;  %v2518_v7 = vrot.slane %v2517_v45, 4 }
 0x25c   :  { %v2387_v46 = vrot.slane %v2386_v6, 2  ;;  %v2519_v4 = vadd.f32 %v2518_v7, %v2517_v45 }
 0x25e   :  { %v2388_v17 = vadd.f32 %v2387_v46, %v2386_v6  ;;  %v2520_v62 = vrot.slane %v2519_v4, 2 }
 0x260   :  { %v2389_v47 = vrot.slane %v2388_v17, 1  ;;  %v2521_v28 = vadd.f32 %v2520_v62, %v2519_v4 }
 0x262   :  { %v2522_v55 = vrot.slane %v2521_v28, 1  ;;  %v2390_v61 = vadd.f32 %v2389_v47, %v2388_v17 }
 0x264   :  { %v2523_v63 = vadd.f32 %v2522_v55, %v2521_v28 }
 0x266   :  { %v2525_v44 = vsel %vm2524_vm1, %v2390_v61, %v2523_v63 }
 0x267   :  { %v2527_v13 = vsel %vm2526_vm2, %v2525_v44, 0.0 }
 0x268   :  { %2528 = vst [vmem:[%s4445_s3] sm:$0xff] %v2527_v13 }

// kernel: ems_yolo_forward.14
= control target key start
LH: loop header
LB: loop body
LE: loop exit
PB: predicated region body
PF: predicated region fallthrough
CT: control target
= control target key end

     0   :  { %vm550_vm0 = vcmask 523264   ;;  %vm940_vm1 = vcmask 1040384   ;;  %vm942_vm2 = vcmask 1041408   ;;  %s1650_s1 = inlined_call_operand.vmem [shape: bf16[576,128], index: 1, kind: input, shape index: {}]   ;;  %s1651_s0 = inlined_call_operand.vmem [shape: bf16[128,576], index: 0, kind: input, shape index: {}]   ;;  %s1652_s2 = inlined_call_operand.vmem [shape: f32[128,128], index: 2, kind: output, shape index: {0}]   ;;  %s1653_s3 = inlined_call_operand.vmem [shape: f32[8,128], index: 3, kind: output, shape index: {1}]  }
   0x1   :  { %v1209_v0 = vld [vmem:[%s1650_s1 + $0x40] sm:$0xff]   ;;  %v1213_v4 = vld [vmem:[%s1650_s1 + $0x48] sm:$0xff]   ;;  %v1217_v8 = vld [vmem:[%s1650_s1 + $0x50] sm:$0xff]  }
   0x2   :  { %v1210_v1 = vld [vmem:[%s1650_s1 + $0xc0] sm:$0xff]   ;;  %1037 = vmatprep.subr.bf16.mxu0 %v1209_v0  ;;  %v1214_v5 = vld [vmem:[%s1650_s1 + $0xc8] sm:$0xff]   ;;  %v1218_v9 = vld [vmem:[%s1650_s1 + $0xd0] sm:$0xff]  }
   0x3   :  { %v1211_v2 = vld [vmem:[%s1650_s1] sm:$0xff]   ;;  %1101 = vmatprep.subr.bf16.mxu1 %v1210_v1  ;;  %v1215_v6 = vld [vmem:[%s1650_s1 + $0x8] sm:$0xff]   ;;  %v1219_v10 = vld [vmem:[%s1650_s1 + $0x10] sm:$0xff]  }
   0x4   :  { %v1212_v3 = vld [vmem:[%s1650_s1 + $0x80] sm:$0xff]   ;;  %1038 = vmatpush3.bf16.msra.mxu0 %v1211_v2  ;;  %v1216_v7 = vld [vmem:[%s1650_s1 + $0x88] sm:$0xff]   ;;  %v1220_v11 = vld [vmem:[%s1650_s1 + $0x90] sm:$0xff]  }
   0x5   :  { %1102 = vmatpush3.bf16.msra.mxu1 %v1212_v3  ;;  %1039 = vmatprep.subr.bf16.mxu0 %v1213_v4  ;;  %v1221_v12 = vld [vmem:[%s1650_s1 + $0x58] sm:$0xff]   ;;  %v1225_v16 = vld [vmem:[%s1650_s1 + $0x60] sm:$0xff]   ;;  %v1229_v20 = vld [vmem:[%s1650_s1 + $0x68] sm:$0xff]  }
   0x6   :  { %1103 = vmatprep.subr.bf16.mxu1 %v1214_v5  ;;  %v1222_v13 = vld [vmem:[%s1650_s1 + $0xd8] sm:$0xff]   ;;  %v1226_v17 = vld [vmem:[%s1650_s1 + $0xe0] sm:$0xff]   ;;  %v1230_v21 = vld [vmem:[%s1650_s1 + $0xe8] sm:$0xff]  }
   0x7   :  { %v1223_v14 = vld [vmem:[%s1650_s1 + $0x18] sm:$0xff]   ;;  %v1227_v18 = vld [vmem:[%s1650_s1 + $0x20] sm:$0xff]   ;;  %v1231_v22 = vld [vmem:[%s1650_s1 + $0x28] sm:$0xff]  }
   0x8   :  { %1040 = vmatpush3.bf16.msra.mxu0 %v1215_v6  ;;  %v1224_v15 = vld [vmem:[%s1650_s1 + $0x98] sm:$0xff]   ;;  %v1228_v19 = vld [vmem:[%s1650_s1 + $0xa0] sm:$0xff]   ;;  %v1232_v23 = vld [vmem:[%s1650_s1 + $0xa8] sm:$0xff]  }
   0x9   :  { %1104 = vmatpush3.bf16.msra.mxu1 %v1216_v7  ;;  %1041 = vmatprep.subr.bf16.mxu0 %v1217_v8  ;;  %v1233_v24 = vld [vmem:[%s1650_s1 + $0x70] sm:$0xff]   ;;  %v1237_v28 = vld [vmem:[%s1650_s1 + $0x78] sm:$0xff]   ;;  %v1246_v35 = vld [vmem:[%s1651_s0 + $0xc] ss:$20 sps:$4 sm:$0xff]  }
   0xa   :  { %1105 = vmatprep.subr.bf16.mxu1 %v1218_v9  ;;  %v1234_v25 = vld [vmem:[%s1650_s1 + $0xf0] sm:$0xff]   ;;  %v1238_v29 = vld [vmem:[%s1650_s1 + $0xf8] sm:$0xff]   ;;  %v1247_v36 = vld [vmem:[%s1650_s1 + $0x100] sm:$0xff]   ;;  %704 = vmatprep.mubr.bf16.mxu1 %v1246_v35 }
   0xb   :  { %v1235_v26 = vld [vmem:[%s1650_s1 + $0x30] sm:$0xff]   ;;  %v1239_v30 = vld [vmem:[%s1650_s1 + $0x38] sm:$0xff]   ;;  %v1248_v37 = vld [vmem:[%s1651_s0 + $0x2c] ss:$20 sps:$4 sm:$0xff]  }
   0xc   :  { %1042 = vmatpush3.bf16.msra.mxu0 %v1219_v10  ;;  %v1236_v27 = vld [vmem:[%s1650_s1 + $0xb0] sm:$0xff]   ;;  %v1240_v31 = vld [vmem:[%s1650_s1 + $0xb8] sm:$0xff]   ;;  %v1260_v42 = vld [vmem:[%s1650_s1 + $0x108] sm:$0xff]  }
   0xd   :  { %1106 = vmatpush3.bf16.msra.mxu1 %v1220_v11  ;;  %1043 = vmatprep.subr.bf16.mxu0 %v1221_v12  ;;  %v1241_v32 = vld [vmem:[%s1651_s0] ss:$20 sps:$4 sm:$0xff]   ;;  %v1243_v33 = vld [vmem:[%s1651_s0 + $0x4] ss:$20 sps:$4 sm:$0xff]   ;;  %v1244_v34 = vld [vmem:[%s1651_s0 + $0x8] ss:$20 sps:$4 sm:$0xff]  }
   0xe   :  { %1107 = vmatprep.subr.bf16.mxu1 %v1222_v13  ;;  %607 = vmatprep.mubr.bf16.mxu0 %v1243_v33  ;;  %v1250_v38 = vld [vmem:[%s1651_s0 + $0x34] ss:$20 sps:$4 sm:$0xff]   ;;  %v1253_v40 = vld [vmem:[%s1651_s0 + $0x30] ss:$20 sps:$4 sm:$0xff]   ;;  %v1259_v45 = vld [vmem:[%s1651_s0 + $0x58] ss:$20 sps:$4 sm:$0xff]  }
   0xf   :  { %v1252_v39 = vld [vmem:[%s1651_s0 + $0x28] ss:$20 sps:$4 sm:$0xff]   ;;  %v1258_v44 = vld [vmem:[%s1651_s0 + $0x50] ss:$20 sps:$4 sm:$0xff]   ;;  %v1265_v50 = vld [vmem:[%s1651_s0 + $0x78] ss:$20 sps:$4 sm:$0xff]  }
  0x10   :  { %1044 = vmatpush3.bf16.msra.mxu0 %v1223_v14  ;;  %v1254_v41 = vld [vmem:[%s1651_s0 + $0x54] ss:$20 sps:$4 sm:$0xff]   ;;  %v1256_v43 = vld [vmem:[%s1651_s0 + $0x5c] ss:$20 sps:$4 sm:$0xff]   ;;  %v1263_v48 = vld [vmem:[%s1651_s0 + $0x84] ss:$20 sps:$4 sm:$0xff]  }
  0x11   :  { %1108 = vmatpush3.bf16.msra.mxu1 %v1224_v15  ;;  %1045 = vmatprep.subr.bf16.mxu0 %v1225_v16  ;;  %v1273_v46 = vld [vmem:[%s1650_s1 + $0x110] sm:$0xff]   ;;  %v1286_v49 = vld [vmem:[%s1650_s1 + $0x118] sm:$0xff]   ;;  %v1269_v53 = vld [vmem:[%s1651_s0 + $0xac] ss:$20 sps:$4 sm:$0xff]  }
  0x12   :  { %1109 = vmatprep.subr.bf16.mxu1 %v1226_v17  ;;  %v1261_v47 = vld [vmem:[%s1651_s0 + $0x7c] ss:$20 sps:$4 sm:$0xff]   ;;  %v1266_v51 = vld [vmem:[%s1651_s0 + $0x80] ss:$20 sps:$4 sm:$0xff]   ;;  %v1267_v52 = vld [vmem:[%s1651_s0 + $0xa4] ss:$20 sps:$4 sm:$0xff]  }
  0x13   :  { %v1271_v54 = vld [vmem:[%s1651_s0 + $0xa0] ss:$20 sps:$4 sm:$0xff]   ;;  %v1272_v55 = vld [vmem:[%s1651_s0 + $0xa8] ss:$20 sps:$4 sm:$0xff]   ;;  %v1279_v59 = vld [vmem:[%s1651_s0 + $0xd0] ss:$20 sps:$4 sm:$0xff]  }
  0x14   :  { %1046 = vmatpush3.bf16.msra.mxu0 %v1227_v18  ;;  %v1274_v56 = vld [vmem:[%s1651_s0 + $0xcc] ss:$20 sps:$4 sm:$0xff]   ;;  %v1276_v57 = vld [vmem:[%s1651_s0 + $0xd4] ss:$20 sps:$4 sm:$0xff]   ;;  %v1282_v61 = vld [vmem:[%s1651_s0 + $0xfc] ss:$20 sps:$4 sm:$0xff]  }
  0x15   :  { %1110 = vmatpush3.bf16.msra.mxu1 %v1228_v19  ;;  %1047 = vmatprep.subr.bf16.mxu0 %v1229_v20  ;;  %v1278_v58 = vld [vmem:[%s1651_s0 + $0xc8] ss:$20 sps:$4 sm:$0xff]   ;;  %v1284_v62 = vld [vmem:[%s1651_s0 + $0xf0] ss:$20 sps:$4 sm:$0xff]   ;;  %v1285_v63 = vld [vmem:[%s1651_s0 + $0xf8] ss:$20 sps:$4 sm:$0xff]  }
  0x16   :  { %1111 = vmatprep.subr.bf16.mxu1 %v1230_v21  ;;  %v1280_v60 = vld [vmem:[%s1651_s0 + $0xf4] ss:$20 sps:$4 sm:$0xff]   ;;  %v1287_v0 = vld [vmem:[%s1651_s0 + $0x11c] ss:$20 sps:$4 sm:$0xff]   ;;  %v1289_v1 = vld [vmem:[%s1651_s0 + $0x124] ss:$20 sps:$4 sm:$0xff]  }
  0x17   :  { %v1291_v2 = vld [vmem:[%s1651_s0 + $0x118] ss:$20 sps:$4 sm:$0xff]   ;;  %v1292_v3 = vld [vmem:[%s1651_s0 + $0x120] ss:$20 sps:$4 sm:$0xff]   ;;  %v1293_v4 = vld [vmem:[%s1651_s0 + $0x10] ss:$20 sps:$4 sm:$0xff]  }
  0x18   :  { %1048 = vmatpush3.bf16.msra.mxu0 %v1231_v22  ;;  %v1294_v5 = vld [vmem:[%s1651_s0 + $0xb0] ss:$20 sps:$4 sm:$0xff]   ;;  %v1295_v6 = vld [vmem:[%s1651_s0 + $0x38] ss:$20 sps:$4 sm:$0xff]   ;;  %v1297_v8 = vld [vmem:[%s1651_s0 + $0x60] ss:$20 sps:$4 sm:$0xff]  }
  0x19   :  { %1112 = vmatpush3.bf16.msra.mxu1 %v1232_v23  ;;  %1049 = vmatprep.subr.bf16.mxu0 %v1233_v24  ;;  %v1296_v7 = vld [vmem:[%s1651_s0 + $0xd8] ss:$20 sps:$4 sm:$0xff]   ;;  %v1298_v9 = vld [vmem:[%s1651_s0 + $0x100] ss:$20 sps:$4 sm:$0xff]   ;;  %v1299_v10 = vld [vmem:[%s1651_s0 + $0x88] ss:$20 sps:$4 sm:$0xff]  }
  0x1a   :  { %1113 = vmatprep.subr.bf16.mxu1 %v1234_v25  ;;  %v1300_v11 = vld [vmem:[%s1651_s0 + $0x128] ss:$20 sps:$4 sm:$0xff]  }
  0x1c   :  { %1050 = vmatpush3.bf16.msra.mxu0 %v1235_v26 }
  0x1d   :  { %1114 = vmatpush3.bf16.msra.mxu1 %v1236_v27  ;;  %1051 = vmatprep.subr.bf16.mxu0 %v1237_v28 }
  0x1e   :  { %1115 = vmatprep.subr.bf16.mxu1 %v1238_v29 }
  0x20   :  { %1052 = vmatpush3.bf16.msra.mxu0 %v1239_v30 }
  0x21   :  { %1116 = vmatpush3.bf16.msra.mxu1 %v1240_v31  ;;  %1177 = vmatprep.subr.bf16.mxu0 %v1247_v36 }
  0x22   :  { %1201 = vmatprep.subr.bf16.mxu1 %v1247_v36 }
  0x23   :  { %608 = vmatmul.mubr.bf16.vlgmr.msra.gmra.mrb[0].mxu0 %v1241_v32 }
  0x24   :  { %705 = vmatmul.mubr.bf16.vlgmr.msra.gmra.mrb[0].mxu1 %v1244_v34  ;;  %1178 = vmatpush3.bf16.msra.mxu0 %v1247_v36 }
  0x25   :  { %615 = vmatprep.mubr.bf16.mxu0 %v1248_v37  ;;  %712 = vmatprep.mubr.bf16.mxu1 %v1250_v38 }
  0x26   :  { %1205 = vmatpush3.bf16.msra.mxu1 %v1247_v36  ;;  %1179 = vmatprep.subr.bf16.mxu0 %v1260_v42 }
  0x27   :  { %1202 = vmatprep.subr.bf16.mxu1 %v1260_v42 }
  0x28   :  { %1180 = vmatpush3.bf16.msra.mxu0 %v1260_v42 }
  0x29   :  { %1181 = vmatprep.subr.bf16.mxu0 %v1273_v46 }
  0x2a   :  { %1206 = vmatpush3.bf16.msra.mxu1 %v1260_v42 }
  0x2b   :  { %616 = vmatmul.mubr.bf16.gmra.mrb[4].mxu0 %v1252_v39  ;;  %1203 = vmatprep.subr.bf16.mxu1 %v1273_v46 }
  0x2c   :  { %713 = vmatmul.mubr.bf16.gmra.mrb[4].mxu1 %v1253_v40  ;;  %623 = vmatprep.mubr.bf16.mxu0 %v1254_v41 }
  0x2d   :  { %720 = vmatprep.mubr.bf16.mxu1 %v1256_v43  ;;  %1182 = vmatpush3.bf16.msra.mxu0 %v1273_v46 }
  0x2e   :  { %1207 = vmatpush3.bf16.msra.mxu1 %v1273_v46  ;;  %1183 = vmatprep.subr.bf16.mxu0 %v1286_v49 }
  0x2f   :  { %1204 = vmatprep.subr.bf16.mxu1 %v1286_v49 }
  0x31   :  { %1184 = vmatpush3.bf16.msra.mxu0 %v1286_v49 }
  0x32   :  { %1208 = vmatpush3.bf16.msra.mxu1 %v1286_v49 }
  0x33   :  { %624 = vmatmul.mubr.bf16.gmra.mrb[8].mxu0 %v1258_v44 }
  0x34   :  { %721 = vmatmul.mubr.bf16.gmra.mrb[8].mxu1 %v1259_v45  ;;  %631 = vmatprep.mubr.bf16.mxu0 %v1261_v47 }
  0x35   :  { %728 = vmatprep.mubr.bf16.mxu1 %v1263_v48 }
  0x3b   :  { %632 = vmatmul.mubr.bf16.gmra.mrb[12].mxu0 %v1265_v50 }
  0x3c   :  { %729 = vmatmul.mubr.bf16.gmra.mrb[12].mxu1 %v1266_v51  ;;  %639 = vmatprep.mubr.bf16.mxu0 %v1267_v52 }
  0x3d   :  { %736 = vmatprep.mubr.bf16.mxu1 %v1269_v53 }
  0x43   :  { %640 = vmatmul.mubr.bf16.gmra.mrb[16].mxu0 %v1271_v54 }
  0x44   :  { %737 = vmatmul.mubr.bf16.gmra.mrb[16].mxu1 %v1272_v55  ;;  %647 = vmatprep.mubr.bf16.mxu0 %v1274_v56 }
  0x45   :  { %744 = vmatprep.mubr.bf16.mxu1 %v1276_v57 }
  0x4b   :  { %648 = vmatmul.mubr.bf16.gmra.mrb[20].mxu0 %v1278_v58 }
  0x4c   :  { %745 = vmatmul.mubr.bf16.gmra.mrb[20].mxu1 %v1279_v59  ;;  %655 = vmatprep.mubr.bf16.mxu0 %v1280_v60 }
  0x4d   :  { %752 = vmatprep.mubr.bf16.mxu1 %v1282_v61 }
  0x53   :  { %656 = vmatmul.mubr.bf16.gmra.mrb[24].mxu0 %v1284_v62 }
  0x54   :  { %753 = vmatmul.mubr.bf16.gmra.mrb[24].mxu1 %v1285_v63  ;;  %663 = vmatprep.mubr.bf16.mxu0 %v1287_v0 }
  0x55   :  { %760 = vmatprep.mubr.bf16.mxu1 %v1289_v1 }
  0x5b   :  { %664 = vmatmul.mubr.bf16.gmra.mrb[28].mxu0 %v1291_v2 }
  0x5c   :  { %761 = vmatmul.mubr.bf16.gmra.mrb[28].mxu1 %v1292_v3  ;;  %1185 = vmatprep.mubr.msk.bf16.mxu0 %vm550_vm0, %v1293_v4 }
  0x5d   :  { %1193 = vmatprep.mubr.msk.bf16.mxu1 %vm550_vm0, %v1294_v5 }
  0x63   :  { %1186 = vmatmul.mubr.msk.bf16.vlgmr.msra.gmra.mrb[32].mxu0 %vm550_vm0, %v1295_v6 }
  0x64   :  { %1194 = vmatmul.mubr.msk.bf16.vlgmr.msra.gmra.mrb[32].mxu1 %vm550_vm0, %v1296_v7  ;;  %1189 = vmatprep.mubr.msk.bf16.mxu0 %vm550_vm0, %v1297_v8 }
  0x65   :  { %1197 = vmatprep.mubr.msk.bf16.mxu1 %vm550_vm0, %v1298_v9 }
  0x6b   :  { %1190 = vmatmul.mubr.msk.bf16.gmra.mrb[36].mxu0 %vm550_vm0, %v1299_v10 }
  0x6c   :  { %1198 = vmatmul.mubr.msk.bf16.gmra.mrb[36].mxu1 %vm550_vm0, %v1300_v11 }
  0xf6   :  { %v1053_v12 = vpop.f32.mrb[0].mxu0 }
  0xf7   :  { %v1117_v13 = vpop.f32.mrb[0].mxu1  ;;  %v1054_v14 = vpop.f32.mrb[1].mxu0 }
  0xf8   :  { %v1055_v15 = vadd.f32 %v1054_v14, %v1053_v12  ;;  %v1118_v16 = vpop.f32.mrb[1].mxu1  ;;  %v1056_v17 = vpop.f32.mrb[2].mxu0 }
  0xf9   :  { %v1119_v18 = vadd.f32 %v1118_v16, %v1117_v13  ;;  %v1120_v19 = vpop.f32.mrb[2].mxu1  ;;  %v1057_v20 = vpop.f32.mrb[3].mxu0 }
  0xfa   :  { %v1058_v21 = vadd.f32 %v1057_v20, %v1056_v17  ;;  %v1121_v22 = vpop.f32.mrb[3].mxu1 }
  0xfb   :  { %v1122_v23 = vadd.f32 %v1121_v22, %v1120_v19  ;;  %v1557_v24 = vadd.f32 %v1119_v18, %v1055_v15 }
  0xfd   :  { %v1559_v25 = vadd.f32 %v1122_v23, %v1058_v21 }
  0xfe   :  { %v1059_v26 = vpop.f32.mrb[4].mxu0 }
  0xff   :  { %v1123_v27 = vpop.f32.mrb[4].mxu1  ;;  %v1060_v28 = vpop.f32.mrb[5].mxu0 }
 0x100   :  { %v1061_v29 = vadd.f32 %v1060_v28, %v1059_v26  ;;  %v1124_v30 = vpop.f32.mrb[5].mxu1  ;;  %v1062_v31 = vpop.f32.mrb[6].mxu0 }
 0x101   :  { %v1125_v32 = vadd.f32 %v1124_v30, %v1123_v27  ;;  %v1126_v33 = vpop.f32.mrb[6].mxu1  ;;  %v1063_v34 = vpop.f32.mrb[7].mxu0 }
 0x102   :  { %v1064_v35 = vadd.f32 %v1063_v34, %v1062_v31  ;;  %v1127_v36 = vpop.f32.mrb[7].mxu1 }
 0x103   :  { %v1128_v37 = vadd.f32 %v1127_v36, %v1126_v33  ;;  %v1561_v38 = vadd.f32 %v1125_v32, %v1061_v29 }
 0x105   :  { %v1563_v39 = vadd.f32 %v1128_v37, %v1064_v35 }
 0x106   :  { %v1065_v40 = vpop.f32.mrb[8].mxu0 }
 0x107   :  { %v1129_v41 = vpop.f32.mrb[8].mxu1  ;;  %v1066_v42 = vpop.f32.mrb[9].mxu0 }
 0x108   :  { %v1067_v43 = vadd.f32 %v1066_v42, %v1065_v40  ;;  %v1130_v44 = vpop.f32.mrb[9].mxu1  ;;  %v1068_v45 = vpop.f32.mrb[10].mxu0 }
 0x109   :  { %v1131_v46 = vadd.f32 %v1130_v44, %v1129_v41  ;;  %v1132_v47 = vpop.f32.mrb[10].mxu1  ;;  %v1069_v48 = vpop.f32.mrb[11].mxu0 }
 0x10a   :  { %v1070_v49 = vadd.f32 %v1069_v48, %v1068_v45  ;;  %v1133_v50 = vpop.f32.mrb[11].mxu1 }
 0x10b   :  { %v1134_v51 = vadd.f32 %v1133_v50, %v1132_v47  ;;  %v1565_v52 = vadd.f32 %v1131_v46, %v1067_v43 }
 0x10d   :  { %v1567_v53 = vadd.f32 %v1134_v51, %v1070_v49 }
 0x10e   :  { %v1071_v54 = vpop.f32.mrb[12].mxu0 }
 0x10f   :  { %v1135_v55 = vpop.f32.mrb[12].mxu1  ;;  %v1072_v56 = vpop.f32.mrb[13].mxu0 }
 0x110   :  { %v1073_v57 = vadd.f32 %v1072_v56, %v1071_v54  ;;  %v1136_v58 = vpop.f32.mrb[13].mxu1  ;;  %v1074_v59 = vpop.f32.mrb[14].mxu0 }
 0x111   :  { %v1137_v60 = vadd.f32 %v1136_v58, %v1135_v55  ;;  %v1138_v61 = vpop.f32.mrb[14].mxu1  ;;  %v1075_v62 = vpop.f32.mrb[15].mxu0 }
 0x112   :  { %v1076_v63 = vadd.f32 %v1075_v62, %v1074_v59  ;;  %v1139_v0 = vpop.f32.mrb[15].mxu1 }
 0x113   :  { %v1140_v1 = vadd.f32 %v1139_v0, %v1138_v61  ;;  %v1569_v2 = vadd.f32 %v1137_v60, %v1073_v57 }
 0x115   :  { %v1571_v3 = vadd.f32 %v1140_v1, %v1076_v63 }
 0x116   :  { %v1077_v4 = vpop.f32.mrb[16].mxu0 }
 0x117   :  { %v1141_v5 = vpop.f32.mrb[16].mxu1  ;;  %v1078_v6 = vpop.f32.mrb[17].mxu0 }
 0x118   :  { %v1079_v7 = vadd.f32 %v1078_v6, %v1077_v4  ;;  %v1142_v8 = vpop.f32.mrb[17].mxu1  ;;  %v1080_v9 = vpop.f32.mrb[18].mxu0 }
 0x119   :  { %v1143_v10 = vadd.f32 %v1142_v8, %v1141_v5  ;;  %v1144_v11 = vpop.f32.mrb[18].mxu1  ;;  %v1081_v12 = vpop.f32.mrb[19].mxu0 }
 0x11a   :  { %v1082_v13 = vadd.f32 %v1081_v12, %v1080_v9  ;;  %v1145_v14 = vpop.f32.mrb[19].mxu1 }
 0x11b   :  { %v1146_v15 = vadd.f32 %v1145_v14, %v1144_v11  ;;  %v739_v16 = vadd.f32 %v1143_v10, %v1079_v7 }
 0x11d   :  { %v1573_v17 = vadd.f32 %v1146_v15, %v1082_v13 }
 0x11e   :  { %v1083_v18 = vpop.f32.mrb[20].mxu0 }
 0x11f   :  { %v1147_v19 = vpop.f32.mrb[20].mxu1  ;;  %v1084_v20 = vpop.f32.mrb[21].mxu0 }
 0x120   :  { %v1085_v21 = vadd.f32 %v1084_v20, %v1083_v18  ;;  %v1148_v22 = vpop.f32.mrb[21].mxu1  ;;  %v1086_v23 = vpop.f32.mrb[22].mxu0 }
 0x121   :  { %v1149_v26 = vadd.f32 %v1148_v22, %v1147_v19  ;;  %v1150_v27 = vpop.f32.mrb[22].mxu1  ;;  %v1087_v28 = vpop.f32.mrb[23].mxu0 }
 0x122   :  { %v1088_v29 = vadd.f32 %v1087_v28, %v1086_v23  ;;  %v1151_v30 = vpop.f32.mrb[23].mxu1 }
 0x123   :  { %v1152_v31 = vadd.f32 %v1151_v30, %v1150_v27  ;;  %v747_v32 = vadd.f32 %v1149_v26, %v1085_v21 }
 0x125   :  { %v750_v33 = vadd.f32 %v1152_v31, %v1088_v29 }
 0x126   :  { %v1089_v34 = vpop.f32.mrb[24].mxu0 }
 0x127   :  { %v1153_v35 = vpop.f32.mrb[24].mxu1  ;;  %v1090_v36 = vpop.f32.mrb[25].mxu0 }
 0x128   :  { %v1091_v37 = vadd.f32 %v1090_v36, %v1089_v34  ;;  %v1154_v40 = vpop.f32.mrb[25].mxu1  ;;  %v1092_v41 = vpop.f32.mrb[26].mxu0 }
 0x129   :  { %v1155_v42 = vadd.f32 %v1154_v40, %v1153_v35  ;;  %v1156_v43 = vpop.f32.mrb[26].mxu1  ;;  %v1093_v44 = vpop.f32.mrb[27].mxu0 }
 0x12a   :  { %v1094_v45 = vadd.f32 %v1093_v44, %v1092_v41  ;;  %v1157_v46 = vpop.f32.mrb[27].mxu1 }
 0x12b   :  { %v1158_v47 = vadd.f32 %v1157_v46, %v1156_v43  ;;  %v755_v48 = vadd.f32 %v1155_v42, %v1091_v37 }
 0x12d   :  { %v1575_v49 = vadd.f32 %v1158_v47, %v1094_v45 }
 0x12e   :  { %v1095_v50 = vpop.f32.mrb[28].mxu0 }
 0x12f   :  { %v1159_v51 = vpop.f32.mrb[28].mxu1  ;;  %v1096_v54 = vpop.f32.mrb[29].mxu0 }
 0x130   :  { %v1097_v55 = vadd.f32 %v1096_v54, %v1095_v50  ;;  %v1160_v56 = vpop.f32.mrb[29].mxu1  ;;  %v1098_v57 = vpop.f32.mrb[30].mxu0 }
 0x131   :  { %v1161_v58 = vadd.f32 %v1160_v56, %v1159_v51  ;;  %v1162_v59 = vpop.f32.mrb[30].mxu1  ;;  %v1099_v60 = vpop.f32.mrb[31].mxu0 }
 0x132   :  { %v1100_v61 = vadd.f32 %v1099_v60, %v1098_v57  ;;  %v1163_v62 = vpop.f32.mrb[31].mxu1 }
 0x133   :  { %v1164_v63 = vadd.f32 %v1163_v62, %v1162_v59  ;;  %v763_v0 = vadd.f32 %v1161_v58, %v1097_v55 }
 0x135   :  { %v766_v1 = vadd.f32 %v1164_v63, %v1100_v61 }
 0x136   :  { %v1187_v4 = vpop.f32.mrb[32].mxu0 }
 0x137   :  { %v812_v5 = vadd.f32 %v1187_v4, %v1561_v38  ;;  %v1195_v6 = vpop.f32.mrb[32].mxu1  ;;  %v803_v7 = vpop.f32.mrb[33].mxu0 }
 0x138   :  { %v1578_v8 = vadd.f32 %v1195_v6, %v747_v32  ;;  %v804_v9 = vadd.f32 %v803_v7, %v1557_v24  ;;  %v835_v10 = vpop.f32.mrb[33].mxu1  ;;  %v1188_v11 = vpop.f32.mrb[34].mxu0 }
 0x139   :  { %868 = vst [vmem:[%s1652_s2 + $0x10] sm:$0xff] %v812_v5  ;;  %v836_v12 = vadd.f32 %v835_v10, %v739_v16  ;;  %v815_v13 = vadd.f32 %v1188_v11, %v1563_v39  ;;  %v1196_v14 = vpop.f32.mrb[34].mxu1  ;;  %v806_v15 = vpop.f32.mrb[35].mxu0  ;;  %v905_v20 = vmul.f32 %v812_v5, %v812_v5 }
 0x13a   :  { %876 = vst [vmem:[%s1652_s2 + $0x50] sm:$0xff] %v1578_v8  ;;  %866 = vst [vmem:[%s1652_s2] sm:$0xff] %v804_v9  ;;  %v1592_v24 = vadd.f32 %v1196_v14, %v750_v33  ;;  %v807_v38 = vadd.f32 %v806_v15, %v1559_v25  ;;  %v838_v18 = vpop.f32.mrb[35].mxu1  ;;  %v903_v16 = vmul.f32 %v804_v9, %v804_v9 }
 0x13b   :  { %874 = vst [vmem:[%s1652_s2 + $0x40] sm:$0xff] %v836_v12  ;;  %869 = vst [vmem:[%s1652_s2 + $0x18] sm:$0xff] %v815_v13  ;;  %v839_v39 = vadd.f32 %v838_v18, %v1573_v17  ;;  %v906_v23 = vmul.f32 %v815_v13, %v815_v13  ;;  %v911_v55 = vmul.f32 %v836_v12, %v836_v12 }
 0x13c   :  { %877 = vst [vmem:[%s1652_s2 + $0x58] sm:$0xff] %v1592_v24  ;;  %867 = vst [vmem:[%s1652_s2 + $0x8] sm:$0xff] %v807_v38  ;;  %v882_v25 = vadd.f32 %v807_v38, %v804_v9  ;;  %v904_v19 = vmul.f32 %v807_v38, %v807_v38  ;;  %v913_v61 = vmul.f32 %v1578_v8, %v1578_v8 }
 0x13d   :  { %875 = vst [vmem:[%s1652_s2 + $0x48] sm:$0xff] %v839_v39  ;;  %v912_v58 = vmul.f32 %v839_v39, %v839_v39 }
 0x13e   :  { %v883_v21 = vadd.f32 %v882_v25, %v812_v5  ;;  %v919_v22 = vadd.f32 %v904_v19, %v903_v16  ;;  %v1191_v17 = vpop.f32.mrb[36].mxu0 }
 0x13f   :  { %v828_v26 = vadd.f32 %v1191_v17, %v1569_v2  ;;  %v1199_v27 = vpop.f32.mrb[36].mxu1  ;;  %v819_v28 = vpop.f32.mrb[37].mxu0 }
 0x140   :  { %v920_v29 = vadd.f32 %v919_v22, %v905_v20  ;;  %v860_v30 = vadd.f32 %v1199_v27, %v763_v0  ;;  %v820_v31 = vadd.f32 %v819_v28, %v1565_v52  ;;  %v884_v32 = vadd.f32 %v883_v21, %v815_v13  ;;  %v851_v33 = vpop.f32.mrb[37].mxu1  ;;  %v1192_v34 = vpop.f32.mrb[38].mxu0 }
 0x141   :  { %872 = vst [vmem:[%s1652_s2 + $0x30] sm:$0xff] %v828_v26  ;;  %v852_v35 = vadd.f32 %v851_v33, %v755_v48  ;;  %v831_v36 = vadd.f32 %v1192_v34, %v1571_v3  ;;  %v1200_v37 = vpop.f32.mrb[38].mxu1  ;;  %v822_v40 = vpop.f32.mrb[39].mxu0  ;;  %v909_v48 = vmul.f32 %v828_v26, %v828_v26  ;;  %v914_v0 = vmul.f32 %v1592_v24, %v1592_v24 }
 0x142   :  { %880 = vst [vmem:[%s1652_s2 + $0x70] sm:$0xff] %v860_v30  ;;  %870 = vst [vmem:[%s1652_s2 + $0x20] sm:$0xff] %v820_v31  ;;  %v885_v52 = vadd.f32 %v884_v32, %v820_v31  ;;  %v907_v2 = vmul.f32 %v820_v31, %v820_v31  ;;  %v921_v41 = vadd.f32 %v920_v29, %v906_v23  ;;  %v854_v42 = vpop.f32.mrb[39].mxu1 }
 0x143   :  { %878 = vst [vmem:[%s1652_s2 + $0x60] sm:$0xff] %v852_v35  ;;  %873 = vst [vmem:[%s1652_s2 + $0x38] sm:$0xff] %v831_v36  ;;  %v863_v3 = vadd.f32 %v1200_v37, %v766_v1  ;;  %v823_v43 = vadd.f32 %v822_v40, %v1567_v53  ;;  %v855_v45 = vadd.f32 %v854_v42, %v1575_v49 }
 0x144   :  { %v922_v44 = vadd.f32 %v921_v41, %v907_v2  ;;  %v910_v51 = vmul.f32 %v831_v36, %v831_v36  ;;  %v915_v5 = vmul.f32 %v852_v35, %v852_v35 }
 0x145   :  { %881 = vst [vmem:[%s1652_s2 + $0x78] sm:$0xff] %v863_v3  ;;  %871 = vst [vmem:[%s1652_s2 + $0x28] sm:$0xff] %v823_v43  ;;  %v886_v46 = vadd.f32 %v885_v52, %v823_v43  ;;  %v908_v47 = vmul.f32 %v823_v43, %v823_v43  ;;  %v916_v10 = vmul.f32 %v855_v45, %v855_v45 }
 0x146   :  { %879 = vst [vmem:[%s1652_s2 + $0x68] sm:$0xff] %v855_v45  ;;  %v918_v15 = vmul.f32 %v863_v3, %v863_v3 }
 0x147   :  { %v887_v50 = vadd.f32 %v886_v46, %v828_v26  ;;  %v923_v53 = vadd.f32 %v922_v44, %v908_v47 }
 0x149   :  { %v888_v54 = vadd.f32 %v887_v50, %v831_v36  ;;  %v924_v49 = vadd.f32 %v923_v53, %v909_v48 }
 0x14b   :  { %v889_v56 = vadd.f32 %v888_v54, %v836_v12  ;;  %v925_v57 = vadd.f32 %v924_v49, %v910_v51  ;;  %v917_v12 = vmul.f32 %v860_v30, %v860_v30 }
 0x14d   :  { %v926_v59 = vadd.f32 %v925_v57, %v911_v55  ;;  %v890_v60 = vadd.f32 %v889_v56, %v839_v39 }
 0x14f   :  { %v891_v62 = vadd.f32 %v890_v60, %v1578_v8  ;;  %v927_v63 = vadd.f32 %v926_v59, %v912_v58 }
 0x151   :  { %v892_v1 = vadd.f32 %v891_v62, %v1592_v24  ;;  %v928_v4 = vadd.f32 %v927_v63, %v913_v61 }
 0x153   :  { %v893_v6 = vadd.f32 %v892_v1, %v852_v35  ;;  %v929_v7 = vadd.f32 %v928_v4, %v914_v0 }
 0x155   :  { %v894_v9 = vadd.f32 %v893_v6, %v855_v45  ;;  %v930_v11 = vadd.f32 %v929_v7, %v915_v5 }
 0x157   :  { %v895_v13 = vadd.f32 %v894_v9, %v860_v30  ;;  %v931_v14 = vadd.f32 %v930_v11, %v916_v10 }
 0x159   :  { %v896_v38 = vadd.f32 %v895_v13, %v863_v3  ;;  %v932_v18 = vadd.f32 %v931_v14, %v917_v12 }
 0x15b   :  { %v897_v8 = vrot.slane %v896_v38, 4  ;;  %v933_v39 = vadd.f32 %v932_v18, %v918_v15 }
 0x15d   :  { %v898_v16 = vadd.f32 %v897_v8, %v896_v38  ;;  %v934_v25 = vrot.slane %v933_v39, 4 }
 0x15f   :  { %v899_v19 = vrot.slane %v898_v16, 2  ;;  %v935_v20 = vadd.f32 %v934_v25, %v933_v39 }
 0x161   :  { %v900_v24 = vadd.f32 %v899_v19, %v898_v16  ;;  %v936_v21 = vrot.slane %v935_v20, 2 }
 0x163   :  { %v901_v22 = vrot.slane %v900_v24, 1  ;;  %v937_v17 = vadd.f32 %v936_v21, %v935_v20 }
 0x165   :  { %v938_v23 = vrot.slane %v937_v17, 1  ;;  %v902_v26 = vadd.f32 %v901_v22, %v900_v24 }
 0x167   :  { %v939_v27 = vadd.f32 %v938_v23, %v937_v17 }
 0x169   :  { %v941_v28 = vsel %vm940_vm1, %v902_v26, %v939_v27 }
 0x16a   :  { %v943_v29 = vsel %vm942_vm2, %v941_v28, 0.0 }
 0x16b   :  { %944 = vst [vmem:[%s1653_s3] sm:$0xff] %v943_v29 }

// kernel: ems_yolo_forward.15
= control target key start
LH: loop header
LB: loop body
LE: loop exit
PB: predicated region body
PF: predicated region fallthrough
CT: control target
= control target key end

     0   :  { %v290_v24 = vmov 0.0   ;;  %s441_s0 = inlined_call_operand.vmem [shape: f32[128,128], index: 0, kind: input, shape index: {}]   ;;  %s442_s1 = inlined_call_operand.vmem [shape: f32[1,128], index: 1, kind: input, shape index: {}]   ;;  %s443_s2 = inlined_call_operand.vmem [shape: f32[1,128], index: 2, kind: input, shape index: {}]   ;;  %s444_s3 = inlined_call_operand.vmem [shape: bf16[128,128], index: 3, kind: output, shape index: {}]  }
   0x1   :  { %v14_v0 = vld [vmem:[%s441_s0] sm:$0xff]  ;;  %v15_v1 = vld [vmem:[%s441_s0 + $0x8] sm:$0xff]  ;;  %v16_v6 = vld [vmem:[%s441_s0 + $0x10] sm:$0xff] }
   0x2   :  { %v320_v2 = vld [vmem:[%s442_s1] ss:$0 sm:$0xff]  ;;  %v17_v7 = vld [vmem:[%s441_s0 + $0x18] sm:$0xff]  ;;  %v19_v11 = vld [vmem:[%s441_s0 + $0x28] sm:$0xff] }
   0x3   :  { %v37_v3 = vmul.f32 %v320_v2, %v14_v0  ;;  %v38_v4 = vmul.f32 %v320_v2, %v15_v1  ;;  %v327_v5 = vld [vmem:[%s443_s2] ss:$0 sm:$0xff]  ;;  %v39_v8 = vmul.f32 %v320_v2, %v16_v6  ;;  %v40_v9 = vmul.f32 %v320_v2, %v17_v7  ;;  %v20_v12 = vld [vmem:[%s441_s0 + $0x30] sm:$0xff]  ;;  %v21_v17 = vld [vmem:[%s441_s0 + $0x38] sm:$0xff] }
   0x4   :  { %v18_v10 = vld [vmem:[%s441_s0 + $0x20] sm:$0xff]  ;;  %v42_v16 = vmul.f32 %v320_v2, %v19_v11  ;;  %v43_v20 = vmul.f32 %v320_v2, %v20_v12  ;;  %v44_v21 = vmul.f32 %v320_v2, %v21_v17  ;;  %v23_v28 = vld [vmem:[%s441_s0 + $0x48] sm:$0xff]  ;;  %v24_v32 = vld [vmem:[%s441_s0 + $0x50] sm:$0xff] }
   0x5   :  { %v60_v13 = vadd.f32 %v327_v5, %v37_v3  ;;  %v61_v14 = vadd.f32 %v327_v5, %v38_v4  ;;  %v41_v15 = vmul.f32 %v320_v2, %v18_v10  ;;  %v62_v18 = vadd.f32 %v327_v5, %v39_v8  ;;  %v22_v27 = vld [vmem:[%s441_s0 + $0x40] sm:$0xff]  ;;  %v25_v33 = vld [vmem:[%s441_s0 + $0x58] sm:$0xff]  ;;  %v27_v45 = vld [vmem:[%s441_s0 + $0x68] sm:$0xff] }
   0x6   :  { %v63_v19 = vadd.f32 %v327_v5, %v40_v9  ;;  %v65_v23 = vadd.f32 %v327_v5, %v42_v16  ;;  %v66_v36 = vadd.f32 %v327_v5, %v43_v20  ;;  %v67_v38 = vadd.f32 %v327_v5, %v44_v21  ;;  %v26_v41 = vld [vmem:[%s441_s0 + $0x60] sm:$0xff]  ;;  %v28_v55 = vld [vmem:[%s441_s0 + $0x70] sm:$0xff]  ;;  %v29_v56 = vld [vmem:[%s441_s0 + $0x78] sm:$0xff] }
   0x7   :  { %vm76_vm0 = vcmp.ge.f32.partialorder %v60_v13, 0.0  ;;  %vm77_vm1 = vcmp.ge.f32.partialorder %v61_v14, 0.0  ;;  %v64_v22 = vadd.f32 %v327_v5, %v41_v15  ;;  %vm78_vm2 = vcmp.ge.f32.partialorder %v62_v18, 0.0 }
   0x8   :  { %v210_v25 = vsel %vm76_vm0, 1.0, %v290_v24  ;;  %v211_v26 = vsel %vm77_vm1, 1.0, %v290_v24  ;;  %vm79_vm3 = vcmp.ge.f32.partialorder %v63_v19, 0.0  ;;  %v212_v30 = vsel %vm78_vm2, 1.0, %v290_v24 }
   0x9   :  { %v259_v29 = vpack.c.bf16 %v211_v26, %v210_v25  ;;  %v213_v31 = vsel %vm79_vm3, 1.0, %v290_v24  ;;  %vm80_vm4 = vcmp.ge.f32.partialorder %v64_v22, 0.0  ;;  %vm81_vm5 = vcmp.ge.f32.partialorder %v65_v23, 0.0 }
   0xa   :  { %v262_v34 = vpack.c.bf16 %v213_v31, %v212_v30  ;;  %v214_v35 = vsel %vm80_vm4, 1.0, %v290_v24  ;;  %v215_v37 = vsel %vm81_vm5, 1.0, %v290_v24  ;;  %v45_v39 = vmul.f32 %v320_v2, %v22_v27 }
   0xb   :  { %260 = vst [vmem:[%s444_s3] sm:$0xff] %v259_v29   ;;  %v46_v40 = vmul.f32 %v320_v2, %v23_v28  ;;  %v265_v42 = vpack.c.bf16 %v215_v37, %v214_v35  ;;  %vm82_vm6 = vcmp.ge.f32.partialorder %v66_v36, 0.0  ;;  %v47_v43 = vmul.f32 %v320_v2, %v24_v32 }
   0xc   :  { %282 = vst [vmem:[%s444_s3 + $0x8] sm:$0xff] %v262_v34   ;;  %v48_v44 = vmul.f32 %v320_v2, %v25_v33  ;;  %vm83_vm7 = vcmp.ge.f32.partialorder %v67_v38, 0.0  ;;  %v216_v46 = vsel %vm82_vm6, 1.0, %v290_v24  ;;  %v68_v47 = vadd.f32 %v327_v5, %v45_v39 }
   0xd   :  { %v69_v48 = vadd.f32 %v327_v5, %v46_v40  ;;  %283 = vst [vmem:[%s444_s3 + $0x10] sm:$0xff] %v265_v42   ;;  %v217_v49 = vsel %vm83_vm7, 1.0, %v290_v24  ;;  %v70_v50 = vadd.f32 %v327_v5, %v47_v43  ;;  %v49_v52 = vmul.f32 %v320_v2, %v26_v41 }
   0xe   :  { %v71_v51 = vadd.f32 %v327_v5, %v48_v44  ;;  %v268_v53 = vpack.c.bf16 %v217_v49, %v216_v46  ;;  %vm84_vm8 = vcmp.ge.f32.partialorder %v68_v47, 0.0  ;;  %v50_v54 = vmul.f32 %v320_v2, %v27_v45 }
   0xf   :  { %vm85_vm9 = vcmp.ge.f32.partialorder %v69_v48, 0.0  ;;  %v218_v57 = vsel %vm84_vm8, 1.0, %v290_v24  ;;  %vm86_vm10 = vcmp.ge.f32.partialorder %v70_v50, 0.0  ;;  %v72_v62 = vadd.f32 %v327_v5, %v49_v52 }
  0x10   :  { %v219_v58 = vsel %vm85_vm9, 1.0, %v290_v24  ;;  %vm87_vm11 = vcmp.ge.f32.partialorder %v71_v51, 0.0  ;;  %284 = vst [vmem:[%s444_s3 + $0x18] sm:$0xff] %v268_v53   ;;  %v220_v60 = vsel %vm86_vm10, 1.0, %v290_v24  ;;  %v73_v0 = vadd.f32 %v327_v5, %v50_v54 }
  0x11   :  { %v271_v59 = vpack.c.bf16 %v219_v58, %v218_v57  ;;  %v221_v61 = vsel %vm87_vm11, 1.0, %v290_v24  ;;  %v51_v1 = vmul.f32 %v320_v2, %v28_v55  ;;  %v52_v3 = vmul.f32 %v320_v2, %v29_v56 }
  0x12   :  { %v274_v63 = vpack.c.bf16 %v221_v61, %v220_v60  ;;  %vm88_vm12 = vcmp.ge.f32.partialorder %v72_v62, 0.0  ;;  %vm89_vm13 = vcmp.ge.f32.partialorder %v73_v0, 0.0 }
  0x13   :  { %285 = vst [vmem:[%s444_s3 + $0x20] sm:$0xff] %v271_v59   ;;  %v222_v4 = vsel %vm88_vm12, 1.0, %v290_v24  ;;  %v74_v6 = vadd.f32 %v327_v5, %v51_v1  ;;  %v75_v7 = vadd.f32 %v327_v5, %v52_v3  ;;  %v223_v8 = vsel %vm89_vm13, 1.0, %v290_v24 }
  0x14   :  { %286 = vst [vmem:[%s444_s3 + $0x28] sm:$0xff] %v274_v63   ;;  %v277_v9 = vpack.c.bf16 %v223_v8, %v222_v4 }
  0x15   :  { %vm90_vm14 = vcmp.ge.f32.partialorder %v74_v6, 0.0  ;;  %vm91_vm15 = vcmp.ge.f32.partialorder %v75_v7, 0.0 }
  0x16   :  { %v224_v2 = vsel %vm90_vm14, 1.0, %v290_v24  ;;  %v225_v10 = vsel %vm91_vm15, 1.0, %v290_v24  ;;  %287 = vst [vmem:[%s444_s3 + $0x30] sm:$0xff] %v277_v9  }
  0x17   :  { %v280_v11 = vpack.c.bf16 %v225_v10, %v224_v2 }
  0x19   :  { %288 = vst [vmem:[%s444_s3 + $0x38] sm:$0xff] %v280_v11  }

// kernel: ems_yolo_forward.17
= control target key start
LH: loop header
LB: loop body
LE: loop exit
PB: predicated region body
PF: predicated region fallthrough
CT: control target
= control target key end

     0   :  { %v24_v0 = vlaneseq  ;;  %v135_v34 = vmov 0.0   ;;  %s198_s1 = inlined_call_operand.vmem [shape: f32[1,256], index: 1, kind: input, shape index: {}]   ;;  %s199_s2 = inlined_call_operand.vmem [shape: f32[1,256], index: 2, kind: input, shape index: {}]   ;;  %s200_s0 = inlined_call_operand.vmem [shape: f32[32,256], index: 0, kind: input, shape index: {}]   ;;  %s201_s3 = inlined_call_operand.vmem [shape: bf16[32,256], index: 3, kind: output, shape index: {}]  }
   0x1   :  { %v22_v2 = vld [vmem:[%s198_s1] sm:$0x3]  ;;  %v15_v5 = vld [vmem:[%s200_s0 + $0x8] sm:$0xff]  ;;  %v16_v8 = vld [vmem:[%s200_s0 + $0x10] sm:$0xff] }
   0x2   :  { %v25_v1 = vshrl.u32 %v24_v0, 7  ;;  %v42_v3 = vld [vmem:[%s199_s2] sm:$0x3]  ;;  %v17_v9 = vld [vmem:[%s200_s0 + $0x18] sm:$0xff]  ;;  %v19_v15 = vld [vmem:[%s200_s0 + $0x28] sm:$0xff] }
   0x3   :  { %v14_v4 = vld [vmem:[%s200_s0] sm:$0xff]  ;;  %v20_v16 = vld [vmem:[%s200_s0 + $0x30] sm:$0xff]  ;;  %v21_v17 = vld [vmem:[%s200_s0 + $0x38] sm:$0xff] }
   0x4   :  { %v26_v6 = vsub.s32 0, %v25_v1  ;;  %v30_v7 = vsub.s32 1, %v25_v1  ;;  %v18_v10 = vld [vmem:[%s200_s0 + $0x20] sm:$0xff] }
   0x6   :  { %v27_v11 = vrot.slane %v22_v2, %v26_v6  ;;  %v31_v12 = vrot.slane %v22_v2, %v30_v7  ;;  %v47_v13 = vrot.slane %v42_v3, %v26_v6  ;;  %v51_v14 = vrot.slane %v42_v3, %v30_v7 }
   0x8   :  { %v34_v18 = vmul.f32 %v27_v11, %v14_v4  ;;  %v35_v19 = vmul.f32 %v31_v12, %v15_v5  ;;  %v36_v20 = vmul.f32 %v27_v11, %v16_v8  ;;  %v37_v21 = vmul.f32 %v31_v12, %v17_v9 }
   0x9   :  { %v38_v22 = vmul.f32 %v27_v11, %v18_v10  ;;  %v39_v23 = vmul.f32 %v31_v12, %v19_v15  ;;  %v40_v24 = vmul.f32 %v27_v11, %v20_v16  ;;  %v41_v25 = vmul.f32 %v31_v12, %v21_v17 }
   0xa   :  { %v54_v26 = vadd.f32 %v47_v13, %v34_v18  ;;  %v55_v27 = vadd.f32 %v51_v14, %v35_v19  ;;  %v56_v28 = vadd.f32 %v47_v13, %v36_v20  ;;  %v57_v29 = vadd.f32 %v51_v14, %v37_v21 }
   0xb   :  { %v58_v30 = vadd.f32 %v47_v13, %v38_v22  ;;  %v59_v31 = vadd.f32 %v51_v14, %v39_v23  ;;  %v60_v32 = vadd.f32 %v47_v13, %v40_v24  ;;  %v61_v33 = vadd.f32 %v51_v14, %v41_v25 }
   0xc   :  { %vm62_vm0 = vcmp.ge.f32.partialorder %v54_v26, 0.0  ;;  %vm63_vm1 = vcmp.ge.f32.partialorder %v55_v27, 0.0  ;;  %vm64_vm2 = vcmp.ge.f32.partialorder %v56_v28, 0.0  ;;  %vm65_vm3 = vcmp.ge.f32.partialorder %v57_v29, 0.0 }
   0xd   :  { %v118_v35 = vsel %vm62_vm0, 1.0, %v135_v34  ;;  %v119_v36 = vsel %vm63_vm1, 1.0, %v135_v34  ;;  %v120_v37 = vsel %vm64_vm2, 1.0, %v135_v34  ;;  %v121_v38 = vsel %vm65_vm3, 1.0, %v135_v34 }
   0xe   :  { %v130_v39 = vpack.c.bf16 %v119_v36, %v118_v35  ;;  %v131_v40 = vpack.c.bf16 %v121_v38, %v120_v37  ;;  %vm66_vm4 = vcmp.ge.f32.partialorder %v58_v30, 0.0  ;;  %vm67_vm5 = vcmp.ge.f32.partialorder %v59_v31, 0.0 }
   0xf   :  { %v122_v41 = vsel %vm66_vm4, 1.0, %v135_v34  ;;  %v123_v42 = vsel %vm67_vm5, 1.0, %v135_v34  ;;  %vm68_vm6 = vcmp.ge.f32.partialorder %v60_v32, 0.0  ;;  %vm69_vm7 = vcmp.ge.f32.partialorder %v61_v33, 0.0 }
  0x10   :  { %110 = vst [vmem:[%s201_s3] sm:$0xff] %v130_v39  ;;  %111 = vst [vmem:[%s201_s3 + $0x8] sm:$0xff] %v131_v40  ;;  %v132_v43 = vpack.c.bf16 %v123_v42, %v122_v41  ;;  %v124_v44 = vsel %vm68_vm6, 1.0, %v135_v34  ;;  %v125_v45 = vsel %vm69_vm7, 1.0, %v135_v34 }
  0x11   :  { %v133_v46 = vpack.c.bf16 %v125_v45, %v124_v44 }
  0x12   :  { %112 = vst [vmem:[%s201_s3 + $0x10] sm:$0xff] %v132_v43 }
  0x13   :  { %113 = vst [vmem:[%s201_s3 + $0x18] sm:$0xff] %v133_v46 }

// kernel: ems_yolo_forward.16
= control target key start
LH: loop header
LB: loop body
LE: loop exit
PB: predicated region body
PF: predicated region fallthrough
CT: control target
= control target key end

     0   :  { %vm1307_vm0 = vcmask 1040384   ;;  %vm1310_vm1 = vcmask 1041408   ;;  %s2313_s1 = inlined_call_operand.vmem [shape: bf16[1152,256], index: 1, kind: input, shape index: {}]   ;;  %s2314_s0 = inlined_call_operand.vmem [shape: bf16[32,1152], index: 0, kind: input, shape index: {}]   ;;  %s2315_s2 = inlined_call_operand.vmem [shape: f32[32,256], index: 2, kind: output, shape index: {0}]   ;;  %s2316_s3 = inlined_call_operand.vmem [shape: f32[8,256], index: 3, kind: output, shape index: {1}]  }
   0x1   :  { %v1534_v0 = vld [vmem:[%s2313_s1 + $0x4] ss:$8 sps:$4 sm:$0xff]   ;;  %v1538_v2 = vld [vmem:[%s2313_s1] ss:$8 sps:$4 sm:$0xff]   ;;  %v1540_v4 = vld [vmem:[%s2313_s1 + $0x14] ss:$8 sps:$4 sm:$0xff]  }
   0x2   :  { %v1536_v1 = vld [vmem:[%s2313_s1 + $0x204] ss:$8 sps:$4 sm:$0xff]   ;;  %990 = vmatprep.subr.bf16.mxu1 %v1534_v0  ;;  %v1539_v3 = vld [vmem:[%s2313_s1 + $0x200] ss:$8 sps:$4 sm:$0xff]   ;;  %v1542_v5 = vld [vmem:[%s2313_s1 + $0x214] ss:$8 sps:$4 sm:$0xff]  }
   0x3   :  { %1096 = vmatprep.subr.bf16.mxu0 %v1536_v1  ;;  %991 = vmatpush1.bf16.msra.mxu1 %v1538_v2  ;;  %v1544_v6 = vld [vmem:[%s2313_s1 + $0x10] ss:$8 sps:$4 sm:$0xff]   ;;  %v1546_v8 = vld [vmem:[%s2313_s1 + $0x24] ss:$8 sps:$4 sm:$0xff]   ;;  %v1550_v10 = vld [vmem:[%s2313_s1 + $0x20] ss:$8 sps:$4 sm:$0xff]  }
   0x4   :  { %1097 = vmatpush1.bf16.msra.mxu0 %v1539_v3  ;;  %992 = vmatprep.subr.bf16.mxu1 %v1540_v4  ;;  %v1545_v7 = vld [vmem:[%s2313_s1 + $0x210] ss:$8 sps:$4 sm:$0xff]   ;;  %v1548_v9 = vld [vmem:[%s2313_s1 + $0x224] ss:$8 sps:$4 sm:$0xff]   ;;  %v1551_v11 = vld [vmem:[%s2313_s1 + $0x220] ss:$8 sps:$4 sm:$0xff]  }
   0x5   :  { %1098 = vmatprep.subr.bf16.mxu0 %v1542_v5  ;;  %v1552_v12 = vld [vmem:[%s2313_s1 + $0x34] ss:$8 sps:$4 sm:$0xff]   ;;  %v1556_v14 = vld [vmem:[%s2313_s1 + $0x30] ss:$8 sps:$4 sm:$0xff]   ;;  %v1558_v16 = vld [vmem:[%s2313_s1 + $0x44] ss:$8 sps:$4 sm:$0xff]  }
   0x6   :  { %v1554_v13 = vld [vmem:[%s2313_s1 + $0x234] ss:$8 sps:$4 sm:$0xff]   ;;  %v1557_v15 = vld [vmem:[%s2313_s1 + $0x230] ss:$8 sps:$4 sm:$0xff]   ;;  %v1560_v17 = vld [vmem:[%s2313_s1 + $0x244] ss:$8 sps:$4 sm:$0xff]  }
   0x7   :  { %993 = vmatpush1.bf16.msra.mxu1 %v1544_v6  ;;  %v1562_v18 = vld [vmem:[%s2313_s1 + $0x40] ss:$8 sps:$4 sm:$0xff]   ;;  %v1564_v20 = vld [vmem:[%s2313_s1 + $0x54] ss:$8 sps:$4 sm:$0xff]   ;;  %v1568_v22 = vld [vmem:[%s2313_s1 + $0x50] ss:$8 sps:$4 sm:$0xff]  }
   0x8   :  { %1099 = vmatpush1.bf16.msra.mxu0 %v1545_v7  ;;  %994 = vmatprep.subr.bf16.mxu1 %v1546_v8  ;;  %v1563_v19 = vld [vmem:[%s2313_s1 + $0x240] ss:$8 sps:$4 sm:$0xff]   ;;  %v1566_v21 = vld [vmem:[%s2313_s1 + $0x254] ss:$8 sps:$4 sm:$0xff]   ;;  %v1569_v23 = vld [vmem:[%s2313_s1 + $0x250] ss:$8 sps:$4 sm:$0xff]  }
   0x9   :  { %1100 = vmatprep.subr.bf16.mxu0 %v1548_v9  ;;  %v1570_v24 = vld [vmem:[%s2313_s1 + $0x64] ss:$8 sps:$4 sm:$0xff]   ;;  %v1574_v26 = vld [vmem:[%s2313_s1 + $0x60] ss:$8 sps:$4 sm:$0xff]   ;;  %v1576_v28 = vld [vmem:[%s2313_s1 + $0x74] ss:$8 sps:$4 sm:$0xff]  }
   0xa   :  { %v1572_v25 = vld [vmem:[%s2313_s1 + $0x264] ss:$8 sps:$4 sm:$0xff]   ;;  %v1575_v27 = vld [vmem:[%s2313_s1 + $0x260] ss:$8 sps:$4 sm:$0xff]   ;;  %v1578_v29 = vld [vmem:[%s2313_s1 + $0x274] ss:$8 sps:$4 sm:$0xff]  }
   0xb   :  { %995 = vmatpush1.bf16.msra.mxu1 %v1550_v10  ;;  %v1580_v30 = vld [vmem:[%s2313_s1 + $0x70] ss:$8 sps:$4 sm:$0xff]   ;;  %v1582_v32 = vld [vmem:[%s2313_s1 + $0x84] ss:$8 sps:$4 sm:$0xff]   ;;  %v1586_v34 = vld [vmem:[%s2313_s1 + $0x80] ss:$8 sps:$4 sm:$0xff]  }
   0xc   :  { %1101 = vmatpush1.bf16.msra.mxu0 %v1551_v11  ;;  %996 = vmatprep.subr.bf16.mxu1 %v1552_v12  ;;  %v1581_v31 = vld [vmem:[%s2313_s1 + $0x270] ss:$8 sps:$4 sm:$0xff]   ;;  %v1584_v33 = vld [vmem:[%s2313_s1 + $0x284] ss:$8 sps:$4 sm:$0xff]   ;;  %v1587_v35 = vld [vmem:[%s2313_s1 + $0x280] ss:$8 sps:$4 sm:$0xff]  }
   0xd   :  { %1102 = vmatprep.subr.bf16.mxu0 %v1554_v13  ;;  %v1588_v36 = vld [vmem:[%s2313_s1 + $0x94] ss:$8 sps:$4 sm:$0xff]   ;;  %v1592_v38 = vld [vmem:[%s2313_s1 + $0x90] ss:$8 sps:$4 sm:$0xff]   ;;  %v1594_v40 = vld [vmem:[%s2313_s1 + $0xa4] ss:$8 sps:$4 sm:$0xff]  }
   0xe   :  { %v1590_v37 = vld [vmem:[%s2313_s1 + $0x294] ss:$8 sps:$4 sm:$0xff]   ;;  %v1593_v39 = vld [vmem:[%s2313_s1 + $0x290] ss:$8 sps:$4 sm:$0xff]   ;;  %v1596_v41 = vld [vmem:[%s2313_s1 + $0x2a4] ss:$8 sps:$4 sm:$0xff]  }
   0xf   :  { %997 = vmatpush1.bf16.msra.mxu1 %v1556_v14  ;;  %v1598_v42 = vld [vmem:[%s2313_s1 + $0xa0] ss:$8 sps:$4 sm:$0xff]   ;;  %v1600_v44 = vld [vmem:[%s2313_s1 + $0xb4] ss:$8 sps:$4 sm:$0xff]   ;;  %v1604_v46 = vld [vmem:[%s2313_s1 + $0xb0] ss:$8 sps:$4 sm:$0xff]  }
  0x10   :  { %1103 = vmatpush1.bf16.msra.mxu0 %v1557_v15  ;;  %998 = vmatprep.subr.bf16.mxu1 %v1558_v16  ;;  %v1599_v43 = vld [vmem:[%s2313_s1 + $0x2a0] ss:$8 sps:$4 sm:$0xff]   ;;  %v1602_v45 = vld [vmem:[%s2313_s1 + $0x2b4] ss:$8 sps:$4 sm:$0xff]   ;;  %v1605_v47 = vld [vmem:[%s2313_s1 + $0x2b0] ss:$8 sps:$4 sm:$0xff]  }
  0x11   :  { %1104 = vmatprep.subr.bf16.mxu0 %v1560_v17  ;;  %v1632_v48 = vld [vmem:[%s2314_s0 + $0x4] ss:$36 sps:$4 sm:$0xff]   ;;  %v1638_v51 = vld [vmem:[%s2314_s0 + $0x14] ss:$36 sps:$4 sm:$0xff]  }
  0x12   :  { %v1606_v49 = vld [vmem:[%s2313_s1 + $0xc4] ss:$8 sps:$4 sm:$0xff]   ;;  %1022 = vmatprep.mubr.bf16.mxu1 %v1632_v48  ;;  %v1610_v52 = vld [vmem:[%s2313_s1 + $0xc0] ss:$8 sps:$4 sm:$0xff]   ;;  %v1612_v54 = vld [vmem:[%s2313_s1 + $0xd4] ss:$8 sps:$4 sm:$0xff]   ;;  %1128 = vmatprep.mubr.bf16.mxu0 %v1638_v51 }
  0x13   :  { %999 = vmatpush1.bf16.msra.mxu1 %v1562_v18  ;;  %v1608_v50 = vld [vmem:[%s2313_s1 + $0x2c4] ss:$8 sps:$4 sm:$0xff]   ;;  %v1611_v53 = vld [vmem:[%s2313_s1 + $0x2c0] ss:$8 sps:$4 sm:$0xff]   ;;  %v1614_v55 = vld [vmem:[%s2313_s1 + $0x2d4] ss:$8 sps:$4 sm:$0xff]  }
  0x14   :  { %1105 = vmatpush1.bf16.msra.mxu0 %v1563_v19  ;;  %1000 = vmatprep.subr.bf16.mxu1 %v1564_v20  ;;  %v1616_v56 = vld [vmem:[%s2313_s1 + $0xd0] ss:$8 sps:$4 sm:$0xff]   ;;  %v1618_v58 = vld [vmem:[%s2313_s1 + $0xe4] ss:$8 sps:$4 sm:$0xff]   ;;  %v1622_v60 = vld [vmem:[%s2313_s1 + $0xe0] ss:$8 sps:$4 sm:$0xff]  }
  0x15   :  { %1106 = vmatprep.subr.bf16.mxu0 %v1566_v21  ;;  %v1617_v57 = vld [vmem:[%s2313_s1 + $0x2d0] ss:$8 sps:$4 sm:$0xff]   ;;  %v1620_v59 = vld [vmem:[%s2313_s1 + $0x2e4] ss:$8 sps:$4 sm:$0xff]   ;;  %v1623_v61 = vld [vmem:[%s2313_s1 + $0x2e0] ss:$8 sps:$4 sm:$0xff]  }
  0x16   :  { %v1624_v62 = vld [vmem:[%s2313_s1 + $0xf4] ss:$8 sps:$4 sm:$0xff]   ;;  %v1628_v0 = vld [vmem:[%s2313_s1 + $0xf0] ss:$8 sps:$4 sm:$0xff]   ;;  %v1635_v2 = vld [vmem:[%s2313_s1 + $0x104] ss:$8 sps:$4 sm:$0xff]  }
  0x17   :  { %1001 = vmatpush1.bf16.msra.mxu1 %v1568_v22  ;;  %v1626_v63 = vld [vmem:[%s2313_s1 + $0x2f4] ss:$8 sps:$4 sm:$0xff]   ;;  %v1629_v1 = vld [vmem:[%s2313_s1 + $0x2f0] ss:$8 sps:$4 sm:$0xff]   ;;  %v1641_v3 = vld [vmem:[%s2313_s1 + $0x304] ss:$8 sps:$4 sm:$0xff]  }
  0x18   :  { %1107 = vmatpush1.bf16.msra.mxu0 %v1569_v23  ;;  %1002 = vmatprep.subr.bf16.mxu1 %v1570_v24  ;;  %v1630_v4 = vld [vmem:[%s2314_s0] ss:$36 sps:$4 sm:$0xff]   ;;  %v1636_v6 = vld [vmem:[%s2314_s0 + $0x10] ss:$36 sps:$4 sm:$0xff]  }
  0x19   :  { %1108 = vmatprep.subr.bf16.mxu0 %v1572_v25  ;;  %v1633_v5 = vld [vmem:[%s2313_s1 + $0x100] ss:$8 sps:$4 sm:$0xff]   ;;  %v1644_v8 = vld [vmem:[%s2313_s1 + $0x114] ss:$8 sps:$4 sm:$0xff]   ;;  %v1642_v10 = vld [vmem:[%s2313_s1 + $0x110] ss:$8 sps:$4 sm:$0xff]  }
  0x1a   :  { %v1639_v7 = vld [vmem:[%s2313_s1 + $0x300] ss:$8 sps:$4 sm:$0xff]   ;;  %v1647_v9 = vld [vmem:[%s2313_s1 + $0x314] ss:$8 sps:$4 sm:$0xff]   ;;  %v1645_v11 = vld [vmem:[%s2313_s1 + $0x310] ss:$8 sps:$4 sm:$0xff]  }
  0x1b   :  { %1003 = vmatpush1.bf16.msra.mxu1 %v1574_v26  ;;  %v1650_v12 = vld [vmem:[%s2313_s1 + $0x124] ss:$8 sps:$4 sm:$0xff]   ;;  %v1648_v14 = vld [vmem:[%s2313_s1 + $0x120] ss:$8 sps:$4 sm:$0xff]   ;;  %v1656_v16 = vld [vmem:[%s2313_s1 + $0x134] ss:$8 sps:$4 sm:$0xff]  }
  0x1c   :  { %1109 = vmatpush1.bf16.msra.mxu0 %v1575_v27  ;;  %1004 = vmatprep.subr.bf16.mxu1 %v1576_v28  ;;  %v1653_v13 = vld [vmem:[%s2313_s1 + $0x324] ss:$8 sps:$4 sm:$0xff]   ;;  %v1651_v15 = vld [vmem:[%s2313_s1 + $0x320] ss:$8 sps:$4 sm:$0xff]   ;;  %v1659_v17 = vld [vmem:[%s2313_s1 + $0x334] ss:$8 sps:$4 sm:$0xff]  }
  0x1d   :  { %1110 = vmatprep.subr.bf16.mxu0 %v1578_v29  ;;  %v1654_v18 = vld [vmem:[%s2313_s1 + $0x130] ss:$8 sps:$4 sm:$0xff]   ;;  %v1662_v20 = vld [vmem:[%s2313_s1 + $0x144] ss:$8 sps:$4 sm:$0xff]   ;;  %v1660_v22 = vld [vmem:[%s2313_s1 + $0x140] ss:$8 sps:$4 sm:$0xff]  }
  0x1e   :  { %v1657_v19 = vld [vmem:[%s2313_s1 + $0x330] ss:$8 sps:$4 sm:$0xff]   ;;  %v1665_v21 = vld [vmem:[%s2313_s1 + $0x344] ss:$8 sps:$4 sm:$0xff]   ;;  %v1663_v23 = vld [vmem:[%s2313_s1 + $0x340] ss:$8 sps:$4 sm:$0xff]  }
  0x1f   :  { %1005 = vmatpush1.bf16.msra.mxu1 %v1580_v30  ;;  %v1668_v24 = vld [vmem:[%s2313_s1 + $0x154] ss:$8 sps:$4 sm:$0xff]   ;;  %v1666_v26 = vld [vmem:[%s2313_s1 + $0x150] ss:$8 sps:$4 sm:$0xff]   ;;  %v1674_v28 = vld [vmem:[%s2313_s1 + $0x164] ss:$8 sps:$4 sm:$0xff]  }
  0x20   :  { %1111 = vmatpush1.bf16.msra.mxu0 %v1581_v31  ;;  %1006 = vmatprep.subr.bf16.mxu1 %v1582_v32  ;;  %v1671_v25 = vld [vmem:[%s2313_s1 + $0x354] ss:$8 sps:$4 sm:$0xff]   ;;  %v1669_v27 = vld [vmem:[%s2313_s1 + $0x350] ss:$8 sps:$4 sm:$0xff]   ;;  %v1724_v31 = vld [vmem:[%s2314_s0 + $0x48] ss:$36 sps:$4 sm:$0xff]  }
  0x21   :  { %1112 = vmatprep.subr.bf16.mxu0 %v1584_v33  ;;  %v1720_v29 = vld [vmem:[%s2314_s0 + $0x4c] ss:$36 sps:$4 sm:$0xff]   ;;  %v1722_v30 = vld [vmem:[%s2314_s0 + $0x5c] ss:$36 sps:$4 sm:$0xff]  }
  0x22   :  { %v1677_v32 = vld [vmem:[%s2313_s1 + $0x364] ss:$8 sps:$4 sm:$0xff]   ;;  %v1728_v33 = vld [vmem:[%s2314_s0 + $0x58] ss:$36 sps:$4 sm:$0xff]  }
  0x23   :  { %1007 = vmatpush1.bf16.msra.mxu1 %v1586_v34  ;;  %v1672_v34 = vld [vmem:[%s2313_s1 + $0x160] ss:$8 sps:$4 sm:$0xff]   ;;  %v1690_v48 = vld [vmem:[%s2313_s1 + $0x190] ss:$8 sps:$4 sm:$0xff]   ;;  %v1701_v51 = vld [vmem:[%s2313_s1 + $0x3a4] ss:$8 sps:$4 sm:$0xff]  }
  0x24   :  { %1113 = vmatpush1.bf16.msra.mxu0 %v1587_v35  ;;  %1008 = vmatprep.subr.bf16.mxu1 %v1588_v36  ;;  %v1675_v35 = vld [vmem:[%s2313_s1 + $0x360] ss:$8 sps:$4 sm:$0xff]   ;;  %v1680_v36 = vld [vmem:[%s2313_s1 + $0x174] ss:$8 sps:$4 sm:$0xff]  }
  0x25   :  { %1114 = vmatprep.subr.bf16.mxu0 %v1590_v37  ;;  %v1683_v37 = vld [vmem:[%s2313_s1 + $0x374] ss:$8 sps:$4 sm:$0xff]  }
  0x27   :  { %1009 = vmatpush1.bf16.msra.mxu1 %v1592_v38  ;;  %v1678_v38 = vld [vmem:[%s2313_s1 + $0x170] ss:$8 sps:$4 sm:$0xff]  }
  0x28   :  { %1115 = vmatpush1.bf16.msra.mxu0 %v1593_v39  ;;  %1010 = vmatprep.subr.bf16.mxu1 %v1594_v40  ;;  %v1681_v39 = vld [vmem:[%s2313_s1 + $0x370] ss:$8 sps:$4 sm:$0xff]   ;;  %v1686_v40 = vld [vmem:[%s2313_s1 + $0x184] ss:$8 sps:$4 sm:$0xff]  }
  0x29   :  { %1116 = vmatprep.subr.bf16.mxu0 %v1596_v41  ;;  %v1740_v41 = vld [vmem:[%s2314_s0 + $0xc] ss:$36 sps:$4 sm:$0xff]  }
  0x2b   :  { %1011 = vmatpush1.bf16.msra.mxu1 %v1598_v42  ;;  %v1689_v42 = vld [vmem:[%s2313_s1 + $0x384] ss:$8 sps:$4 sm:$0xff]  }
  0x2c   :  { %1117 = vmatpush1.bf16.msra.mxu0 %v1599_v43  ;;  %1012 = vmatprep.subr.bf16.mxu1 %v1600_v44  ;;  %v1743_v43 = vld [vmem:[%s2314_s0 + $0x1c] ss:$36 sps:$4 sm:$0xff]  }
  0x2d   :  { %1118 = vmatprep.subr.bf16.mxu0 %v1602_v45  ;;  %v1684_v44 = vld [vmem:[%s2313_s1 + $0x180] ss:$8 sps:$4 sm:$0xff]  }
  0x2e   :  { %v1687_v45 = vld [vmem:[%s2313_s1 + $0x380] ss:$8 sps:$4 sm:$0xff]  }
  0x2f   :  { %1013 = vmatpush1.bf16.msra.mxu1 %v1604_v46  ;;  %v1692_v46 = vld [vmem:[%s2313_s1 + $0x194] ss:$8 sps:$4 sm:$0xff]  }
  0x30   :  { %1119 = vmatpush1.bf16.msra.mxu0 %v1605_v47  ;;  %1014 = vmatprep.subr.bf16.mxu1 %v1606_v49  ;;  %v1695_v47 = vld [vmem:[%s2313_s1 + $0x394] ss:$8 sps:$4 sm:$0xff]   ;;  %v1693_v49 = vld [vmem:[%s2313_s1 + $0x390] ss:$8 sps:$4 sm:$0xff]  }
  0x31   :  { %1120 = vmatprep.subr.bf16.mxu0 %v1608_v50  ;;  %v1698_v50 = vld [vmem:[%s2313_s1 + $0x1a4] ss:$8 sps:$4 sm:$0xff]  }
  0x33   :  { %1015 = vmatpush1.bf16.msra.mxu1 %v1610_v52  ;;  %v1696_v52 = vld [vmem:[%s2313_s1 + $0x1a0] ss:$8 sps:$4 sm:$0xff]  }
  0x34   :  { %1121 = vmatpush1.bf16.msra.mxu0 %v1611_v53  ;;  %1016 = vmatprep.subr.bf16.mxu1 %v1612_v54  ;;  %v1699_v53 = vld [vmem:[%s2313_s1 + $0x3a0] ss:$8 sps:$4 sm:$0xff]   ;;  %v1704_v54 = vld [vmem:[%s2313_s1 + $0x1b4] ss:$8 sps:$4 sm:$0xff]  }
  0x35   :  { %1122 = vmatprep.subr.bf16.mxu0 %v1614_v55  ;;  %v1707_v55 = vld [vmem:[%s2313_s1 + $0x3b4] ss:$8 sps:$4 sm:$0xff]  }
  0x37   :  { %1017 = vmatpush1.bf16.msra.mxu1 %v1616_v56  ;;  %v1702_v56 = vld [vmem:[%s2313_s1 + $0x1b0] ss:$8 sps:$4 sm:$0xff]  }
  0x38   :  { %1123 = vmatpush1.bf16.msra.mxu0 %v1617_v57  ;;  %1018 = vmatprep.subr.bf16.mxu1 %v1618_v58  ;;  %v1705_v57 = vld [vmem:[%s2313_s1 + $0x3b0] ss:$8 sps:$4 sm:$0xff]   ;;  %v1710_v58 = vld [vmem:[%s2313_s1 + $0x1c4] ss:$8 sps:$4 sm:$0xff]  }
  0x39   :  { %1124 = vmatprep.subr.bf16.mxu0 %v1620_v59  ;;  %v1713_v59 = vld [vmem:[%s2313_s1 + $0x3c4] ss:$8 sps:$4 sm:$0xff]  }
  0x3b   :  { %1019 = vmatpush1.bf16.msra.mxu1 %v1622_v60  ;;  %v1708_v60 = vld [vmem:[%s2313_s1 + $0x1c0] ss:$8 sps:$4 sm:$0xff]  }
  0x3c   :  { %1125 = vmatpush1.bf16.msra.mxu0 %v1623_v61  ;;  %1020 = vmatprep.subr.bf16.mxu1 %v1624_v62  ;;  %v1711_v61 = vld [vmem:[%s2313_s1 + $0x3c0] ss:$8 sps:$4 sm:$0xff]   ;;  %v1716_v62 = vld [vmem:[%s2313_s1 + $0x1d4] ss:$8 sps:$4 sm:$0xff]  }
  0x3d   :  { %1126 = vmatprep.subr.bf16.mxu0 %v1626_v63  ;;  %v1719_v63 = vld [vmem:[%s2313_s1 + $0x3d4] ss:$8 sps:$4 sm:$0xff]  }
  0x3f   :  { %1021 = vmatpush1.bf16.msra.mxu1 %v1628_v0  ;;  %v1714_v0 = vld [vmem:[%s2313_s1 + $0x1d0] ss:$8 sps:$4 sm:$0xff]  }
  0x40   :  { %1127 = vmatpush1.bf16.msra.mxu0 %v1629_v1  ;;  %1043 = vmatprep.subr.bf16.mxu1 %v1635_v2  ;;  %v1717_v1 = vld [vmem:[%s2313_s1 + $0x3d0] ss:$8 sps:$4 sm:$0xff]   ;;  %v1727_v2 = vld [vmem:[%s2313_s1 + $0x1e4] ss:$8 sps:$4 sm:$0xff]  }
  0x41   :  { %1149 = vmatprep.subr.bf16.mxu0 %v1641_v3  ;;  %v1731_v3 = vld [vmem:[%s2313_s1 + $0x3e4] ss:$8 sps:$4 sm:$0xff]  }
  0x42   :  { %1023 = vmatmul.mubr.bf16.vlgmr.msra.gmra.mrb[0].mxu1 %v1630_v4  ;;  %v1725_v4 = vld [vmem:[%s2313_s1 + $0x1e0] ss:$8 sps:$4 sm:$0xff]  }
  0x43   :  { %1129 = vmatmul.mubr.bf16.vlgmr.msra.gmra.mrb[0].mxu0 %v1636_v6  ;;  %1044 = vmatpush1.bf16.msra.mxu1 %v1633_v5  ;;  %v1729_v5 = vld [vmem:[%s2313_s1 + $0x3e0] ss:$8 sps:$4 sm:$0xff]   ;;  %v1734_v6 = vld [vmem:[%s2313_s1 + $0x1f4] ss:$8 sps:$4 sm:$0xff]  }
  0x44   :  { %1150 = vmatpush1.bf16.msra.mxu0 %v1639_v7  ;;  %1045 = vmatprep.subr.bf16.mxu1 %v1644_v8  ;;  %v1737_v7 = vld [vmem:[%s2313_s1 + $0x3f4] ss:$8 sps:$4 sm:$0xff]   ;;  %v1732_v8 = vld [vmem:[%s2313_s1 + $0x1f0] ss:$8 sps:$4 sm:$0xff]  }
  0x45   :  { %1151 = vmatprep.subr.bf16.mxu0 %v1647_v9  ;;  %1032 = vmatprep.mubr.bf16.mxu1 %v1720_v29  ;;  %v1735_v9 = vld [vmem:[%s2313_s1 + $0x3f0] ss:$8 sps:$4 sm:$0xff]   ;;  %v1770_v29 = vld [vmem:[%s2313_s1 + $0x464] ss:$8 sps:$4 sm:$0xff]  }
  0x46   :  { %1138 = vmatprep.mubr.bf16.mxu0 %v1722_v30  ;;  %v1768_v30 = vld [vmem:[%s2313_s1 + $0x460] ss:$8 sps:$4 sm:$0xff]  }
  0x47   :  { %1046 = vmatpush1.bf16.msra.mxu1 %v1642_v10  ;;  %v1746_v10 = vld [vmem:[%s2313_s1 + $0x404] ss:$8 sps:$4 sm:$0xff]  }
  0x48   :  { %1152 = vmatpush1.bf16.msra.mxu0 %v1645_v11  ;;  %1047 = vmatprep.subr.bf16.mxu1 %v1650_v12  ;;  %v1738_v11 = vld [vmem:[%s2314_s0 + $0x8] ss:$36 sps:$4 sm:$0xff]   ;;  %v1741_v12 = vld [vmem:[%s2314_s0 + $0x18] ss:$36 sps:$4 sm:$0xff]  }
  0x49   :  { %1153 = vmatprep.subr.bf16.mxu0 %v1653_v13  ;;  %v1744_v13 = vld [vmem:[%s2313_s1 + $0x400] ss:$8 sps:$4 sm:$0xff]  }
  0x4a   :  { %1033 = vmatmul.mubr.bf16.gmra.mrb[4].mxu1 %v1724_v31  ;;  %v1773_v31 = vld [vmem:[%s2313_s1 + $0x474] ss:$8 sps:$4 sm:$0xff]  }
  0x4b   :  { %1048 = vmatpush1.bf16.msra.mxu1 %v1648_v14  ;;  %1139 = vmatmul.mubr.bf16.gmra.mrb[4].mxu0 %v1728_v33  ;;  %v1749_v14 = vld [vmem:[%s2313_s1 + $0x414] ss:$8 sps:$4 sm:$0xff]   ;;  %v1774_v33 = vld [vmem:[%s2314_s0 + $0x20] ss:$36 sps:$4 sm:$0xff]  }
  0x4c   :  { %1154 = vmatpush1.bf16.msra.mxu0 %v1651_v15  ;;  %1049 = vmatprep.subr.bf16.mxu1 %v1656_v16  ;;  %v1750_v15 = vld [vmem:[%s2314_s0 + $0x54] ss:$36 sps:$4 sm:$0xff]   ;;  %v1752_v16 = vld [vmem:[%s2314_s0 + $0x64] ss:$36 sps:$4 sm:$0xff]  }
  0x4d   :  { %1155 = vmatprep.subr.bf16.mxu0 %v1659_v17  ;;  %1075 = vmatprep.mubr.bf16.mxu1 %v1740_v41  ;;  %v1747_v17 = vld [vmem:[%s2313_s1 + $0x410] ss:$8 sps:$4 sm:$0xff]  }
  0x4e   :  { %1181 = vmatprep.mubr.bf16.mxu0 %v1743_v43 }
  0x4f   :  { %1050 = vmatpush1.bf16.msra.mxu1 %v1654_v18  ;;  %v1758_v18 = vld [vmem:[%s2313_s1 + $0x424] ss:$8 sps:$4 sm:$0xff]  }
  0x50   :  { %1156 = vmatpush1.bf16.msra.mxu0 %v1657_v19  ;;  %1051 = vmatprep.subr.bf16.mxu1 %v1662_v20  ;;  %v1754_v19 = vld [vmem:[%s2314_s0 + $0x50] ss:$36 sps:$4 sm:$0xff]   ;;  %v1755_v20 = vld [vmem:[%s2314_s0 + $0x60] ss:$36 sps:$4 sm:$0xff]  }
  0x51   :  { %1157 = vmatprep.subr.bf16.mxu0 %v1665_v21  ;;  %v1756_v21 = vld [vmem:[%s2313_s1 + $0x420] ss:$8 sps:$4 sm:$0xff]  }
  0x53   :  { %1052 = vmatpush1.bf16.msra.mxu1 %v1660_v22  ;;  %v1761_v22 = vld [vmem:[%s2313_s1 + $0x434] ss:$8 sps:$4 sm:$0xff]  }
  0x54   :  { %1158 = vmatpush1.bf16.msra.mxu0 %v1663_v23  ;;  %1053 = vmatprep.subr.bf16.mxu1 %v1668_v24  ;;  %v1759_v23 = vld [vmem:[%s2313_s1 + $0x430] ss:$8 sps:$4 sm:$0xff]   ;;  %v1764_v24 = vld [vmem:[%s2313_s1 + $0x444] ss:$8 sps:$4 sm:$0xff]  }
  0x55   :  { %1159 = vmatprep.subr.bf16.mxu0 %v1671_v25  ;;  %v1776_v25 = vmov 0  }
  0x57   :  { %1054 = vmatpush1.bf16.msra.mxu1 %v1666_v26  ;;  %v1762_v26 = vld [vmem:[%s2313_s1 + $0x440] ss:$8 sps:$4 sm:$0xff]  }
  0x58   :  { %1160 = vmatpush1.bf16.msra.mxu0 %v1669_v27  ;;  %1055 = vmatprep.subr.bf16.mxu1 %v1674_v28  ;;  %v1767_v27 = vld [vmem:[%s2313_s1 + $0x454] ss:$8 sps:$4 sm:$0xff]   ;;  %v1765_v28 = vld [vmem:[%s2313_s1 + $0x450] ss:$8 sps:$4 sm:$0xff]  }
  0x59   :  { %1161 = vmatprep.subr.bf16.mxu0 %v1677_v32  ;;  %v1771_v32 = vld [vmem:[%s2313_s1 + $0x470] ss:$8 sps:$4 sm:$0xff]  }
  0x5b   :  { %1056 = vmatpush1.bf16.msra.mxu1 %v1672_v34  ;;  %v1775_v34 = vld [vmem:[%s2314_s0 + $0x68] ss:$36 sps:$4 sm:$0xff]  }
  0x5c   :  { %1162 = vmatpush1.bf16.msra.mxu0 %v1675_v35  ;;  %1057 = vmatprep.subr.bf16.mxu1 %v1680_v36 }
  0x5d   :  { %1163 = vmatprep.subr.bf16.mxu0 %v1683_v37 }
  0x5f   :  { %1058 = vmatpush1.bf16.msra.mxu1 %v1678_v38 }
  0x60   :  { %1164 = vmatpush1.bf16.msra.mxu0 %v1681_v39  ;;  %1059 = vmatprep.subr.bf16.mxu1 %v1686_v40 }
  0x61   :  { %1165 = vmatprep.subr.bf16.mxu0 %v1689_v42 }
  0x63   :  { %1060 = vmatpush1.bf16.msra.mxu1 %v1684_v44 }
  0x64   :  { %1166 = vmatpush1.bf16.msra.mxu0 %v1687_v45  ;;  %1061 = vmatprep.subr.bf16.mxu1 %v1692_v46 }
  0x65   :  { %1167 = vmatprep.subr.bf16.mxu0 %v1695_v47 }
  0x67   :  { %1062 = vmatpush1.bf16.msra.mxu1 %v1690_v48 }
  0x68   :  { %1168 = vmatpush1.bf16.msra.mxu0 %v1693_v49  ;;  %1063 = vmatprep.subr.bf16.mxu1 %v1698_v50 }
  0x69   :  { %1169 = vmatprep.subr.bf16.mxu0 %v1701_v51 }
  0x6b   :  { %1064 = vmatpush1.bf16.msra.mxu1 %v1696_v52 }
  0x6c   :  { %1170 = vmatpush1.bf16.msra.mxu0 %v1699_v53  ;;  %1065 = vmatprep.subr.bf16.mxu1 %v1704_v54 }
  0x6d   :  { %1171 = vmatprep.subr.bf16.mxu0 %v1707_v55 }
  0x6f   :  { %1066 = vmatpush1.bf16.msra.mxu1 %v1702_v56 }
  0x70   :  { %1172 = vmatpush1.bf16.msra.mxu0 %v1705_v57  ;;  %1067 = vmatprep.subr.bf16.mxu1 %v1710_v58 }
  0x71   :  { %1173 = vmatprep.subr.bf16.mxu0 %v1713_v59 }
  0x73   :  { %1068 = vmatpush1.bf16.msra.mxu1 %v1708_v60 }
  0x74   :  { %1174 = vmatpush1.bf16.msra.mxu0 %v1711_v61  ;;  %1069 = vmatprep.subr.bf16.mxu1 %v1716_v62 }
  0x75   :  { %1175 = vmatprep.subr.bf16.mxu0 %v1719_v63 }
  0x77   :  { %1070 = vmatpush1.bf16.msra.mxu1 %v1714_v0 }
  0x78   :  { %1176 = vmatpush1.bf16.msra.mxu0 %v1717_v1  ;;  %1071 = vmatprep.subr.bf16.mxu1 %v1727_v2 }
  0x79   :  { %1177 = vmatprep.subr.bf16.mxu0 %v1731_v3 }
  0x7b   :  { %1072 = vmatpush1.bf16.msra.mxu1 %v1725_v4 }
  0x7c   :  { %1178 = vmatpush1.bf16.msra.mxu0 %v1729_v5  ;;  %1073 = vmatprep.subr.bf16.mxu1 %v1734_v6 }
  0x7d   :  { %1179 = vmatprep.subr.bf16.mxu0 %v1737_v7 }
  0x7f   :  { %1074 = vmatpush1.bf16.msra.mxu1 %v1732_v8 }
  0x80   :  { %1180 = vmatpush1.bf16.msra.mxu0 %v1735_v9  ;;  %1485 = vmatprep.subr.bf16.mxu1 %v1746_v10 }
  0x81   :  { %1202 = vmatprep.subr.bf16.mxu0 %v1746_v10 }
  0x82   :  { %1076 = vmatmul.mubr.bf16.vlgmr.msra.gmra.mrb[0].mxu1 %v1738_v11 }
  0x83   :  { %1182 = vmatmul.mubr.bf16.vlgmr.msra.gmra.mrb[0].mxu0 %v1741_v12  ;;  %1493 = vmatpush1.bf16.msra.mxu1 %v1744_v13 }
  0x84   :  { %1203 = vmatpush1.bf16.msra.mxu0 %v1744_v13  ;;  %1486 = vmatprep.subr.bf16.mxu1 %v1749_v14 }
  0x85   :  { %1204 = vmatprep.subr.bf16.mxu0 %v1749_v14  ;;  %1085 = vmatprep.mubr.bf16.mxu1 %v1750_v15 }
  0x86   :  { %1191 = vmatprep.mubr.bf16.mxu0 %v1752_v16 }
  0x87   :  { %1494 = vmatpush1.bf16.msra.mxu1 %v1747_v17 }
  0x88   :  { %1205 = vmatpush1.bf16.msra.mxu0 %v1747_v17  ;;  %1487 = vmatprep.subr.bf16.mxu1 %v1758_v18 }
  0x89   :  { %1206 = vmatprep.subr.bf16.mxu0 %v1758_v18 }
  0x8a   :  { %1086 = vmatmul.mubr.bf16.gmra.mrb[4].mxu1 %v1754_v19 }
  0x8b   :  { %1192 = vmatmul.mubr.bf16.gmra.mrb[4].mxu0 %v1755_v20  ;;  %1495 = vmatpush1.bf16.msra.mxu1 %v1756_v21 }
  0x8c   :  { %1207 = vmatpush1.bf16.msra.mxu0 %v1756_v21  ;;  %1488 = vmatprep.subr.bf16.mxu1 %v1761_v22 }
  0x8d   :  { %1208 = vmatprep.subr.bf16.mxu0 %v1761_v22  ;;  %1234 = vmatprep.mubr.bf16.mxu0 %v1776_v25 }
  0x8e   :  { %1244 = vmatprep.mubr.bf16.mxu1 %v1776_v25 }
  0x8f   :  { %1496 = vmatpush1.bf16.msra.mxu1 %v1759_v23 }
  0x90   :  { %1209 = vmatpush1.bf16.msra.mxu0 %v1759_v23  ;;  %1489 = vmatprep.subr.bf16.mxu1 %v1764_v24 }
  0x91   :  { %1210 = vmatprep.subr.bf16.mxu0 %v1764_v24 }
  0x93   :  { %1497 = vmatpush1.bf16.msra.mxu1 %v1762_v26 }
  0x94   :  { %1211 = vmatpush1.bf16.msra.mxu0 %v1762_v26  ;;  %1490 = vmatprep.subr.bf16.mxu1 %v1767_v27 }
  0x95   :  { %1212 = vmatprep.subr.bf16.mxu0 %v1767_v27 }
  0x97   :  { %1498 = vmatpush1.bf16.msra.mxu1 %v1765_v28 }
  0x98   :  { %1213 = vmatpush1.bf16.msra.mxu0 %v1765_v28  ;;  %1491 = vmatprep.subr.bf16.mxu1 %v1770_v29 }
  0x99   :  { %1214 = vmatprep.subr.bf16.mxu0 %v1770_v29 }
  0x9b   :  { %1499 = vmatpush1.bf16.msra.mxu1 %v1768_v30 }
  0x9c   :  { %1215 = vmatpush1.bf16.msra.mxu0 %v1768_v30  ;;  %1492 = vmatprep.subr.bf16.mxu1 %v1773_v31 }
  0x9d   :  { %1216 = vmatprep.subr.bf16.mxu0 %v1773_v31 }
  0x9f   :  { %1500 = vmatpush1.bf16.msra.mxu1 %v1771_v32 }
  0xa0   :  { %1217 = vmatpush1.bf16.msra.mxu0 %v1771_v32 }
  0xa2   :  { %1245 = vmatmul.mubr.bf16.vlgmr.msra.gmra.mrb[8].mxu1 %v1775_v34 }
  0xa3   :  { %1235 = vmatmul.mubr.bf16.vlgmr.msra.gmra.mrb[0].mxu0 %v1774_v33 }
 0x155   :  { %v1077_v35 = vpop.f32.mrb[0].mxu1 }
 0x156   :  { %v1079_v36 = vpop.f32.mrb[1].mxu1 }
 0x157   :  { %v1081_v37 = vpop.f32.mrb[2].mxu1 }
 0x158   :  { %v1083_v38 = vpop.f32.mrb[3].mxu1 }
 0x15d   :  { %v1087_v39 = vpop.f32.mrb[4].mxu1 }
 0x15e   :  { %v1193_v40 = vpop.f32.mrb[4].mxu0  ;;  %v1089_v42 = vpop.f32.mrb[5].mxu1 }
 0x15f   :  { %v1505_v41 = vadd.f32 %v1193_v40, %v1087_v39  ;;  %v1195_v43 = vpop.f32.mrb[5].mxu0  ;;  %v1091_v45 = vpop.f32.mrb[6].mxu1 }
 0x160   :  { %v1507_v44 = vadd.f32 %v1195_v43, %v1089_v42  ;;  %v1197_v46 = vpop.f32.mrb[6].mxu0  ;;  %v1093_v48 = vpop.f32.mrb[7].mxu1 }
 0x161   :  { %v1509_v47 = vadd.f32 %v1197_v46, %v1091_v45  ;;  %v1199_v49 = vpop.f32.mrb[7].mxu0 }
 0x162   :  { %v1511_v50 = vadd.f32 %v1199_v49, %v1093_v48 }
 0x175   :  { %v1246_v52 = vpop.f32.mrb[8].mxu1 }
 0x176   :  { %v1236_v51 = vpop.f32.mrb[0].mxu0  ;;  %v1506_v54 = vadd.f32 %v1505_v41, %v1246_v52  ;;  %v1248_v56 = vpop.f32.mrb[9].mxu1 }
 0x177   :  { %v1501_v53 = vadd.f32 %v1236_v51, %v1077_v35  ;;  %v1238_v55 = vpop.f32.mrb[1].mxu0  ;;  %v1508_v58 = vadd.f32 %v1507_v44, %v1248_v56  ;;  %v1250_v60 = vpop.f32.mrb[10].mxu1 }
 0x178   :  { %v1502_v57 = vadd.f32 %v1238_v55, %v1079_v36  ;;  %v1240_v59 = vpop.f32.mrb[2].mxu0  ;;  %1259 = vst [vmem:[%s2315_s2 + $0x20] sm:$0xff] %v1506_v54  ;;  %v1510_v62 = vadd.f32 %v1509_v47, %v1250_v60  ;;  %v1252_v0 = vpop.f32.mrb[11].mxu1  ;;  %v1285_v9 = vmul.f32 %v1506_v54, %v1506_v54 }
 0x179   :  { %1255 = vst [vmem:[%s2315_s2] sm:$0xff] %v1501_v53  ;;  %v1503_v61 = vadd.f32 %v1240_v59, %v1081_v37  ;;  %v1242_v63 = vpop.f32.mrb[3].mxu0  ;;  %1260 = vst [vmem:[%s2315_s2 + $0x28] sm:$0xff] %v1508_v58  ;;  %v1512_v2 = vadd.f32 %v1511_v50, %v1252_v0  ;;  %v1281_v3 = vmul.f32 %v1501_v53, %v1501_v53 }
 0x17a   :  { %1256 = vst [vmem:[%s2315_s2 + $0x8] sm:$0xff] %v1502_v57  ;;  %v1504_v1 = vadd.f32 %v1242_v63, %v1083_v38  ;;  %1261 = vst [vmem:[%s2315_s2 + $0x30] sm:$0xff] %v1510_v62  ;;  %v1282_v6 = vmul.f32 %v1502_v57, %v1502_v57  ;;  %v1286_v12 = vmul.f32 %v1508_v58, %v1508_v58 }
 0x17b   :  { %1257 = vst [vmem:[%s2315_s2 + $0x10] sm:$0xff] %v1503_v61  ;;  %v1263_v4 = vadd.f32 %v1503_v61, %v1501_v53  ;;  %v1283_v5 = vmul.f32 %v1503_v61, %v1503_v61  ;;  %1262 = vst [vmem:[%s2315_s2 + $0x38] sm:$0xff] %v1512_v2  ;;  %v1287_v16 = vmul.f32 %v1510_v62, %v1510_v62 }
 0x17c   :  { %1258 = vst [vmem:[%s2315_s2 + $0x18] sm:$0xff] %v1504_v1  ;;  %v1272_v7 = vadd.f32 %v1504_v1, %v1502_v57  ;;  %v1284_v8 = vmul.f32 %v1504_v1, %v1504_v1  ;;  %v1288_v19 = vmul.f32 %v1512_v2, %v1512_v2 }
 0x17d   :  { %v1289_v10 = vadd.f32 %v1283_v5, %v1281_v3  ;;  %v1264_v11 = vadd.f32 %v1506_v54, %v1263_v4 }
 0x17e   :  { %v1298_v13 = vadd.f32 %v1284_v8, %v1282_v6  ;;  %v1273_v14 = vadd.f32 %v1508_v58, %v1272_v7 }
 0x17f   :  { %v1265_v15 = vadd.f32 %v1510_v62, %v1264_v11  ;;  %v1290_v17 = vadd.f32 %v1289_v10, %v1285_v9 }
 0x180   :  { %v1274_v18 = vadd.f32 %v1512_v2, %v1273_v14  ;;  %v1299_v20 = vadd.f32 %v1298_v13, %v1286_v12 }
 0x181   :  { %v1266_v21 = vrot.slane %v1265_v15, 4  ;;  %v1291_v22 = vadd.f32 %v1290_v17, %v1287_v16 }
 0x182   :  { %v1275_v23 = vrot.slane %v1274_v18, 4  ;;  %v1300_v24 = vadd.f32 %v1299_v20, %v1288_v19 }
 0x183   :  { %v1267_v25 = vadd.f32 %v1266_v21, %v1265_v15  ;;  %v1292_v26 = vrot.slane %v1291_v22, 4 }
 0x184   :  { %v1276_v27 = vadd.f32 %v1275_v23, %v1274_v18  ;;  %v1301_v28 = vrot.slane %v1300_v24, 4 }
 0x185   :  { %v1268_v29 = vrot.slane %v1267_v25, 2  ;;  %v1293_v30 = vadd.f32 %v1292_v26, %v1291_v22 }
 0x186   :  { %v1277_v31 = vrot.slane %v1276_v27, 2  ;;  %v1302_v32 = vadd.f32 %v1301_v28, %v1300_v24 }
 0x187   :  { %v1269_v33 = vadd.f32 %v1268_v29, %v1267_v25  ;;  %v1294_v34 = vrot.slane %v1293_v30, 2 }
 0x188   :  { %v1278_v35 = vadd.f32 %v1277_v31, %v1276_v27  ;;  %v1303_v36 = vrot.slane %v1302_v32, 2 }
 0x189   :  { %v1270_v37 = vrot.slane %v1269_v33, 1  ;;  %v1295_v38 = vadd.f32 %v1294_v34, %v1293_v30 }
 0x18a   :  { %v1279_v39 = vrot.slane %v1278_v35, 1  ;;  %v1304_v40 = vadd.f32 %v1303_v36, %v1302_v32 }
 0x18b   :  { %v1296_v41 = vrot.slane %v1295_v38, 1  ;;  %v1271_v43 = vadd.f32 %v1270_v37, %v1269_v33 }
 0x18c   :  { %v1305_v42 = vrot.slane %v1304_v40, 1  ;;  %v1280_v45 = vadd.f32 %v1279_v39, %v1278_v35 }
 0x18d   :  { %v1297_v44 = vadd.f32 %v1296_v41, %v1295_v38 }
 0x18e   :  { %v1306_v46 = vadd.f32 %v1305_v42, %v1304_v40 }
 0x18f   :  { %v1308_v47 = vsel %vm1307_vm0, %v1271_v43, %v1297_v44 }
 0x190   :  { %v1311_v48 = vsel %vm1310_vm1, %v1308_v47, 0.0  ;;  %v1309_v49 = vsel %vm1307_vm0, %v1280_v45, %v1306_v46 }
 0x191   :  { %1313 = vst [vmem:[%s2316_s3] sm:$0xff] %v1311_v48  ;;  %v1312_v50 = vsel %vm1310_vm1, %v1309_v49, 0.0 }
 0x192   :  { %1314 = vst [vmem:[%s2316_s3 + $0x8] sm:$0xff] %v1312_v50 }

// kernel: ems_yolo_forward.19
= control target key start
LH: loop header
LB: loop body
LE: loop exit
PB: predicated region body
PF: predicated region fallthrough
CT: control target
= control target key end

     0   :  { %v420_v48 = vlaneseq  ;;  %s1263_s1 = inlined_call_operand.vmem [shape: bf16[256,256], index: 1, kind: input, shape index: {}]   ;;  %s1264_s0 = inlined_call_operand.vmem [shape: bf16[128,256], index: 0, kind: input, shape index: {}]   ;;  %s1265_s2 = inlined_call_operand.vmem [shape: f32[1,256], index: 2, kind: input, shape index: {}]   ;;  %s1266_s3 = inlined_call_operand.vmem [shape: f32[1,256], index: 3, kind: input, shape index: {}]   ;;  %s1267_s4 = inlined_call_operand.vmem [shape: bf16[128,256], index: 4, kind: output, shape index: {}]  }
   0x1   :  { %v863_v0 = vld [vmem:[%s1263_s1 + $0x4] ss:$8 sps:$4 sm:$0xff]   ;;  %v865_v1 = vld [vmem:[%s1263_s1] ss:$8 sps:$4 sm:$0xff]   ;;  %v866_v2 = vld [vmem:[%s1263_s1 + $0x14] ss:$8 sps:$4 sm:$0xff]  }
   0x2   :  { %305 = vmatprep.subr.bf16.mxu0 %v863_v0  ;;  %830 = vmatprep.subr.bf16.mxu1 %v863_v0  ;;  %v868_v3 = vld [vmem:[%s1263_s1 + $0x10] ss:$8 sps:$4 sm:$0xff]   ;;  %v869_v4 = vld [vmem:[%s1263_s1 + $0x24] ss:$8 sps:$4 sm:$0xff]   ;;  %v871_v5 = vld [vmem:[%s1263_s1 + $0x20] ss:$8 sps:$4 sm:$0xff]  }
   0x3   :  { %306 = vmatpush1.bf16.msra.mxu0 %v865_v1  ;;  %846 = vmatpush1.bf16.msra.mxu1 %v865_v1  ;;  %v872_v6 = vld [vmem:[%s1263_s1 + $0x34] ss:$8 sps:$4 sm:$0xff]   ;;  %v874_v7 = vld [vmem:[%s1263_s1 + $0x30] ss:$8 sps:$4 sm:$0xff]   ;;  %v875_v8 = vld [vmem:[%s1263_s1 + $0x44] ss:$8 sps:$4 sm:$0xff]  }
   0x4   :  { %307 = vmatprep.subr.bf16.mxu0 %v866_v2  ;;  %831 = vmatprep.subr.bf16.mxu1 %v866_v2  ;;  %v877_v9 = vld [vmem:[%s1263_s1 + $0x40] ss:$8 sps:$4 sm:$0xff]   ;;  %v878_v10 = vld [vmem:[%s1263_s1 + $0x54] ss:$8 sps:$4 sm:$0xff]   ;;  %v880_v11 = vld [vmem:[%s1263_s1 + $0x50] ss:$8 sps:$4 sm:$0xff]  }
   0x5   :  { %v881_v12 = vld [vmem:[%s1263_s1 + $0x64] ss:$8 sps:$4 sm:$0xff]   ;;  %v883_v14 = vld [vmem:[%s1263_s1 + $0x60] ss:$8 sps:$4 sm:$0xff]   ;;  %v884_v16 = vld [vmem:[%s1263_s1 + $0x74] ss:$8 sps:$4 sm:$0xff]  }
   0x6   :  { %v913_v13 = vld [vmem:[%s1264_s0 + $0x4] ss:$8 sps:$4 sm:$0xff]   ;;  %v886_v17 = vld [vmem:[%s1263_s1 + $0x70] ss:$8 sps:$4 sm:$0xff]   ;;  %v889_v19 = vld [vmem:[%s1263_s1 + $0x80] ss:$8 sps:$4 sm:$0xff]  }
   0x7   :  { %308 = vmatpush1.bf16.msra.mxu0 %v868_v3  ;;  %847 = vmatpush1.bf16.msra.mxu1 %v868_v3  ;;  %v916_v15 = vld [vmem:[%s1264_s0 + $0x44] ss:$8 sps:$4 sm:$0xff]   ;;  %v890_v20 = vld [vmem:[%s1263_s1 + $0x94] ss:$8 sps:$4 sm:$0xff]   ;;  %v892_v21 = vld [vmem:[%s1263_s1 + $0x90] ss:$8 sps:$4 sm:$0xff]  }
   0x8   :  { %309 = vmatprep.subr.bf16.mxu0 %v869_v4  ;;  %832 = vmatprep.subr.bf16.mxu1 %v869_v4  ;;  %v887_v18 = vld [vmem:[%s1263_s1 + $0x84] ss:$8 sps:$4 sm:$0xff]   ;;  %v895_v23 = vld [vmem:[%s1263_s1 + $0xa0] ss:$8 sps:$4 sm:$0xff]   ;;  %v896_v24 = vld [vmem:[%s1263_s1 + $0xb4] ss:$8 sps:$4 sm:$0xff]  }
   0x9   :  { %337 = vmatprep.mubr.bf16.mxu0 %v913_v13  ;;  %377 = vmatprep.mubr.bf16.mxu1 %v916_v15  ;;  %v893_v22 = vld [vmem:[%s1263_s1 + $0xa4] ss:$8 sps:$4 sm:$0xff]   ;;  %v898_v25 = vld [vmem:[%s1263_s1 + $0xb0] ss:$8 sps:$4 sm:$0xff]   ;;  %v901_v27 = vld [vmem:[%s1263_s1 + $0xc0] ss:$8 sps:$4 sm:$0xff]  }
   0xa   :  { %v899_v26 = vld [vmem:[%s1263_s1 + $0xc4] ss:$8 sps:$4 sm:$0xff]   ;;  %v902_v28 = vld [vmem:[%s1263_s1 + $0xd4] ss:$8 sps:$4 sm:$0xff]   ;;  %v904_v29 = vld [vmem:[%s1263_s1 + $0xd0] ss:$8 sps:$4 sm:$0xff]  }
   0xb   :  { %310 = vmatpush1.bf16.msra.mxu0 %v871_v5  ;;  %848 = vmatpush1.bf16.msra.mxu1 %v871_v5  ;;  %v905_v30 = vld [vmem:[%s1263_s1 + $0xe4] ss:$8 sps:$4 sm:$0xff]   ;;  %v907_v31 = vld [vmem:[%s1263_s1 + $0xe0] ss:$8 sps:$4 sm:$0xff]   ;;  %v908_v32 = vld [vmem:[%s1263_s1 + $0xf4] ss:$8 sps:$4 sm:$0xff]  }
   0xc   :  { %311 = vmatprep.subr.bf16.mxu0 %v872_v6  ;;  %833 = vmatprep.subr.bf16.mxu1 %v872_v6  ;;  %v910_v33 = vld [vmem:[%s1263_s1 + $0xf0] ss:$8 sps:$4 sm:$0xff]   ;;  %v911_v34 = vld [vmem:[%s1264_s0] ss:$8 sps:$4 sm:$0xff]   ;;  %v917_v36 = vld [vmem:[%s1264_s0 + $0x14] ss:$8 sps:$4 sm:$0xff]  }
   0xd   :  { %v914_v35 = vld [vmem:[%s1264_s0 + $0x40] ss:$8 sps:$4 sm:$0xff]   ;;  %v919_v37 = vld [vmem:[%s1264_s0 + $0x54] ss:$8 sps:$4 sm:$0xff]   ;;  %v921_v38 = vld [vmem:[%s1264_s0 + $0x10] ss:$8 sps:$4 sm:$0xff]  }
   0xe   :  { %v922_v39 = vld [vmem:[%s1264_s0 + $0x50] ss:$8 sps:$4 sm:$0xff]   ;;  %v923_v40 = vld [vmem:[%s1264_s0 + $0x24] ss:$8 sps:$4 sm:$0xff]   ;;  %v927_v42 = vld [vmem:[%s1264_s0 + $0x20] ss:$8 sps:$4 sm:$0xff]  }
   0xf   :  { %312 = vmatpush1.bf16.msra.mxu0 %v874_v7  ;;  %849 = vmatpush1.bf16.msra.mxu1 %v874_v7  ;;  %v925_v41 = vld [vmem:[%s1264_s0 + $0x64] ss:$8 sps:$4 sm:$0xff]   ;;  %v928_v43 = vld [vmem:[%s1264_s0 + $0x60] ss:$8 sps:$4 sm:$0xff]   ;;  %v929_v44 = vld [vmem:[%s1264_s0 + $0x34] ss:$8 sps:$4 sm:$0xff]  }
  0x10   :  { %313 = vmatprep.subr.bf16.mxu0 %v875_v8  ;;  %834 = vmatprep.subr.bf16.mxu1 %v875_v8  ;;  %v931_v45 = vld [vmem:[%s1264_s0 + $0x74] ss:$8 sps:$4 sm:$0xff]   ;;  %v933_v46 = vld [vmem:[%s1264_s0 + $0x30] ss:$8 sps:$4 sm:$0xff]   ;;  %v421_v49 = vshrl.u32 %v420_v48, 7 }
  0x11   :  { %v934_v47 = vld [vmem:[%s1264_s0 + $0x70] ss:$8 sps:$4 sm:$0xff]   ;;  %v418_v51 = vld [vmem:[%s1265_s2] sm:$0x3] }
  0x12   :  { %v422_v50 = vsub.s32 0, %v421_v49  ;;  %v426_v52 = vsub.s32 1, %v421_v49  ;;  %v462_v53 = vld [vmem:[%s1266_s3] sm:$0x3] }
  0x13   :  { %314 = vmatpush1.bf16.msra.mxu0 %v877_v9  ;;  %850 = vmatpush1.bf16.msra.mxu1 %v877_v9 }
  0x14   :  { %315 = vmatprep.subr.bf16.mxu0 %v878_v10  ;;  %835 = vmatprep.subr.bf16.mxu1 %v878_v10  ;;  %v1111_v54 = vrot.slane %v418_v51, %v422_v50  ;;  %v1113_v55 = vrot.slane %v418_v51, %v426_v52  ;;  %v1115_v56 = vrot.slane %v462_v53, %v422_v50 }
  0x15   :  { %v1117_v59 = vrot.slane %v462_v53, %v426_v52 }
  0x17   :  { %316 = vmatpush1.bf16.msra.mxu0 %v880_v11  ;;  %851 = vmatpush1.bf16.msra.mxu1 %v880_v11 }
  0x18   :  { %317 = vmatprep.subr.bf16.mxu0 %v881_v12  ;;  %836 = vmatprep.subr.bf16.mxu1 %v881_v12 }
  0x1b   :  { %318 = vmatpush1.bf16.msra.mxu0 %v883_v14  ;;  %852 = vmatpush1.bf16.msra.mxu1 %v883_v14 }
  0x1c   :  { %319 = vmatprep.subr.bf16.mxu0 %v884_v16  ;;  %837 = vmatprep.subr.bf16.mxu1 %v884_v16  ;;  %v935_v16 = vmov 0.0  }
  0x1f   :  { %320 = vmatpush1.bf16.msra.mxu0 %v886_v17  ;;  %853 = vmatpush1.bf16.msra.mxu1 %v886_v17 }
  0x20   :  { %321 = vmatprep.subr.bf16.mxu0 %v887_v18  ;;  %838 = vmatprep.subr.bf16.mxu1 %v887_v18 }
  0x23   :  { %322 = vmatpush1.bf16.msra.mxu0 %v889_v19  ;;  %854 = vmatpush1.bf16.msra.mxu1 %v889_v19 }
  0x24   :  { %323 = vmatprep.subr.bf16.mxu0 %v890_v20  ;;  %839 = vmatprep.subr.bf16.mxu1 %v890_v20 }
  0x27   :  { %324 = vmatpush1.bf16.msra.mxu0 %v892_v21  ;;  %855 = vmatpush1.bf16.msra.mxu1 %v892_v21 }
  0x28   :  { %325 = vmatprep.subr.bf16.mxu0 %v893_v22  ;;  %840 = vmatprep.subr.bf16.mxu1 %v893_v22 }
  0x2b   :  { %326 = vmatpush1.bf16.msra.mxu0 %v895_v23  ;;  %856 = vmatpush1.bf16.msra.mxu1 %v895_v23 }
  0x2c   :  { %327 = vmatprep.subr.bf16.mxu0 %v896_v24  ;;  %841 = vmatprep.subr.bf16.mxu1 %v896_v24 }
  0x2f   :  { %328 = vmatpush1.bf16.msra.mxu0 %v898_v25  ;;  %857 = vmatpush1.bf16.msra.mxu1 %v898_v25 }
  0x30   :  { %329 = vmatprep.subr.bf16.mxu0 %v899_v26  ;;  %842 = vmatprep.subr.bf16.mxu1 %v899_v26 }
  0x33   :  { %330 = vmatpush1.bf16.msra.mxu0 %v901_v27  ;;  %858 = vmatpush1.bf16.msra.mxu1 %v901_v27 }
  0x34   :  { %331 = vmatprep.subr.bf16.mxu0 %v902_v28  ;;  %843 = vmatprep.subr.bf16.mxu1 %v902_v28 }
  0x37   :  { %332 = vmatpush1.bf16.msra.mxu0 %v904_v29  ;;  %859 = vmatpush1.bf16.msra.mxu1 %v904_v29 }
  0x38   :  { %333 = vmatprep.subr.bf16.mxu0 %v905_v30  ;;  %844 = vmatprep.subr.bf16.mxu1 %v905_v30 }
  0x3b   :  { %334 = vmatpush1.bf16.msra.mxu0 %v907_v31  ;;  %860 = vmatpush1.bf16.msra.mxu1 %v907_v31 }
  0x3c   :  { %335 = vmatprep.subr.bf16.mxu0 %v908_v32  ;;  %845 = vmatprep.subr.bf16.mxu1 %v908_v32 }
  0x3f   :  { %336 = vmatpush1.bf16.msra.mxu0 %v910_v33  ;;  %861 = vmatpush1.bf16.msra.mxu1 %v910_v33 }
  0x42   :  { %338 = vmatmul.mubr.bf16.vlgmr.msra.gmra.mrb[0].mxu0 %v911_v34  ;;  %378 = vmatmul.mubr.bf16.vlgmr.msra.gmra.mrb[0].mxu1 %v914_v35 }
  0x43   :  { %347 = vmatprep.mubr.bf16.mxu0 %v917_v36  ;;  %387 = vmatprep.mubr.bf16.mxu1 %v919_v37 }
  0x4a   :  { %348 = vmatmul.mubr.bf16.gmra.mrb[4].mxu0 %v921_v38  ;;  %388 = vmatmul.mubr.bf16.gmra.mrb[4].mxu1 %v922_v39 }
  0x4b   :  { %357 = vmatprep.mubr.bf16.mxu0 %v923_v40  ;;  %397 = vmatprep.mubr.bf16.mxu1 %v925_v41 }
  0x52   :  { %358 = vmatmul.mubr.bf16.gmra.mrb[8].mxu0 %v927_v42  ;;  %398 = vmatmul.mubr.bf16.gmra.mrb[8].mxu1 %v928_v43 }
  0x53   :  { %367 = vmatprep.mubr.bf16.mxu0 %v929_v44  ;;  %407 = vmatprep.mubr.bf16.mxu1 %v931_v45 }
  0x5a   :  { %368 = vmatmul.mubr.bf16.gmra.mrb[12].mxu0 %v933_v46  ;;  %408 = vmatmul.mubr.bf16.gmra.mrb[12].mxu1 %v934_v47 }
 0x115   :  { %v339_v57 = vpop.f32.mrb[0].mxu0  ;;  %v379_v58 = vpop.f32.mrb[0].mxu1 }
 0x116   :  { %v430_v60 = vmul.f32 %v1111_v54, %v339_v57  ;;  %v446_v61 = vmul.f32 %v1111_v54, %v379_v58  ;;  %v341_v62 = vpop.f32.mrb[1].mxu0  ;;  %v381_v63 = vpop.f32.mrb[1].mxu1 }
 0x117   :  { %v431_v0 = vmul.f32 %v1113_v55, %v341_v62  ;;  %v447_v1 = vmul.f32 %v1113_v55, %v381_v63  ;;  %v343_v2 = vpop.f32.mrb[2].mxu0  ;;  %v383_v3 = vpop.f32.mrb[2].mxu1 }
 0x118   :  { %v474_v4 = vadd.f32 %v1115_v56, %v430_v60  ;;  %v490_v5 = vadd.f32 %v1115_v56, %v446_v61  ;;  %v432_v6 = vmul.f32 %v1111_v54, %v343_v2  ;;  %v448_v7 = vmul.f32 %v1111_v54, %v383_v3  ;;  %v345_v8 = vpop.f32.mrb[3].mxu0  ;;  %v385_v9 = vpop.f32.mrb[3].mxu1 }
 0x119   :  { %v475_v10 = vadd.f32 %v1117_v59, %v431_v0  ;;  %v491_v11 = vadd.f32 %v1117_v59, %v447_v1  ;;  %v433_v12 = vmul.f32 %v1113_v55, %v345_v8  ;;  %v449_v13 = vmul.f32 %v1113_v55, %v385_v9 }
 0x11a   :  { %vm506_vm0 = vcmp.ge.f32.partialorder %v474_v4, 0.0  ;;  %vm522_vm1 = vcmp.ge.f32.partialorder %v490_v5, 0.0  ;;  %v476_v14 = vadd.f32 %v1115_v56, %v432_v6  ;;  %v492_v15 = vadd.f32 %v1115_v56, %v448_v7 }
 0x11b   :  { %v766_v17 = vsel %vm506_vm0, 1.0, %v935_v16  ;;  %v782_v18 = vsel %vm522_vm1, 1.0, %v935_v16  ;;  %vm507_vm2 = vcmp.ge.f32.partialorder %v475_v10, 0.0  ;;  %vm523_vm3 = vcmp.ge.f32.partialorder %v491_v11, 0.0 }
 0x11c   :  { %v767_v19 = vsel %vm507_vm2, 1.0, %v935_v16  ;;  %v783_v20 = vsel %vm523_vm3, 1.0, %v935_v16  ;;  %vm508_vm4 = vcmp.ge.f32.partialorder %v476_v14, 0.0  ;;  %vm524_vm5 = vcmp.ge.f32.partialorder %v492_v15, 0.0 }
 0x11d   :  { %v814_v21 = vpack.c.bf16 %v767_v19, %v766_v17  ;;  %v822_v22 = vpack.c.bf16 %v783_v20, %v782_v18  ;;  %v349_v23 = vpop.f32.mrb[4].mxu0  ;;  %v389_v24 = vpop.f32.mrb[4].mxu1  ;;  %v477_v25 = vadd.f32 %v1117_v59, %v433_v12  ;;  %v493_v26 = vadd.f32 %v1117_v59, %v449_v13 }
 0x11e   :  { %v434_v27 = vmul.f32 %v1111_v54, %v349_v23  ;;  %v450_v28 = vmul.f32 %v1111_v54, %v389_v24  ;;  %v351_v29 = vpop.f32.mrb[5].mxu0  ;;  %v391_v30 = vpop.f32.mrb[5].mxu1  ;;  %v768_v31 = vsel %vm508_vm4, 1.0, %v935_v16  ;;  %v784_v32 = vsel %vm524_vm5, 1.0, %v935_v16 }
 0x11f   :  { %698 = vst [vmem:[%s1267_s4] sm:$0xff] %v814_v21  ;;  %706 = vst [vmem:[%s1267_s4 + $0x40] sm:$0xff] %v822_v22  ;;  %v435_v33 = vmul.f32 %v1113_v55, %v351_v29  ;;  %v451_v34 = vmul.f32 %v1113_v55, %v391_v30  ;;  %v353_v35 = vpop.f32.mrb[6].mxu0  ;;  %v393_v36 = vpop.f32.mrb[6].mxu1  ;;  %vm509_vm6 = vcmp.ge.f32.partialorder %v477_v25, 0.0  ;;  %vm525_vm7 = vcmp.ge.f32.partialorder %v493_v26, 0.0 }
 0x120   :  { %v478_v37 = vadd.f32 %v1115_v56, %v434_v27  ;;  %v494_v38 = vadd.f32 %v1115_v56, %v450_v28  ;;  %v355_v39 = vpop.f32.mrb[7].mxu0  ;;  %v395_v40 = vpop.f32.mrb[7].mxu1  ;;  %v769_v41 = vsel %vm509_vm6, 1.0, %v935_v16  ;;  %v785_v42 = vsel %vm525_vm7, 1.0, %v935_v16 }
 0x121   :  { %v479_v43 = vadd.f32 %v1117_v59, %v435_v33  ;;  %v495_v44 = vadd.f32 %v1117_v59, %v451_v34  ;;  %v815_v45 = vpack.c.bf16 %v769_v41, %v768_v31  ;;  %v823_v46 = vpack.c.bf16 %v785_v42, %v784_v32 }
 0x122   :  { %vm510_vm8 = vcmp.ge.f32.partialorder %v478_v37, 0.0  ;;  %vm526_vm9 = vcmp.ge.f32.partialorder %v494_v38, 0.0  ;;  %v436_v51 = vmul.f32 %v1111_v54, %v353_v35  ;;  %v452_v52 = vmul.f32 %v1111_v54, %v393_v36 }
 0x123   :  { %v770_v47 = vsel %vm510_vm8, 1.0, %v935_v16  ;;  %v786_v48 = vsel %vm526_vm9, 1.0, %v935_v16  ;;  %vm511_vm10 = vcmp.ge.f32.partialorder %v479_v43, 0.0  ;;  %vm527_vm11 = vcmp.ge.f32.partialorder %v495_v44, 0.0  ;;  %699 = vst [vmem:[%s1267_s4 + $0x8] sm:$0xff] %v815_v45  ;;  %707 = vst [vmem:[%s1267_s4 + $0x48] sm:$0xff] %v823_v46 }
 0x124   :  { %v771_v49 = vsel %vm511_vm10, 1.0, %v935_v16  ;;  %v787_v50 = vsel %vm527_vm11, 1.0, %v935_v16  ;;  %v437_v58 = vmul.f32 %v1113_v55, %v355_v39  ;;  %v453_v60 = vmul.f32 %v1113_v55, %v395_v40 }
 0x125   :  { %v816_v53 = vpack.c.bf16 %v771_v49, %v770_v47  ;;  %v824_v57 = vpack.c.bf16 %v787_v50, %v786_v48  ;;  %v359_v61 = vpop.f32.mrb[8].mxu0  ;;  %v399_v62 = vpop.f32.mrb[8].mxu1  ;;  %v480_v63 = vadd.f32 %v1115_v56, %v436_v51  ;;  %v496_v0 = vadd.f32 %v1115_v56, %v452_v52 }
 0x126   :  { %v438_v1 = vmul.f32 %v1111_v54, %v359_v61  ;;  %v454_v2 = vmul.f32 %v1111_v54, %v399_v62  ;;  %v361_v3 = vpop.f32.mrb[9].mxu0  ;;  %v401_v4 = vpop.f32.mrb[9].mxu1  ;;  %v481_v5 = vadd.f32 %v1117_v59, %v437_v58  ;;  %v497_v6 = vadd.f32 %v1117_v59, %v453_v60 }
 0x127   :  { %700 = vst [vmem:[%s1267_s4 + $0x10] sm:$0xff] %v816_v53  ;;  %708 = vst [vmem:[%s1267_s4 + $0x50] sm:$0xff] %v824_v57  ;;  %v439_v7 = vmul.f32 %v1113_v55, %v361_v3  ;;  %v455_v8 = vmul.f32 %v1113_v55, %v401_v4  ;;  %v363_v9 = vpop.f32.mrb[10].mxu0  ;;  %v403_v10 = vpop.f32.mrb[10].mxu1  ;;  %vm512_vm12 = vcmp.ge.f32.partialorder %v480_v63, 0.0  ;;  %vm528_vm13 = vcmp.ge.f32.partialorder %v496_v0, 0.0 }
 0x128   :  { %v482_v11 = vadd.f32 %v1115_v56, %v438_v1  ;;  %v498_v12 = vadd.f32 %v1115_v56, %v454_v2  ;;  %v365_v13 = vpop.f32.mrb[11].mxu0  ;;  %v405_v14 = vpop.f32.mrb[11].mxu1  ;;  %v772_v15 = vsel %vm512_vm12, 1.0, %v935_v16  ;;  %v788_v17 = vsel %vm528_vm13, 1.0, %v935_v16 }
 0x129   :  { %vm513_vm14 = vcmp.ge.f32.partialorder %v481_v5, 0.0  ;;  %vm529_vm15 = vcmp.ge.f32.partialorder %v497_v6, 0.0  ;;  %v483_v22 = vadd.f32 %v1117_v59, %v439_v7  ;;  %v499_v23 = vadd.f32 %v1117_v59, %v455_v8 }
 0x12a   :  { %v773_v18 = vsel %vm513_vm14, 1.0, %v935_v16  ;;  %v789_v19 = vsel %vm529_vm15, 1.0, %v935_v16  ;;  %vm514_vm0 = vcmp.ge.f32.partialorder %v482_v11, 0.0  ;;  %vm530_vm1 = vcmp.ge.f32.partialorder %v498_v12, 0.0 }
 0x12b   :  { %v817_v20 = vpack.c.bf16 %v773_v18, %v772_v15  ;;  %v825_v21 = vpack.c.bf16 %v789_v19, %v788_v17  ;;  %v440_v24 = vmul.f32 %v1111_v54, %v363_v9  ;;  %v456_v25 = vmul.f32 %v1111_v54, %v403_v10 }
 0x12c   :  { %v774_v26 = vsel %vm514_vm0, 1.0, %v935_v16  ;;  %v790_v27 = vsel %vm530_vm1, 1.0, %v935_v16  ;;  %v441_v28 = vmul.f32 %v1113_v55, %v365_v13  ;;  %v457_v29 = vmul.f32 %v1113_v55, %v405_v14 }
 0x12d   :  { %701 = vst [vmem:[%s1267_s4 + $0x18] sm:$0xff] %v817_v20  ;;  %709 = vst [vmem:[%s1267_s4 + $0x58] sm:$0xff] %v825_v21  ;;  %v369_v30 = vpop.f32.mrb[12].mxu0  ;;  %v409_v31 = vpop.f32.mrb[12].mxu1  ;;  %vm515_vm2 = vcmp.ge.f32.partialorder %v483_v22, 0.0  ;;  %vm531_vm3 = vcmp.ge.f32.partialorder %v499_v23, 0.0  ;;  %v484_v32 = vadd.f32 %v1115_v56, %v440_v24  ;;  %v500_v33 = vadd.f32 %v1115_v56, %v456_v25 }
 0x12e   :  { %v371_v34 = vpop.f32.mrb[13].mxu0  ;;  %v411_v35 = vpop.f32.mrb[13].mxu1  ;;  %v775_v36 = vsel %vm515_vm2, 1.0, %v935_v16  ;;  %v791_v37 = vsel %vm531_vm3, 1.0, %v935_v16  ;;  %v485_v38 = vadd.f32 %v1117_v59, %v441_v28  ;;  %v501_v39 = vadd.f32 %v1117_v59, %v457_v29 }
 0x12f   :  { %v373_v40 = vpop.f32.mrb[14].mxu0  ;;  %v413_v41 = vpop.f32.mrb[14].mxu1  ;;  %v818_v42 = vpack.c.bf16 %v775_v36, %v774_v26  ;;  %v826_v43 = vpack.c.bf16 %v791_v37, %v790_v27  ;;  %vm516_vm4 = vcmp.ge.f32.partialorder %v484_v32, 0.0  ;;  %vm532_vm5 = vcmp.ge.f32.partialorder %v500_v33, 0.0 }
 0x130   :  { %v375_v44 = vpop.f32.mrb[15].mxu0  ;;  %v415_v45 = vpop.f32.mrb[15].mxu1  ;;  %v776_v46 = vsel %vm516_vm4, 1.0, %v935_v16  ;;  %v792_v47 = vsel %vm532_vm5, 1.0, %v935_v16  ;;  %vm517_vm6 = vcmp.ge.f32.partialorder %v485_v38, 0.0  ;;  %vm533_vm7 = vcmp.ge.f32.partialorder %v501_v39, 0.0 }
 0x131   :  { %702 = vst [vmem:[%s1267_s4 + $0x20] sm:$0xff] %v818_v42  ;;  %710 = vst [vmem:[%s1267_s4 + $0x60] sm:$0xff] %v826_v43  ;;  %v777_v48 = vsel %vm517_vm6, 1.0, %v935_v16  ;;  %v793_v49 = vsel %vm533_vm7, 1.0, %v935_v16  ;;  %v442_v50 = vmul.f32 %v1111_v54, %v369_v30  ;;  %v458_v51 = vmul.f32 %v1111_v54, %v409_v31 }
 0x132   :  { %v819_v52 = vpack.c.bf16 %v777_v48, %v776_v46  ;;  %v827_v53 = vpack.c.bf16 %v793_v49, %v792_v47  ;;  %v443_v57 = vmul.f32 %v1113_v55, %v371_v34  ;;  %v459_v58 = vmul.f32 %v1113_v55, %v411_v35 }
 0x133   :  { %v486_v60 = vadd.f32 %v1115_v56, %v442_v50  ;;  %v502_v61 = vadd.f32 %v1115_v56, %v458_v51  ;;  %v444_v62 = vmul.f32 %v1111_v54, %v373_v40  ;;  %v460_v63 = vmul.f32 %v1111_v54, %v413_v41 }
 0x134   :  { %703 = vst [vmem:[%s1267_s4 + $0x28] sm:$0xff] %v819_v52  ;;  %711 = vst [vmem:[%s1267_s4 + $0x68] sm:$0xff] %v827_v53  ;;  %v487_v0 = vadd.f32 %v1117_v59, %v443_v57  ;;  %v503_v1 = vadd.f32 %v1117_v59, %v459_v58  ;;  %v445_v2 = vmul.f32 %v1113_v55, %v375_v44 }
 0x135   :  { %v461_v3 = vmul.f32 %v1113_v55, %v415_v45  ;;  %vm518_vm8 = vcmp.ge.f32.partialorder %v486_v60, 0.0  ;;  %vm534_vm9 = vcmp.ge.f32.partialorder %v502_v61, 0.0  ;;  %v488_v54 = vadd.f32 %v1115_v56, %v444_v62 }
 0x136   :  { %v504_v4 = vadd.f32 %v1115_v56, %v460_v63  ;;  %v778_v5 = vsel %vm518_vm8, 1.0, %v935_v16  ;;  %v794_v6 = vsel %vm534_vm9, 1.0, %v935_v16  ;;  %vm519_vm10 = vcmp.ge.f32.partialorder %v487_v0, 0.0 }
 0x137   :  { %vm535_vm11 = vcmp.ge.f32.partialorder %v503_v1, 0.0  ;;  %v779_v7 = vsel %vm519_vm10, 1.0, %v935_v16  ;;  %vm520_vm12 = vcmp.ge.f32.partialorder %v488_v54, 0.0  ;;  %v489_v10 = vadd.f32 %v1117_v59, %v445_v2 }
 0x138   :  { %v795_v8 = vsel %vm535_vm11, 1.0, %v935_v16  ;;  %vm536_vm13 = vcmp.ge.f32.partialorder %v504_v4, 0.0  ;;  %v820_v9 = vpack.c.bf16 %v779_v7, %v778_v5  ;;  %v505_v11 = vadd.f32 %v1117_v59, %v461_v3 }
 0x139   :  { %v828_v55 = vpack.c.bf16 %v795_v8, %v794_v6  ;;  %v780_v56 = vsel %vm520_vm12, 1.0, %v935_v16  ;;  %v796_v12 = vsel %vm536_vm13, 1.0, %v935_v16  ;;  %vm521_vm14 = vcmp.ge.f32.partialorder %v489_v10, 0.0 }
 0x13a   :  { %704 = vst [vmem:[%s1267_s4 + $0x30] sm:$0xff] %v820_v9  ;;  %vm537_vm15 = vcmp.ge.f32.partialorder %v505_v11, 0.0  ;;  %v781_v13 = vsel %vm521_vm14, 1.0, %v935_v16 }
 0x13b   :  { %712 = vst [vmem:[%s1267_s4 + $0x70] sm:$0xff] %v828_v55  ;;  %v797_v14 = vsel %vm537_vm15, 1.0, %v935_v16  ;;  %v821_v15 = vpack.c.bf16 %v781_v13, %v780_v56 }
 0x13c   :  { %v829_v59 = vpack.c.bf16 %v797_v14, %v796_v12 }
 0x13d   :  { %705 = vst [vmem:[%s1267_s4 + $0x38] sm:$0xff] %v821_v15 }
 0x13e   :  { %713 = vst [vmem:[%s1267_s4 + $0x78] sm:$0xff] %v829_v59 }

// kernel: ems_yolo_forward.18
= control target key start
LH: loop header
LB: loop body
LE: loop exit
PB: predicated region body
PF: predicated region fallthrough
CT: control target
= control target key end

     0   :  { %s9869_s1 = inlined_call_operand.vmem [shape: bf16[3456,256], index: 1, kind: input, shape index: {}]   ;;  %s9870_s0 = inlined_call_operand.vmem [shape: bf16[128,3456], index: 0, kind: input, shape index: {}]   ;;  %s9871_s2 = inlined_call_operand.vmem [shape: f32[1,256], index: 2, kind: input, shape index: {}]   ;;  %s9872_s3 = inlined_call_operand.vmem [shape: f32[1,256], index: 3, kind: input, shape index: {}]   ;;  %s9873_s4 = inlined_call_operand.vmem [shape: bf16[128,256], index: 4, kind: output, shape index: {}]  }
   0x1   :  { %v6805_v0 = vld [vmem:[%s9869_s1 + $0x4] ss:$8 sps:$4 sm:$0xff]   ;;  %v6809_v2 = vld [vmem:[%s9869_s1] ss:$8 sps:$4 sm:$0xff]   ;;  %v6811_v4 = vld [vmem:[%s9869_s1 + $0x14] ss:$8 sps:$4 sm:$0xff]  }
   0x2   :  { %v6807_v1 = vld [vmem:[%s9869_s1 + $0x704] ss:$8 sps:$4 sm:$0xff]   ;;  %3922 = vmatprep.subr.bf16.mxu1 %v6805_v0  ;;  %v6810_v3 = vld [vmem:[%s9869_s1 + $0x700] ss:$8 sps:$4 sm:$0xff]   ;;  %v6813_v5 = vld [vmem:[%s9869_s1 + $0x714] ss:$8 sps:$4 sm:$0xff]  }
   0x3   :  { %4713 = vmatprep.subr.bf16.mxu0 %v6807_v1  ;;  %3923 = vmatpush1.bf16.msra.mxu1 %v6809_v2  ;;  %v6815_v6 = vld [vmem:[%s9869_s1 + $0x10] ss:$8 sps:$4 sm:$0xff]   ;;  %v6817_v8 = vld [vmem:[%s9869_s1 + $0x24] ss:$8 sps:$4 sm:$0xff]   ;;  %v6821_v10 = vld [vmem:[%s9869_s1 + $0x20] ss:$8 sps:$4 sm:$0xff]  }
   0x4   :  { %4714 = vmatpush1.bf16.msra.mxu0 %v6810_v3  ;;  %3924 = vmatprep.subr.bf16.mxu1 %v6811_v4  ;;  %v6816_v7 = vld [vmem:[%s9869_s1 + $0x710] ss:$8 sps:$4 sm:$0xff]   ;;  %v6819_v9 = vld [vmem:[%s9869_s1 + $0x724] ss:$8 sps:$4 sm:$0xff]   ;;  %v6822_v11 = vld [vmem:[%s9869_s1 + $0x720] ss:$8 sps:$4 sm:$0xff]  }
   0x5   :  { %4715 = vmatprep.subr.bf16.mxu0 %v6813_v5  ;;  %v6823_v12 = vld [vmem:[%s9869_s1 + $0x34] ss:$8 sps:$4 sm:$0xff]   ;;  %v6827_v14 = vld [vmem:[%s9869_s1 + $0x30] ss:$8 sps:$4 sm:$0xff]   ;;  %v6829_v16 = vld [vmem:[%s9869_s1 + $0x44] ss:$8 sps:$4 sm:$0xff]  }
   0x6   :  { %v6825_v13 = vld [vmem:[%s9869_s1 + $0x734] ss:$8 sps:$4 sm:$0xff]   ;;  %v6828_v15 = vld [vmem:[%s9869_s1 + $0x730] ss:$8 sps:$4 sm:$0xff]   ;;  %v6831_v17 = vld [vmem:[%s9869_s1 + $0x744] ss:$8 sps:$4 sm:$0xff]  }
   0x7   :  { %3925 = vmatpush1.bf16.msra.mxu1 %v6815_v6  ;;  %v6833_v18 = vld [vmem:[%s9869_s1 + $0x40] ss:$8 sps:$4 sm:$0xff]   ;;  %v6835_v20 = vld [vmem:[%s9869_s1 + $0x54] ss:$8 sps:$4 sm:$0xff]   ;;  %v6839_v22 = vld [vmem:[%s9869_s1 + $0x50] ss:$8 sps:$4 sm:$0xff]  }
   0x8   :  { %4716 = vmatpush1.bf16.msra.mxu0 %v6816_v7  ;;  %3926 = vmatprep.subr.bf16.mxu1 %v6817_v8  ;;  %v6834_v19 = vld [vmem:[%s9869_s1 + $0x740] ss:$8 sps:$4 sm:$0xff]   ;;  %v6837_v21 = vld [vmem:[%s9869_s1 + $0x754] ss:$8 sps:$4 sm:$0xff]   ;;  %v6840_v23 = vld [vmem:[%s9869_s1 + $0x750] ss:$8 sps:$4 sm:$0xff]  }
   0x9   :  { %4717 = vmatprep.subr.bf16.mxu0 %v6819_v9  ;;  %v6841_v24 = vld [vmem:[%s9869_s1 + $0x64] ss:$8 sps:$4 sm:$0xff]   ;;  %v6845_v26 = vld [vmem:[%s9869_s1 + $0x60] ss:$8 sps:$4 sm:$0xff]   ;;  %v6847_v28 = vld [vmem:[%s9869_s1 + $0x74] ss:$8 sps:$4 sm:$0xff]  }
   0xa   :  { %v6843_v25 = vld [vmem:[%s9869_s1 + $0x764] ss:$8 sps:$4 sm:$0xff]   ;;  %v6846_v27 = vld [vmem:[%s9869_s1 + $0x760] ss:$8 sps:$4 sm:$0xff]   ;;  %v6849_v29 = vld [vmem:[%s9869_s1 + $0x774] ss:$8 sps:$4 sm:$0xff]  }
   0xb   :  { %3927 = vmatpush1.bf16.msra.mxu1 %v6821_v10  ;;  %v6851_v30 = vld [vmem:[%s9869_s1 + $0x70] ss:$8 sps:$4 sm:$0xff]   ;;  %v6853_v32 = vld [vmem:[%s9869_s1 + $0x84] ss:$8 sps:$4 sm:$0xff]   ;;  %v6857_v34 = vld [vmem:[%s9869_s1 + $0x80] ss:$8 sps:$4 sm:$0xff]  }
   0xc   :  { %4718 = vmatpush1.bf16.msra.mxu0 %v6822_v11  ;;  %3928 = vmatprep.subr.bf16.mxu1 %v6823_v12  ;;  %v6852_v31 = vld [vmem:[%s9869_s1 + $0x770] ss:$8 sps:$4 sm:$0xff]   ;;  %v6855_v33 = vld [vmem:[%s9869_s1 + $0x784] ss:$8 sps:$4 sm:$0xff]   ;;  %v6858_v35 = vld [vmem:[%s9869_s1 + $0x780] ss:$8 sps:$4 sm:$0xff]  }
   0xd   :  { %4719 = vmatprep.subr.bf16.mxu0 %v6825_v13  ;;  %v6859_v36 = vld [vmem:[%s9869_s1 + $0x94] ss:$8 sps:$4 sm:$0xff]   ;;  %v6863_v38 = vld [vmem:[%s9869_s1 + $0x90] ss:$8 sps:$4 sm:$0xff]   ;;  %v6865_v40 = vld [vmem:[%s9869_s1 + $0xa4] ss:$8 sps:$4 sm:$0xff]  }
   0xe   :  { %v6861_v37 = vld [vmem:[%s9869_s1 + $0x794] ss:$8 sps:$4 sm:$0xff]   ;;  %v6864_v39 = vld [vmem:[%s9869_s1 + $0x790] ss:$8 sps:$4 sm:$0xff]   ;;  %v6867_v41 = vld [vmem:[%s9869_s1 + $0x7a4] ss:$8 sps:$4 sm:$0xff]  }
   0xf   :  { %3929 = vmatpush1.bf16.msra.mxu1 %v6827_v14  ;;  %v6869_v42 = vld [vmem:[%s9869_s1 + $0xa0] ss:$8 sps:$4 sm:$0xff]   ;;  %v6871_v44 = vld [vmem:[%s9869_s1 + $0xb4] ss:$8 sps:$4 sm:$0xff]   ;;  %v6875_v46 = vld [vmem:[%s9869_s1 + $0xb0] ss:$8 sps:$4 sm:$0xff]  }
  0x10   :  { %4720 = vmatpush1.bf16.msra.mxu0 %v6828_v15  ;;  %3930 = vmatprep.subr.bf16.mxu1 %v6829_v16  ;;  %v6870_v43 = vld [vmem:[%s9869_s1 + $0x7a0] ss:$8 sps:$4 sm:$0xff]   ;;  %v6873_v45 = vld [vmem:[%s9869_s1 + $0x7b4] ss:$8 sps:$4 sm:$0xff]   ;;  %v6876_v47 = vld [vmem:[%s9869_s1 + $0x7b0] ss:$8 sps:$4 sm:$0xff]  }
  0x11   :  { %4721 = vmatprep.subr.bf16.mxu0 %v6831_v17  ;;  %v6877_v48 = vld [vmem:[%s9869_s1 + $0xc4] ss:$8 sps:$4 sm:$0xff]   ;;  %v6906_v51 = vld [vmem:[%s9870_s0 + $0x3c] ss:$108 sps:$4 sm:$0xff]   ;;  %v6887_v56 = vld [vmem:[%s9869_s1 + $0xd0] ss:$8 sps:$4 sm:$0xff]  }
  0x12   :  { %v6903_v49 = vld [vmem:[%s9870_s0 + $0x4] ss:$108 sps:$4 sm:$0xff]   ;;  %v6881_v52 = vld [vmem:[%s9869_s1 + $0xc0] ss:$8 sps:$4 sm:$0xff]   ;;  %4745 = vmatprep.mubr.bf16.mxu0 %v6906_v51  ;;  %v6883_v54 = vld [vmem:[%s9869_s1 + $0xd4] ss:$8 sps:$4 sm:$0xff]  }
  0x13   :  { %3931 = vmatpush1.bf16.msra.mxu1 %v6833_v18  ;;  %v6879_v50 = vld [vmem:[%s9869_s1 + $0x7c4] ss:$8 sps:$4 sm:$0xff]   ;;  %3954 = vmatprep.mubr.bf16.mxu1 %v6903_v49  ;;  %v6882_v53 = vld [vmem:[%s9869_s1 + $0x7c0] ss:$8 sps:$4 sm:$0xff]   ;;  %v6885_v55 = vld [vmem:[%s9869_s1 + $0x7d4] ss:$8 sps:$4 sm:$0xff]  }
  0x14   :  { %4722 = vmatpush1.bf16.msra.mxu0 %v6834_v19  ;;  %3932 = vmatprep.subr.bf16.mxu1 %v6835_v20  ;;  %v6888_v57 = vld [vmem:[%s9869_s1 + $0x7d0] ss:$8 sps:$4 sm:$0xff]   ;;  %v6889_v58 = vld [vmem:[%s9869_s1 + $0xe4] ss:$8 sps:$4 sm:$0xff]   ;;  %v6893_v60 = vld [vmem:[%s9869_s1 + $0xe0] ss:$8 sps:$4 sm:$0xff]  }
  0x15   :  { %4723 = vmatprep.subr.bf16.mxu0 %v6837_v21  ;;  %v6891_v59 = vld [vmem:[%s9869_s1 + $0x7e4] ss:$8 sps:$4 sm:$0xff]   ;;  %v6894_v61 = vld [vmem:[%s9869_s1 + $0x7e0] ss:$8 sps:$4 sm:$0xff]   ;;  %v6895_v62 = vld [vmem:[%s9869_s1 + $0xf4] ss:$8 sps:$4 sm:$0xff]  }
  0x16   :  { %v6897_v63 = vld [vmem:[%s9869_s1 + $0x7f4] ss:$8 sps:$4 sm:$0xff]   ;;  %v6899_v0 = vld [vmem:[%s9869_s1 + $0xf0] ss:$8 sps:$4 sm:$0xff]   ;;  %v6909_v2 = vld [vmem:[%s9869_s1 + $0x104] ss:$8 sps:$4 sm:$0xff]  }
  0x17   :  { %3933 = vmatpush1.bf16.msra.mxu1 %v6839_v22  ;;  %v6900_v1 = vld [vmem:[%s9869_s1 + $0x7f0] ss:$8 sps:$4 sm:$0xff]   ;;  %v6912_v3 = vld [vmem:[%s9869_s1 + $0x804] ss:$8 sps:$4 sm:$0xff]   ;;  %v6907_v6 = vld [vmem:[%s9869_s1 + $0x100] ss:$8 sps:$4 sm:$0xff]  }
  0x18   :  { %4724 = vmatpush1.bf16.msra.mxu0 %v6840_v23  ;;  %3934 = vmatprep.subr.bf16.mxu1 %v6841_v24  ;;  %v6901_v4 = vld [vmem:[%s9870_s0] ss:$108 sps:$4 sm:$0xff]   ;;  %v6904_v5 = vld [vmem:[%s9870_s0 + $0x38] ss:$108 sps:$4 sm:$0xff]   ;;  %v6915_v8 = vld [vmem:[%s9869_s1 + $0x114] ss:$8 sps:$4 sm:$0xff]  }
  0x19   :  { %4725 = vmatprep.subr.bf16.mxu0 %v6843_v25  ;;  %v6910_v7 = vld [vmem:[%s9869_s1 + $0x800] ss:$8 sps:$4 sm:$0xff]   ;;  %v6918_v9 = vld [vmem:[%s9869_s1 + $0x814] ss:$8 sps:$4 sm:$0xff]   ;;  %v6913_v12 = vld [vmem:[%s9869_s1 + $0x110] ss:$8 sps:$4 sm:$0xff]  }
  0x1a   :  { %v6919_v10 = vld [vmem:[%s9870_s0 + $0xdc] ss:$108 sps:$4 sm:$0xff]   ;;  %v6921_v11 = vld [vmem:[%s9870_s0 + $0x114] ss:$108 sps:$4 sm:$0xff]   ;;  %v6916_v13 = vld [vmem:[%s9869_s1 + $0x810] ss:$8 sps:$4 sm:$0xff]  }
  0x1b   :  { %3935 = vmatpush1.bf16.msra.mxu1 %v6845_v26  ;;  %v6926_v14 = vld [vmem:[%s9869_s1 + $0x124] ss:$8 sps:$4 sm:$0xff]   ;;  %v6924_v17 = vld [vmem:[%s9869_s1 + $0x120] ss:$8 sps:$4 sm:$0xff]   ;;  %v6927_v18 = vld [vmem:[%s9870_s0 + $0x110] ss:$108 sps:$4 sm:$0xff]  }
  0x1c   :  { %4726 = vmatpush1.bf16.msra.mxu0 %v6846_v27  ;;  %3936 = vmatprep.subr.bf16.mxu1 %v6847_v28  ;;  %v6930_v15 = vld [vmem:[%s9869_s1 + $0x824] ss:$8 sps:$4 sm:$0xff]   ;;  %v6928_v19 = vld [vmem:[%s9869_s1 + $0x820] ss:$8 sps:$4 sm:$0xff]   ;;  %v6933_v20 = vld [vmem:[%s9869_s1 + $0x134] ss:$8 sps:$4 sm:$0xff]  }
  0x1d   :  { %4727 = vmatprep.subr.bf16.mxu0 %v6849_v29  ;;  %v6923_v16 = vld [vmem:[%s9870_s0 + $0xd8] ss:$108 sps:$4 sm:$0xff]   ;;  %v6936_v21 = vld [vmem:[%s9869_s1 + $0x834] ss:$8 sps:$4 sm:$0xff]   ;;  %v6942_v29 = vld [vmem:[%s9869_s1 + $0x140] ss:$8 sps:$4 sm:$0xff]  }
  0x1e   :  { %v6937_v22 = vld [vmem:[%s9870_s0 + $0x1b4] ss:$108 sps:$4 sm:$0xff]   ;;  %v6939_v23 = vld [vmem:[%s9870_s0 + $0x1ec] ss:$108 sps:$4 sm:$0xff]   ;;  %v6941_v28 = vld [vmem:[%s9870_s0 + $0x1b0] ss:$108 sps:$4 sm:$0xff]  }
  0x1f   :  { %3937 = vmatpush1.bf16.msra.mxu1 %v6851_v30  ;;  %v6931_v24 = vld [vmem:[%s9869_s1 + $0x130] ss:$8 sps:$4 sm:$0xff]   ;;  %v6944_v26 = vld [vmem:[%s9869_s1 + $0x144] ss:$8 sps:$4 sm:$0xff]   ;;  %v6945_v30 = vld [vmem:[%s9870_s0 + $0x1e8] ss:$108 sps:$4 sm:$0xff]  }
  0x20   :  { %4728 = vmatpush1.bf16.msra.mxu0 %v6852_v31  ;;  %3938 = vmatprep.subr.bf16.mxu1 %v6853_v32  ;;  %v6934_v25 = vld [vmem:[%s9869_s1 + $0x830] ss:$8 sps:$4 sm:$0xff]   ;;  %v6948_v27 = vld [vmem:[%s9869_s1 + $0x844] ss:$8 sps:$4 sm:$0xff]   ;;  %v6946_v31 = vld [vmem:[%s9869_s1 + $0x840] ss:$8 sps:$4 sm:$0xff]  }
  0x21   :  { %4729 = vmatprep.subr.bf16.mxu0 %v6855_v33  ;;  %v6951_v32 = vld [vmem:[%s9869_s1 + $0x154] ss:$8 sps:$4 sm:$0xff]   ;;  %v6970_v49 = vld [vmem:[%s9869_s1 + $0x870] ss:$8 sps:$4 sm:$0xff]   ;;  %v6984_v51 = vld [vmem:[%s9869_s1 + $0x884] ss:$8 sps:$4 sm:$0xff]  }
  0x22   :  { %v6954_v33 = vld [vmem:[%s9869_s1 + $0x854] ss:$8 sps:$4 sm:$0xff]  }
  0x23   :  { %3939 = vmatpush1.bf16.msra.mxu1 %v6857_v34  ;;  %v6955_v34 = vld [vmem:[%s9870_s0 + $0x28c] ss:$108 sps:$4 sm:$0xff]  }
  0x24   :  { %4730 = vmatpush1.bf16.msra.mxu0 %v6858_v35  ;;  %3940 = vmatprep.subr.bf16.mxu1 %v6859_v36  ;;  %v6957_v35 = vld [vmem:[%s9870_s0 + $0x2c4] ss:$108 sps:$4 sm:$0xff]  }
  0x25   :  { %4731 = vmatprep.subr.bf16.mxu0 %v6861_v37  ;;  %v6949_v36 = vld [vmem:[%s9869_s1 + $0x150] ss:$8 sps:$4 sm:$0xff]  }
  0x26   :  { %v6952_v37 = vld [vmem:[%s9869_s1 + $0x850] ss:$8 sps:$4 sm:$0xff]  }
  0x27   :  { %3941 = vmatpush1.bf16.msra.mxu1 %v6863_v38  ;;  %v6962_v38 = vld [vmem:[%s9869_s1 + $0x164] ss:$8 sps:$4 sm:$0xff]  }
  0x28   :  { %4732 = vmatpush1.bf16.msra.mxu0 %v6864_v39  ;;  %3942 = vmatprep.subr.bf16.mxu1 %v6865_v40  ;;  %v6966_v39 = vld [vmem:[%s9869_s1 + $0x864] ss:$8 sps:$4 sm:$0xff]   ;;  %v6959_v40 = vld [vmem:[%s9870_s0 + $0x288] ss:$108 sps:$4 sm:$0xff]  }
  0x29   :  { %4733 = vmatprep.subr.bf16.mxu0 %v6867_v41  ;;  %v6960_v41 = vld [vmem:[%s9869_s1 + $0x160] ss:$8 sps:$4 sm:$0xff]  }
  0x2b   :  { %3943 = vmatpush1.bf16.msra.mxu1 %v6869_v42  ;;  %v6963_v42 = vld [vmem:[%s9870_s0 + $0x2c0] ss:$108 sps:$4 sm:$0xff]  }
  0x2c   :  { %4734 = vmatpush1.bf16.msra.mxu0 %v6870_v43  ;;  %3944 = vmatprep.subr.bf16.mxu1 %v6871_v44  ;;  %v6964_v43 = vld [vmem:[%s9869_s1 + $0x860] ss:$8 sps:$4 sm:$0xff]   ;;  %v6969_v44 = vld [vmem:[%s9869_s1 + $0x174] ss:$8 sps:$4 sm:$0xff]  }
  0x2d   :  { %4735 = vmatprep.subr.bf16.mxu0 %v6873_v45  ;;  %v6972_v45 = vld [vmem:[%s9869_s1 + $0x874] ss:$8 sps:$4 sm:$0xff]  }
  0x2f   :  { %3945 = vmatpush1.bf16.msra.mxu1 %v6875_v46  ;;  %v6973_v46 = vld [vmem:[%s9870_s0 + $0x364] ss:$108 sps:$4 sm:$0xff]  }
  0x30   :  { %4736 = vmatpush1.bf16.msra.mxu0 %v6876_v47  ;;  %3946 = vmatprep.subr.bf16.mxu1 %v6877_v48  ;;  %v6975_v47 = vld [vmem:[%s9870_s0 + $0x39c] ss:$108 sps:$4 sm:$0xff]   ;;  %v6967_v48 = vld [vmem:[%s9869_s1 + $0x170] ss:$8 sps:$4 sm:$0xff]  }
  0x31   :  { %4737 = vmatprep.subr.bf16.mxu0 %v6879_v50  ;;  %v6980_v50 = vld [vmem:[%s9869_s1 + $0x184] ss:$8 sps:$4 sm:$0xff]  }
  0x33   :  { %3947 = vmatpush1.bf16.msra.mxu1 %v6881_v52  ;;  %v6977_v52 = vld [vmem:[%s9870_s0 + $0x360] ss:$108 sps:$4 sm:$0xff]  }
  0x34   :  { %4738 = vmatpush1.bf16.msra.mxu0 %v6882_v53  ;;  %3948 = vmatprep.subr.bf16.mxu1 %v6883_v54  ;;  %v6978_v53 = vld [vmem:[%s9869_s1 + $0x180] ss:$8 sps:$4 sm:$0xff]   ;;  %v6981_v54 = vld [vmem:[%s9870_s0 + $0x398] ss:$108 sps:$4 sm:$0xff]  }
  0x35   :  { %4739 = vmatprep.subr.bf16.mxu0 %v6885_v55  ;;  %v6982_v55 = vld [vmem:[%s9869_s1 + $0x880] ss:$8 sps:$4 sm:$0xff]  }
  0x37   :  { %3949 = vmatpush1.bf16.msra.mxu1 %v6887_v56  ;;  %v6987_v56 = vld [vmem:[%s9869_s1 + $0x194] ss:$8 sps:$4 sm:$0xff]  }
  0x38   :  { %4740 = vmatpush1.bf16.msra.mxu0 %v6888_v57  ;;  %3950 = vmatprep.subr.bf16.mxu1 %v6889_v58  ;;  %v6990_v57 = vld [vmem:[%s9869_s1 + $0x894] ss:$8 sps:$4 sm:$0xff]  }
  0x39   :  { %4741 = vmatprep.subr.bf16.mxu0 %v6891_v59  ;;  %v6991_v58 = vld [vmem:[%s9870_s0 + $0x43c] ss:$108 sps:$4 sm:$0xff]   ;;  %v6993_v59 = vld [vmem:[%s9870_s0 + $0x474] ss:$108 sps:$4 sm:$0xff]  }
  0x3b   :  { %3951 = vmatpush1.bf16.msra.mxu1 %v6893_v60  ;;  %v6985_v60 = vld [vmem:[%s9869_s1 + $0x190] ss:$8 sps:$4 sm:$0xff]  }
  0x3c   :  { %4742 = vmatpush1.bf16.msra.mxu0 %v6894_v61  ;;  %3952 = vmatprep.subr.bf16.mxu1 %v6895_v62  ;;  %v6988_v61 = vld [vmem:[%s9869_s1 + $0x890] ss:$8 sps:$4 sm:$0xff]   ;;  %v6998_v62 = vld [vmem:[%s9869_s1 + $0x1a4] ss:$8 sps:$4 sm:$0xff]  }
  0x3d   :  { %4743 = vmatprep.subr.bf16.mxu0 %v6897_v63  ;;  %v7002_v63 = vld [vmem:[%s9869_s1 + $0x8a4] ss:$8 sps:$4 sm:$0xff]  }
  0x3f   :  { %3953 = vmatpush1.bf16.msra.mxu1 %v6899_v0  ;;  %v6995_v0 = vld [vmem:[%s9870_s0 + $0x438] ss:$108 sps:$4 sm:$0xff]  }
  0x40   :  { %4744 = vmatpush1.bf16.msra.mxu0 %v6900_v1  ;;  %4035 = vmatprep.subr.bf16.mxu1 %v6909_v2  ;;  %v6996_v1 = vld [vmem:[%s9869_s1 + $0x1a0] ss:$8 sps:$4 sm:$0xff]   ;;  %v6999_v2 = vld [vmem:[%s9870_s0 + $0x470] ss:$108 sps:$4 sm:$0xff]  }
  0x41   :  { %4826 = vmatprep.subr.bf16.mxu0 %v6912_v3  ;;  %v7000_v3 = vld [vmem:[%s9869_s1 + $0x8a0] ss:$8 sps:$4 sm:$0xff]  }
  0x42   :  { %3955 = vmatmul.mubr.bf16.vlgmr.msra.gmra.mrb[0].mxu1 %v6901_v4  ;;  %v7005_v4 = vld [vmem:[%s9869_s1 + $0x1b4] ss:$8 sps:$4 sm:$0xff]  }
  0x43   :  { %4746 = vmatmul.mubr.bf16.vlgmr.msra.gmra.mrb[0].mxu0 %v6904_v5  ;;  %4036 = vmatpush1.bf16.msra.mxu1 %v6907_v6  ;;  %v7008_v5 = vld [vmem:[%s9869_s1 + $0x8b4] ss:$8 sps:$4 sm:$0xff]  }
  0x44   :  { %4827 = vmatpush1.bf16.msra.mxu0 %v6910_v7  ;;  %4037 = vmatprep.subr.bf16.mxu1 %v6915_v8  ;;  %v7009_v6 = vld [vmem:[%s9870_s0 + $0x514] ss:$108 sps:$4 sm:$0xff]   ;;  %v7011_v7 = vld [vmem:[%s9870_s0 + $0x54c] ss:$108 sps:$4 sm:$0xff]  }
  0x45   :  { %4828 = vmatprep.subr.bf16.mxu0 %v6918_v9  ;;  %3964 = vmatprep.mubr.bf16.mxu1 %v6919_v10  ;;  %v7003_v8 = vld [vmem:[%s9869_s1 + $0x1b0] ss:$8 sps:$4 sm:$0xff]   ;;  %v7016_v10 = vld [vmem:[%s9869_s1 + $0x1c4] ss:$8 sps:$4 sm:$0xff]  }
  0x46   :  { %4755 = vmatprep.mubr.bf16.mxu0 %v6921_v11  ;;  %v7006_v9 = vld [vmem:[%s9869_s1 + $0x8b0] ss:$8 sps:$4 sm:$0xff]   ;;  %v7020_v11 = vld [vmem:[%s9869_s1 + $0x8c4] ss:$8 sps:$4 sm:$0xff]  }
  0x47   :  { %4038 = vmatpush1.bf16.msra.mxu1 %v6913_v12  ;;  %v7013_v12 = vld [vmem:[%s9870_s0 + $0x510] ss:$108 sps:$4 sm:$0xff]  }
  0x48   :  { %4829 = vmatpush1.bf16.msra.mxu0 %v6916_v13  ;;  %4039 = vmatprep.subr.bf16.mxu1 %v6926_v14  ;;  %v7014_v13 = vld [vmem:[%s9869_s1 + $0x1c0] ss:$8 sps:$4 sm:$0xff]  }
  0x49   :  { %4830 = vmatprep.subr.bf16.mxu0 %v6930_v15  ;;  %v7017_v14 = vld [vmem:[%s9870_s0 + $0x548] ss:$108 sps:$4 sm:$0xff]  }
  0x4a   :  { %3965 = vmatmul.mubr.bf16.gmra.mrb[4].mxu1 %v6923_v16  ;;  %v7018_v15 = vld [vmem:[%s9869_s1 + $0x8c0] ss:$8 sps:$4 sm:$0xff]   ;;  %v7023_v16 = vld [vmem:[%s9869_s1 + $0x1d4] ss:$8 sps:$4 sm:$0xff]  }
  0x4b   :  { %4756 = vmatmul.mubr.bf16.gmra.mrb[4].mxu0 %v6927_v18  ;;  %4040 = vmatpush1.bf16.msra.mxu1 %v6924_v17  ;;  %v7026_v17 = vld [vmem:[%s9869_s1 + $0x8d4] ss:$8 sps:$4 sm:$0xff]   ;;  %v7027_v18 = vld [vmem:[%s9870_s0 + $0x5ec] ss:$108 sps:$4 sm:$0xff]  }
  0x4c   :  { %4831 = vmatpush1.bf16.msra.mxu0 %v6928_v19  ;;  %4041 = vmatprep.subr.bf16.mxu1 %v6933_v20  ;;  %v7029_v19 = vld [vmem:[%s9870_s0 + $0x624] ss:$108 sps:$4 sm:$0xff]  }
  0x4d   :  { %4832 = vmatprep.subr.bf16.mxu0 %v6936_v21  ;;  %3974 = vmatprep.mubr.bf16.mxu1 %v6937_v22  ;;  %v7021_v20 = vld [vmem:[%s9869_s1 + $0x1d0] ss:$8 sps:$4 sm:$0xff]   ;;  %v7034_v22 = vld [vmem:[%s9869_s1 + $0x1e4] ss:$8 sps:$4 sm:$0xff]  }
  0x4e   :  { %4765 = vmatprep.mubr.bf16.mxu0 %v6939_v23  ;;  %v7024_v21 = vld [vmem:[%s9869_s1 + $0x8d0] ss:$8 sps:$4 sm:$0xff]   ;;  %v7038_v23 = vld [vmem:[%s9869_s1 + $0x8e4] ss:$8 sps:$4 sm:$0xff]  }
  0x4f   :  { %4042 = vmatpush1.bf16.msra.mxu1 %v6931_v24  ;;  %v7031_v24 = vld [vmem:[%s9870_s0 + $0x5e8] ss:$108 sps:$4 sm:$0xff]  }
  0x50   :  { %4833 = vmatpush1.bf16.msra.mxu0 %v6934_v25  ;;  %4043 = vmatprep.subr.bf16.mxu1 %v6944_v26  ;;  %v7032_v25 = vld [vmem:[%s9869_s1 + $0x1e0] ss:$8 sps:$4 sm:$0xff]  }
  0x51   :  { %4834 = vmatprep.subr.bf16.mxu0 %v6948_v27  ;;  %v7035_v26 = vld [vmem:[%s9870_s0 + $0x620] ss:$108 sps:$4 sm:$0xff]  }
  0x52   :  { %3975 = vmatmul.mubr.bf16.gmra.mrb[8].mxu1 %v6941_v28  ;;  %v7036_v27 = vld [vmem:[%s9869_s1 + $0x8e0] ss:$8 sps:$4 sm:$0xff]   ;;  %v7041_v28 = vld [vmem:[%s9869_s1 + $0x1f4] ss:$8 sps:$4 sm:$0xff]  }
  0x53   :  { %4766 = vmatmul.mubr.bf16.gmra.mrb[8].mxu0 %v6945_v30  ;;  %4044 = vmatpush1.bf16.msra.mxu1 %v6942_v29  ;;  %v7044_v29 = vld [vmem:[%s9869_s1 + $0x8f4] ss:$8 sps:$4 sm:$0xff]   ;;  %v7047_v30 = vld [vmem:[%s9870_s0 + $0xc] ss:$108 sps:$4 sm:$0xff]  }
  0x54   :  { %4835 = vmatpush1.bf16.msra.mxu0 %v6946_v31  ;;  %4045 = vmatprep.subr.bf16.mxu1 %v6951_v32  ;;  %v7050_v31 = vld [vmem:[%s9870_s0 + $0x44] ss:$108 sps:$4 sm:$0xff]  }
  0x55   :  { %4836 = vmatprep.subr.bf16.mxu0 %v6954_v33  ;;  %3984 = vmatprep.mubr.bf16.mxu1 %v6955_v34  ;;  %v7039_v32 = vld [vmem:[%s9869_s1 + $0x1f0] ss:$8 sps:$4 sm:$0xff]   ;;  %v7053_v34 = vld [vmem:[%s9869_s1 + $0x204] ss:$8 sps:$4 sm:$0xff]  }
  0x56   :  { %4775 = vmatprep.mubr.bf16.mxu0 %v6957_v35  ;;  %v7042_v33 = vld [vmem:[%s9869_s1 + $0x8f0] ss:$8 sps:$4 sm:$0xff]   ;;  %v7056_v35 = vld [vmem:[%s9869_s1 + $0x904] ss:$8 sps:$4 sm:$0xff]  }
  0x57   :  { %4046 = vmatpush1.bf16.msra.mxu1 %v6949_v36  ;;  %v7045_v36 = vld [vmem:[%s9870_s0 + $0x8] ss:$108 sps:$4 sm:$0xff]  }
  0x58   :  { %4837 = vmatpush1.bf16.msra.mxu0 %v6952_v37  ;;  %4047 = vmatprep.subr.bf16.mxu1 %v6962_v38  ;;  %v7048_v37 = vld [vmem:[%s9870_s0 + $0x40] ss:$108 sps:$4 sm:$0xff]  }
  0x59   :  { %4838 = vmatprep.subr.bf16.mxu0 %v6966_v39  ;;  %v7051_v38 = vld [vmem:[%s9869_s1 + $0x200] ss:$8 sps:$4 sm:$0xff]  }
  0x5a   :  { %3985 = vmatmul.mubr.bf16.gmra.mrb[12].mxu1 %v6959_v40  ;;  %v7054_v39 = vld [vmem:[%s9869_s1 + $0x900] ss:$8 sps:$4 sm:$0xff]   ;;  %v7059_v40 = vld [vmem:[%s9869_s1 + $0x214] ss:$8 sps:$4 sm:$0xff]  }
  0x5b   :  { %4776 = vmatmul.mubr.bf16.gmra.mrb[12].mxu0 %v6963_v42  ;;  %4048 = vmatpush1.bf16.msra.mxu1 %v6960_v41  ;;  %v7062_v41 = vld [vmem:[%s9869_s1 + $0x914] ss:$8 sps:$4 sm:$0xff]   ;;  %v7063_v42 = vld [vmem:[%s9870_s0 + $0xe4] ss:$108 sps:$4 sm:$0xff]  }
  0x5c   :  { %4839 = vmatpush1.bf16.msra.mxu0 %v6964_v43  ;;  %4049 = vmatprep.subr.bf16.mxu1 %v6969_v44  ;;  %v7065_v43 = vld [vmem:[%s9870_s0 + $0x11c] ss:$108 sps:$4 sm:$0xff]   ;;  %v7057_v44 = vld [vmem:[%s9869_s1 + $0x210] ss:$8 sps:$4 sm:$0xff]  }
  0x5d   :  { %4840 = vmatprep.subr.bf16.mxu0 %v6972_v45  ;;  %3994 = vmatprep.mubr.bf16.mxu1 %v6973_v46  ;;  %v7060_v45 = vld [vmem:[%s9869_s1 + $0x910] ss:$8 sps:$4 sm:$0xff]   ;;  %v7070_v46 = vld [vmem:[%s9869_s1 + $0x224] ss:$8 sps:$4 sm:$0xff]  }
  0x5e   :  { %4785 = vmatprep.mubr.bf16.mxu0 %v6975_v47  ;;  %v7074_v47 = vld [vmem:[%s9869_s1 + $0x924] ss:$8 sps:$4 sm:$0xff]  }
  0x5f   :  { %4050 = vmatpush1.bf16.msra.mxu1 %v6967_v48  ;;  %v7067_v48 = vld [vmem:[%s9870_s0 + $0xe0] ss:$108 sps:$4 sm:$0xff]  }
  0x60   :  { %4841 = vmatpush1.bf16.msra.mxu0 %v6970_v49  ;;  %4051 = vmatprep.subr.bf16.mxu1 %v6980_v50  ;;  %v7068_v49 = vld [vmem:[%s9869_s1 + $0x220] ss:$8 sps:$4 sm:$0xff]   ;;  %v7071_v50 = vld [vmem:[%s9870_s0 + $0x118] ss:$108 sps:$4 sm:$0xff]  }
  0x61   :  { %4842 = vmatprep.subr.bf16.mxu0 %v6984_v51  ;;  %v7072_v51 = vld [vmem:[%s9869_s1 + $0x920] ss:$8 sps:$4 sm:$0xff]  }
  0x62   :  { %3995 = vmatmul.mubr.bf16.gmra.mrb[16].mxu1 %v6977_v52  ;;  %v7077_v52 = vld [vmem:[%s9869_s1 + $0x234] ss:$8 sps:$4 sm:$0xff]  }
  0x63   :  { %4786 = vmatmul.mubr.bf16.gmra.mrb[16].mxu0 %v6981_v54  ;;  %4052 = vmatpush1.bf16.msra.mxu1 %v6978_v53  ;;  %v7080_v53 = vld [vmem:[%s9869_s1 + $0x934] ss:$8 sps:$4 sm:$0xff]  }
  0x64   :  { %4843 = vmatpush1.bf16.msra.mxu0 %v6982_v55  ;;  %4053 = vmatprep.subr.bf16.mxu1 %v6987_v56  ;;  %v7081_v54 = vld [vmem:[%s9870_s0 + $0x1bc] ss:$108 sps:$4 sm:$0xff]   ;;  %v7083_v55 = vld [vmem:[%s9870_s0 + $0x1f4] ss:$108 sps:$4 sm:$0xff]   ;;  %v7075_v56 = vld [vmem:[%s9869_s1 + $0x230] ss:$8 sps:$4 sm:$0xff]  }
  0x65   :  { %4844 = vmatprep.subr.bf16.mxu0 %v6990_v57  ;;  %4004 = vmatprep.mubr.bf16.mxu1 %v6991_v58  ;;  %v7078_v57 = vld [vmem:[%s9869_s1 + $0x930] ss:$8 sps:$4 sm:$0xff]   ;;  %v7088_v58 = vld [vmem:[%s9869_s1 + $0x244] ss:$8 sps:$4 sm:$0xff]  }
  0x66   :  { %4795 = vmatprep.mubr.bf16.mxu0 %v6993_v59  ;;  %v7092_v59 = vld [vmem:[%s9869_s1 + $0x944] ss:$8 sps:$4 sm:$0xff]  }
  0x67   :  { %4054 = vmatpush1.bf16.msra.mxu1 %v6985_v60  ;;  %v7085_v60 = vld [vmem:[%s9870_s0 + $0x1b8] ss:$108 sps:$4 sm:$0xff]  }
  0x68   :  { %4845 = vmatpush1.bf16.msra.mxu0 %v6988_v61  ;;  %4055 = vmatprep.subr.bf16.mxu1 %v6998_v62  ;;  %v7086_v61 = vld [vmem:[%s9869_s1 + $0x240] ss:$8 sps:$4 sm:$0xff]   ;;  %v7089_v62 = vld [vmem:[%s9870_s0 + $0x1f0] ss:$108 sps:$4 sm:$0xff]  }
  0x69   :  { %4846 = vmatprep.subr.bf16.mxu0 %v7002_v63  ;;  %v7090_v63 = vld [vmem:[%s9869_s1 + $0x940] ss:$8 sps:$4 sm:$0xff]  }
  0x6a   :  { %4005 = vmatmul.mubr.bf16.gmra.mrb[20].mxu1 %v6995_v0  ;;  %v7095_v0 = vld [vmem:[%s9869_s1 + $0x254] ss:$8 sps:$4 sm:$0xff]  }
  0x6b   :  { %4796 = vmatmul.mubr.bf16.gmra.mrb[20].mxu0 %v6999_v2  ;;  %4056 = vmatpush1.bf16.msra.mxu1 %v6996_v1  ;;  %v7098_v1 = vld [vmem:[%s9869_s1 + $0x954] ss:$8 sps:$4 sm:$0xff]  }
  0x6c   :  { %4847 = vmatpush1.bf16.msra.mxu0 %v7000_v3  ;;  %4057 = vmatprep.subr.bf16.mxu1 %v7005_v4  ;;  %v7099_v2 = vld [vmem:[%s9870_s0 + $0x294] ss:$108 sps:$4 sm:$0xff]   ;;  %v7101_v3 = vld [vmem:[%s9870_s0 + $0x2cc] ss:$108 sps:$4 sm:$0xff]  }
  0x6d   :  { %4848 = vmatprep.subr.bf16.mxu0 %v7008_v5  ;;  %4014 = vmatprep.mubr.bf16.mxu1 %v7009_v6  ;;  %v7093_v4 = vld [vmem:[%s9869_s1 + $0x250] ss:$8 sps:$4 sm:$0xff]   ;;  %v7106_v6 = vld [vmem:[%s9869_s1 + $0x264] ss:$8 sps:$4 sm:$0xff]  }
  0x6e   :  { %4805 = vmatprep.mubr.bf16.mxu0 %v7011_v7  ;;  %v7096_v5 = vld [vmem:[%s9869_s1 + $0x950] ss:$8 sps:$4 sm:$0xff]   ;;  %v7110_v7 = vld [vmem:[%s9869_s1 + $0x964] ss:$8 sps:$4 sm:$0xff]  }
  0x6f   :  { %4058 = vmatpush1.bf16.msra.mxu1 %v7003_v8  ;;  %v7103_v8 = vld [vmem:[%s9870_s0 + $0x290] ss:$108 sps:$4 sm:$0xff]  }
  0x70   :  { %4849 = vmatpush1.bf16.msra.mxu0 %v7006_v9  ;;  %4059 = vmatprep.subr.bf16.mxu1 %v7016_v10  ;;  %v7104_v9 = vld [vmem:[%s9869_s1 + $0x260] ss:$8 sps:$4 sm:$0xff]  }
  0x71   :  { %4850 = vmatprep.subr.bf16.mxu0 %v7020_v11  ;;  %v7107_v10 = vld [vmem:[%s9870_s0 + $0x2c8] ss:$108 sps:$4 sm:$0xff]  }
  0x72   :  { %4015 = vmatmul.mubr.bf16.gmra.mrb[24].mxu1 %v7013_v12  ;;  %v7108_v11 = vld [vmem:[%s9869_s1 + $0x960] ss:$8 sps:$4 sm:$0xff]   ;;  %v7113_v12 = vld [vmem:[%s9869_s1 + $0x274] ss:$8 sps:$4 sm:$0xff]  }
  0x73   :  { %4806 = vmatmul.mubr.bf16.gmra.mrb[24].mxu0 %v7017_v14  ;;  %4060 = vmatpush1.bf16.msra.mxu1 %v7014_v13  ;;  %v7116_v13 = vld [vmem:[%s9869_s1 + $0x974] ss:$8 sps:$4 sm:$0xff]   ;;  %v7117_v14 = vld [vmem:[%s9870_s0 + $0x36c] ss:$108 sps:$4 sm:$0xff]  }
  0x74   :  { %4851 = vmatpush1.bf16.msra.mxu0 %v7018_v15  ;;  %4061 = vmatprep.subr.bf16.mxu1 %v7023_v16  ;;  %v7119_v15 = vld [vmem:[%s9870_s0 + $0x3a4] ss:$108 sps:$4 sm:$0xff]  }
  0x75   :  { %4852 = vmatprep.subr.bf16.mxu0 %v7026_v17  ;;  %4024 = vmatprep.mubr.bf16.mxu1 %v7027_v18  ;;  %v7111_v16 = vld [vmem:[%s9869_s1 + $0x270] ss:$8 sps:$4 sm:$0xff]   ;;  %v7124_v18 = vld [vmem:[%s9869_s1 + $0x284] ss:$8 sps:$4 sm:$0xff]  }
  0x76   :  { %4815 = vmatprep.mubr.bf16.mxu0 %v7029_v19  ;;  %v7114_v17 = vld [vmem:[%s9869_s1 + $0x970] ss:$8 sps:$4 sm:$0xff]   ;;  %v7128_v19 = vld [vmem:[%s9869_s1 + $0x984] ss:$8 sps:$4 sm:$0xff]  }
  0x77   :  { %4062 = vmatpush1.bf16.msra.mxu1 %v7021_v20  ;;  %v7121_v20 = vld [vmem:[%s9870_s0 + $0x368] ss:$108 sps:$4 sm:$0xff]  }
  0x78   :  { %4853 = vmatpush1.bf16.msra.mxu0 %v7024_v21  ;;  %4063 = vmatprep.subr.bf16.mxu1 %v7034_v22  ;;  %v7122_v21 = vld [vmem:[%s9869_s1 + $0x280] ss:$8 sps:$4 sm:$0xff]  }
  0x79   :  { %4854 = vmatprep.subr.bf16.mxu0 %v7038_v23  ;;  %v7125_v22 = vld [vmem:[%s9870_s0 + $0x3a0] ss:$108 sps:$4 sm:$0xff]  }
  0x7a   :  { %4025 = vmatmul.mubr.bf16.gmra.mrb[28].mxu1 %v7031_v24  ;;  %v7126_v23 = vld [vmem:[%s9869_s1 + $0x980] ss:$8 sps:$4 sm:$0xff]   ;;  %v7131_v24 = vld [vmem:[%s9869_s1 + $0x294] ss:$8 sps:$4 sm:$0xff]  }
  0x7b   :  { %4816 = vmatmul.mubr.bf16.gmra.mrb[28].mxu0 %v7035_v26  ;;  %4064 = vmatpush1.bf16.msra.mxu1 %v7032_v25  ;;  %v7134_v25 = vld [vmem:[%s9869_s1 + $0x994] ss:$8 sps:$4 sm:$0xff]   ;;  %v7135_v26 = vld [vmem:[%s9870_s0 + $0x444] ss:$108 sps:$4 sm:$0xff]  }
  0x7c   :  { %4855 = vmatpush1.bf16.msra.mxu0 %v7036_v27  ;;  %4065 = vmatprep.subr.bf16.mxu1 %v7041_v28  ;;  %v7137_v27 = vld [vmem:[%s9870_s0 + $0x47c] ss:$108 sps:$4 sm:$0xff]   ;;  %v7129_v28 = vld [vmem:[%s9869_s1 + $0x290] ss:$8 sps:$4 sm:$0xff]  }
  0x7d   :  { %4856 = vmatprep.subr.bf16.mxu0 %v7044_v29  ;;  %4067 = vmatprep.mubr.bf16.mxu1 %v7047_v30  ;;  %v7132_v29 = vld [vmem:[%s9869_s1 + $0x990] ss:$8 sps:$4 sm:$0xff]   ;;  %v7142_v30 = vld [vmem:[%s9869_s1 + $0x2a4] ss:$8 sps:$4 sm:$0xff]  }
  0x7e   :  { %4858 = vmatprep.mubr.bf16.mxu0 %v7050_v31  ;;  %v7146_v31 = vld [vmem:[%s9869_s1 + $0x9a4] ss:$8 sps:$4 sm:$0xff]  }
  0x7f   :  { %4066 = vmatpush1.bf16.msra.mxu1 %v7039_v32  ;;  %v7139_v32 = vld [vmem:[%s9870_s0 + $0x440] ss:$108 sps:$4 sm:$0xff]  }
  0x80   :  { %4857 = vmatpush1.bf16.msra.mxu0 %v7042_v33  ;;  %4148 = vmatprep.subr.bf16.mxu1 %v7053_v34  ;;  %v7140_v33 = vld [vmem:[%s9869_s1 + $0x2a0] ss:$8 sps:$4 sm:$0xff]   ;;  %v7143_v34 = vld [vmem:[%s9870_s0 + $0x478] ss:$108 sps:$4 sm:$0xff]  }
  0x81   :  { %4939 = vmatprep.subr.bf16.mxu0 %v7056_v35  ;;  %v7144_v35 = vld [vmem:[%s9869_s1 + $0x9a0] ss:$8 sps:$4 sm:$0xff]  }
  0x82   :  { %4068 = vmatmul.mubr.bf16.vlgmr.msra.gmra.mrb[0].mxu1 %v7045_v36  ;;  %v7149_v36 = vld [vmem:[%s9869_s1 + $0x2b4] ss:$8 sps:$4 sm:$0xff]  }
  0x83   :  { %4859 = vmatmul.mubr.bf16.vlgmr.msra.gmra.mrb[0].mxu0 %v7048_v37  ;;  %4149 = vmatpush1.bf16.msra.mxu1 %v7051_v38  ;;  %v7152_v37 = vld [vmem:[%s9869_s1 + $0x9b4] ss:$8 sps:$4 sm:$0xff]  }
  0x84   :  { %4940 = vmatpush1.bf16.msra.mxu0 %v7054_v39  ;;  %4150 = vmatprep.subr.bf16.mxu1 %v7059_v40  ;;  %v7153_v38 = vld [vmem:[%s9870_s0 + $0x51c] ss:$108 sps:$4 sm:$0xff]   ;;  %v7155_v39 = vld [vmem:[%s9870_s0 + $0x554] ss:$108 sps:$4 sm:$0xff]   ;;  %v7147_v40 = vld [vmem:[%s9869_s1 + $0x2b0] ss:$8 sps:$4 sm:$0xff]  }
  0x85   :  { %4941 = vmatprep.subr.bf16.mxu0 %v7062_v41  ;;  %4077 = vmatprep.mubr.bf16.mxu1 %v7063_v42  ;;  %v7150_v41 = vld [vmem:[%s9869_s1 + $0x9b0] ss:$8 sps:$4 sm:$0xff]   ;;  %v7160_v42 = vld [vmem:[%s9869_s1 + $0x2c4] ss:$8 sps:$4 sm:$0xff]  }
  0x86   :  { %4868 = vmatprep.mubr.bf16.mxu0 %v7065_v43  ;;  %v7164_v43 = vld [vmem:[%s9869_s1 + $0x9c4] ss:$8 sps:$4 sm:$0xff]  }
  0x87   :  { %4151 = vmatpush1.bf16.msra.mxu1 %v7057_v44  ;;  %v7157_v44 = vld [vmem:[%s9870_s0 + $0x518] ss:$108 sps:$4 sm:$0xff]  }
  0x88   :  { %4942 = vmatpush1.bf16.msra.mxu0 %v7060_v45  ;;  %4152 = vmatprep.subr.bf16.mxu1 %v7070_v46  ;;  %v7158_v45 = vld [vmem:[%s9869_s1 + $0x2c0] ss:$8 sps:$4 sm:$0xff]   ;;  %v7161_v46 = vld [vmem:[%s9870_s0 + $0x550] ss:$108 sps:$4 sm:$0xff]  }
  0x89   :  { %4943 = vmatprep.subr.bf16.mxu0 %v7074_v47  ;;  %v7162_v47 = vld [vmem:[%s9869_s1 + $0x9c0] ss:$8 sps:$4 sm:$0xff]  }
  0x8a   :  { %4078 = vmatmul.mubr.bf16.gmra.mrb[4].mxu1 %v7067_v48  ;;  %v7167_v48 = vld [vmem:[%s9869_s1 + $0x2d4] ss:$8 sps:$4 sm:$0xff]  }
  0x8b   :  { %4869 = vmatmul.mubr.bf16.gmra.mrb[4].mxu0 %v7071_v50  ;;  %4153 = vmatpush1.bf16.msra.mxu1 %v7068_v49  ;;  %v7170_v49 = vld [vmem:[%s9869_s1 + $0x9d4] ss:$8 sps:$4 sm:$0xff]  }
  0x8c   :  { %4944 = vmatpush1.bf16.msra.mxu0 %v7072_v51  ;;  %4154 = vmatprep.subr.bf16.mxu1 %v7077_v52  ;;  %v7171_v50 = vld [vmem:[%s9870_s0 + $0x5f4] ss:$108 sps:$4 sm:$0xff]   ;;  %v7173_v51 = vld [vmem:[%s9870_s0 + $0x62c] ss:$108 sps:$4 sm:$0xff]  }
  0x8d   :  { %4945 = vmatprep.subr.bf16.mxu0 %v7080_v53  ;;  %4087 = vmatprep.mubr.bf16.mxu1 %v7081_v54  ;;  %v7165_v52 = vld [vmem:[%s9869_s1 + $0x2d0] ss:$8 sps:$4 sm:$0xff]   ;;  %v7178_v54 = vld [vmem:[%s9869_s1 + $0x2e4] ss:$8 sps:$4 sm:$0xff]  }
  0x8e   :  { %4878 = vmatprep.mubr.bf16.mxu0 %v7083_v55  ;;  %v7168_v53 = vld [vmem:[%s9869_s1 + $0x9d0] ss:$8 sps:$4 sm:$0xff]   ;;  %v7182_v55 = vld [vmem:[%s9869_s1 + $0x9e4] ss:$8 sps:$4 sm:$0xff]  }
  0x8f   :  { %4155 = vmatpush1.bf16.msra.mxu1 %v7075_v56  ;;  %v7175_v56 = vld [vmem:[%s9870_s0 + $0x5f0] ss:$108 sps:$4 sm:$0xff]  }
  0x90   :  { %4946 = vmatpush1.bf16.msra.mxu0 %v7078_v57  ;;  %4156 = vmatprep.subr.bf16.mxu1 %v7088_v58  ;;  %v7176_v57 = vld [vmem:[%s9869_s1 + $0x2e0] ss:$8 sps:$4 sm:$0xff]  }
  0x91   :  { %4947 = vmatprep.subr.bf16.mxu0 %v7092_v59  ;;  %v7179_v58 = vld [vmem:[%s9870_s0 + $0x628] ss:$108 sps:$4 sm:$0xff]  }
  0x92   :  { %4088 = vmatmul.mubr.bf16.gmra.mrb[8].mxu1 %v7085_v60  ;;  %v7180_v59 = vld [vmem:[%s9869_s1 + $0x9e0] ss:$8 sps:$4 sm:$0xff]   ;;  %v7185_v60 = vld [vmem:[%s9869_s1 + $0x2f4] ss:$8 sps:$4 sm:$0xff]  }
  0x93   :  { %4879 = vmatmul.mubr.bf16.gmra.mrb[8].mxu0 %v7089_v62  ;;  %4157 = vmatpush1.bf16.msra.mxu1 %v7086_v61  ;;  %v7188_v61 = vld [vmem:[%s9869_s1 + $0x9f4] ss:$8 sps:$4 sm:$0xff]  }
  0x94   :  { %4948 = vmatpush1.bf16.msra.mxu0 %v7090_v63  ;;  %4158 = vmatprep.subr.bf16.mxu1 %v7095_v0  ;;  %v7191_v62 = vld [vmem:[%s9870_s0 + $0x14] ss:$108 sps:$4 sm:$0xff]   ;;  %v7194_v63 = vld [vmem:[%s9870_s0 + $0x4c] ss:$108 sps:$4 sm:$0xff]  }
  0x95   :  { %4949 = vmatprep.subr.bf16.mxu0 %v7098_v1  ;;  %4097 = vmatprep.mubr.bf16.mxu1 %v7099_v2  ;;  %v7183_v0 = vld [vmem:[%s9869_s1 + $0x2f0] ss:$8 sps:$4 sm:$0xff]   ;;  %v7197_v2 = vld [vmem:[%s9869_s1 + $0x304] ss:$8 sps:$4 sm:$0xff]  }
  0x96   :  { %4888 = vmatprep.mubr.bf16.mxu0 %v7101_v3  ;;  %v7186_v1 = vld [vmem:[%s9869_s1 + $0x9f0] ss:$8 sps:$4 sm:$0xff]   ;;  %v7200_v3 = vld [vmem:[%s9869_s1 + $0xa04] ss:$8 sps:$4 sm:$0xff]  }
  0x97   :  { %4159 = vmatpush1.bf16.msra.mxu1 %v7093_v4  ;;  %v7189_v4 = vld [vmem:[%s9870_s0 + $0x10] ss:$108 sps:$4 sm:$0xff]  }
  0x98   :  { %4950 = vmatpush1.bf16.msra.mxu0 %v7096_v5  ;;  %4160 = vmatprep.subr.bf16.mxu1 %v7106_v6  ;;  %v7192_v5 = vld [vmem:[%s9870_s0 + $0x48] ss:$108 sps:$4 sm:$0xff]  }
  0x99   :  { %4951 = vmatprep.subr.bf16.mxu0 %v7110_v7  ;;  %v7195_v6 = vld [vmem:[%s9869_s1 + $0x300] ss:$8 sps:$4 sm:$0xff]  }
  0x9a   :  { %4098 = vmatmul.mubr.bf16.gmra.mrb[12].mxu1 %v7103_v8  ;;  %v7198_v7 = vld [vmem:[%s9869_s1 + $0xa00] ss:$8 sps:$4 sm:$0xff]   ;;  %v7203_v8 = vld [vmem:[%s9869_s1 + $0x314] ss:$8 sps:$4 sm:$0xff]  }
  0x9b   :  { %4889 = vmatmul.mubr.bf16.gmra.mrb[12].mxu0 %v7107_v10  ;;  %4161 = vmatpush1.bf16.msra.mxu1 %v7104_v9  ;;  %v7206_v9 = vld [vmem:[%s9869_s1 + $0xa14] ss:$8 sps:$4 sm:$0xff]   ;;  %v7207_v10 = vld [vmem:[%s9870_s0 + $0xec] ss:$108 sps:$4 sm:$0xff]  }
  0x9c   :  { %4952 = vmatpush1.bf16.msra.mxu0 %v7108_v11  ;;  %4162 = vmatprep.subr.bf16.mxu1 %v7113_v12  ;;  %v7209_v11 = vld [vmem:[%s9870_s0 + $0x124] ss:$108 sps:$4 sm:$0xff]  }
  0x9d   :  { %4953 = vmatprep.subr.bf16.mxu0 %v7116_v13  ;;  %4107 = vmatprep.mubr.bf16.mxu1 %v7117_v14  ;;  %v7201_v12 = vld [vmem:[%s9869_s1 + $0x310] ss:$8 sps:$4 sm:$0xff]   ;;  %v7214_v14 = vld [vmem:[%s9869_s1 + $0x324] ss:$8 sps:$4 sm:$0xff]  }
  0x9e   :  { %4898 = vmatprep.mubr.bf16.mxu0 %v7119_v15  ;;  %v7204_v13 = vld [vmem:[%s9869_s1 + $0xa10] ss:$8 sps:$4 sm:$0xff]   ;;  %v7218_v15 = vld [vmem:[%s9869_s1 + $0xa24] ss:$8 sps:$4 sm:$0xff]  }
  0x9f   :  { %4163 = vmatpush1.bf16.msra.mxu1 %v7111_v16  ;;  %v7211_v16 = vld [vmem:[%s9870_s0 + $0xe8] ss:$108 sps:$4 sm:$0xff]  }
  0xa0   :  { %4954 = vmatpush1.bf16.msra.mxu0 %v7114_v17  ;;  %4164 = vmatprep.subr.bf16.mxu1 %v7124_v18  ;;  %v7212_v17 = vld [vmem:[%s9869_s1 + $0x320] ss:$8 sps:$4 sm:$0xff]  }
  0xa1   :  { %4955 = vmatprep.subr.bf16.mxu0 %v7128_v19  ;;  %v7215_v18 = vld [vmem:[%s9870_s0 + $0x120] ss:$108 sps:$4 sm:$0xff]  }
  0xa2   :  { %4108 = vmatmul.mubr.bf16.gmra.mrb[16].mxu1 %v7121_v20  ;;  %v7216_v19 = vld [vmem:[%s9869_s1 + $0xa20] ss:$8 sps:$4 sm:$0xff]   ;;  %v7221_v20 = vld [vmem:[%s9869_s1 + $0x334] ss:$8 sps:$4 sm:$0xff]  }
  0xa3   :  { %4899 = vmatmul.mubr.bf16.gmra.mrb[16].mxu0 %v7125_v22  ;;  %4165 = vmatpush1.bf16.msra.mxu1 %v7122_v21  ;;  %v7224_v21 = vld [vmem:[%s9869_s1 + $0xa34] ss:$8 sps:$4 sm:$0xff]   ;;  %v7225_v22 = vld [vmem:[%s9870_s0 + $0x1c4] ss:$108 sps:$4 sm:$0xff]  }
  0xa4   :  { %4956 = vmatpush1.bf16.msra.mxu0 %v7126_v23  ;;  %4166 = vmatprep.subr.bf16.mxu1 %v7131_v24  ;;  %v7227_v23 = vld [vmem:[%s9870_s0 + $0x1fc] ss:$108 sps:$4 sm:$0xff]   ;;  %v7219_v24 = vld [vmem:[%s9869_s1 + $0x330] ss:$8 sps:$4 sm:$0xff]  }
  0xa5   :  { %4957 = vmatprep.subr.bf16.mxu0 %v7134_v25  ;;  %4117 = vmatprep.mubr.bf16.mxu1 %v7135_v26  ;;  %v7222_v25 = vld [vmem:[%s9869_s1 + $0xa30] ss:$8 sps:$4 sm:$0xff]   ;;  %v7232_v26 = vld [vmem:[%s9869_s1 + $0x344] ss:$8 sps:$4 sm:$0xff]  }
  0xa6   :  { %4908 = vmatprep.mubr.bf16.mxu0 %v7137_v27  ;;  %v7236_v27 = vld [vmem:[%s9869_s1 + $0xa44] ss:$8 sps:$4 sm:$0xff]  }
  0xa7   :  { %4167 = vmatpush1.bf16.msra.mxu1 %v7129_v28  ;;  %v7229_v28 = vld [vmem:[%s9870_s0 + $0x1c0] ss:$108 sps:$4 sm:$0xff]  }
  0xa8   :  { %4958 = vmatpush1.bf16.msra.mxu0 %v7132_v29  ;;  %4168 = vmatprep.subr.bf16.mxu1 %v7142_v30  ;;  %v7230_v29 = vld [vmem:[%s9869_s1 + $0x340] ss:$8 sps:$4 sm:$0xff]   ;;  %v7233_v30 = vld [vmem:[%s9870_s0 + $0x1f8] ss:$108 sps:$4 sm:$0xff]  }
  0xa9   :  { %4959 = vmatprep.subr.bf16.mxu0 %v7146_v31  ;;  %v7234_v31 = vld [vmem:[%s9869_s1 + $0xa40] ss:$8 sps:$4 sm:$0xff]  }
  0xaa   :  { %4118 = vmatmul.mubr.bf16.gmra.mrb[20].mxu1 %v7139_v32  ;;  %v7239_v32 = vld [vmem:[%s9869_s1 + $0x354] ss:$8 sps:$4 sm:$0xff]  }
  0xab   :  { %4909 = vmatmul.mubr.bf16.gmra.mrb[20].mxu0 %v7143_v34  ;;  %4169 = vmatpush1.bf16.msra.mxu1 %v7140_v33  ;;  %v7242_v33 = vld [vmem:[%s9869_s1 + $0xa54] ss:$8 sps:$4 sm:$0xff]  }
  0xac   :  { %4960 = vmatpush1.bf16.msra.mxu0 %v7144_v35  ;;  %4170 = vmatprep.subr.bf16.mxu1 %v7149_v36  ;;  %v7243_v34 = vld [vmem:[%s9870_s0 + $0x29c] ss:$108 sps:$4 sm:$0xff]   ;;  %v7245_v35 = vld [vmem:[%s9870_s0 + $0x2d4] ss:$108 sps:$4 sm:$0xff]   ;;  %v7237_v36 = vld [vmem:[%s9869_s1 + $0x350] ss:$8 sps:$4 sm:$0xff]  }
  0xad   :  { %4961 = vmatprep.subr.bf16.mxu0 %v7152_v37  ;;  %4127 = vmatprep.mubr.bf16.mxu1 %v7153_v38  ;;  %v7240_v37 = vld [vmem:[%s9869_s1 + $0xa50] ss:$8 sps:$4 sm:$0xff]   ;;  %v7250_v38 = vld [vmem:[%s9869_s1 + $0x364] ss:$8 sps:$4 sm:$0xff]  }
  0xae   :  { %4918 = vmatprep.mubr.bf16.mxu0 %v7155_v39  ;;  %v7254_v39 = vld [vmem:[%s9869_s1 + $0xa64] ss:$8 sps:$4 sm:$0xff]  }
  0xaf   :  { %4171 = vmatpush1.bf16.msra.mxu1 %v7147_v40  ;;  %v7247_v40 = vld [vmem:[%s9870_s0 + $0x298] ss:$108 sps:$4 sm:$0xff]  }
  0xb0   :  { %4962 = vmatpush1.bf16.msra.mxu0 %v7150_v41  ;;  %4172 = vmatprep.subr.bf16.mxu1 %v7160_v42  ;;  %v7248_v41 = vld [vmem:[%s9869_s1 + $0x360] ss:$8 sps:$4 sm:$0xff]   ;;  %v7251_v42 = vld [vmem:[%s9870_s0 + $0x2d0] ss:$108 sps:$4 sm:$0xff]  }
  0xb1   :  { %4963 = vmatprep.subr.bf16.mxu0 %v7164_v43  ;;  %v7252_v43 = vld [vmem:[%s9869_s1 + $0xa60] ss:$8 sps:$4 sm:$0xff]  }
  0xb2   :  { %4128 = vmatmul.mubr.bf16.gmra.mrb[24].mxu1 %v7157_v44  ;;  %v7257_v44 = vld [vmem:[%s9869_s1 + $0x374] ss:$8 sps:$4 sm:$0xff]  }
  0xb3   :  { %4919 = vmatmul.mubr.bf16.gmra.mrb[24].mxu0 %v7161_v46  ;;  %4173 = vmatpush1.bf16.msra.mxu1 %v7158_v45  ;;  %v7260_v45 = vld [vmem:[%s9869_s1 + $0xa74] ss:$8 sps:$4 sm:$0xff]  }
  0xb4   :  { %4964 = vmatpush1.bf16.msra.mxu0 %v7162_v47  ;;  %4174 = vmatprep.subr.bf16.mxu1 %v7167_v48  ;;  %v7261_v46 = vld [vmem:[%s9870_s0 + $0x374] ss:$108 sps:$4 sm:$0xff]   ;;  %v7263_v47 = vld [vmem:[%s9870_s0 + $0x3ac] ss:$108 sps:$4 sm:$0xff]  }
  0xb5   :  { %4965 = vmatprep.subr.bf16.mxu0 %v7170_v49  ;;  %4137 = vmatprep.mubr.bf16.mxu1 %v7171_v50  ;;  %v7255_v48 = vld [vmem:[%s9869_s1 + $0x370] ss:$8 sps:$4 sm:$0xff]   ;;  %v7268_v50 = vld [vmem:[%s9869_s1 + $0x384] ss:$8 sps:$4 sm:$0xff]  }
  0xb6   :  { %4928 = vmatprep.mubr.bf16.mxu0 %v7173_v51  ;;  %v7258_v49 = vld [vmem:[%s9869_s1 + $0xa70] ss:$8 sps:$4 sm:$0xff]   ;;  %v7272_v51 = vld [vmem:[%s9869_s1 + $0xa84] ss:$8 sps:$4 sm:$0xff]  }
  0xb7   :  { %4175 = vmatpush1.bf16.msra.mxu1 %v7165_v52  ;;  %v7265_v52 = vld [vmem:[%s9870_s0 + $0x370] ss:$108 sps:$4 sm:$0xff]  }
  0xb8   :  { %4966 = vmatpush1.bf16.msra.mxu0 %v7168_v53  ;;  %4176 = vmatprep.subr.bf16.mxu1 %v7178_v54  ;;  %v7266_v53 = vld [vmem:[%s9869_s1 + $0x380] ss:$8 sps:$4 sm:$0xff]  }
  0xb9   :  { %4967 = vmatprep.subr.bf16.mxu0 %v7182_v55  ;;  %v7269_v54 = vld [vmem:[%s9870_s0 + $0x3a8] ss:$108 sps:$4 sm:$0xff]  }
  0xba   :  { %4138 = vmatmul.mubr.bf16.gmra.mrb[28].mxu1 %v7175_v56  ;;  %v7270_v55 = vld [vmem:[%s9869_s1 + $0xa80] ss:$8 sps:$4 sm:$0xff]   ;;  %v7275_v56 = vld [vmem:[%s9869_s1 + $0x394] ss:$8 sps:$4 sm:$0xff]  }
  0xbb   :  { %4929 = vmatmul.mubr.bf16.gmra.mrb[28].mxu0 %v7179_v58  ;;  %4177 = vmatpush1.bf16.msra.mxu1 %v7176_v57  ;;  %v7278_v57 = vld [vmem:[%s9869_s1 + $0xa94] ss:$8 sps:$4 sm:$0xff]   ;;  %v7279_v58 = vld [vmem:[%s9870_s0 + $0x44c] ss:$108 sps:$4 sm:$0xff]  }
  0xbc   :  { %4968 = vmatpush1.bf16.msra.mxu0 %v7180_v59  ;;  %4178 = vmatprep.subr.bf16.mxu1 %v7185_v60  ;;  %v7281_v59 = vld [vmem:[%s9870_s0 + $0x484] ss:$108 sps:$4 sm:$0xff]  }
  0xbd   :  { %4969 = vmatprep.subr.bf16.mxu0 %v7188_v61  ;;  %4180 = vmatprep.mubr.bf16.mxu1 %v7191_v62  ;;  %v7273_v60 = vld [vmem:[%s9869_s1 + $0x390] ss:$8 sps:$4 sm:$0xff]   ;;  %v7286_v62 = vld [vmem:[%s9869_s1 + $0x3a4] ss:$8 sps:$4 sm:$0xff]  }
  0xbe   :  { %4971 = vmatprep.mubr.bf16.mxu0 %v7194_v63  ;;  %v7276_v61 = vld [vmem:[%s9869_s1 + $0xa90] ss:$8 sps:$4 sm:$0xff]   ;;  %v7290_v63 = vld [vmem:[%s9869_s1 + $0xaa4] ss:$8 sps:$4 sm:$0xff]  }
  0xbf   :  { %4179 = vmatpush1.bf16.msra.mxu1 %v7183_v0  ;;  %v7283_v0 = vld [vmem:[%s9870_s0 + $0x448] ss:$108 sps:$4 sm:$0xff]  }
  0xc0   :  { %4970 = vmatpush1.bf16.msra.mxu0 %v7186_v1  ;;  %4261 = vmatprep.subr.bf16.mxu1 %v7197_v2  ;;  %v7284_v1 = vld [vmem:[%s9869_s1 + $0x3a0] ss:$8 sps:$4 sm:$0xff]  }
  0xc1   :  { %5052 = vmatprep.subr.bf16.mxu0 %v7200_v3  ;;  %v7287_v2 = vld [vmem:[%s9870_s0 + $0x480] ss:$108 sps:$4 sm:$0xff]  }
  0xc2   :  { %4181 = vmatmul.mubr.bf16.vlgmr.msra.gmra.mrb[0].mxu1 %v7189_v4  ;;  %v7288_v3 = vld [vmem:[%s9869_s1 + $0xaa0] ss:$8 sps:$4 sm:$0xff]   ;;  %v7293_v4 = vld [vmem:[%s9869_s1 + $0x3b4] ss:$8 sps:$4 sm:$0xff]  }
  0xc3   :  { %4972 = vmatmul.mubr.bf16.vlgmr.msra.gmra.mrb[0].mxu0 %v7192_v5  ;;  %4262 = vmatpush1.bf16.msra.mxu1 %v7195_v6  ;;  %v7296_v5 = vld [vmem:[%s9869_s1 + $0xab4] ss:$8 sps:$4 sm:$0xff]   ;;  %v7297_v6 = vld [vmem:[%s9870_s0 + $0x524] ss:$108 sps:$4 sm:$0xff]  }
  0xc4   :  { %5053 = vmatpush1.bf16.msra.mxu0 %v7198_v7  ;;  %4263 = vmatprep.subr.bf16.mxu1 %v7203_v8  ;;  %v7299_v7 = vld [vmem:[%s9870_s0 + $0x55c] ss:$108 sps:$4 sm:$0xff]   ;;  %v7291_v8 = vld [vmem:[%s9869_s1 + $0x3b0] ss:$8 sps:$4 sm:$0xff]  }
  0xc5   :  { %5054 = vmatprep.subr.bf16.mxu0 %v7206_v9  ;;  %4190 = vmatprep.mubr.bf16.mxu1 %v7207_v10  ;;  %v7294_v9 = vld [vmem:[%s9869_s1 + $0xab0] ss:$8 sps:$4 sm:$0xff]   ;;  %v7304_v10 = vld [vmem:[%s9869_s1 + $0x3c4] ss:$8 sps:$4 sm:$0xff]  }
  0xc6   :  { %4981 = vmatprep.mubr.bf16.mxu0 %v7209_v11  ;;  %v7308_v11 = vld [vmem:[%s9869_s1 + $0xac4] ss:$8 sps:$4 sm:$0xff]  }
  0xc7   :  { %4264 = vmatpush1.bf16.msra.mxu1 %v7201_v12  ;;  %v7301_v12 = vld [vmem:[%s9870_s0 + $0x520] ss:$108 sps:$4 sm:$0xff]  }
  0xc8   :  { %5055 = vmatpush1.bf16.msra.mxu0 %v7204_v13  ;;  %4265 = vmatprep.subr.bf16.mxu1 %v7214_v14  ;;  %v7302_v13 = vld [vmem:[%s9869_s1 + $0x3c0] ss:$8 sps:$4 sm:$0xff]   ;;  %v7305_v14 = vld [vmem:[%s9870_s0 + $0x558] ss:$108 sps:$4 sm:$0xff]  }
  0xc9   :  { %5056 = vmatprep.subr.bf16.mxu0 %v7218_v15  ;;  %v7306_v15 = vld [vmem:[%s9869_s1 + $0xac0] ss:$8 sps:$4 sm:$0xff]  }
  0xca   :  { %4191 = vmatmul.mubr.bf16.gmra.mrb[4].mxu1 %v7211_v16  ;;  %v7311_v16 = vld [vmem:[%s9869_s1 + $0x3d4] ss:$8 sps:$4 sm:$0xff]  }
  0xcb   :  { %4982 = vmatmul.mubr.bf16.gmra.mrb[4].mxu0 %v7215_v18  ;;  %4266 = vmatpush1.bf16.msra.mxu1 %v7212_v17  ;;  %v7314_v17 = vld [vmem:[%s9869_s1 + $0xad4] ss:$8 sps:$4 sm:$0xff]  }
  0xcc   :  { %5057 = vmatpush1.bf16.msra.mxu0 %v7216_v19  ;;  %4267 = vmatprep.subr.bf16.mxu1 %v7221_v20  ;;  %v7315_v18 = vld [vmem:[%s9870_s0 + $0x5fc] ss:$108 sps:$4 sm:$0xff]   ;;  %v7317_v19 = vld [vmem:[%s9870_s0 + $0x634] ss:$108 sps:$4 sm:$0xff]   ;;  %v7309_v20 = vld [vmem:[%s9869_s1 + $0x3d0] ss:$8 sps:$4 sm:$0xff]  }
  0xcd   :  { %5058 = vmatprep.subr.bf16.mxu0 %v7224_v21  ;;  %4200 = vmatprep.mubr.bf16.mxu1 %v7225_v22  ;;  %v7312_v21 = vld [vmem:[%s9869_s1 + $0xad0] ss:$8 sps:$4 sm:$0xff]   ;;  %v7322_v22 = vld [vmem:[%s9869_s1 + $0x3e4] ss:$8 sps:$4 sm:$0xff]  }
  0xce   :  { %4991 = vmatprep.mubr.bf16.mxu0 %v7227_v23  ;;  %v7326_v23 = vld [vmem:[%s9869_s1 + $0xae4] ss:$8 sps:$4 sm:$0xff]  }
  0xcf   :  { %4268 = vmatpush1.bf16.msra.mxu1 %v7219_v24  ;;  %v7319_v24 = vld [vmem:[%s9870_s0 + $0x5f8] ss:$108 sps:$4 sm:$0xff]  }
  0xd0   :  { %5059 = vmatpush1.bf16.msra.mxu0 %v7222_v25  ;;  %4269 = vmatprep.subr.bf16.mxu1 %v7232_v26  ;;  %v7320_v25 = vld [vmem:[%s9869_s1 + $0x3e0] ss:$8 sps:$4 sm:$0xff]   ;;  %v7323_v26 = vld [vmem:[%s9870_s0 + $0x630] ss:$108 sps:$4 sm:$0xff]  }
  0xd1   :  { %5060 = vmatprep.subr.bf16.mxu0 %v7236_v27  ;;  %v7324_v27 = vld [vmem:[%s9869_s1 + $0xae0] ss:$8 sps:$4 sm:$0xff]  }
  0xd2   :  { %4201 = vmatmul.mubr.bf16.gmra.mrb[8].mxu1 %v7229_v28  ;;  %v7329_v28 = vld [vmem:[%s9869_s1 + $0x3f4] ss:$8 sps:$4 sm:$0xff]  }
  0xd3   :  { %4992 = vmatmul.mubr.bf16.gmra.mrb[8].mxu0 %v7233_v30  ;;  %4270 = vmatpush1.bf16.msra.mxu1 %v7230_v29  ;;  %v7332_v29 = vld [vmem:[%s9869_s1 + $0xaf4] ss:$8 sps:$4 sm:$0xff]  }
  0xd4   :  { %5061 = vmatpush1.bf16.msra.mxu0 %v7234_v31  ;;  %4271 = vmatprep.subr.bf16.mxu1 %v7239_v32  ;;  %v7335_v30 = vld [vmem:[%s9870_s0 + $0x1c] ss:$108 sps:$4 sm:$0xff]   ;;  %v7338_v31 = vld [vmem:[%s9870_s0 + $0x54] ss:$108 sps:$4 sm:$0xff]   ;;  %v7327_v32 = vld [vmem:[%s9869_s1 + $0x3f0] ss:$8 sps:$4 sm:$0xff]  }
  0xd5   :  { %5062 = vmatprep.subr.bf16.mxu0 %v7242_v33  ;;  %4210 = vmatprep.mubr.bf16.mxu1 %v7243_v34  ;;  %v7330_v33 = vld [vmem:[%s9869_s1 + $0xaf0] ss:$8 sps:$4 sm:$0xff]   ;;  %v7341_v34 = vld [vmem:[%s9869_s1 + $0x404] ss:$8 sps:$4 sm:$0xff]  }
  0xd6   :  { %5001 = vmatprep.mubr.bf16.mxu0 %v7245_v35  ;;  %v7344_v35 = vld [vmem:[%s9869_s1 + $0xb04] ss:$8 sps:$4 sm:$0xff]  }
  0xd7   :  { %4272 = vmatpush1.bf16.msra.mxu1 %v7237_v36  ;;  %v7333_v36 = vld [vmem:[%s9870_s0 + $0x18] ss:$108 sps:$4 sm:$0xff]  }
  0xd8   :  { %5063 = vmatpush1.bf16.msra.mxu0 %v7240_v37  ;;  %4273 = vmatprep.subr.bf16.mxu1 %v7250_v38  ;;  %v7336_v37 = vld [vmem:[%s9870_s0 + $0x50] ss:$108 sps:$4 sm:$0xff]   ;;  %v7339_v38 = vld [vmem:[%s9869_s1 + $0x400] ss:$8 sps:$4 sm:$0xff]  }
  0xd9   :  { %5064 = vmatprep.subr.bf16.mxu0 %v7254_v39  ;;  %v7342_v39 = vld [vmem:[%s9869_s1 + $0xb00] ss:$8 sps:$4 sm:$0xff]  }
  0xda   :  { %4211 = vmatmul.mubr.bf16.gmra.mrb[12].mxu1 %v7247_v40  ;;  %v7347_v40 = vld [vmem:[%s9869_s1 + $0x414] ss:$8 sps:$4 sm:$0xff]  }
  0xdb   :  { %5002 = vmatmul.mubr.bf16.gmra.mrb[12].mxu0 %v7251_v42  ;;  %4274 = vmatpush1.bf16.msra.mxu1 %v7248_v41  ;;  %v7350_v41 = vld [vmem:[%s9869_s1 + $0xb14] ss:$8 sps:$4 sm:$0xff]  }
  0xdc   :  { %5065 = vmatpush1.bf16.msra.mxu0 %v7252_v43  ;;  %4275 = vmatprep.subr.bf16.mxu1 %v7257_v44  ;;  %v7351_v42 = vld [vmem:[%s9870_s0 + $0xf4] ss:$108 sps:$4 sm:$0xff]   ;;  %v7353_v43 = vld [vmem:[%s9870_s0 + $0x12c] ss:$108 sps:$4 sm:$0xff]  }
  0xdd   :  { %5066 = vmatprep.subr.bf16.mxu0 %v7260_v45  ;;  %4220 = vmatprep.mubr.bf16.mxu1 %v7261_v46  ;;  %v7345_v44 = vld [vmem:[%s9869_s1 + $0x410] ss:$8 sps:$4 sm:$0xff]   ;;  %v7358_v46 = vld [vmem:[%s9869_s1 + $0x424] ss:$8 sps:$4 sm:$0xff]  }
  0xde   :  { %5011 = vmatprep.mubr.bf16.mxu0 %v7263_v47  ;;  %v7348_v45 = vld [vmem:[%s9869_s1 + $0xb10] ss:$8 sps:$4 sm:$0xff]   ;;  %v7362_v47 = vld [vmem:[%s9869_s1 + $0xb24] ss:$8 sps:$4 sm:$0xff]  }
  0xdf   :  { %4276 = vmatpush1.bf16.msra.mxu1 %v7255_v48  ;;  %v7355_v48 = vld [vmem:[%s9870_s0 + $0xf0] ss:$108 sps:$4 sm:$0xff]  }
  0xe0   :  { %5067 = vmatpush1.bf16.msra.mxu0 %v7258_v49  ;;  %4277 = vmatprep.subr.bf16.mxu1 %v7268_v50  ;;  %v7356_v49 = vld [vmem:[%s9869_s1 + $0x420] ss:$8 sps:$4 sm:$0xff]  }
  0xe1   :  { %5068 = vmatprep.subr.bf16.mxu0 %v7272_v51  ;;  %v7359_v50 = vld [vmem:[%s9870_s0 + $0x128] ss:$108 sps:$4 sm:$0xff]  }
  0xe2   :  { %4221 = vmatmul.mubr.bf16.gmra.mrb[16].mxu1 %v7265_v52  ;;  %v7360_v51 = vld [vmem:[%s9869_s1 + $0xb20] ss:$8 sps:$4 sm:$0xff]   ;;  %v7365_v52 = vld [vmem:[%s9869_s1 + $0x434] ss:$8 sps:$4 sm:$0xff]  }
  0xe3   :  { %5012 = vmatmul.mubr.bf16.gmra.mrb[16].mxu0 %v7269_v54  ;;  %4278 = vmatpush1.bf16.msra.mxu1 %v7266_v53  ;;  %v7368_v53 = vld [vmem:[%s9869_s1 + $0xb34] ss:$8 sps:$4 sm:$0xff]   ;;  %v7369_v54 = vld [vmem:[%s9870_s0 + $0x1cc] ss:$108 sps:$4 sm:$0xff]  }
  0xe4   :  { %5069 = vmatpush1.bf16.msra.mxu0 %v7270_v55  ;;  %4279 = vmatprep.subr.bf16.mxu1 %v7275_v56  ;;  %v7371_v55 = vld [vmem:[%s9870_s0 + $0x204] ss:$108 sps:$4 sm:$0xff]  }
  0xe5   :  { %5070 = vmatprep.subr.bf16.mxu0 %v7278_v57  ;;  %4230 = vmatprep.mubr.bf16.mxu1 %v7279_v58  ;;  %v7363_v56 = vld [vmem:[%s9869_s1 + $0x430] ss:$8 sps:$4 sm:$0xff]   ;;  %v7376_v58 = vld [vmem:[%s9869_s1 + $0x444] ss:$8 sps:$4 sm:$0xff]  }
  0xe6   :  { %5021 = vmatprep.mubr.bf16.mxu0 %v7281_v59  ;;  %v7366_v57 = vld [vmem:[%s9869_s1 + $0xb30] ss:$8 sps:$4 sm:$0xff]   ;;  %v7380_v59 = vld [vmem:[%s9869_s1 + $0xb44] ss:$8 sps:$4 sm:$0xff]  }
  0xe7   :  { %4280 = vmatpush1.bf16.msra.mxu1 %v7273_v60  ;;  %v7373_v60 = vld [vmem:[%s9870_s0 + $0x1c8] ss:$108 sps:$4 sm:$0xff]  }
  0xe8   :  { %5071 = vmatpush1.bf16.msra.mxu0 %v7276_v61  ;;  %4281 = vmatprep.subr.bf16.mxu1 %v7286_v62  ;;  %v7374_v61 = vld [vmem:[%s9869_s1 + $0x440] ss:$8 sps:$4 sm:$0xff]  }
  0xe9   :  { %5072 = vmatprep.subr.bf16.mxu0 %v7290_v63  ;;  %v7377_v62 = vld [vmem:[%s9870_s0 + $0x200] ss:$108 sps:$4 sm:$0xff]  }
  0xea   :  { %4231 = vmatmul.mubr.bf16.gmra.mrb[20].mxu1 %v7283_v0  ;;  %v7378_v63 = vld [vmem:[%s9869_s1 + $0xb40] ss:$8 sps:$4 sm:$0xff]   ;;  %v7383_v0 = vld [vmem:[%s9869_s1 + $0x454] ss:$8 sps:$4 sm:$0xff]  }
  0xeb   :  { %5022 = vmatmul.mubr.bf16.gmra.mrb[20].mxu0 %v7287_v2  ;;  %4282 = vmatpush1.bf16.msra.mxu1 %v7284_v1  ;;  %v7386_v1 = vld [vmem:[%s9869_s1 + $0xb54] ss:$8 sps:$4 sm:$0xff]   ;;  %v7387_v2 = vld [vmem:[%s9870_s0 + $0x2a4] ss:$108 sps:$4 sm:$0xff]  }
  0xec   :  { %5073 = vmatpush1.bf16.msra.mxu0 %v7288_v3  ;;  %4283 = vmatprep.subr.bf16.mxu1 %v7293_v4  ;;  %v7389_v3 = vld [vmem:[%s9870_s0 + $0x2dc] ss:$108 sps:$4 sm:$0xff]   ;;  %v7381_v4 = vld [vmem:[%s9869_s1 + $0x450] ss:$8 sps:$4 sm:$0xff]  }
  0xed   :  { %5074 = vmatprep.subr.bf16.mxu0 %v7296_v5  ;;  %4240 = vmatprep.mubr.bf16.mxu1 %v7297_v6  ;;  %v7384_v5 = vld [vmem:[%s9869_s1 + $0xb50] ss:$8 sps:$4 sm:$0xff]   ;;  %v7394_v6 = vld [vmem:[%s9869_s1 + $0x464] ss:$8 sps:$4 sm:$0xff]  }
  0xee   :  { %5031 = vmatprep.mubr.bf16.mxu0 %v7299_v7  ;;  %v7398_v7 = vld [vmem:[%s9869_s1 + $0xb64] ss:$8 sps:$4 sm:$0xff]  }
  0xef   :  { %4284 = vmatpush1.bf16.msra.mxu1 %v7291_v8  ;;  %v7391_v8 = vld [vmem:[%s9870_s0 + $0x2a0] ss:$108 sps:$4 sm:$0xff]  }
  0xf0   :  { %5075 = vmatpush1.bf16.msra.mxu0 %v7294_v9  ;;  %4285 = vmatprep.subr.bf16.mxu1 %v7304_v10  ;;  %v7392_v9 = vld [vmem:[%s9869_s1 + $0x460] ss:$8 sps:$4 sm:$0xff]   ;;  %v7395_v10 = vld [vmem:[%s9870_s0 + $0x2d8] ss:$108 sps:$4 sm:$0xff]  }
  0xf1   :  { %5076 = vmatprep.subr.bf16.mxu0 %v7308_v11  ;;  %v7396_v11 = vld [vmem:[%s9869_s1 + $0xb60] ss:$8 sps:$4 sm:$0xff]  }
  0xf2   :  { %4241 = vmatmul.mubr.bf16.gmra.mrb[24].mxu1 %v7301_v12  ;;  %v7401_v12 = vld [vmem:[%s9869_s1 + $0x474] ss:$8 sps:$4 sm:$0xff]  }
  0xf3   :  { %5032 = vmatmul.mubr.bf16.gmra.mrb[24].mxu0 %v7305_v14  ;;  %4286 = vmatpush1.bf16.msra.mxu1 %v7302_v13  ;;  %v7404_v13 = vld [vmem:[%s9869_s1 + $0xb74] ss:$8 sps:$4 sm:$0xff]  }
  0xf4   :  { %5077 = vmatpush1.bf16.msra.mxu0 %v7306_v15  ;;  %4287 = vmatprep.subr.bf16.mxu1 %v7311_v16  ;;  %v7405_v14 = vld [vmem:[%s9870_s0 + $0x37c] ss:$108 sps:$4 sm:$0xff]   ;;  %v7407_v15 = vld [vmem:[%s9870_s0 + $0x3b4] ss:$108 sps:$4 sm:$0xff]   ;;  %v7399_v16 = vld [vmem:[%s9869_s1 + $0x470] ss:$8 sps:$4 sm:$0xff]  }
  0xf5   :  { %5078 = vmatprep.subr.bf16.mxu0 %v7314_v17  ;;  %4250 = vmatprep.mubr.bf16.mxu1 %v7315_v18  ;;  %v7402_v17 = vld [vmem:[%s9869_s1 + $0xb70] ss:$8 sps:$4 sm:$0xff]   ;;  %v7412_v18 = vld [vmem:[%s9869_s1 + $0x484] ss:$8 sps:$4 sm:$0xff]  }
  0xf6   :  { %5041 = vmatprep.mubr.bf16.mxu0 %v7317_v19  ;;  %v7416_v19 = vld [vmem:[%s9869_s1 + $0xb84] ss:$8 sps:$4 sm:$0xff]  }
  0xf7   :  { %4288 = vmatpush1.bf16.msra.mxu1 %v7309_v20  ;;  %v7409_v20 = vld [vmem:[%s9870_s0 + $0x378] ss:$108 sps:$4 sm:$0xff]  }
  0xf8   :  { %5079 = vmatpush1.bf16.msra.mxu0 %v7312_v21  ;;  %4289 = vmatprep.subr.bf16.mxu1 %v7322_v22  ;;  %v7410_v21 = vld [vmem:[%s9869_s1 + $0x480] ss:$8 sps:$4 sm:$0xff]   ;;  %v7413_v22 = vld [vmem:[%s9870_s0 + $0x3b0] ss:$108 sps:$4 sm:$0xff]  }
  0xf9   :  { %5080 = vmatprep.subr.bf16.mxu0 %v7326_v23  ;;  %v7414_v23 = vld [vmem:[%s9869_s1 + $0xb80] ss:$8 sps:$4 sm:$0xff]  }
  0xfa   :  { %4251 = vmatmul.mubr.bf16.gmra.mrb[28].mxu1 %v7319_v24  ;;  %v7419_v24 = vld [vmem:[%s9869_s1 + $0x494] ss:$8 sps:$4 sm:$0xff]  }
  0xfb   :  { %5042 = vmatmul.mubr.bf16.gmra.mrb[28].mxu0 %v7323_v26  ;;  %4290 = vmatpush1.bf16.msra.mxu1 %v7320_v25  ;;  %v7422_v25 = vld [vmem:[%s9869_s1 + $0xb94] ss:$8 sps:$4 sm:$0xff]  }
  0xfc   :  { %5081 = vmatpush1.bf16.msra.mxu0 %v7324_v27  ;;  %4291 = vmatprep.subr.bf16.mxu1 %v7329_v28  ;;  %v7423_v26 = vld [vmem:[%s9870_s0 + $0x454] ss:$108 sps:$4 sm:$0xff]   ;;  %v7425_v27 = vld [vmem:[%s9870_s0 + $0x48c] ss:$108 sps:$4 sm:$0xff]  }
  0xfd   :  { %5082 = vmatprep.subr.bf16.mxu0 %v7332_v29  ;;  %4293 = vmatprep.mubr.bf16.mxu1 %v7335_v30  ;;  %v7417_v28 = vld [vmem:[%s9869_s1 + $0x490] ss:$8 sps:$4 sm:$0xff]   ;;  %v7430_v30 = vld [vmem:[%s9869_s1 + $0x4a4] ss:$8 sps:$4 sm:$0xff]  }
  0xfe   :  { %5084 = vmatprep.mubr.bf16.mxu0 %v7338_v31  ;;  %v7420_v29 = vld [vmem:[%s9869_s1 + $0xb90] ss:$8 sps:$4 sm:$0xff]   ;;  %v7434_v31 = vld [vmem:[%s9869_s1 + $0xba4] ss:$8 sps:$4 sm:$0xff]  }
  0xff   :  { %4292 = vmatpush1.bf16.msra.mxu1 %v7327_v32  ;;  %v7427_v32 = vld [vmem:[%s9870_s0 + $0x450] ss:$108 sps:$4 sm:$0xff]  }
 0x100   :  { %5083 = vmatpush1.bf16.msra.mxu0 %v7330_v33  ;;  %4374 = vmatprep.subr.bf16.mxu1 %v7341_v34  ;;  %v7428_v33 = vld [vmem:[%s9869_s1 + $0x4a0] ss:$8 sps:$4 sm:$0xff]  }
 0x101   :  { %5165 = vmatprep.subr.bf16.mxu0 %v7344_v35  ;;  %v7431_v34 = vld [vmem:[%s9870_s0 + $0x488] ss:$108 sps:$4 sm:$0xff]  }
 0x102   :  { %4294 = vmatmul.mubr.bf16.vlgmr.msra.gmra.mrb[0].mxu1 %v7333_v36  ;;  %v7432_v35 = vld [vmem:[%s9869_s1 + $0xba0] ss:$8 sps:$4 sm:$0xff]   ;;  %v7437_v36 = vld [vmem:[%s9869_s1 + $0x4b4] ss:$8 sps:$4 sm:$0xff]  }
 0x103   :  { %5085 = vmatmul.mubr.bf16.vlgmr.msra.gmra.mrb[0].mxu0 %v7336_v37  ;;  %4375 = vmatpush1.bf16.msra.mxu1 %v7339_v38  ;;  %v7440_v37 = vld [vmem:[%s9869_s1 + $0xbb4] ss:$8 sps:$4 sm:$0xff]   ;;  %v7441_v38 = vld [vmem:[%s9870_s0 + $0x52c] ss:$108 sps:$4 sm:$0xff]  }
 0x104   :  { %5166 = vmatpush1.bf16.msra.mxu0 %v7342_v39  ;;  %4376 = vmatprep.subr.bf16.mxu1 %v7347_v40  ;;  %v7443_v39 = vld [vmem:[%s9870_s0 + $0x564] ss:$108 sps:$4 sm:$0xff]  }
 0x105   :  { %5167 = vmatprep.subr.bf16.mxu0 %v7350_v41  ;;  %4303 = vmatprep.mubr.bf16.mxu1 %v7351_v42  ;;  %v7435_v40 = vld [vmem:[%s9869_s1 + $0x4b0] ss:$8 sps:$4 sm:$0xff]   ;;  %v7448_v42 = vld [vmem:[%s9869_s1 + $0x4c4] ss:$8 sps:$4 sm:$0xff]  }
 0x106   :  { %5094 = vmatprep.mubr.bf16.mxu0 %v7353_v43  ;;  %v7438_v41 = vld [vmem:[%s9869_s1 + $0xbb0] ss:$8 sps:$4 sm:$0xff]   ;;  %v7452_v43 = vld [vmem:[%s9869_s1 + $0xbc4] ss:$8 sps:$4 sm:$0xff]  }
 0x107   :  { %4377 = vmatpush1.bf16.msra.mxu1 %v7345_v44  ;;  %v7445_v44 = vld [vmem:[%s9870_s0 + $0x528] ss:$108 sps:$4 sm:$0xff]  }
 0x108   :  { %5168 = vmatpush1.bf16.msra.mxu0 %v7348_v45  ;;  %4378 = vmatprep.subr.bf16.mxu1 %v7358_v46  ;;  %v7446_v45 = vld [vmem:[%s9869_s1 + $0x4c0] ss:$8 sps:$4 sm:$0xff]  }
 0x109   :  { %5169 = vmatprep.subr.bf16.mxu0 %v7362_v47  ;;  %v7449_v46 = vld [vmem:[%s9870_s0 + $0x560] ss:$108 sps:$4 sm:$0xff]  }
 0x10a   :  { %4304 = vmatmul.mubr.bf16.gmra.mrb[4].mxu1 %v7355_v48  ;;  %v7450_v47 = vld [vmem:[%s9869_s1 + $0xbc0] ss:$8 sps:$4 sm:$0xff]   ;;  %v7455_v48 = vld [vmem:[%s9869_s1 + $0x4d4] ss:$8 sps:$4 sm:$0xff]  }
 0x10b   :  { %5095 = vmatmul.mubr.bf16.gmra.mrb[4].mxu0 %v7359_v50  ;;  %4379 = vmatpush1.bf16.msra.mxu1 %v7356_v49  ;;  %v7458_v49 = vld [vmem:[%s9869_s1 + $0xbd4] ss:$8 sps:$4 sm:$0xff]   ;;  %v7459_v50 = vld [vmem:[%s9870_s0 + $0x604] ss:$108 sps:$4 sm:$0xff]  }
 0x10c   :  { %5170 = vmatpush1.bf16.msra.mxu0 %v7360_v51  ;;  %4380 = vmatprep.subr.bf16.mxu1 %v7365_v52  ;;  %v7461_v51 = vld [vmem:[%s9870_s0 + $0x63c] ss:$108 sps:$4 sm:$0xff]   ;;  %v7453_v52 = vld [vmem:[%s9869_s1 + $0x4d0] ss:$8 sps:$4 sm:$0xff]  }
 0x10d   :  { %5171 = vmatprep.subr.bf16.mxu0 %v7368_v53  ;;  %4313 = vmatprep.mubr.bf16.mxu1 %v7369_v54  ;;  %v7456_v53 = vld [vmem:[%s9869_s1 + $0xbd0] ss:$8 sps:$4 sm:$0xff]   ;;  %v7466_v54 = vld [vmem:[%s9869_s1 + $0x4e4] ss:$8 sps:$4 sm:$0xff]  }
 0x10e   :  { %5104 = vmatprep.mubr.bf16.mxu0 %v7371_v55  ;;  %v7470_v55 = vld [vmem:[%s9869_s1 + $0xbe4] ss:$8 sps:$4 sm:$0xff]  }
 0x10f   :  { %4381 = vmatpush1.bf16.msra.mxu1 %v7363_v56  ;;  %v7463_v56 = vld [vmem:[%s9870_s0 + $0x600] ss:$108 sps:$4 sm:$0xff]  }
 0x110   :  { %5172 = vmatpush1.bf16.msra.mxu0 %v7366_v57  ;;  %4382 = vmatprep.subr.bf16.mxu1 %v7376_v58  ;;  %v7464_v57 = vld [vmem:[%s9869_s1 + $0x4e0] ss:$8 sps:$4 sm:$0xff]   ;;  %v7467_v58 = vld [vmem:[%s9870_s0 + $0x638] ss:$108 sps:$4 sm:$0xff]  }
 0x111   :  { %5173 = vmatprep.subr.bf16.mxu0 %v7380_v59  ;;  %v7468_v59 = vld [vmem:[%s9869_s1 + $0xbe0] ss:$8 sps:$4 sm:$0xff]  }
 0x112   :  { %4314 = vmatmul.mubr.bf16.gmra.mrb[8].mxu1 %v7373_v60  ;;  %v7473_v60 = vld [vmem:[%s9869_s1 + $0x4f4] ss:$8 sps:$4 sm:$0xff]  }
 0x113   :  { %5105 = vmatmul.mubr.bf16.gmra.mrb[8].mxu0 %v7377_v62  ;;  %4383 = vmatpush1.bf16.msra.mxu1 %v7374_v61  ;;  %v7476_v61 = vld [vmem:[%s9869_s1 + $0xbf4] ss:$8 sps:$4 sm:$0xff]   ;;  %v7479_v62 = vld [vmem:[%s9870_s0 + $0x24] ss:$108 sps:$4 sm:$0xff]  }
 0x114   :  { %5174 = vmatpush1.bf16.msra.mxu0 %v7378_v63  ;;  %4384 = vmatprep.subr.bf16.mxu1 %v7383_v0  ;;  %v7482_v63 = vld [vmem:[%s9870_s0 + $0x5c] ss:$108 sps:$4 sm:$0xff]   ;;  %v7471_v0 = vld [vmem:[%s9869_s1 + $0x4f0] ss:$8 sps:$4 sm:$0xff]  }
 0x115   :  { %5175 = vmatprep.subr.bf16.mxu0 %v7386_v1  ;;  %4323 = vmatprep.mubr.bf16.mxu1 %v7387_v2  ;;  %v7474_v1 = vld [vmem:[%s9869_s1 + $0xbf0] ss:$8 sps:$4 sm:$0xff]   ;;  %v7485_v2 = vld [vmem:[%s9869_s1 + $0x504] ss:$8 sps:$4 sm:$0xff]  }
 0x116   :  { %5114 = vmatprep.mubr.bf16.mxu0 %v7389_v3  ;;  %v7488_v3 = vld [vmem:[%s9869_s1 + $0xc04] ss:$8 sps:$4 sm:$0xff]  }
 0x117   :  { %4385 = vmatpush1.bf16.msra.mxu1 %v7381_v4  ;;  %v7477_v4 = vld [vmem:[%s9870_s0 + $0x20] ss:$108 sps:$4 sm:$0xff]  }
 0x118   :  { %5176 = vmatpush1.bf16.msra.mxu0 %v7384_v5  ;;  %4386 = vmatprep.subr.bf16.mxu1 %v7394_v6  ;;  %v7480_v5 = vld [vmem:[%s9870_s0 + $0x58] ss:$108 sps:$4 sm:$0xff]   ;;  %v7483_v6 = vld [vmem:[%s9869_s1 + $0x500] ss:$8 sps:$4 sm:$0xff]  }
 0x119   :  { %5177 = vmatprep.subr.bf16.mxu0 %v7398_v7  ;;  %v7486_v7 = vld [vmem:[%s9869_s1 + $0xc00] ss:$8 sps:$4 sm:$0xff]  }
 0x11a   :  { %4324 = vmatmul.mubr.bf16.gmra.mrb[12].mxu1 %v7391_v8  ;;  %v7491_v8 = vld [vmem:[%s9869_s1 + $0x514] ss:$8 sps:$4 sm:$0xff]  }
 0x11b   :  { %5115 = vmatmul.mubr.bf16.gmra.mrb[12].mxu0 %v7395_v10  ;;  %4387 = vmatpush1.bf16.msra.mxu1 %v7392_v9  ;;  %v7494_v9 = vld [vmem:[%s9869_s1 + $0xc14] ss:$8 sps:$4 sm:$0xff]  }
 0x11c   :  { %5178 = vmatpush1.bf16.msra.mxu0 %v7396_v11  ;;  %4388 = vmatprep.subr.bf16.mxu1 %v7401_v12  ;;  %v7495_v10 = vld [vmem:[%s9870_s0 + $0xfc] ss:$108 sps:$4 sm:$0xff]   ;;  %v7497_v11 = vld [vmem:[%s9870_s0 + $0x134] ss:$108 sps:$4 sm:$0xff]   ;;  %v7489_v12 = vld [vmem:[%s9869_s1 + $0x510] ss:$8 sps:$4 sm:$0xff]  }
 0x11d   :  { %5179 = vmatprep.subr.bf16.mxu0 %v7404_v13  ;;  %4333 = vmatprep.mubr.bf16.mxu1 %v7405_v14  ;;  %v7492_v13 = vld [vmem:[%s9869_s1 + $0xc10] ss:$8 sps:$4 sm:$0xff]   ;;  %v7502_v14 = vld [vmem:[%s9869_s1 + $0x524] ss:$8 sps:$4 sm:$0xff]  }
 0x11e   :  { %5124 = vmatprep.mubr.bf16.mxu0 %v7407_v15  ;;  %v7506_v15 = vld [vmem:[%s9869_s1 + $0xc24] ss:$8 sps:$4 sm:$0xff]  }
 0x11f   :  { %4389 = vmatpush1.bf16.msra.mxu1 %v7399_v16  ;;  %v7499_v16 = vld [vmem:[%s9870_s0 + $0xf8] ss:$108 sps:$4 sm:$0xff]  }
 0x120   :  { %5180 = vmatpush1.bf16.msra.mxu0 %v7402_v17  ;;  %4390 = vmatprep.subr.bf16.mxu1 %v7412_v18  ;;  %v7500_v17 = vld [vmem:[%s9869_s1 + $0x520] ss:$8 sps:$4 sm:$0xff]   ;;  %v7503_v18 = vld [vmem:[%s9870_s0 + $0x130] ss:$108 sps:$4 sm:$0xff]  }
 0x121   :  { %5181 = vmatprep.subr.bf16.mxu0 %v7416_v19  ;;  %v7504_v19 = vld [vmem:[%s9869_s1 + $0xc20] ss:$8 sps:$4 sm:$0xff]  }
 0x122   :  { %4334 = vmatmul.mubr.bf16.gmra.mrb[16].mxu1 %v7409_v20  ;;  %v7509_v20 = vld [vmem:[%s9869_s1 + $0x534] ss:$8 sps:$4 sm:$0xff]  }
 0x123   :  { %5125 = vmatmul.mubr.bf16.gmra.mrb[16].mxu0 %v7413_v22  ;;  %4391 = vmatpush1.bf16.msra.mxu1 %v7410_v21  ;;  %v7512_v21 = vld [vmem:[%s9869_s1 + $0xc34] ss:$8 sps:$4 sm:$0xff]  }
 0x124   :  { %5182 = vmatpush1.bf16.msra.mxu0 %v7414_v23  ;;  %4392 = vmatprep.subr.bf16.mxu1 %v7419_v24  ;;  %v7513_v22 = vld [vmem:[%s9870_s0 + $0x1d4] ss:$108 sps:$4 sm:$0xff]   ;;  %v7515_v23 = vld [vmem:[%s9870_s0 + $0x20c] ss:$108 sps:$4 sm:$0xff]  }
 0x125   :  { %5183 = vmatprep.subr.bf16.mxu0 %v7422_v25  ;;  %4343 = vmatprep.mubr.bf16.mxu1 %v7423_v26  ;;  %v7507_v24 = vld [vmem:[%s9869_s1 + $0x530] ss:$8 sps:$4 sm:$0xff]   ;;  %v7520_v26 = vld [vmem:[%s9869_s1 + $0x544] ss:$8 sps:$4 sm:$0xff]  }
 0x126   :  { %5134 = vmatprep.mubr.bf16.mxu0 %v7425_v27  ;;  %v7510_v25 = vld [vmem:[%s9869_s1 + $0xc30] ss:$8 sps:$4 sm:$0xff]   ;;  %v7524_v27 = vld [vmem:[%s9869_s1 + $0xc44] ss:$8 sps:$4 sm:$0xff]  }
 0x127   :  { %4393 = vmatpush1.bf16.msra.mxu1 %v7417_v28  ;;  %v7517_v28 = vld [vmem:[%s9870_s0 + $0x1d0] ss:$108 sps:$4 sm:$0xff]  }
 0x128   :  { %5184 = vmatpush1.bf16.msra.mxu0 %v7420_v29  ;;  %4394 = vmatprep.subr.bf16.mxu1 %v7430_v30  ;;  %v7518_v29 = vld [vmem:[%s9869_s1 + $0x540] ss:$8 sps:$4 sm:$0xff]  }
 0x129   :  { %5185 = vmatprep.subr.bf16.mxu0 %v7434_v31  ;;  %v7521_v30 = vld [vmem:[%s9870_s0 + $0x208] ss:$108 sps:$4 sm:$0xff]  }
 0x12a   :  { %4344 = vmatmul.mubr.bf16.gmra.mrb[20].mxu1 %v7427_v32  ;;  %v7522_v31 = vld [vmem:[%s9869_s1 + $0xc40] ss:$8 sps:$4 sm:$0xff]   ;;  %v7527_v32 = vld [vmem:[%s9869_s1 + $0x554] ss:$8 sps:$4 sm:$0xff]  }
 0x12b   :  { %5135 = vmatmul.mubr.bf16.gmra.mrb[20].mxu0 %v7431_v34  ;;  %4395 = vmatpush1.bf16.msra.mxu1 %v7428_v33  ;;  %v7530_v33 = vld [vmem:[%s9869_s1 + $0xc54] ss:$8 sps:$4 sm:$0xff]   ;;  %v7531_v34 = vld [vmem:[%s9870_s0 + $0x2ac] ss:$108 sps:$4 sm:$0xff]  }
 0x12c   :  { %5186 = vmatpush1.bf16.msra.mxu0 %v7432_v35  ;;  %4396 = vmatprep.subr.bf16.mxu1 %v7437_v36  ;;  %v7533_v35 = vld [vmem:[%s9870_s0 + $0x2e4] ss:$108 sps:$4 sm:$0xff]  }
 0x12d   :  { %5187 = vmatprep.subr.bf16.mxu0 %v7440_v37  ;;  %4353 = vmatprep.mubr.bf16.mxu1 %v7441_v38  ;;  %v7525_v36 = vld [vmem:[%s9869_s1 + $0x550] ss:$8 sps:$4 sm:$0xff]   ;;  %v7538_v38 = vld [vmem:[%s9869_s1 + $0x564] ss:$8 sps:$4 sm:$0xff]  }
 0x12e   :  { %5144 = vmatprep.mubr.bf16.mxu0 %v7443_v39  ;;  %v7528_v37 = vld [vmem:[%s9869_s1 + $0xc50] ss:$8 sps:$4 sm:$0xff]   ;;  %v7542_v39 = vld [vmem:[%s9869_s1 + $0xc64] ss:$8 sps:$4 sm:$0xff]  }
 0x12f   :  { %4397 = vmatpush1.bf16.msra.mxu1 %v7435_v40  ;;  %v7535_v40 = vld [vmem:[%s9870_s0 + $0x2a8] ss:$108 sps:$4 sm:$0xff]  }
 0x130   :  { %5188 = vmatpush1.bf16.msra.mxu0 %v7438_v41  ;;  %4398 = vmatprep.subr.bf16.mxu1 %v7448_v42  ;;  %v7536_v41 = vld [vmem:[%s9869_s1 + $0x560] ss:$8 sps:$4 sm:$0xff]  }
 0x131   :  { %5189 = vmatprep.subr.bf16.mxu0 %v7452_v43  ;;  %v7539_v42 = vld [vmem:[%s9870_s0 + $0x2e0] ss:$108 sps:$4 sm:$0xff]  }
 0x132   :  { %4354 = vmatmul.mubr.bf16.gmra.mrb[24].mxu1 %v7445_v44  ;;  %v7540_v43 = vld [vmem:[%s9869_s1 + $0xc60] ss:$8 sps:$4 sm:$0xff]   ;;  %v7545_v44 = vld [vmem:[%s9869_s1 + $0x574] ss:$8 sps:$4 sm:$0xff]  }
 0x133   :  { %5145 = vmatmul.mubr.bf16.gmra.mrb[24].mxu0 %v7449_v46  ;;  %4399 = vmatpush1.bf16.msra.mxu1 %v7446_v45  ;;  %v7548_v45 = vld [vmem:[%s9869_s1 + $0xc74] ss:$8 sps:$4 sm:$0xff]   ;;  %v7549_v46 = vld [vmem:[%s9870_s0 + $0x384] ss:$108 sps:$4 sm:$0xff]  }
 0x134   :  { %5190 = vmatpush1.bf16.msra.mxu0 %v7450_v47  ;;  %4400 = vmatprep.subr.bf16.mxu1 %v7455_v48  ;;  %v7551_v47 = vld [vmem:[%s9870_s0 + $0x3bc] ss:$108 sps:$4 sm:$0xff]   ;;  %v7543_v48 = vld [vmem:[%s9869_s1 + $0x570] ss:$8 sps:$4 sm:$0xff]  }
 0x135   :  { %5191 = vmatprep.subr.bf16.mxu0 %v7458_v49  ;;  %4363 = vmatprep.mubr.bf16.mxu1 %v7459_v50  ;;  %v7546_v49 = vld [vmem:[%s9869_s1 + $0xc70] ss:$8 sps:$4 sm:$0xff]   ;;  %v7556_v50 = vld [vmem:[%s9869_s1 + $0x584] ss:$8 sps:$4 sm:$0xff]  }
 0x136   :  { %5154 = vmatprep.mubr.bf16.mxu0 %v7461_v51  ;;  %v7560_v51 = vld [vmem:[%s9869_s1 + $0xc84] ss:$8 sps:$4 sm:$0xff]  }
 0x137   :  { %4401 = vmatpush1.bf16.msra.mxu1 %v7453_v52  ;;  %v7553_v52 = vld [vmem:[%s9870_s0 + $0x380] ss:$108 sps:$4 sm:$0xff]  }
 0x138   :  { %5192 = vmatpush1.bf16.msra.mxu0 %v7456_v53  ;;  %4402 = vmatprep.subr.bf16.mxu1 %v7466_v54  ;;  %v7554_v53 = vld [vmem:[%s9869_s1 + $0x580] ss:$8 sps:$4 sm:$0xff]   ;;  %v7557_v54 = vld [vmem:[%s9870_s0 + $0x3b8] ss:$108 sps:$4 sm:$0xff]  }
 0x139   :  { %5193 = vmatprep.subr.bf16.mxu0 %v7470_v55  ;;  %v7558_v55 = vld [vmem:[%s9869_s1 + $0xc80] ss:$8 sps:$4 sm:$0xff]  }
 0x13a   :  { %4364 = vmatmul.mubr.bf16.gmra.mrb[28].mxu1 %v7463_v56  ;;  %v7563_v56 = vld [vmem:[%s9869_s1 + $0x594] ss:$8 sps:$4 sm:$0xff]  }
 0x13b   :  { %5155 = vmatmul.mubr.bf16.gmra.mrb[28].mxu0 %v7467_v58  ;;  %4403 = vmatpush1.bf16.msra.mxu1 %v7464_v57  ;;  %v7566_v57 = vld [vmem:[%s9869_s1 + $0xc94] ss:$8 sps:$4 sm:$0xff]  }
 0x13c   :  { %5194 = vmatpush1.bf16.msra.mxu0 %v7468_v59  ;;  %4404 = vmatprep.subr.bf16.mxu1 %v7473_v60  ;;  %v7567_v58 = vld [vmem:[%s9870_s0 + $0x45c] ss:$108 sps:$4 sm:$0xff]   ;;  %v7569_v59 = vld [vmem:[%s9870_s0 + $0x494] ss:$108 sps:$4 sm:$0xff]   ;;  %v7561_v60 = vld [vmem:[%s9869_s1 + $0x590] ss:$8 sps:$4 sm:$0xff]  }
 0x13d   :  { %5195 = vmatprep.subr.bf16.mxu0 %v7476_v61  ;;  %4406 = vmatprep.mubr.bf16.mxu1 %v7479_v62  ;;  %v7564_v61 = vld [vmem:[%s9869_s1 + $0xc90] ss:$8 sps:$4 sm:$0xff]   ;;  %v7574_v62 = vld [vmem:[%s9869_s1 + $0x5a4] ss:$8 sps:$4 sm:$0xff]  }
 0x13e   :  { %5197 = vmatprep.mubr.bf16.mxu0 %v7482_v63  ;;  %v7578_v63 = vld [vmem:[%s9869_s1 + $0xca4] ss:$8 sps:$4 sm:$0xff]  }
 0x13f   :  { %4405 = vmatpush1.bf16.msra.mxu1 %v7471_v0  ;;  %v7571_v0 = vld [vmem:[%s9870_s0 + $0x458] ss:$108 sps:$4 sm:$0xff]  }
 0x140   :  { %5196 = vmatpush1.bf16.msra.mxu0 %v7474_v1  ;;  %4487 = vmatprep.subr.bf16.mxu1 %v7485_v2  ;;  %v7572_v1 = vld [vmem:[%s9869_s1 + $0x5a0] ss:$8 sps:$4 sm:$0xff]   ;;  %v7575_v2 = vld [vmem:[%s9870_s0 + $0x490] ss:$108 sps:$4 sm:$0xff]  }
 0x141   :  { %5278 = vmatprep.subr.bf16.mxu0 %v7488_v3  ;;  %v7576_v3 = vld [vmem:[%s9869_s1 + $0xca0] ss:$8 sps:$4 sm:$0xff]  }
 0x142   :  { %4407 = vmatmul.mubr.bf16.vlgmr.msra.gmra.mrb[0].mxu1 %v7477_v4  ;;  %v7581_v4 = vld [vmem:[%s9869_s1 + $0x5b4] ss:$8 sps:$4 sm:$0xff]  }
 0x143   :  { %5198 = vmatmul.mubr.bf16.vlgmr.msra.gmra.mrb[0].mxu0 %v7480_v5  ;;  %4488 = vmatpush1.bf16.msra.mxu1 %v7483_v6  ;;  %v7584_v5 = vld [vmem:[%s9869_s1 + $0xcb4] ss:$8 sps:$4 sm:$0xff]  }
 0x144   :  { %5279 = vmatpush1.bf16.msra.mxu0 %v7486_v7  ;;  %4489 = vmatprep.subr.bf16.mxu1 %v7491_v8  ;;  %v7585_v6 = vld [vmem:[%s9870_s0 + $0x534] ss:$108 sps:$4 sm:$0xff]   ;;  %v7587_v7 = vld [vmem:[%s9870_s0 + $0x56c] ss:$108 sps:$4 sm:$0xff]  }
 0x145   :  { %5280 = vmatprep.subr.bf16.mxu0 %v7494_v9  ;;  %4416 = vmatprep.mubr.bf16.mxu1 %v7495_v10  ;;  %v7579_v8 = vld [vmem:[%s9869_s1 + $0x5b0] ss:$8 sps:$4 sm:$0xff]   ;;  %v7592_v10 = vld [vmem:[%s9869_s1 + $0x5c4] ss:$8 sps:$4 sm:$0xff]  }
 0x146   :  { %5207 = vmatprep.mubr.bf16.mxu0 %v7497_v11  ;;  %v7582_v9 = vld [vmem:[%s9869_s1 + $0xcb0] ss:$8 sps:$4 sm:$0xff]  }
 0x147   :  { %4490 = vmatpush1.bf16.msra.mxu1 %v7489_v12  ;;  %v7589_v11 = vld [vmem:[%s9870_s0 + $0x530] ss:$108 sps:$4 sm:$0xff]   ;;  %v7596_v12 = vld [vmem:[%s9869_s1 + $0xcc4] ss:$8 sps:$4 sm:$0xff]  }
 0x148   :  { %5281 = vmatpush1.bf16.msra.mxu0 %v7492_v13  ;;  %4491 = vmatprep.subr.bf16.mxu1 %v7502_v14  ;;  %v7590_v13 = vld [vmem:[%s9869_s1 + $0x5c0] ss:$8 sps:$4 sm:$0xff]  }
 0x149   :  { %5282 = vmatprep.subr.bf16.mxu0 %v7506_v15  ;;  %v7593_v14 = vld [vmem:[%s9870_s0 + $0x568] ss:$108 sps:$4 sm:$0xff]  }
 0x14a   :  { %4417 = vmatmul.mubr.bf16.gmra.mrb[4].mxu1 %v7499_v16  ;;  %v7594_v15 = vld [vmem:[%s9869_s1 + $0xcc0] ss:$8 sps:$4 sm:$0xff]   ;;  %v7599_v16 = vld [vmem:[%s9869_s1 + $0x5d4] ss:$8 sps:$4 sm:$0xff]  }
 0x14b   :  { %5208 = vmatmul.mubr.bf16.gmra.mrb[4].mxu0 %v7503_v18  ;;  %4492 = vmatpush1.bf16.msra.mxu1 %v7500_v17  ;;  %v7602_v17 = vld [vmem:[%s9869_s1 + $0xcd4] ss:$8 sps:$4 sm:$0xff]   ;;  %v7603_v18 = vld [vmem:[%s9870_s0 + $0x60c] ss:$108 sps:$4 sm:$0xff]  }
 0x14c   :  { %5283 = vmatpush1.bf16.msra.mxu0 %v7504_v19  ;;  %4493 = vmatprep.subr.bf16.mxu1 %v7509_v20  ;;  %v7605_v19 = vld [vmem:[%s9870_s0 + $0x644] ss:$108 sps:$4 sm:$0xff]  }
 0x14d   :  { %5284 = vmatprep.subr.bf16.mxu0 %v7512_v21  ;;  %4426 = vmatprep.mubr.bf16.mxu1 %v7513_v22  ;;  %v7597_v20 = vld [vmem:[%s9869_s1 + $0x5d0] ss:$8 sps:$4 sm:$0xff]   ;;  %v7610_v22 = vld [vmem:[%s9869_s1 + $0x5e4] ss:$8 sps:$4 sm:$0xff]  }
 0x14e   :  { %5217 = vmatprep.mubr.bf16.mxu0 %v7515_v23  ;;  %v7600_v21 = vld [vmem:[%s9869_s1 + $0xcd0] ss:$8 sps:$4 sm:$0xff]   ;;  %v7607_v23 = vld [vmem:[%s9870_s0 + $0x608] ss:$108 sps:$4 sm:$0xff]  }
 0x14f   :  { %4494 = vmatpush1.bf16.msra.mxu1 %v7507_v24  ;;  %v7614_v24 = vld [vmem:[%s9869_s1 + $0xce4] ss:$8 sps:$4 sm:$0xff]  }
 0x150   :  { %5285 = vmatpush1.bf16.msra.mxu0 %v7510_v25  ;;  %4495 = vmatprep.subr.bf16.mxu1 %v7520_v26  ;;  %v7608_v25 = vld [vmem:[%s9869_s1 + $0x5e0] ss:$8 sps:$4 sm:$0xff]  }
 0x151   :  { %5286 = vmatprep.subr.bf16.mxu0 %v7524_v27  ;;  %v7611_v26 = vld [vmem:[%s9870_s0 + $0x640] ss:$108 sps:$4 sm:$0xff]  }
 0x152   :  { %4427 = vmatmul.mubr.bf16.gmra.mrb[8].mxu1 %v7517_v28  ;;  %v7612_v27 = vld [vmem:[%s9869_s1 + $0xce0] ss:$8 sps:$4 sm:$0xff]   ;;  %v7617_v28 = vld [vmem:[%s9869_s1 + $0x5f4] ss:$8 sps:$4 sm:$0xff]  }
 0x153   :  { %5218 = vmatmul.mubr.bf16.gmra.mrb[8].mxu0 %v7521_v30  ;;  %4496 = vmatpush1.bf16.msra.mxu1 %v7518_v29  ;;  %v7620_v29 = vld [vmem:[%s9869_s1 + $0xcf4] ss:$8 sps:$4 sm:$0xff]   ;;  %v7623_v30 = vld [vmem:[%s9870_s0 + $0x2c] ss:$108 sps:$4 sm:$0xff]  }
 0x154   :  { %5287 = vmatpush1.bf16.msra.mxu0 %v7522_v31  ;;  %4497 = vmatprep.subr.bf16.mxu1 %v7527_v32  ;;  %v7626_v31 = vld [vmem:[%s9870_s0 + $0x64] ss:$108 sps:$4 sm:$0xff]  }
 0x155   :  { %5288 = vmatprep.subr.bf16.mxu0 %v7530_v33  ;;  %4436 = vmatprep.mubr.bf16.mxu1 %v7531_v34  ;;  %v7615_v32 = vld [vmem:[%s9869_s1 + $0x5f0] ss:$8 sps:$4 sm:$0xff]   ;;  %v7629_v34 = vld [vmem:[%s9869_s1 + $0x604] ss:$8 sps:$4 sm:$0xff]  }
 0x156   :  { %5227 = vmatprep.mubr.bf16.mxu0 %v7533_v35  ;;  %v7618_v33 = vld [vmem:[%s9869_s1 + $0xcf0] ss:$8 sps:$4 sm:$0xff]   ;;  %v7632_v35 = vld [vmem:[%s9869_s1 + $0xd04] ss:$8 sps:$4 sm:$0xff]  }
 0x157   :  { %4498 = vmatpush1.bf16.msra.mxu1 %v7525_v36  ;;  %v7621_v36 = vld [vmem:[%s9870_s0 + $0x28] ss:$108 sps:$4 sm:$0xff]  }
 0x158   :  { %5289 = vmatpush1.bf16.msra.mxu0 %v7528_v37  ;;  %4499 = vmatprep.subr.bf16.mxu1 %v7538_v38  ;;  %v7624_v37 = vld [vmem:[%s9870_s0 + $0x60] ss:$108 sps:$4 sm:$0xff]  }
 0x159   :  { %5290 = vmatprep.subr.bf16.mxu0 %v7542_v39  ;;  %v7627_v38 = vld [vmem:[%s9869_s1 + $0x600] ss:$8 sps:$4 sm:$0xff]  }
 0x15a   :  { %4437 = vmatmul.mubr.bf16.gmra.mrb[12].mxu1 %v7535_v40  ;;  %v7630_v39 = vld [vmem:[%s9869_s1 + $0xd00] ss:$8 sps:$4 sm:$0xff]   ;;  %v7635_v40 = vld [vmem:[%s9869_s1 + $0x614] ss:$8 sps:$4 sm:$0xff]  }
 0x15b   :  { %5228 = vmatmul.mubr.bf16.gmra.mrb[12].mxu0 %v7539_v42  ;;  %4500 = vmatpush1.bf16.msra.mxu1 %v7536_v41  ;;  %v7636_v41 = vld [vmem:[%s9870_s0 + $0x104] ss:$108 sps:$4 sm:$0xff]   ;;  %v7638_v42 = vld [vmem:[%s9870_s0 + $0x13c] ss:$108 sps:$4 sm:$0xff]  }
 0x15c   :  { %5291 = vmatpush1.bf16.msra.mxu0 %v7540_v43  ;;  %4501 = vmatprep.subr.bf16.mxu1 %v7545_v44  ;;  %v7647_v43 = vld [vmem:[%s9869_s1 + $0xd14] ss:$8 sps:$4 sm:$0xff]   ;;  %v7633_v44 = vld [vmem:[%s9869_s1 + $0x610] ss:$8 sps:$4 sm:$0xff]  }
 0x15d   :  { %5292 = vmatprep.subr.bf16.mxu0 %v7548_v45  ;;  %4446 = vmatprep.mubr.bf16.mxu1 %v7549_v46  ;;  %v7643_v45 = vld [vmem:[%s9869_s1 + $0x624] ss:$8 sps:$4 sm:$0xff]   ;;  %v7645_v46 = vld [vmem:[%s9869_s1 + $0xd10] ss:$8 sps:$4 sm:$0xff]  }
 0x15e   :  { %5237 = vmatprep.mubr.bf16.mxu0 %v7551_v47  ;;  %v7662_v47 = vld [vmem:[%s9869_s1 + $0xd24] ss:$8 sps:$4 sm:$0xff]  }
 0x15f   :  { %4502 = vmatpush1.bf16.msra.mxu1 %v7543_v48  ;;  %v7640_v48 = vld [vmem:[%s9870_s0 + $0x100] ss:$108 sps:$4 sm:$0xff]  }
 0x160   :  { %5293 = vmatpush1.bf16.msra.mxu0 %v7546_v49  ;;  %4503 = vmatprep.subr.bf16.mxu1 %v7556_v50  ;;  %v7641_v49 = vld [vmem:[%s9869_s1 + $0x620] ss:$8 sps:$4 sm:$0xff]   ;;  %v7644_v50 = vld [vmem:[%s9870_s0 + $0x138] ss:$108 sps:$4 sm:$0xff]  }
 0x161   :  { %5294 = vmatprep.subr.bf16.mxu0 %v7560_v51  ;;  %v7650_v51 = vld [vmem:[%s9869_s1 + $0x634] ss:$8 sps:$4 sm:$0xff]  }
 0x162   :  { %4447 = vmatmul.mubr.bf16.gmra.mrb[16].mxu1 %v7553_v52  ;;  %v7651_v52 = vld [vmem:[%s9870_s0 + $0x1dc] ss:$108 sps:$4 sm:$0xff]  }
 0x163   :  { %5238 = vmatmul.mubr.bf16.gmra.mrb[16].mxu0 %v7557_v54  ;;  %4504 = vmatpush1.bf16.msra.mxu1 %v7554_v53  ;;  %v7653_v53 = vld [vmem:[%s9870_s0 + $0x214] ss:$108 sps:$4 sm:$0xff]  }
 0x164   :  { %5295 = vmatpush1.bf16.msra.mxu0 %v7558_v55  ;;  %4505 = vmatprep.subr.bf16.mxu1 %v7563_v56  ;;  %v7660_v54 = vld [vmem:[%s9869_s1 + $0xd20] ss:$8 sps:$4 sm:$0xff]   ;;  %v7677_v55 = vld [vmem:[%s9869_s1 + $0xd34] ss:$8 sps:$4 sm:$0xff]   ;;  %v7648_v56 = vld [vmem:[%s9869_s1 + $0x630] ss:$8 sps:$4 sm:$0xff]  }
 0x165   :  { %5296 = vmatprep.subr.bf16.mxu0 %v7566_v57  ;;  %4456 = vmatprep.mubr.bf16.mxu1 %v7567_v58  ;;  %v7655_v57 = vld [vmem:[%s9870_s0 + $0x1d8] ss:$108 sps:$4 sm:$0xff]  }
 0x166   :  { %5247 = vmatprep.mubr.bf16.mxu0 %v7569_v59  ;;  %v7658_v58 = vld [vmem:[%s9869_s1 + $0x644] ss:$8 sps:$4 sm:$0xff]   ;;  %v7675_v59 = vld [vmem:[%s9869_s1 + $0xd30] ss:$8 sps:$4 sm:$0xff]  }
 0x167   :  { %4506 = vmatpush1.bf16.msra.mxu1 %v7561_v60  ;;  %v7656_v60 = vld [vmem:[%s9869_s1 + $0x640] ss:$8 sps:$4 sm:$0xff]  }
 0x168   :  { %5297 = vmatpush1.bf16.msra.mxu0 %v7564_v61  ;;  %4507 = vmatprep.subr.bf16.mxu1 %v7574_v62  ;;  %v7659_v61 = vld [vmem:[%s9870_s0 + $0x210] ss:$108 sps:$4 sm:$0xff]  }
 0x169   :  { %5298 = vmatprep.subr.bf16.mxu0 %v7578_v63  ;;  %v7665_v62 = vld [vmem:[%s9869_s1 + $0x654] ss:$8 sps:$4 sm:$0xff]  }
 0x16a   :  { %4457 = vmatmul.mubr.bf16.gmra.mrb[20].mxu1 %v7571_v0  ;;  %v7666_v63 = vld [vmem:[%s9870_s0 + $0x2b4] ss:$108 sps:$4 sm:$0xff]   ;;  %v7668_v0 = vld [vmem:[%s9870_s0 + $0x2ec] ss:$108 sps:$4 sm:$0xff]  }
 0x16b   :  { %5248 = vmatmul.mubr.bf16.gmra.mrb[20].mxu0 %v7575_v2  ;;  %4508 = vmatpush1.bf16.msra.mxu1 %v7572_v1  ;;  %v7692_v1 = vld [vmem:[%s9869_s1 + $0xd44] ss:$8 sps:$4 sm:$0xff]   ;;  %v7690_v2 = vld [vmem:[%s9869_s1 + $0xd40] ss:$8 sps:$4 sm:$0xff]  }
 0x16c   :  { %5299 = vmatpush1.bf16.msra.mxu0 %v7576_v3  ;;  %4509 = vmatprep.subr.bf16.mxu1 %v7581_v4  ;;  %v7663_v3 = vld [vmem:[%s9869_s1 + $0x650] ss:$8 sps:$4 sm:$0xff]   ;;  %v7707_v4 = vld [vmem:[%s9869_s1 + $0xd54] ss:$8 sps:$4 sm:$0xff]  }
 0x16d   :  { %5300 = vmatprep.subr.bf16.mxu0 %v7584_v5  ;;  %4466 = vmatprep.mubr.bf16.mxu1 %v7585_v6  ;;  %v7673_v5 = vld [vmem:[%s9869_s1 + $0x664] ss:$8 sps:$4 sm:$0xff]   ;;  %v7670_v6 = vld [vmem:[%s9870_s0 + $0x2b0] ss:$108 sps:$4 sm:$0xff]  }
 0x16e   :  { %5257 = vmatprep.mubr.bf16.mxu0 %v7587_v7  ;;  %v7671_v7 = vld [vmem:[%s9869_s1 + $0x660] ss:$8 sps:$4 sm:$0xff]  }
 0x16f   :  { %4510 = vmatpush1.bf16.msra.mxu1 %v7579_v8  ;;  %v7674_v8 = vld [vmem:[%s9870_s0 + $0x2e8] ss:$108 sps:$4 sm:$0xff]  }
 0x170   :  { %5301 = vmatpush1.bf16.msra.mxu0 %v7582_v9  ;;  %4511 = vmatprep.subr.bf16.mxu1 %v7592_v10  ;;  %v7680_v9 = vld [vmem:[%s9869_s1 + $0x674] ss:$8 sps:$4 sm:$0xff]   ;;  %v7681_v10 = vld [vmem:[%s9870_s0 + $0x38c] ss:$108 sps:$4 sm:$0xff]  }
 0x171   :  { %5302 = vmatprep.subr.bf16.mxu0 %v7596_v12  ;;  %v7705_v12 = vld [vmem:[%s9869_s1 + $0xd50] ss:$8 sps:$4 sm:$0xff]  }
 0x172   :  { %4467 = vmatmul.mubr.bf16.gmra.mrb[24].mxu1 %v7589_v11  ;;  %v7683_v11 = vld [vmem:[%s9870_s0 + $0x3c4] ss:$108 sps:$4 sm:$0xff]  }
 0x173   :  { %5258 = vmatmul.mubr.bf16.gmra.mrb[24].mxu0 %v7593_v14  ;;  %4512 = vmatpush1.bf16.msra.mxu1 %v7590_v13  ;;  %v7722_v13 = vld [vmem:[%s9869_s1 + $0xd64] ss:$8 sps:$4 sm:$0xff]   ;;  %v7678_v14 = vld [vmem:[%s9869_s1 + $0x670] ss:$8 sps:$4 sm:$0xff]  }
 0x174   :  { %5303 = vmatpush1.bf16.msra.mxu0 %v7594_v15  ;;  %4513 = vmatprep.subr.bf16.mxu1 %v7599_v16  ;;  %v7685_v15 = vld [vmem:[%s9870_s0 + $0x388] ss:$108 sps:$4 sm:$0xff]   ;;  %v7688_v16 = vld [vmem:[%s9869_s1 + $0x684] ss:$8 sps:$4 sm:$0xff]  }
 0x175   :  { %5304 = vmatprep.subr.bf16.mxu0 %v7602_v17  ;;  %4476 = vmatprep.mubr.bf16.mxu1 %v7603_v18  ;;  %v7686_v17 = vld [vmem:[%s9869_s1 + $0x680] ss:$8 sps:$4 sm:$0xff]  }
 0x176   :  { %5267 = vmatprep.mubr.bf16.mxu0 %v7605_v19  ;;  %v7720_v18 = vld [vmem:[%s9869_s1 + $0xd60] ss:$8 sps:$4 sm:$0xff]  }
 0x177   :  { %4514 = vmatpush1.bf16.msra.mxu1 %v7597_v20  ;;  %v7689_v19 = vld [vmem:[%s9870_s0 + $0x3c0] ss:$108 sps:$4 sm:$0xff]   ;;  %v7695_v20 = vld [vmem:[%s9869_s1 + $0x694] ss:$8 sps:$4 sm:$0xff]  }
 0x178   :  { %5305 = vmatpush1.bf16.msra.mxu0 %v7600_v21  ;;  %4515 = vmatprep.subr.bf16.mxu1 %v7610_v22  ;;  %v7696_v21 = vld [vmem:[%s9870_s0 + $0x464] ss:$108 sps:$4 sm:$0xff]   ;;  %v7698_v22 = vld [vmem:[%s9870_s0 + $0x49c] ss:$108 sps:$4 sm:$0xff]  }
 0x179   :  { %5306 = vmatprep.subr.bf16.mxu0 %v7614_v24  ;;  %v7735_v24 = vld [vmem:[%s9869_s1 + $0xd70] ss:$8 sps:$4 sm:$0xff]  }
 0x17a   :  { %4477 = vmatmul.mubr.bf16.gmra.mrb[28].mxu1 %v7607_v23  ;;  %v7737_v23 = vld [vmem:[%s9869_s1 + $0xd74] ss:$8 sps:$4 sm:$0xff]  }
 0x17b   :  { %5268 = vmatmul.mubr.bf16.gmra.mrb[28].mxu0 %v7611_v26  ;;  %4516 = vmatpush1.bf16.msra.mxu1 %v7608_v25  ;;  %v7693_v25 = vld [vmem:[%s9869_s1 + $0x690] ss:$8 sps:$4 sm:$0xff]   ;;  %v7700_v26 = vld [vmem:[%s9870_s0 + $0x460] ss:$108 sps:$4 sm:$0xff]  }
 0x17c   :  { %5307 = vmatpush1.bf16.msra.mxu0 %v7612_v27  ;;  %4517 = vmatprep.subr.bf16.mxu1 %v7617_v28  ;;  %v7703_v27 = vld [vmem:[%s9869_s1 + $0x6a4] ss:$8 sps:$4 sm:$0xff]   ;;  %v7701_v28 = vld [vmem:[%s9869_s1 + $0x6a0] ss:$8 sps:$4 sm:$0xff]  }
 0x17d   :  { %5308 = vmatprep.subr.bf16.mxu0 %v7620_v29  ;;  %4519 = vmatprep.mubr.bf16.mxu1 %v7623_v30  ;;  %v7704_v29 = vld [vmem:[%s9870_s0 + $0x498] ss:$108 sps:$4 sm:$0xff]   ;;  %v7710_v30 = vld [vmem:[%s9869_s1 + $0x6b4] ss:$8 sps:$4 sm:$0xff]  }
 0x17e   :  { %5310 = vmatprep.mubr.bf16.mxu0 %v7626_v31  ;;  %v7711_v31 = vld [vmem:[%s9870_s0 + $0x53c] ss:$108 sps:$4 sm:$0xff]  }
 0x17f   :  { %4518 = vmatpush1.bf16.msra.mxu1 %v7615_v32  ;;  %v7713_v32 = vld [vmem:[%s9870_s0 + $0x574] ss:$108 sps:$4 sm:$0xff]  }
 0x180   :  { %5309 = vmatpush1.bf16.msra.mxu0 %v7618_v33  ;;  %4600 = vmatprep.subr.bf16.mxu1 %v7629_v34  ;;  %v7708_v33 = vld [vmem:[%s9869_s1 + $0x6b0] ss:$8 sps:$4 sm:$0xff]  }
 0x181   :  { %5391 = vmatprep.subr.bf16.mxu0 %v7632_v35  ;;  %v7715_v34 = vld [vmem:[%s9870_s0 + $0x538] ss:$108 sps:$4 sm:$0xff]  }
 0x182   :  { %4520 = vmatmul.mubr.bf16.vlgmr.msra.gmra.mrb[0].mxu1 %v7621_v36  ;;  %v7718_v35 = vld [vmem:[%s9869_s1 + $0x6c4] ss:$8 sps:$4 sm:$0xff]   ;;  %v7716_v36 = vld [vmem:[%s9869_s1 + $0x6c0] ss:$8 sps:$4 sm:$0xff]  }
 0x183   :  { %5311 = vmatmul.mubr.bf16.vlgmr.msra.gmra.mrb[0].mxu0 %v7624_v37  ;;  %4601 = vmatpush1.bf16.msra.mxu1 %v7627_v38  ;;  %v7719_v37 = vld [vmem:[%s9870_s0 + $0x570] ss:$108 sps:$4 sm:$0xff]   ;;  %v7726_v38 = vld [vmem:[%s9870_s0 + $0x614] ss:$108 sps:$4 sm:$0xff]  }
 0x184   :  { %5392 = vmatpush1.bf16.msra.mxu0 %v7630_v39  ;;  %4602 = vmatprep.subr.bf16.mxu1 %v7635_v40  ;;  %v7725_v39 = vld [vmem:[%s9869_s1 + $0x6d4] ss:$8 sps:$4 sm:$0xff]   ;;  %v7728_v40 = vld [vmem:[%s9870_s0 + $0x64c] ss:$108 sps:$4 sm:$0xff]  }
 0x185   :  { %4529 = vmatprep.mubr.bf16.mxu1 %v7636_v41  ;;  %5320 = vmatprep.mubr.bf16.mxu0 %v7638_v42  ;;  %v7723_v41 = vld [vmem:[%s9869_s1 + $0x6d0] ss:$8 sps:$4 sm:$0xff]   ;;  %v7733_v42 = vld [vmem:[%s9869_s1 + $0x6e4] ss:$8 sps:$4 sm:$0xff]  }
 0x186   :  { %5393 = vmatprep.subr.bf16.mxu0 %v7647_v43  ;;  %v7730_v43 = vld [vmem:[%s9870_s0 + $0x610] ss:$108 sps:$4 sm:$0xff]  }
 0x187   :  { %4603 = vmatpush1.bf16.msra.mxu1 %v7633_v44  ;;  %v7734_v44 = vld [vmem:[%s9870_s0 + $0x648] ss:$108 sps:$4 sm:$0xff]  }
 0x188   :  { %5394 = vmatpush1.bf16.msra.mxu0 %v7645_v46  ;;  %4604 = vmatprep.subr.bf16.mxu1 %v7643_v45  ;;  %v7731_v45 = vld [vmem:[%s9869_s1 + $0x6e0] ss:$8 sps:$4 sm:$0xff]  }
 0x189   :  { %5395 = vmatprep.subr.bf16.mxu0 %v7662_v47  ;;  %v7743_v46 = vld [vmem:[%s9870_s0 + $0x34] ss:$108 sps:$4 sm:$0xff]  }
 0x18a   :  { %4530 = vmatmul.mubr.bf16.gmra.mrb[4].mxu1 %v7640_v48  ;;  %v7740_v47 = vld [vmem:[%s9869_s1 + $0x6f4] ss:$8 sps:$4 sm:$0xff]   ;;  %v7738_v48 = vld [vmem:[%s9869_s1 + $0x6f0] ss:$8 sps:$4 sm:$0xff]  }
 0x18b   :  { %5321 = vmatmul.mubr.bf16.gmra.mrb[4].mxu0 %v7644_v50  ;;  %4605 = vmatpush1.bf16.msra.mxu1 %v7641_v49  ;;  %v7773_v49 = vmov 0   ;;  %v7741_v50 = vld [vmem:[%s9870_s0 + $0x30] ss:$108 sps:$4 sm:$0xff]  }
 0x18c   :  { %4539 = vmatprep.mubr.bf16.mxu1 %v7651_v52  ;;  %4606 = vmatprep.subr.bf16.mxu1 %v7650_v51  ;;  %v7744_v51 = vld [vmem:[%s9870_s0 + $0x68] ss:$108 sps:$4 sm:$0xff]   ;;  %v7745_v52 = vld [vmem:[%s9870_s0 + $0x10c] ss:$108 sps:$4 sm:$0xff]  }
 0x18d   :  { %5330 = vmatprep.mubr.bf16.mxu0 %v7653_v53  ;;  %5396 = vmatpush1.bf16.msra.mxu0 %v7660_v54  ;;  %v7747_v53 = vld [vmem:[%s9870_s0 + $0x108] ss:$108 sps:$4 sm:$0xff]   ;;  %v7748_v54 = vld [vmem:[%s9870_s0 + $0x140] ss:$108 sps:$4 sm:$0xff]  }
 0x18e   :  { %5397 = vmatprep.subr.bf16.mxu0 %v7677_v55  ;;  %v7749_v55 = vld [vmem:[%s9870_s0 + $0x1e4] ss:$108 sps:$4 sm:$0xff]  }
 0x18f   :  { %4607 = vmatpush1.bf16.msra.mxu1 %v7648_v56  ;;  %v7751_v56 = vld [vmem:[%s9870_s0 + $0x1e0] ss:$108 sps:$4 sm:$0xff]  }
 0x190   :  { %4608 = vmatprep.subr.bf16.mxu1 %v7658_v58  ;;  %v7753_v58 = vld [vmem:[%s9870_s0 + $0x2bc] ss:$108 sps:$4 sm:$0xff]  }
 0x191   :  { %5398 = vmatpush1.bf16.msra.mxu0 %v7675_v59  ;;  %v7755_v59 = vld [vmem:[%s9870_s0 + $0x2b8] ss:$108 sps:$4 sm:$0xff]  }
 0x192   :  { %4540 = vmatmul.mubr.bf16.gmra.mrb[8].mxu1 %v7655_v57  ;;  %5399 = vmatprep.subr.bf16.mxu0 %v7692_v1  ;;  %v7752_v57 = vld [vmem:[%s9870_s0 + $0x218] ss:$108 sps:$4 sm:$0xff]   ;;  %v7763_v1 = vld [vmem:[%s9870_s0 + $0x468] ss:$108 sps:$4 sm:$0xff]  }
 0x193   :  { %5331 = vmatmul.mubr.bf16.gmra.mrb[8].mxu0 %v7659_v61  ;;  %4609 = vmatpush1.bf16.msra.mxu1 %v7656_v60  ;;  %v7756_v60 = vld [vmem:[%s9870_s0 + $0x2f0] ss:$108 sps:$4 sm:$0xff]   ;;  %v7757_v61 = vld [vmem:[%s9870_s0 + $0x394] ss:$108 sps:$4 sm:$0xff]  }
 0x194   :  { %4549 = vmatprep.mubr.bf16.mxu1 %v7666_v63  ;;  %4610 = vmatprep.subr.bf16.mxu1 %v7665_v62  ;;  %v7759_v62 = vld [vmem:[%s9870_s0 + $0x390] ss:$108 sps:$4 sm:$0xff]   ;;  %v7760_v63 = vld [vmem:[%s9870_s0 + $0x3c8] ss:$108 sps:$4 sm:$0xff]  }
 0x195   :  { %5340 = vmatprep.mubr.bf16.mxu0 %v7668_v0  ;;  %5400 = vmatpush1.bf16.msra.mxu0 %v7690_v2  ;;  %v7761_v0 = vld [vmem:[%s9870_s0 + $0x46c] ss:$108 sps:$4 sm:$0xff]  }
 0x196   :  { %5401 = vmatprep.subr.bf16.mxu0 %v7707_v4  ;;  %v7764_v2 = vld [vmem:[%s9870_s0 + $0x4a0] ss:$108 sps:$4 sm:$0xff]  }
 0x197   :  { %4611 = vmatpush1.bf16.msra.mxu1 %v7663_v3  ;;  %v7765_v3 = vld [vmem:[%s9870_s0 + $0x544] ss:$108 sps:$4 sm:$0xff]   ;;  %v7767_v4 = vld [vmem:[%s9870_s0 + $0x540] ss:$108 sps:$4 sm:$0xff]  }
 0x198   :  { %4612 = vmatprep.subr.bf16.mxu1 %v7673_v5  ;;  %v7768_v5 = vld [vmem:[%s9870_s0 + $0x578] ss:$108 sps:$4 sm:$0xff]  }
 0x199   :  { %5402 = vmatpush1.bf16.msra.mxu0 %v7705_v12  ;;  %v5504_v12 = vld [vmem:[%s9871_s2] sm:$0x3] }
 0x19a   :  { %4550 = vmatmul.mubr.bf16.gmra.mrb[12].mxu1 %v7670_v6  ;;  %5403 = vmatprep.subr.bf16.mxu0 %v7722_v13  ;;  %v7769_v6 = vld [vmem:[%s9870_s0 + $0x61c] ss:$108 sps:$4 sm:$0xff]  }
 0x19b   :  { %5341 = vmatmul.mubr.bf16.gmra.mrb[12].mxu0 %v7674_v8  ;;  %4613 = vmatpush1.bf16.msra.mxu1 %v7671_v7  ;;  %v7771_v7 = vld [vmem:[%s9870_s0 + $0x618] ss:$108 sps:$4 sm:$0xff]   ;;  %v7772_v8 = vld [vmem:[%s9870_s0 + $0x650] ss:$108 sps:$4 sm:$0xff]  }
 0x19c   :  { %4559 = vmatprep.mubr.bf16.mxu1 %v7681_v10  ;;  %4614 = vmatprep.subr.bf16.mxu1 %v7680_v9  ;;  %v5506_v9 = vlaneseq }
 0x19d   :  { %5350 = vmatprep.mubr.bf16.mxu0 %v7683_v11  ;;  %5404 = vmatpush1.bf16.msra.mxu0 %v7720_v18 }
 0x19e   :  { %5405 = vmatprep.subr.bf16.mxu0 %v7737_v23  ;;  %v5507_v10 = vshrl.u32 %v5506_v9, 7 }
 0x19f   :  { %4615 = vmatpush1.bf16.msra.mxu1 %v7678_v14  ;;  %v5548_v14 = vld [vmem:[%s9872_s3] sm:$0x3] }
 0x1a0   :  { %4616 = vmatprep.subr.bf16.mxu1 %v7688_v16  ;;  %v5508_v11 = vsub.s32 0, %v5507_v10  ;;  %v5512_v13 = vsub.s32 1, %v5507_v10 }
 0x1a1   :  { %5406 = vmatpush1.bf16.msra.mxu0 %v7735_v24 }
 0x1a2   :  { %4560 = vmatmul.mubr.bf16.gmra.mrb[16].mxu1 %v7685_v15  ;;  %v9749_v15 = vrot.slane %v5504_v12, %v5508_v11  ;;  %v9751_v18 = vrot.slane %v5504_v12, %v5512_v13  ;;  %v9755_v24 = vrot.slane %v5548_v14, %v5512_v13 }
 0x1a3   :  { %5351 = vmatmul.mubr.bf16.gmra.mrb[16].mxu0 %v7689_v19  ;;  %4617 = vmatpush1.bf16.msra.mxu1 %v7686_v17 }
 0x1a4   :  { %4569 = vmatprep.mubr.bf16.mxu1 %v7696_v21  ;;  %4618 = vmatprep.subr.bf16.mxu1 %v7695_v20  ;;  %v9753_v20 = vrot.slane %v5548_v14, %v5508_v11 }
 0x1a5   :  { %5360 = vmatprep.mubr.bf16.mxu0 %v7698_v22 }
 0x1a7   :  { %4619 = vmatpush1.bf16.msra.mxu1 %v7693_v25 }
 0x1a8   :  { %4620 = vmatprep.subr.bf16.mxu1 %v7703_v27 }
 0x1aa   :  { %4570 = vmatmul.mubr.bf16.gmra.mrb[20].mxu1 %v7700_v26 }
 0x1ab   :  { %5361 = vmatmul.mubr.bf16.gmra.mrb[20].mxu0 %v7704_v29  ;;  %4621 = vmatpush1.bf16.msra.mxu1 %v7701_v28 }
 0x1ac   :  { %4579 = vmatprep.mubr.bf16.mxu1 %v7711_v31  ;;  %4622 = vmatprep.subr.bf16.mxu1 %v7710_v30 }
 0x1ad   :  { %5370 = vmatprep.mubr.bf16.mxu0 %v7713_v32 }
 0x1af   :  { %4623 = vmatpush1.bf16.msra.mxu1 %v7708_v33 }
 0x1b0   :  { %4624 = vmatprep.subr.bf16.mxu1 %v7718_v35 }
 0x1b2   :  { %4580 = vmatmul.mubr.bf16.gmra.mrb[24].mxu1 %v7715_v34 }
 0x1b3   :  { %5371 = vmatmul.mubr.bf16.gmra.mrb[24].mxu0 %v7719_v37  ;;  %4625 = vmatpush1.bf16.msra.mxu1 %v7716_v36 }
 0x1b4   :  { %4589 = vmatprep.mubr.bf16.mxu1 %v7726_v38  ;;  %4626 = vmatprep.subr.bf16.mxu1 %v7725_v39 }
 0x1b5   :  { %5380 = vmatprep.mubr.bf16.mxu0 %v7728_v40 }
 0x1b7   :  { %4627 = vmatpush1.bf16.msra.mxu1 %v7723_v41 }
 0x1b8   :  { %4628 = vmatprep.subr.bf16.mxu1 %v7733_v42 }
 0x1ba   :  { %4590 = vmatmul.mubr.bf16.gmra.mrb[28].mxu1 %v7730_v43 }
 0x1bb   :  { %5381 = vmatmul.mubr.bf16.gmra.mrb[28].mxu0 %v7734_v44  ;;  %4629 = vmatpush1.bf16.msra.mxu1 %v7731_v45 }
 0x1bc   :  { %4632 = vmatprep.mubr.bf16.mxu1 %v7743_v46  ;;  %4630 = vmatprep.subr.bf16.mxu1 %v7740_v47 }
 0x1bd   :  { %5423 = vmatprep.mubr.bf16.mxu0 %v7773_v49 }
 0x1bf   :  { %4631 = vmatpush1.bf16.msra.mxu1 %v7738_v48 }
 0x1c2   :  { %4633 = vmatmul.mubr.bf16.vlgmr.msra.gmra.mrb[0].mxu1 %v7741_v50 }
 0x1c3   :  { %5424 = vmatmul.mubr.bf16.vlgmr.msra.gmra.mrb[0].mxu0 %v7744_v51  ;;  %4642 = vmatprep.mubr.bf16.mxu1 %v7745_v52 }
 0x1c4   :  { %5433 = vmatprep.mubr.bf16.mxu0 %v7773_v49 }
 0x1ca   :  { %4643 = vmatmul.mubr.bf16.gmra.mrb[4].mxu1 %v7747_v53 }
 0x1cb   :  { %5434 = vmatmul.mubr.bf16.gmra.mrb[4].mxu0 %v7748_v54  ;;  %4652 = vmatprep.mubr.bf16.mxu1 %v7749_v55 }
 0x1cc   :  { %5443 = vmatprep.mubr.bf16.mxu0 %v7773_v49 }
 0x1d2   :  { %4653 = vmatmul.mubr.bf16.gmra.mrb[8].mxu1 %v7751_v56 }
 0x1d3   :  { %5444 = vmatmul.mubr.bf16.gmra.mrb[8].mxu0 %v7752_v57  ;;  %4662 = vmatprep.mubr.bf16.mxu1 %v7753_v58 }
 0x1d4   :  { %5453 = vmatprep.mubr.bf16.mxu0 %v7773_v49 }
 0x1da   :  { %4663 = vmatmul.mubr.bf16.gmra.mrb[12].mxu1 %v7755_v59 }
 0x1db   :  { %5454 = vmatmul.mubr.bf16.gmra.mrb[12].mxu0 %v7756_v60  ;;  %4672 = vmatprep.mubr.bf16.mxu1 %v7757_v61 }
 0x1dc   :  { %5463 = vmatprep.mubr.bf16.mxu0 %v7773_v49 }
 0x1e2   :  { %4673 = vmatmul.mubr.bf16.gmra.mrb[16].mxu1 %v7759_v62 }
 0x1e3   :  { %5464 = vmatmul.mubr.bf16.gmra.mrb[16].mxu0 %v7760_v63  ;;  %4682 = vmatprep.mubr.bf16.mxu1 %v7761_v0 }
 0x1e4   :  { %5473 = vmatprep.mubr.bf16.mxu0 %v7773_v49 }
 0x1ea   :  { %4683 = vmatmul.mubr.bf16.gmra.mrb[20].mxu1 %v7763_v1 }
 0x1eb   :  { %5474 = vmatmul.mubr.bf16.gmra.mrb[20].mxu0 %v7764_v2  ;;  %4692 = vmatprep.mubr.bf16.mxu1 %v7765_v3 }
 0x1ec   :  { %5483 = vmatprep.mubr.bf16.mxu0 %v7773_v49 }
 0x1f2   :  { %4693 = vmatmul.mubr.bf16.gmra.mrb[24].mxu1 %v7767_v4 }
 0x1f3   :  { %5484 = vmatmul.mubr.bf16.gmra.mrb[24].mxu0 %v7768_v5  ;;  %4702 = vmatprep.mubr.bf16.mxu1 %v7769_v6 }
 0x1f4   :  { %5493 = vmatprep.mubr.bf16.mxu0 %v7773_v49 }
 0x1fa   :  { %4703 = vmatmul.mubr.bf16.gmra.mrb[28].mxu1 %v7771_v7 }
 0x1fb   :  { %5494 = vmatmul.mubr.bf16.gmra.mrb[28].mxu0 %v7772_v8 }
 0x295   :  { %v4634_v16 = vpop.f32.mrb[0].mxu1 }
 0x296   :  { %v5425_v17 = vpop.f32.mrb[0].mxu0  ;;  %v4636_v21 = vpop.f32.mrb[1].mxu1 }
 0x297   :  { %v6388_v19 = vadd.f32 %v5425_v17, %v4634_v16  ;;  %v5427_v22 = vpop.f32.mrb[1].mxu0  ;;  %v4638_v25 = vpop.f32.mrb[2].mxu1 }
 0x298   :  { %v6389_v23 = vadd.f32 %v5427_v22, %v4636_v21  ;;  %v5429_v26 = vpop.f32.mrb[2].mxu0  ;;  %v4640_v29 = vpop.f32.mrb[3].mxu1 }
 0x299   :  { %v5516_v27 = vmul.f32 %v6388_v19, %v9749_v15  ;;  %v6390_v28 = vadd.f32 %v5429_v26, %v4638_v25  ;;  %v5431_v30 = vpop.f32.mrb[3].mxu0 }
 0x29a   :  { %v5517_v31 = vmul.f32 %v6389_v23, %v9751_v18  ;;  %v6391_v32 = vadd.f32 %v5431_v30, %v4640_v29 }
 0x29b   :  { %v5560_v33 = vadd.f32 %v9753_v20, %v5516_v27  ;;  %v5518_v34 = vmul.f32 %v6390_v28, %v9749_v15 }
 0x29c   :  { %v5561_v35 = vadd.f32 %v9755_v24, %v5517_v31  ;;  %v5519_v36 = vmul.f32 %v6391_v32, %v9751_v18 }
 0x29d   :  { %v5562_v37 = vadd.f32 %v9753_v20, %v5518_v34  ;;  %v4644_v40 = vpop.f32.mrb[4].mxu1 }
 0x29e   :  { %v6372_v38 = vpack.c.bf16 %v5561_v35, %v5560_v33  ;;  %v5563_v39 = vadd.f32 %v9755_v24, %v5519_v36  ;;  %v5435_v41 = vpop.f32.mrb[4].mxu0  ;;  %v4646_v43 = vpop.f32.mrb[5].mxu1 }
 0x29f   :  { %v6392_v42 = vadd.f32 %v5435_v41, %v4644_v40  ;;  %v5437_v44 = vpop.f32.mrb[5].mxu0  ;;  %v4648_v47 = vpop.f32.mrb[6].mxu1 }
 0x2a0   :  { %5688 = vst [vmem:[%s9873_s4] sm:$0xff] %v6372_v38  ;;  %v6373_v45 = vpack.c.bf16 %v5563_v39, %v5562_v37  ;;  %v6393_v46 = vadd.f32 %v5437_v44, %v4646_v43  ;;  %v5439_v48 = vpop.f32.mrb[6].mxu0  ;;  %v4650_v51 = vpop.f32.mrb[7].mxu1 }
 0x2a1   :  { %v5520_v49 = vmul.f32 %v6392_v42, %v9749_v15  ;;  %v6394_v50 = vadd.f32 %v5439_v48, %v4648_v47  ;;  %v5441_v52 = vpop.f32.mrb[7].mxu0 }
 0x2a2   :  { %5689 = vst [vmem:[%s9873_s4 + $0x8] sm:$0xff] %v6373_v45  ;;  %v5521_v53 = vmul.f32 %v6393_v46, %v9751_v18  ;;  %v6395_v54 = vadd.f32 %v5441_v52, %v4650_v51 }
 0x2a3   :  { %v5564_v55 = vadd.f32 %v9753_v20, %v5520_v49  ;;  %v5522_v56 = vmul.f32 %v6394_v50, %v9749_v15 }
 0x2a4   :  { %v5565_v57 = vadd.f32 %v9755_v24, %v5521_v53  ;;  %v5523_v58 = vmul.f32 %v6395_v54, %v9751_v18 }
 0x2a5   :  { %v5566_v59 = vadd.f32 %v9753_v20, %v5522_v56  ;;  %v4654_v62 = vpop.f32.mrb[8].mxu1 }
 0x2a6   :  { %v6374_v60 = vpack.c.bf16 %v5565_v57, %v5564_v55  ;;  %v5567_v61 = vadd.f32 %v9755_v24, %v5523_v58  ;;  %v5445_v63 = vpop.f32.mrb[8].mxu0  ;;  %v4656_v1 = vpop.f32.mrb[9].mxu1 }
 0x2a7   :  { %v6396_v0 = vadd.f32 %v5445_v63, %v4654_v62  ;;  %v5447_v2 = vpop.f32.mrb[9].mxu0  ;;  %v4658_v5 = vpop.f32.mrb[10].mxu1 }
 0x2a8   :  { %5690 = vst [vmem:[%s9873_s4 + $0x10] sm:$0xff] %v6374_v60  ;;  %v6375_v3 = vpack.c.bf16 %v5567_v61, %v5566_v59  ;;  %v6397_v4 = vadd.f32 %v5447_v2, %v4656_v1  ;;  %v5449_v6 = vpop.f32.mrb[10].mxu0  ;;  %v4660_v9 = vpop.f32.mrb[11].mxu1 }
 0x2a9   :  { %v5524_v7 = vmul.f32 %v6396_v0, %v9749_v15  ;;  %v6398_v8 = vadd.f32 %v5449_v6, %v4658_v5  ;;  %v5451_v10 = vpop.f32.mrb[11].mxu0 }
 0x2aa   :  { %5691 = vst [vmem:[%s9873_s4 + $0x18] sm:$0xff] %v6375_v3  ;;  %v5525_v11 = vmul.f32 %v6397_v4, %v9751_v18  ;;  %v6399_v12 = vadd.f32 %v5451_v10, %v4660_v9 }
 0x2ab   :  { %v5568_v13 = vadd.f32 %v9753_v20, %v5524_v7  ;;  %v5526_v14 = vmul.f32 %v6398_v8, %v9749_v15 }
 0x2ac   :  { %v5569_v16 = vadd.f32 %v9755_v24, %v5525_v11  ;;  %v5527_v17 = vmul.f32 %v6399_v12, %v9751_v18 }
 0x2ad   :  { %v5570_v19 = vadd.f32 %v9753_v20, %v5526_v14  ;;  %v4664_v23 = vpop.f32.mrb[12].mxu1 }
 0x2ae   :  { %v6376_v21 = vpack.c.bf16 %v5569_v16, %v5568_v13  ;;  %v5571_v22 = vadd.f32 %v9755_v24, %v5527_v17  ;;  %v5455_v25 = vpop.f32.mrb[12].mxu0  ;;  %v4666_v27 = vpop.f32.mrb[13].mxu1 }
 0x2af   :  { %v6400_v26 = vadd.f32 %v5455_v25, %v4664_v23  ;;  %v5457_v28 = vpop.f32.mrb[13].mxu0  ;;  %v4668_v31 = vpop.f32.mrb[14].mxu1 }
 0x2b0   :  { %5692 = vst [vmem:[%s9873_s4 + $0x20] sm:$0xff] %v6376_v21  ;;  %v6377_v29 = vpack.c.bf16 %v5571_v22, %v5570_v19  ;;  %v6401_v30 = vadd.f32 %v5457_v28, %v4666_v27  ;;  %v5459_v32 = vpop.f32.mrb[14].mxu0  ;;  %v4670_v35 = vpop.f32.mrb[15].mxu1 }
 0x2b1   :  { %v5528_v33 = vmul.f32 %v6400_v26, %v9749_v15  ;;  %v6402_v34 = vadd.f32 %v5459_v32, %v4668_v31  ;;  %v5461_v36 = vpop.f32.mrb[15].mxu0 }
 0x2b2   :  { %5693 = vst [vmem:[%s9873_s4 + $0x28] sm:$0xff] %v6377_v29  ;;  %v5529_v37 = vmul.f32 %v6401_v30, %v9751_v18  ;;  %v6403_v38 = vadd.f32 %v5461_v36, %v4670_v35 }
 0x2b3   :  { %v5572_v39 = vadd.f32 %v9753_v20, %v5528_v33  ;;  %v5530_v40 = vmul.f32 %v6402_v34, %v9749_v15 }
 0x2b4   :  { %v5573_v41 = vadd.f32 %v9755_v24, %v5529_v37  ;;  %v5531_v42 = vmul.f32 %v6403_v38, %v9751_v18 }
 0x2b5   :  { %v5574_v43 = vadd.f32 %v9753_v20, %v5530_v40  ;;  %v4674_v46 = vpop.f32.mrb[16].mxu1 }
 0x2b6   :  { %v6378_v44 = vpack.c.bf16 %v5573_v41, %v5572_v39  ;;  %v5575_v45 = vadd.f32 %v9755_v24, %v5531_v42  ;;  %v5465_v47 = vpop.f32.mrb[16].mxu0  ;;  %v4676_v49 = vpop.f32.mrb[17].mxu1 }
 0x2b7   :  { %v6404_v48 = vadd.f32 %v5465_v47, %v4674_v46  ;;  %v5467_v50 = vpop.f32.mrb[17].mxu0  ;;  %v4678_v53 = vpop.f32.mrb[18].mxu1 }
 0x2b8   :  { %5694 = vst [vmem:[%s9873_s4 + $0x30] sm:$0xff] %v6378_v44  ;;  %v6379_v51 = vpack.c.bf16 %v5575_v45, %v5574_v43  ;;  %v6405_v52 = vadd.f32 %v5467_v50, %v4676_v49  ;;  %v5469_v54 = vpop.f32.mrb[18].mxu0  ;;  %v4680_v57 = vpop.f32.mrb[19].mxu1 }
 0x2b9   :  { %v5532_v55 = vmul.f32 %v6404_v48, %v9749_v15  ;;  %v6406_v56 = vadd.f32 %v5469_v54, %v4678_v53  ;;  %v5471_v58 = vpop.f32.mrb[19].mxu0 }
 0x2ba   :  { %5695 = vst [vmem:[%s9873_s4 + $0x38] sm:$0xff] %v6379_v51  ;;  %v5533_v59 = vmul.f32 %v6405_v52, %v9751_v18  ;;  %v6407_v60 = vadd.f32 %v5471_v58, %v4680_v57 }
 0x2bb   :  { %v5576_v61 = vadd.f32 %v9753_v20, %v5532_v55  ;;  %v5534_v62 = vmul.f32 %v6406_v56, %v9749_v15 }
 0x2bc   :  { %v5577_v63 = vadd.f32 %v9755_v24, %v5533_v59  ;;  %v5535_v0 = vmul.f32 %v6407_v60, %v9751_v18 }
 0x2bd   :  { %v5578_v1 = vadd.f32 %v9753_v20, %v5534_v62  ;;  %v4684_v4 = vpop.f32.mrb[20].mxu1 }
 0x2be   :  { %v6380_v2 = vpack.c.bf16 %v5577_v63, %v5576_v61  ;;  %v5579_v3 = vadd.f32 %v9755_v24, %v5535_v0  ;;  %v5475_v5 = vpop.f32.mrb[20].mxu0  ;;  %v4686_v7 = vpop.f32.mrb[21].mxu1 }
 0x2bf   :  { %v6408_v6 = vadd.f32 %v5475_v5, %v4684_v4  ;;  %v5477_v8 = vpop.f32.mrb[21].mxu0  ;;  %v4688_v11 = vpop.f32.mrb[22].mxu1 }
 0x2c0   :  { %5696 = vst [vmem:[%s9873_s4 + $0x40] sm:$0xff] %v6380_v2  ;;  %v6381_v9 = vpack.c.bf16 %v5579_v3, %v5578_v1  ;;  %v6409_v10 = vadd.f32 %v5477_v8, %v4686_v7  ;;  %v5479_v12 = vpop.f32.mrb[22].mxu0  ;;  %v4690_v16 = vpop.f32.mrb[23].mxu1 }
 0x2c1   :  { %v5536_v13 = vmul.f32 %v6408_v6, %v9749_v15  ;;  %v6410_v14 = vadd.f32 %v5479_v12, %v4688_v11  ;;  %v5481_v17 = vpop.f32.mrb[23].mxu0 }
 0x2c2   :  { %5697 = vst [vmem:[%s9873_s4 + $0x48] sm:$0xff] %v6381_v9  ;;  %v5537_v19 = vmul.f32 %v6409_v10, %v9751_v18  ;;  %v6411_v21 = vadd.f32 %v5481_v17, %v4690_v16 }
 0x2c3   :  { %v5580_v22 = vadd.f32 %v9753_v20, %v5536_v13  ;;  %v5538_v23 = vmul.f32 %v6410_v14, %v9749_v15 }
 0x2c4   :  { %v5581_v25 = vadd.f32 %v9755_v24, %v5537_v19  ;;  %v5539_v26 = vmul.f32 %v6411_v21, %v9751_v18 }
 0x2c5   :  { %v5582_v27 = vadd.f32 %v9753_v20, %v5538_v23  ;;  %v4694_v30 = vpop.f32.mrb[24].mxu1 }
 0x2c6   :  { %v6382_v28 = vpack.c.bf16 %v5581_v25, %v5580_v22  ;;  %v5583_v29 = vadd.f32 %v9755_v24, %v5539_v26  ;;  %v5485_v31 = vpop.f32.mrb[24].mxu0  ;;  %v4696_v33 = vpop.f32.mrb[25].mxu1 }
 0x2c7   :  { %v6412_v32 = vadd.f32 %v5485_v31, %v4694_v30  ;;  %v5487_v34 = vpop.f32.mrb[25].mxu0  ;;  %v4698_v37 = vpop.f32.mrb[26].mxu1 }
 0x2c8   :  { %5698 = vst [vmem:[%s9873_s4 + $0x50] sm:$0xff] %v6382_v28  ;;  %v6383_v35 = vpack.c.bf16 %v5583_v29, %v5582_v27  ;;  %v6413_v36 = vadd.f32 %v5487_v34, %v4696_v33  ;;  %v5489_v38 = vpop.f32.mrb[26].mxu0  ;;  %v4700_v41 = vpop.f32.mrb[27].mxu1 }
 0x2c9   :  { %v5540_v39 = vmul.f32 %v6412_v32, %v9749_v15  ;;  %v6414_v40 = vadd.f32 %v5489_v38, %v4698_v37  ;;  %v5491_v42 = vpop.f32.mrb[27].mxu0 }
 0x2ca   :  { %5699 = vst [vmem:[%s9873_s4 + $0x58] sm:$0xff] %v6383_v35  ;;  %v5541_v43 = vmul.f32 %v6413_v36, %v9751_v18  ;;  %v6415_v44 = vadd.f32 %v5491_v42, %v4700_v41 }
 0x2cb   :  { %v5584_v45 = vadd.f32 %v9753_v20, %v5540_v39  ;;  %v5542_v46 = vmul.f32 %v6414_v40, %v9749_v15 }
 0x2cc   :  { %v5585_v47 = vadd.f32 %v9755_v24, %v5541_v43  ;;  %v5543_v48 = vmul.f32 %v6415_v44, %v9751_v18 }
 0x2cd   :  { %v5586_v49 = vadd.f32 %v9753_v20, %v5542_v46  ;;  %v4704_v52 = vpop.f32.mrb[28].mxu1 }
 0x2ce   :  { %v6384_v50 = vpack.c.bf16 %v5585_v47, %v5584_v45  ;;  %v5587_v51 = vadd.f32 %v9755_v24, %v5543_v48  ;;  %v5495_v53 = vpop.f32.mrb[28].mxu0  ;;  %v4706_v55 = vpop.f32.mrb[29].mxu1 }
 0x2cf   :  { %v6416_v54 = vadd.f32 %v5495_v53, %v4704_v52  ;;  %v5497_v56 = vpop.f32.mrb[29].mxu0  ;;  %v4708_v59 = vpop.f32.mrb[30].mxu1 }
 0x2d0   :  { %5700 = vst [vmem:[%s9873_s4 + $0x60] sm:$0xff] %v6384_v50  ;;  %v6385_v57 = vpack.c.bf16 %v5587_v51, %v5586_v49  ;;  %v6417_v58 = vadd.f32 %v5497_v56, %v4706_v55  ;;  %v5499_v60 = vpop.f32.mrb[30].mxu0  ;;  %v4710_v63 = vpop.f32.mrb[31].mxu1 }
 0x2d1   :  { %v5544_v61 = vmul.f32 %v6416_v54, %v9749_v15  ;;  %v6418_v62 = vadd.f32 %v5499_v60, %v4708_v59  ;;  %v5501_v0 = vpop.f32.mrb[31].mxu0 }
 0x2d2   :  { %5701 = vst [vmem:[%s9873_s4 + $0x68] sm:$0xff] %v6385_v57  ;;  %v5545_v1 = vmul.f32 %v6417_v58, %v9751_v18  ;;  %v6419_v2 = vadd.f32 %v5501_v0, %v4710_v63 }
 0x2d3   :  { %v5588_v3 = vadd.f32 %v9753_v20, %v5544_v61  ;;  %v5546_v4 = vmul.f32 %v6418_v62, %v9749_v15 }
 0x2d4   :  { %v5589_v5 = vadd.f32 %v9755_v24, %v5545_v1  ;;  %v5547_v6 = vmul.f32 %v6419_v2, %v9751_v18 }
 0x2d5   :  { %v5590_v7 = vadd.f32 %v9753_v20, %v5546_v4 }
 0x2d6   :  { %v6386_v8 = vpack.c.bf16 %v5589_v5, %v5588_v3  ;;  %v5591_v9 = vadd.f32 %v9755_v24, %v5547_v6 }
 0x2d8   :  { %5702 = vst [vmem:[%s9873_s4 + $0x70] sm:$0xff] %v6386_v8  ;;  %v6387_v10 = vpack.c.bf16 %v5591_v9, %v5590_v7 }
 0x2da   :  { %5703 = vst [vmem:[%s9873_s4 + $0x78] sm:$0xff] %v6387_v10 }

</bundles_post_ra>
